<compile_context>
chip_gen: v7x
topology: tpu7x:2x2x1
jax: 0.10.0
libtpu: 0.0.40
codegen_flags: <defaults>
</compile_context>

<pallas_src>
import functools

import jax
import jax.numpy as jnp
from jax.experimental import pallas as pl
from jax.experimental.pallas import tpu as pltpu

_VMEM_LIMIT = 32 * 1024 * 1024   # >= scoped default everywhere, tiny actual use
_HEAD_PAD = 128                  # lane-dense combined steer|throttle output width

# Conv geometry (forced by fc1 = 64*8*8 -> 128x128 spatial input).
_S2D = 4              # conv1 (8x8 stride 4) == 2x2 stride 1 on space-to-depth(4)
_Q = 11               # stride-3 phase grid extent: ceil(31 / 3)
_CHUNK_ROWS = 144     # padded rows per phase chunk (>= 12 + 128, multiple of 8)


# ----------------------------------------------------------------------------
# Kernel 1: fused conv1 + BN + ReLU -> conv2 + BN + ReLU -> conv3 + BN + ReLU
# ----------------------------------------------------------------------------
def _conv_stack_kernel(p1_ref, w1_ref, s1_ref, w2_ref, s2_ref, w3_ref, s3_ref,
                       o_ref, a1_ref):
    """Per-sample fused conv stack; all intermediates stay in VMEM.

    a1 scratch layout: chunk c = py*3+px holds conv1 output rows r = qy*11+qx
    for image position (y, x) = (3*qy+py, 3*qx+px)  (y, x in [0, 31)).
    """
    # conv1: 9 phase chunks, each a plain (144,256)@(256,32) matmul.
    for c in range(9):
        y1 = jnp.dot(p1_ref[0, c], w1_ref[...], preferred_element_type=jnp.float32)
        a1_ref[c] = jnp.maximum(y1 + s1_ref[...], 0.0).astype(a1_ref.dtype)

    # conv2 (4x4, stride 3): 16 shifted matmuls on the 11-grid.
    # output row r = oy*11 + ox (valid for oy, ox < 10); source row = start + r.
    acc2 = jnp.zeros((128, 64), jnp.float32)
    for ki in range(4):
        for kj in range(4):
            c = (ki % 3) * 3 + (kj % 3)
            start = (ki // 3) * _Q + (kj // 3)
            lhs = a1_ref[c, pl.ds(start, 128), :]
            acc2 = acc2 + jnp.dot(lhs, w2_ref[ki * 4 + kj],
                                  preferred_element_type=jnp.float32)
    a2 = jnp.maximum(acc2 + s2_ref[...], 0.0).astype(jnp.bfloat16)

    # conv3 (3x3, stride 1): 9 shifted matmuls on the same 11-grid.
    # output row r = oy*11 + ox (valid for oy, ox < 8); source row = r + ki*11+kj.
    acc3 = jnp.zeros((88, 64), jnp.float32)
    for ki in range(3):
        for kj in range(3):
            off = ki * _Q + kj
            acc3 = acc3 + jnp.dot(a2[off:off + 88, :], w3_ref[ki * 3 + kj],
                                  preferred_element_type=jnp.float32)
    a3 = jnp.maximum(acc3 + s3_ref[...], 0.0).astype(o_ref.dtype)

    # Extract the valid 8x8 grid -> (64, 64) features ordered (oy, ox, channel).
    for oy in range(8):
        o_ref[0, oy * 8:(oy + 1) * 8, :] = a3[oy * _Q: oy * _Q + 8, :]


def conv_stack(p1, w1, s1, w2, s2, w3, s3):
    """p1: (N, 9, 144, K1) bf16 phase-chunked conv1 patches -> (N, 64, 64) bf16."""
    N, nchunk, rows, k1 = p1.shape
    assert (nchunk, rows) == (9, _CHUNK_ROWS)
    return pl.pallas_call(
        _conv_stack_kernel,
        out_shape=jax.ShapeDtypeStruct((N, 64, 64), jnp.bfloat16),
        grid=(N,),
        in_specs=[
            pl.BlockSpec((1, 9, _CHUNK_ROWS, k1), lambda n: (n, 0, 0, 0)),
            pl.BlockSpec(w1.shape, lambda n: (0, 0)),
            pl.BlockSpec(s1.shape, lambda n: (0, 0)),
            pl.BlockSpec(w2.shape, lambda n: (0, 0, 0)),
            pl.BlockSpec(s2.shape, lambda n: (0, 0)),
            pl.BlockSpec(w3.shape, lambda n: (0, 0, 0)),
            pl.BlockSpec(s3.shape, lambda n: (0, 0)),
        ],
        out_specs=pl.BlockSpec((1, 64, 64), lambda n: (n, 0, 0)),
        scratch_shapes=[pltpu.VMEM((9, _CHUNK_ROWS, 32), jnp.bfloat16)],
        compiler_params=pltpu.CompilerParams(
            dimension_semantics=("parallel",),
            vmem_limit_bytes=_VMEM_LIMIT,
        ),
    )(p1, w1, s1, w2, s2, w3, s3)


# ----------------------------------------------------------------------------
# Kernel 2: fc1 (K-chunked) + BN + ReLU -> fc2 + BN + ReLU -> [steer|throttle]
# ----------------------------------------------------------------------------
def _fc_stack_kernel(x_ref, w1_ref, s1_ref, w2_ref, s2_ref, w3_ref, b3_ref,
                     o_ref, acc_ref):
    k = pl.program_id(0)

    @pl.when(k == 0)
    def _():
        acc_ref[...] = jnp.zeros_like(acc_ref)

    acc_ref[...] += jnp.dot(x_ref[...], w1_ref[...],
                            preferred_element_type=jnp.float32)

    @pl.when(k == pl.num_programs(0) - 1)
    def _():
        h = jnp.maximum(acc_ref[...] + s1_ref[...], 0.0)
        h = jnp.dot(h.astype(jnp.bfloat16), w2_ref[...],
                    preferred_element_type=jnp.float32)
        h = jnp.maximum(h + s2_ref[...], 0.0)
        h = jnp.dot(h.astype(jnp.bfloat16), w3_ref[...],
                    preferred_element_type=jnp.float32)
        o_ref[...] = (h + b3_ref[...]).astype(o_ref.dtype)


def fc_stack(x, w1, s1, w2, s2, w3, b3, *, k_chunk=1024):
    """x: (B, 4096) bf16 -> (B, _HEAD_PAD) f32; fc1 K split so its DMA pipelines."""
    B, K = x.shape
    H1 = w1.shape[1]
    assert K % k_chunk == 0
    return pl.pallas_call(
        _fc_stack_kernel,
        out_shape=jax.ShapeDtypeStruct((B, _HEAD_PAD), jnp.float32),
        grid=(K // k_chunk,),
        in_specs=[
            pl.BlockSpec((B, k_chunk), lambda k: (0, k)),
            pl.BlockSpec((k_chunk, H1), lambda k: (k, 0)),
            pl.BlockSpec(s1.shape, lambda k: (0, 0)),
            pl.BlockSpec(w2.shape, lambda k: (0, 0)),
            pl.BlockSpec(s2.shape, lambda k: (0, 0)),
            pl.BlockSpec(w3.shape, lambda k: (0, 0)),
            pl.BlockSpec(b3.shape, lambda k: (0, 0)),
        ],
        out_specs=pl.BlockSpec((B, _HEAD_PAD), lambda k: (0, 0)),
        scratch_shapes=[pltpu.VMEM((B, H1), jnp.float32)],
        compiler_params=pltpu.CompilerParams(
            dimension_semantics=("arbitrary",),
            vmem_limit_bytes=_VMEM_LIMIT,
        ),
    )(x, w1, s1, w2, s2, w3, b3)


# ----------------------------------------------------------------------------
# Glue (pure slicing/reshape on the raw input, runs once in XLA)
# ----------------------------------------------------------------------------
def _space_to_depth(x, s):
    N, H, W, C = x.shape
    assert H % s == 0 and W % s == 0
    x = x.reshape(N, H // s, s, W // s, s, C)
    x = jnp.transpose(x, (0, 1, 3, 2, 4, 5))
    return x.reshape(N, H // s, W // s, s * s * C)


def _im2col_nhwc(x, kh, kw, stride):
    """NHWC -> (N, Ho, Wo, kh*kw*C) patch grid."""
    N, H, W, C = x.shape
    Ho = (H - kh) // stride + 1
    Wo = (W - kw) // stride + 1
    cols = []
    for i in range(kh):
        for j in range(kw):
            cols.append(x[:, i:i + stride * Ho:stride, j:j + stride * Wo:stride, :])
    p = jnp.stack(cols, axis=3)                     # (N, Ho, Wo, kh*kw, C)
    return p.reshape(N, Ho, Wo, kh * kw * C)


def _phase_chunks(p):
    """(N, 31, 31, K) patch grid -> (N, 9, 144, K) bf16 stride-3 phase chunks.

    Chunk c = py*3+px holds rows r = qy*11+qx for output position
    (y, x) = (3*qy+py, 3*qx+px); padded rows / positions >= 31 are zero.
    """
    N, H, W, K = p.shape
    p = jnp.pad(p, ((0, 0), (0, 3 * _Q - H), (0, 3 * _Q - W), (0, 0)))
    p = p.reshape(N, _Q, 3, _Q, 3, K)
    p = jnp.transpose(p, (0, 2, 4, 1, 3, 5))        # (N, py, px, qy, qx, K)
    p = p.reshape(N, 9, _Q * _Q, K)
    p = jnp.pad(p, ((0, 0), (0, 0), (0, _CHUNK_ROWS - _Q * _Q), (0, 0)))
    return p.astype(jnp.bfloat16)


# ----------------------------------------------------------------------------
# Parameter preparation: fold BN, permute weights, cast to bf16 (done once)
# ----------------------------------------------------------------------------
def _fold_bn(bias, gamma, beta, mean, var, eps=1e-5):
    scale = gamma / jnp.sqrt(var + eps)
    shift = beta + scale * (bias - mean)
    return scale, shift


def _conv_weight_matrix(w_oihw):
    Cout, Cin, KH, KW = w_oihw.shape
    return jnp.transpose(w_oihw, (2, 3, 1, 0)).reshape(KH * KW * Cin, Cout)


def _conv_weight_matrix_s2d(w_oihw, s):
    """Weight for conv(k, stride=s) re-expressed as conv(k//s, stride=1) on a
    space-to-depth(s) input; rows match _im2col_nhwc(space_to_depth(x, s), ...)."""
    Cout, Cin, K, Kw = w_oihw.shape
    assert K == Kw and K % s == 0
    kk = K // s
    w = w_oihw.reshape(Cout, Cin, kk, s, kk, s)      # (o, c, ki, di, kj, dj)
    w = jnp.transpose(w, (2, 4, 3, 5, 1, 0))         # (ki, kj, di, dj, c, o)
    return w.reshape(kk * kk * s * s * Cin, Cout)


def prepare_params(params):
    prep = {}
    scale1, shift1 = _fold_bn(params["conv1_b"], *params["bn1"])
    w1 = _conv_weight_matrix_s2d(params["conv1_w"], _S2D)
    prep["c1_w"] = (w1 * scale1[None, :]).astype(jnp.bfloat16)        # (64*Cin, 32)
    prep["c1_shift"] = shift1.reshape(1, -1).astype(jnp.float32)

    scale2, shift2 = _fold_bn(params["conv2_b"], *params["bn2"])
    w2 = _conv_weight_matrix(params["conv2_w"]) * scale2[None, :]     # (512, 64)
    prep["c2_w"] = w2.reshape(16, 32, 64).astype(jnp.bfloat16)
    prep["c2_shift"] = shift2.reshape(1, -1).astype(jnp.float32)

    scale3, shift3 = _fold_bn(params["conv3_b"], *params["bn3"])
    w3 = _conv_weight_matrix(params["conv3_w"]) * scale3[None, :]     # (576, 64)
    prep["c3_w"] = w3.reshape(9, 64, 64).astype(jnp.bfloat16)
    prep["c3_shift"] = shift3.reshape(1, -1).astype(jnp.float32)

    # fc1: permute columns from PyTorch NCHW flatten (c,h,w) to (h,w,c).
    O = params["fc1_w"].shape[0]
    w1fc = params["fc1_w"].reshape(O, 64, 8, 8)
    w1fc = jnp.transpose(w1fc, (2, 3, 1, 0)).reshape(64 * 64, O)      # (4096, 512)
    sclf1, shf1 = _fold_bn(params["fc1_b"], *params["bnf1"])
    prep["fc1_w"] = (w1fc * sclf1[None, :]).astype(jnp.bfloat16)
    prep["fc1_shift"] = shf1.reshape(1, -1).astype(jnp.float32)

    sclf2, shf2 = _fold_bn(params["fc2_b"], *params["bnf2"])
    prep["fc2_w"] = (params["fc2_w"].T * sclf2[None, :]).astype(jnp.bfloat16)
    prep["fc2_shift"] = shf2.reshape(1, -1).astype(jnp.float32)

    # heads: concat steer|throttle, zero-pad to a lane-dense 128-wide output.
    n_s = params["fc3s_w"].shape[0]
    n_t = params["fc3t_w"].shape[0]
    assert n_s + n_t <= _HEAD_PAD
    w3h = jnp.concatenate([params["fc3s_w"].T, params["fc3t_w"].T], axis=1)
    b3h = jnp.concatenate([params["fc3s_b"], params["fc3t_b"]])
    prep["head_w"] = jnp.pad(w3h, ((0, 0), (0, _HEAD_PAD - n_s - n_t))).astype(jnp.bfloat16)
    prep["head_b"] = jnp.pad(b3h, (0, _HEAD_PAD - n_s - n_t)).reshape(1, -1).astype(jnp.float32)
    return prep


# ----------------------------------------------------------------------------
# Forward pass (mirrors ConvNet.forward, eval-mode BN)
# ----------------------------------------------------------------------------
def convnet_forward(prep, x_nchw, *, num_steer, num_throttle):
    if x_nchw.ndim == 3:
        x_nchw = x_nchw[None]                                         # unsqueeze(0)
    N = x_nchw.shape[0]
    x = jnp.transpose(x_nchw, (0, 2, 3, 1)).astype(jnp.bfloat16)      # NCHW -> NHWC

    # conv1 patches: 8x8/stride-4 conv == 2x2/stride-1 conv on space-to-depth(4),
    # rows phase-reordered so the fused kernel's conv2 slices are contiguous.
    p1 = _im2col_nhwc(_space_to_depth(x, _S2D), 2, 2, 1)              # (N,31,31,64*Cin)
    p1 = _phase_chunks(p1)                                            # (N,9,144,64*Cin)

    feat = conv_stack(p1, prep["c1_w"], prep["c1_shift"],
                      prep["c2_w"], prep["c2_shift"],
                      prep["c3_w"], prep["c3_shift"])                 # (N, 64, 64)
    feat = feat.reshape(N, 64 * 64)                                   # free reshape

    out = fc_stack(feat, prep["fc1_w"], prep["fc1_shift"],
                   prep["fc2_w"], prep["fc2_shift"],
                   prep["head_w"], prep["head_b"])
    steer = out[:, :num_steer]
    throttle = out[:, num_steer:num_steer + num_throttle]
    return steer, throttle


# ----------------------------------------------------------------------------
# Pure-JAX reference (non-Pallas) for validation
# ----------------------------------------------------------------------------
def convnet_reference(params, x):
    eps = 1e-5

    def bn(y, bn_p, shape):
        gamma, beta, mean, var = (a.reshape(shape) for a in bn_p)
        return gamma * (y - mean) / jnp.sqrt(var + eps) + beta

    def conv(y, w, b, bn_p, stride):
        y = jax.lax.conv_general_dilated(
            y, w, (stride, stride), "VALID",
            dimension_numbers=("NCHW", "OIHW", "NCHW"))
        y = y + b.reshape(1, -1, 1, 1)
        return jnp.maximum(bn(y, bn_p, (1, -1, 1, 1)), 0.0)

    if x.ndim == 3:
        x = x[None]
    y = conv(x, params["conv1_w"], params["conv1_b"], params["bn1"], 4)
    y = conv(y, params["conv2_w"], params["conv2_b"], params["bn2"], 3)
    y = conv(y, params["conv3_w"], params["conv3_b"], params["bn3"], 1)
    y = y.reshape(y.shape[0], -1)
    y = jnp.maximum(bn(y @ params["fc1_w"].T + params["fc1_b"], params["bnf1"], (1, -1)), 0.0)
    y = jnp.maximum(bn(y @ params["fc2_w"].T + params["fc2_b"], params["bnf2"], (1, -1)), 0.0)
    steer = y @ params["fc3s_w"].T + params["fc3s_b"]
    throttle = y @ params["fc3t_w"].T + params["fc3t_b"]
    return steer, throttle


# ----------------------------------------------------------------------------
# Deterministic parameter construction (shapes from ConvNet.__init__)
# ----------------------------------------------------------------------------
def init_params(key, in_channels, num_actions_steer, num_actions_throttle):
    ks = jax.random.split(key, 17)

    def w(k, shape, fan_in):
        return jax.random.normal(k, shape, jnp.float32) / jnp.sqrt(fan_in)

    def bn(k, c):
        k1, k2, k3, k4 = jax.random.split(k, 4)
        gamma = 1.0 + 0.1 * jax.random.normal(k1, (c,), jnp.float32)
        beta = 0.1 * jax.random.normal(k2, (c,), jnp.float32)
        mean = 0.1 * jax.random.normal(k3, (c,), jnp.float32)
        var = 1.0 + 0.1 * jax.random.uniform(k4, (c,), jnp.float32)
        return gamma, beta, mean, var

    p = {}
    p["conv1_w"] = w(ks[0], (32, in_channels, 8, 8), in_channels * 64)
    p["conv1_b"] = w(ks[1], (32,), in_channels * 64)
    p["bn1"] = bn(ks[12], 32)
    p["conv2_w"] = w(ks[2], (64, 32, 4, 4), 32 * 16)
    p["conv2_b"] = w(ks[3], (64,), 32 * 16)
    p["bn2"] = bn(ks[13], 64)
    p["conv3_w"] = w(ks[4], (64, 64, 3, 3), 64 * 9)
    p["conv3_b"] = w(ks[5], (64,), 64 * 9)
    p["bn3"] = bn(ks[14], 64)
    p["fc1_w"] = w(ks[6], (512, 64 * 8 * 8), 64 * 8 * 8)
    p["fc1_b"] = w(ks[7], (512,), 64 * 8 * 8)
    p["bnf1"] = bn(ks[15], 512)
    p["fc2_w"] = w(ks[8], (128, 512), 512)
    p["fc2_b"] = w(ks[9], (128,), 512)
    p["bnf2"] = bn(ks[16], 128)
    p["fc3s_w"] = w(ks[10], (num_actions_steer, 128), 128)
    p["fc3s_b"] = jnp.zeros((num_actions_steer,), jnp.float32)
    p["fc3t_w"] = w(ks[11], (num_actions_throttle, 128), 128)
    p["fc3t_b"] = jnp.zeros((num_actions_throttle,), jnp.float32)
    return p


if __name__ == "__main__":
    # Architecture forces 128x128 spatial input (fc1 expects 64*8*8 features).
    batch, in_channels = 2, 4
    num_actions_steer, num_actions_throttle = 7, 4

    key = jax.random.PRNGKey(0)
    pkey, xkey = jax.random.split(key)
    params = init_params(pkey, in_channels, num_actions_steer, num_actions_throttle)
    x = jax.random.normal(xkey, (batch, in_channels, 128, 128), jnp.float32)

    prep = prepare_params(params)
    fwd = jax.jit(functools.partial(convnet_forward,
                                    num_steer=num_actions_steer,
                                    num_throttle=num_actions_throttle))
    steer, throttle = jax.block_until_ready(fwd(prep, x))

    assert steer.shape == (batch, num_actions_steer)
    assert throttle.shape == (batch, num_actions_throttle)
    assert steer.dtype == jnp.float32 and throttle.dtype == jnp.float32

    # Validate against the pure-JAX reference (bf16 matmul path => loose tol).
    steer_ref, throttle_ref = jax.jit(convnet_reference)(params, x)
    assert jnp.allclose(steer, steer_ref, atol=5e-2, rtol=5e-2), \
        float(jnp.max(jnp.abs(steer - steer_ref)))
    assert jnp.allclose(throttle, throttle_ref, atol=5e-2, rtol=5e-2), \
        float(jnp.max(jnp.abs(throttle - throttle_ref)))

    print("KERNEL_OK")
</pallas_src>

<mosaic_0001>
module attributes {stable_mosaic.version = 11 : i64} {
  func.func @_conv_stack_kernel(%arg0: i32, %arg1: memref<1x9x144x256xbf16, #tpu.memory_space<vmem>>, %arg2: memref<256x32xbf16, #tpu.memory_space<vmem>>, %arg3: memref<1x32xf32, #tpu.memory_space<vmem>>, %arg4: memref<16x32x64xbf16, #tpu.memory_space<vmem>>, %arg5: memref<1x64xf32, #tpu.memory_space<vmem>>, %arg6: memref<9x64x64xbf16, #tpu.memory_space<vmem>>, %arg7: memref<1x64xf32, #tpu.memory_space<vmem>>, %arg8: memref<1x64x64xbf16, #tpu.memory_space<vmem>>, %arg9: memref<9x144x32xbf16, #tpu.memory_space<vmem>>) attributes {dimension_semantics = [#tpu.dimension_semantics<parallel>], iteration_bounds = array<i64: 2>, scalar_prefetch = 0 : i64, scratch_operands = 1 : i64, tpu.core_type = #tpu.core_type<tc>, window_params = [{transform_indices = @transform_0, window_bounds = array<i64: 1, 9, 144, 256>}, {pipeline_mode = #tpu.pipeline_mode<synchronous>, transform_indices = @transform_1, window_bounds = array<i64: 256, 32>}, {pipeline_mode = #tpu.pipeline_mode<synchronous>, transform_indices = @transform_2, window_bounds = array<i64: 1, 32>}, {pipeline_mode = #tpu.pipeline_mode<synchronous>, transform_indices = @transform_3, window_bounds = array<i64: 16, 32, 64>}, {pipeline_mode = #tpu.pipeline_mode<synchronous>, transform_indices = @transform_4, window_bounds = array<i64: 1, 64>}, {pipeline_mode = #tpu.pipeline_mode<synchronous>, transform_indices = @transform_5, window_bounds = array<i64: 9, 64, 64>}, {pipeline_mode = #tpu.pipeline_mode<synchronous>, transform_indices = @transform_6, window_bounds = array<i64: 1, 64>}, {transform_indices = @transform_7, window_bounds = array<i64: 1, 64, 64>}]} {
    %c0 = arith.constant 0 : index
    %c0_0 = arith.constant 0 : index
    %c0_1 = arith.constant 0 : index
    %c0_2 = arith.constant 0 : index
    %0 = vector.load %arg1[%c0, %c0_0, %c0_1, %c0_2] : memref<1x9x144x256xbf16, #tpu.memory_space<vmem>>, vector<1x1x144x256xbf16>
    %1 = vector.shape_cast %0 : vector<1x1x144x256xbf16> to vector<144x256xbf16>
    %c0_3 = arith.constant 0 : index
    %c0_4 = arith.constant 0 : index
    %2 = vector.load %arg2[%c0_3, %c0_4] : memref<256x32xbf16, #tpu.memory_space<vmem>>, vector<256x32xbf16>
    %cst = arith.constant dense<0.000000e+00> : vector<144x32xf32>
    %3 = tpu.matmul %1, %2, %cst {dimension_numbers = #tpu.dot_dimension_numbers<[1], [0], [0], [1], [0, 0, 1, 1], [], []>} : vector<144x256xbf16>, vector<256x32xbf16>, vector<144x32xf32> -> vector<144x32xf32>
    %c0_5 = arith.constant 0 : index
    %c0_6 = arith.constant 0 : index
    %4 = vector.load %arg3[%c0_5, %c0_6] : memref<1x32xf32, #tpu.memory_space<vmem>>, vector<1x32xf32>
    %5 = vector.broadcast %4 : vector<1x32xf32> to vector<144x32xf32>
    %6 = arith.addf %3, %5 : vector<144x32xf32>
    %cst_7 = arith.constant 0.000000e+00 : f32
    %7 = vector.broadcast %cst_7 : f32 to vector<144x32xf32>
    %8 = arith.maximumf %6, %7 : vector<144x32xf32>
    %9 = arith.truncf %8 : vector<144x32xf32> to vector<144x32xbf16>
    %c0_8 = arith.constant 0 : index
    %c0_9 = arith.constant 0 : index
    %c0_10 = arith.constant 0 : index
    %10 = vector.load %arg9[%c0_8, %c0_9, %c0_10] : memref<9x144x32xbf16, #tpu.memory_space<vmem>>, vector<1x144x32xbf16>
    %11 = vector.shape_cast %10 : vector<1x144x32xbf16> to vector<144x32xbf16>
    %12 = vector.shape_cast %9 : vector<144x32xbf16> to vector<1x144x32xbf16>
    tpu.vector_store %arg9[%c0_8, %c0_9, %c0_10], %12 {strides = array<i32>} : memref<9x144x32xbf16, #tpu.memory_space<vmem>>, vector<1x144x32xbf16>,
    %c0_11 = arith.constant 0 : index
    %c1 = arith.constant 1 : index
    %c0_12 = arith.constant 0 : index
    %c0_13 = arith.constant 0 : index
    %13 = vector.load %arg1[%c0_11, %c1, %c0_12, %c0_13] : memref<1x9x144x256xbf16, #tpu.memory_space<vmem>>, vector<1x1x144x256xbf16>
    %14 = vector.shape_cast %13 : vector<1x1x144x256xbf16> to vector<144x256xbf16>
    %c0_14 = arith.constant 0 : index
    %c0_15 = arith.constant 0 : index
    %15 = vector.load %arg2[%c0_14, %c0_15] : memref<256x32xbf16, #tpu.memory_space<vmem>>, vector<256x32xbf16>
    %cst_16 = arith.constant dense<0.000000e+00> : vector<144x32xf32>
    %16 = tpu.matmul %14, %15, %cst_16 {dimension_numbers = #tpu.dot_dimension_numbers<[1], [0], [0], [1], [0, 0, 1, 1], [], []>} : vector<144x256xbf16>, vector<256x32xbf16>, vector<144x32xf32> -> vector<144x32xf32>
    %c0_17 = arith.constant 0 : index
    %c0_18 = arith.constant 0 : index
    %17 = vector.load %arg3[%c0_17, %c0_18] : memref<1x32xf32, #tpu.memory_space<vmem>>, vector<1x32xf32>
    %18 = vector.broadcast %17 : vector<1x32xf32> to vector<144x32xf32>
    %19 = arith.addf %16, %18 : vector<144x32xf32>
    %cst_19 = arith.constant 0.000000e+00 : f32
    %20 = vector.broadcast %cst_19 : f32 to vector<144x32xf32>
    %21 = arith.maximumf %19, %20 : vector<144x32xf32>
    %22 = arith.truncf %21 : vector<144x32xf32> to vector<144x32xbf16>
    %c1_20 = arith.constant 1 : index
    %c0_21 = arith.constant 0 : index
    %c0_22 = arith.constant 0 : index
    %23 = vector.load %arg9[%c1_20, %c0_21, %c0_22] : memref<9x144x32xbf16, #tpu.memory_space<vmem>>, vector<1x144x32xbf16>
    %24 = vector.shape_cast %23 : vector<1x144x32xbf16> to vector<144x32xbf16>
    %25 = vector.shape_cast %22 : vector<144x32xbf16> to vector<1x144x32xbf16>
    tpu.vector_store %arg9[%c1_20, %c0_21, %c0_22], %25 {strides = array<i32>} : memref<9x144x32xbf16, #tpu.memory_space<vmem>>, vector<1x144x32xbf16>,
    %c0_23 = arith.constant 0 : index
    %c2 = arith.constant 2 : index
    %c0_24 = arith.constant 0 : index
    %c0_25 = arith.constant 0 : index
    %26 = vector.load %arg1[%c0_23, %c2, %c0_24, %c0_25] : memref<1x9x144x256xbf16, #tpu.memory_space<vmem>>, vector<1x1x144x256xbf16>
    %27 = vector.shape_cast %26 : vector<1x1x144x256xbf16> to vector<144x256xbf16>
    %c0_26 = arith.constant 0 : index
    %c0_27 = arith.constant 0 : index
    %28 = vector.load %arg2[%c0_26, %c0_27] : memref<256x32xbf16, #tpu.memory_space<vmem>>, vector<256x32xbf16>
    %cst_28 = arith.constant dense<0.000000e+00> : vector<144x32xf32>
    %29 = tpu.matmul %27, %28, %cst_28 {dimension_numbers = #tpu.dot_dimension_numbers<[1], [0], [0], [1], [0, 0, 1, 1], [], []>} : vector<144x256xbf16>, vector<256x32xbf16>, vector<144x32xf32> -> vector<144x32xf32>
    %c0_29 = arith.constant 0 : index
    %c0_30 = arith.constant 0 : index
    %30 = vector.load %arg3[%c0_29, %c0_30] : memref<1x32xf32, #tpu.memory_space<vmem>>, vector<1x32xf32>
    %31 = vector.broadcast %30 : vector<1x32xf32> to vector<144x32xf32>
    %32 = arith.addf %29, %31 : vector<144x32xf32>
    %cst_31 = arith.constant 0.000000e+00 : f32
    %33 = vector.broadcast %cst_31 : f32 to vector<144x32xf32>
    %34 = arith.maximumf %32, %33 : vector<144x32xf32>
    %35 = arith.truncf %34 : vector<144x32xf32> to vector<144x32xbf16>
    %c2_32 = arith.constant 2 : index
    %c0_33 = arith.constant 0 : index
    %c0_34 = arith.constant 0 : index
    %36 = vector.load %arg9[%c2_32, %c0_33, %c0_34] : memref<9x144x32xbf16, #tpu.memory_space<vmem>>, vector<1x144x32xbf16>
    %37 = vector.shape_cast %36 : vector<1x144x32xbf16> to vector<144x32xbf16>
    %38 = vector.shape_cast %35 : vector<144x32xbf16> to vector<1x144x32xbf16>
    tpu.vector_store %arg9[%c2_32, %c0_33, %c0_34], %38 {strides = array<i32>} : memref<9x144x32xbf16, #tpu.memory_space<vmem>>, vector<1x144x32xbf16>,
    %c0_35 = arith.constant 0 : index
    %c3 = arith.constant 3 : index
    %c0_36 = arith.constant 0 : index
    %c0_37 = arith.constant 0 : index
    %39 = vector.load %arg1[%c0_35, %c3, %c0_36, %c0_37] : memref<1x9x144x256xbf16, #tpu.memory_space<vmem>>, vector<1x1x144x256xbf16>
    %40 = vector.shape_cast %39 : vector<1x1x144x256xbf16> to vector<144x256xbf16>
    %c0_38 = arith.constant 0 : index
    %c0_39 = arith.constant 0 : index
    %41 = vector.load %arg2[%c0_38, %c0_39] : memref<256x32xbf16, #tpu.memory_space<vmem>>, vector<256x32xbf16>
    %cst_40 = arith.constant dense<0.000000e+00> : vector<144x32xf32>
    %42 = tpu.matmul %40, %41, %cst_40 {dimension_numbers = #tpu.dot_dimension_numbers<[1], [0], [0], [1], [0, 0, 1, 1], [], []>} : vector<144x256xbf16>, vector<256x32xbf16>, vector<144x32xf32> -> vector<144x32xf32>
    %c0_41 = arith.constant 0 : index
    %c0_42 = arith.constant 0 : index
    %43 = vector.load %arg3[%c0_41, %c0_42] : memref<1x32xf32, #tpu.memory_space<vmem>>, vector<1x32xf32>
    %44 = vector.broadcast %43 : vector<1x32xf32> to vector<144x32xf32>
    %45 = arith.addf %42, %44 : vector<144x32xf32>
    %cst_43 = arith.constant 0.000000e+00 : f32
    %46 = vector.broadcast %cst_43 : f32 to vector<144x32xf32>
    %47 = arith.maximumf %45, %46 : vector<144x32xf32>
    %48 = arith.truncf %47 : vector<144x32xf32> to vector<144x32xbf16>
    %c3_44 = arith.constant 3 : index
    %c0_45 = arith.constant 0 : index
    %c0_46 = arith.constant 0 : index
    %49 = vector.load %arg9[%c3_44, %c0_45, %c0_46] : memref<9x144x32xbf16, #tpu.memory_space<vmem>>, vector<1x144x32xbf16>
    %50 = vector.shape_cast %49 : vector<1x144x32xbf16> to vector<144x32xbf16>
    %51 = vector.shape_cast %48 : vector<144x32xbf16> to vector<1x144x32xbf16>
    tpu.vector_store %arg9[%c3_44, %c0_45, %c0_46], %51 {strides = array<i32>} : memref<9x144x32xbf16, #tpu.memory_space<vmem>>, vector<1x144x32xbf16>,
    %c0_47 = arith.constant 0 : index
    %c4 = arith.constant 4 : index
    %c0_48 = arith.constant 0 : index
    %c0_49 = arith.constant 0 : index
    %52 = vector.load %arg1[%c0_47, %c4, %c0_48, %c0_49] : memref<1x9x144x256xbf16, #tpu.memory_space<vmem>>, vector<1x1x144x256xbf16>
    %53 = vector.shape_cast %52 : vector<1x1x144x256xbf16> to vector<144x256xbf16>
    %c0_50 = arith.constant 0 : index
    %c0_51 = arith.constant 0 : index
    %54 = vector.load %arg2[%c0_50, %c0_51] : memref<256x32xbf16, #tpu.memory_space<vmem>>, vector<256x32xbf16>
    %cst_52 = arith.constant dense<0.000000e+00> : vector<144x32xf32>
    %55 = tpu.matmul %53, %54, %cst_52 {dimension_numbers = #tpu.dot_dimension_numbers<[1], [0], [0], [1], [0, 0, 1, 1], [], []>} : vector<144x256xbf16>, vector<256x32xbf16>, vector<144x32xf32> -> vector<144x32xf32>
    %c0_53 = arith.constant 0 : index
    %c0_54 = arith.constant 0 : index
    %56 = vector.load %arg3[%c0_53, %c0_54] : memref<1x32xf32, #tpu.memory_space<vmem>>, vector<1x32xf32>
    %57 = vector.broadcast %56 : vector<1x32xf32> to vector<144x32xf32>
    %58 = arith.addf %55, %57 : vector<144x32xf32>
    %cst_55 = arith.constant 0.000000e+00 : f32
    %59 = vector.broadcast %cst_55 : f32 to vector<144x32xf32>
    %60 = arith.maximumf %58, %59 : vector<144x32xf32>
    %61 = arith.truncf %60 : vector<144x32xf32> to vector<144x32xbf16>
    %c4_56 = arith.constant 4 : index
    %c0_57 = arith.constant 0 : index
    %c0_58 = arith.constant 0 : index
    %62 = vector.load %arg9[%c4_56, %c0_57, %c0_58] : memref<9x144x32xbf16, #tpu.memory_space<vmem>>, vector<1x144x32xbf16>
    %63 = vector.shape_cast %62 : vector<1x144x32xbf16> to vector<144x32xbf16>
    %64 = vector.shape_cast %61 : vector<144x32xbf16> to vector<1x144x32xbf16>
    tpu.vector_store %arg9[%c4_56, %c0_57, %c0_58], %64 {strides = array<i32>} : memref<9x144x32xbf16, #tpu.memory_space<vmem>>, vector<1x144x32xbf16>,
    %c0_59 = arith.constant 0 : index
    %c5 = arith.constant 5 : index
    %c0_60 = arith.constant 0 : index
    %c0_61 = arith.constant 0 : index
    %65 = vector.load %arg1[%c0_59, %c5, %c0_60, %c0_61] : memref<1x9x144x256xbf16, #tpu.memory_space<vmem>>, vector<1x1x144x256xbf16>
    %66 = vector.shape_cast %65 : vector<1x1x144x256xbf16> to vector<144x256xbf16>
    %c0_62 = arith.constant 0 : index
    %c0_63 = arith.constant 0 : index
    %67 = vector.load %arg2[%c0_62, %c0_63] : memref<256x32xbf16, #tpu.memory_space<vmem>>, vector<256x32xbf16>
    %cst_64 = arith.constant dense<0.000000e+00> : vector<144x32xf32>
    %68 = tpu.matmul %66, %67, %cst_64 {dimension_numbers = #tpu.dot_dimension_numbers<[1], [0], [0], [1], [0, 0, 1, 1], [], []>} : vector<144x256xbf16>, vector<256x32xbf16>, vector<144x32xf32> -> vector<144x32xf32>
    %c0_65 = arith.constant 0 : index
    %c0_66 = arith.constant 0 : index
    %69 = vector.load %arg3[%c0_65, %c0_66] : memref<1x32xf32, #tpu.memory_space<vmem>>, vector<1x32xf32>
    %70 = vector.broadcast %69 : vector<1x32xf32> to vector<144x32xf32>
    %71 = arith.addf %68, %70 : vector<144x32xf32>
    %cst_67 = arith.constant 0.000000e+00 : f32
    %72 = vector.broadcast %cst_67 : f32 to vector<144x32xf32>
    %73 = arith.maximumf %71, %72 : vector<144x32xf32>
    %74 = arith.truncf %73 : vector<144x32xf32> to vector<144x32xbf16>
    %c5_68 = arith.constant 5 : index
    %c0_69 = arith.constant 0 : index
    %c0_70 = arith.constant 0 : index
    %75 = vector.load %arg9[%c5_68, %c0_69, %c0_70] : memref<9x144x32xbf16, #tpu.memory_space<vmem>>, vector<1x144x32xbf16>
    %76 = vector.shape_cast %75 : vector<1x144x32xbf16> to vector<144x32xbf16>
    %77 = vector.shape_cast %74 : vector<144x32xbf16> to vector<1x144x32xbf16>
    tpu.vector_store %arg9[%c5_68, %c0_69, %c0_70], %77 {strides = array<i32>} : memref<9x144x32xbf16, #tpu.memory_space<vmem>>, vector<1x144x32xbf16>,
    %c0_71 = arith.constant 0 : index
    %c6 = arith.constant 6 : index
    %c0_72 = arith.constant 0 : index
    %c0_73 = arith.constant 0 : index
    %78 = vector.load %arg1[%c0_71, %c6, %c0_72, %c0_73] : memref<1x9x144x256xbf16, #tpu.memory_space<vmem>>, vector<1x1x144x256xbf16>
    %79 = vector.shape_cast %78 : vector<1x1x144x256xbf16> to vector<144x256xbf16>
    %c0_74 = arith.constant 0 : index
    %c0_75 = arith.constant 0 : index
    %80 = vector.load %arg2[%c0_74, %c0_75] : memref<256x32xbf16, #tpu.memory_space<vmem>>, vector<256x32xbf16>
    %cst_76 = arith.constant dense<0.000000e+00> : vector<144x32xf32>
    %81 = tpu.matmul %79, %80, %cst_76 {dimension_numbers = #tpu.dot_dimension_numbers<[1], [0], [0], [1], [0, 0, 1, 1], [], []>} : vector<144x256xbf16>, vector<256x32xbf16>, vector<144x32xf32> -> vector<144x32xf32>
    %c0_77 = arith.constant 0 : index
    %c0_78 = arith.constant 0 : index
    %82 = vector.load %arg3[%c0_77, %c0_78] : memref<1x32xf32, #tpu.memory_space<vmem>>, vector<1x32xf32>
    %83 = vector.broadcast %82 : vector<1x32xf32> to vector<144x32xf32>
    %84 = arith.addf %81, %83 : vector<144x32xf32>
    %cst_79 = arith.constant 0.000000e+00 : f32
    %85 = vector.broadcast %cst_79 : f32 to vector<144x32xf32>
    %86 = arith.maximumf %84, %85 : vector<144x32xf32>
    %87 = arith.truncf %86 : vector<144x32xf32> to vector<144x32xbf16>
    %c6_80 = arith.constant 6 : index
    %c0_81 = arith.constant 0 : index
    %c0_82 = arith.constant 0 : index
    %88 = vector.load %arg9[%c6_80, %c0_81, %c0_82] : memref<9x144x32xbf16, #tpu.memory_space<vmem>>, vector<1x144x32xbf16>
    %89 = vector.shape_cast %88 : vector<1x144x32xbf16> to vector<144x32xbf16>
    %90 = vector.shape_cast %87 : vector<144x32xbf16> to vector<1x144x32xbf16>
    tpu.vector_store %arg9[%c6_80, %c0_81, %c0_82], %90 {strides = array<i32>} : memref<9x144x32xbf16, #tpu.memory_space<vmem>>, vector<1x144x32xbf16>,
    %c0_83 = arith.constant 0 : index
    %c7 = arith.constant 7 : index
    %c0_84 = arith.constant 0 : index
    %c0_85 = arith.constant 0 : index
    %91 = vector.load %arg1[%c0_83, %c7, %c0_84, %c0_85] : memref<1x9x144x256xbf16, #tpu.memory_space<vmem>>, vector<1x1x144x256xbf16>
    %92 = vector.shape_cast %91 : vector<1x1x144x256xbf16> to vector<144x256xbf16>
    %c0_86 = arith.constant 0 : index
    %c0_87 = arith.constant 0 : index
    %93 = vector.load %arg2[%c0_86, %c0_87] : memref<256x32xbf16, #tpu.memory_space<vmem>>, vector<256x32xbf16>
    %cst_88 = arith.constant dense<0.000000e+00> : vector<144x32xf32>
    %94 = tpu.matmul %92, %93, %cst_88 {dimension_numbers = #tpu.dot_dimension_numbers<[1], [0], [0], [1], [0, 0, 1, 1], [], []>} : vector<144x256xbf16>, vector<256x32xbf16>, vector<144x32xf32> -> vector<144x32xf32>
    %c0_89 = arith.constant 0 : index
    %c0_90 = arith.constant 0 : index
    %95 = vector.load %arg3[%c0_89, %c0_90] : memref<1x32xf32, #tpu.memory_space<vmem>>, vector<1x32xf32>
    %96 = vector.broadcast %95 : vector<1x32xf32> to vector<144x32xf32>
    %97 = arith.addf %94, %96 : vector<144x32xf32>
    %cst_91 = arith.constant 0.000000e+00 : f32
    %98 = vector.broadcast %cst_91 : f32 to vector<144x32xf32>
    %99 = arith.maximumf %97, %98 : vector<144x32xf32>
    %100 = arith.truncf %99 : vector<144x32xf32> to vector<144x32xbf16>
    %c7_92 = arith.constant 7 : index
    %c0_93 = arith.constant 0 : index
    %c0_94 = arith.constant 0 : index
    %101 = vector.load %arg9[%c7_92, %c0_93, %c0_94] : memref<9x144x32xbf16, #tpu.memory_space<vmem>>, vector<1x144x32xbf16>
    %102 = vector.shape_cast %101 : vector<1x144x32xbf16> to vector<144x32xbf16>
    %103 = vector.shape_cast %100 : vector<144x32xbf16> to vector<1x144x32xbf16>
    tpu.vector_store %arg9[%c7_92, %c0_93, %c0_94], %103 {strides = array<i32>} : memref<9x144x32xbf16, #tpu.memory_space<vmem>>, vector<1x144x32xbf16>,
    %c0_95 = arith.constant 0 : index
    %c8 = arith.constant 8 : index
    %c0_96 = arith.constant 0 : index
    %c0_97 = arith.constant 0 : index
    %104 = vector.load %arg1[%c0_95, %c8, %c0_96, %c0_97] : memref<1x9x144x256xbf16, #tpu.memory_space<vmem>>, vector<1x1x144x256xbf16>
    %105 = vector.shape_cast %104 : vector<1x1x144x256xbf16> to vector<144x256xbf16>
    %c0_98 = arith.constant 0 : index
    %c0_99 = arith.constant 0 : index
    %106 = vector.load %arg2[%c0_98, %c0_99] : memref<256x32xbf16, #tpu.memory_space<vmem>>, vector<256x32xbf16>
    %cst_100 = arith.constant dense<0.000000e+00> : vector<144x32xf32>
    %107 = tpu.matmul %105, %106, %cst_100 {dimension_numbers = #tpu.dot_dimension_numbers<[1], [0], [0], [1], [0, 0, 1, 1], [], []>} : vector<144x256xbf16>, vector<256x32xbf16>, vector<144x32xf32> -> vector<144x32xf32>
    %c0_101 = arith.constant 0 : index
    %c0_102 = arith.constant 0 : index
    %108 = vector.load %arg3[%c0_101, %c0_102] : memref<1x32xf32, #tpu.memory_space<vmem>>, vector<1x32xf32>
    %109 = vector.broadcast %108 : vector<1x32xf32> to vector<144x32xf32>
    %110 = arith.addf %107, %109 : vector<144x32xf32>
    %cst_103 = arith.constant 0.000000e+00 : f32
    %111 = vector.broadcast %cst_103 : f32 to vector<144x32xf32>
    %112 = arith.maximumf %110, %111 : vector<144x32xf32>
    %113 = arith.truncf %112 : vector<144x32xf32> to vector<144x32xbf16>
    %c8_104 = arith.constant 8 : index
    %c0_105 = arith.constant 0 : index
    %c0_106 = arith.constant 0 : index
    %114 = vector.load %arg9[%c8_104, %c0_105, %c0_106] : memref<9x144x32xbf16, #tpu.memory_space<vmem>>, vector<1x144x32xbf16>
    %115 = vector.shape_cast %114 : vector<1x144x32xbf16> to vector<144x32xbf16>
    %116 = vector.shape_cast %113 : vector<144x32xbf16> to vector<1x144x32xbf16>
    tpu.vector_store %arg9[%c8_104, %c0_105, %c0_106], %116 {strides = array<i32>} : memref<9x144x32xbf16, #tpu.memory_space<vmem>>, vector<1x144x32xbf16>,
    %cst_107 = arith.constant 0.000000e+00 : f32
    %117 = vector.broadcast %cst_107 : f32 to vector<128x64xf32>
    %c0_108 = arith.constant 0 : index
    %c0_109 = arith.constant 0 : index
    %c0_110 = arith.constant 0 : index
    %118 = vector.load %arg9[%c0_108, %c0_109, %c0_110] : memref<9x144x32xbf16, #tpu.memory_space<vmem>>, vector<1x128x32xbf16>
    %119 = vector.shape_cast %118 : vector<1x128x32xbf16> to vector<128x32xbf16>
    %c0_111 = arith.constant 0 : index
    %c0_112 = arith.constant 0 : index
    %c0_113 = arith.constant 0 : index
    %120 = vector.load %arg4[%c0_111, %c0_112, %c0_113] : memref<16x32x64xbf16, #tpu.memory_space<vmem>>, vector<1x32x64xbf16>
    %121 = vector.shape_cast %120 : vector<1x32x64xbf16> to vector<32x64xbf16>
    %cst_114 = arith.constant dense<0.000000e+00> : vector<128x64xf32>
    %122 = tpu.matmul %119, %121, %cst_114 {dimension_numbers = #tpu.dot_dimension_numbers<[1], [0], [0], [1], [0, 0, 1, 1], [], []>} : vector<128x32xbf16>, vector<32x64xbf16>, vector<128x64xf32> -> vector<128x64xf32>
    %123 = arith.addf %117, %122 : vector<128x64xf32>
    %c1_115 = arith.constant 1 : index
    %c0_116 = arith.constant 0 : index
    %c0_117 = arith.constant 0 : index
    %124 = vector.load %arg9[%c1_115, %c0_116, %c0_117] : memref<9x144x32xbf16, #tpu.memory_space<vmem>>, vector<1x128x32xbf16>
    %125 = vector.shape_cast %124 : vector<1x128x32xbf16> to vector<128x32xbf16>
    %c1_118 = arith.constant 1 : index
    %c0_119 = arith.constant 0 : index
    %c0_120 = arith.constant 0 : index
    %126 = vector.load %arg4[%c1_118, %c0_119, %c0_120] : memref<16x32x64xbf16, #tpu.memory_space<vmem>>, vector<1x32x64xbf16>
    %127 = vector.shape_cast %126 : vector<1x32x64xbf16> to vector<32x64xbf16>
    %cst_121 = arith.constant dense<0.000000e+00> : vector<128x64xf32>
    %128 = tpu.matmul %125, %127, %cst_121 {dimension_numbers = #tpu.dot_dimension_numbers<[1], [0], [0], [1], [0, 0, 1, 1], [], []>} : vector<128x32xbf16>, vector<32x64xbf16>, vector<128x64xf32> -> vector<128x64xf32>
    %129 = arith.addf %123, %128 : vector<128x64xf32>
    %c2_122 = arith.constant 2 : index
    %c0_123 = arith.constant 0 : index
    %c0_124 = arith.constant 0 : index
    %130 = vector.load %arg9[%c2_122, %c0_123, %c0_124] : memref<9x144x32xbf16, #tpu.memory_space<vmem>>, vector<1x128x32xbf16>
    %131 = vector.shape_cast %130 : vector<1x128x32xbf16> to vector<128x32xbf16>
    %c2_125 = arith.constant 2 : index
    %c0_126 = arith.constant 0 : index
    %c0_127 = arith.constant 0 : index
    %132 = vector.load %arg4[%c2_125, %c0_126, %c0_127] : memref<16x32x64xbf16, #tpu.memory_space<vmem>>, vector<1x32x64xbf16>
    %133 = vector.shape_cast %132 : vector<1x32x64xbf16> to vector<32x64xbf16>
    %cst_128 = arith.constant dense<0.000000e+00> : vector<128x64xf32>
    %134 = tpu.matmul %131, %133, %cst_128 {dimension_numbers = #tpu.dot_dimension_numbers<[1], [0], [0], [1], [0, 0, 1, 1], [], []>} : vector<128x32xbf16>, vector<32x64xbf16>, vector<128x64xf32> -> vector<128x64xf32>
    %135 = arith.addf %129, %134 : vector<128x64xf32>
    %c0_129 = arith.constant 0 : index
    %c1_130 = arith.constant 1 : index
    %c0_131 = arith.constant 0 : index
    %136 = vector.load %arg9[%c0_129, %c1_130, %c0_131] : memref<9x144x32xbf16, #tpu.memory_space<vmem>>, vector<1x128x32xbf16>
    %137 = vector.shape_cast %136 : vector<1x128x32xbf16> to vector<128x32xbf16>
    %c3_132 = arith.constant 3 : index
    %c0_133 = arith.constant 0 : index
    %c0_134 = arith.constant 0 : index
    %138 = vector.load %arg4[%c3_132, %c0_133, %c0_134] : memref<16x32x64xbf16, #tpu.memory_space<vmem>>, vector<1x32x64xbf16>
    %139 = vector.shape_cast %138 : vector<1x32x64xbf16> to vector<32x64xbf16>
    %cst_135 = arith.constant dense<0.000000e+00> : vector<128x64xf32>
    %140 = tpu.matmul %137, %139, %cst_135 {dimension_numbers = #tpu.dot_dimension_numbers<[1], [0], [0], [1], [0, 0, 1, 1], [], []>} : vector<128x32xbf16>, vector<32x64xbf16>, vector<128x64xf32> -> vector<128x64xf32>
    %141 = arith.addf %135, %140 : vector<128x64xf32>
    %c3_136 = arith.constant 3 : index
    %c0_137 = arith.constant 0 : index
    %c0_138 = arith.constant 0 : index
    %142 = vector.load %arg9[%c3_136, %c0_137, %c0_138] : memref<9x144x32xbf16, #tpu.memory_space<vmem>>, vector<1x128x32xbf16>
    %143 = vector.shape_cast %142 : vector<1x128x32xbf16> to vector<128x32xbf16>
    %c4_139 = arith.constant 4 : index
    %c0_140 = arith.constant 0 : index
    %c0_141 = arith.constant 0 : index
    %144 = vector.load %arg4[%c4_139, %c0_140, %c0_141] : memref<16x32x64xbf16, #tpu.memory_space<vmem>>, vector<1x32x64xbf16>
    %145 = vector.shape_cast %144 : vector<1x32x64xbf16> to vector<32x64xbf16>
    %cst_142 = arith.constant dense<0.000000e+00> : vector<128x64xf32>
    %146 = tpu.matmul %143, %145, %cst_142 {dimension_numbers = #tpu.dot_dimension_numbers<[1], [0], [0], [1], [0, 0, 1, 1], [], []>} : vector<128x32xbf16>, vector<32x64xbf16>, vector<128x64xf32> -> vector<128x64xf32>
    %147 = arith.addf %141, %146 : vector<128x64xf32>
    %c4_143 = arith.constant 4 : index
    %c0_144 = arith.constant 0 : index
    %c0_145 = arith.constant 0 : index
    %148 = vector.load %arg9[%c4_143, %c0_144, %c0_145] : memref<9x144x32xbf16, #tpu.memory_space<vmem>>, vector<1x128x32xbf16>
    %149 = vector.shape_cast %148 : vector<1x128x32xbf16> to vector<128x32xbf16>
    %c5_146 = arith.constant 5 : index
    %c0_147 = arith.constant 0 : index
    %c0_148 = arith.constant 0 : index
    %150 = vector.load %arg4[%c5_146, %c0_147, %c0_148] : memref<16x32x64xbf16, #tpu.memory_space<vmem>>, vector<1x32x64xbf16>
    %151 = vector.shape_cast %150 : vector<1x32x64xbf16> to vector<32x64xbf16>
    %cst_149 = arith.constant dense<0.000000e+00> : vector<128x64xf32>
    %152 = tpu.matmul %149, %151, %cst_149 {dimension_numbers = #tpu.dot_dimension_numbers<[1], [0], [0], [1], [0, 0, 1, 1], [], []>} : vector<128x32xbf16>, vector<32x64xbf16>, vector<128x64xf32> -> vector<128x64xf32>
    %153 = arith.addf %147, %152 : vector<128x64xf32>
    %c5_150 = arith.constant 5 : index
    %c0_151 = arith.constant 0 : index
    %c0_152 = arith.constant 0 : index
    %154 = vector.load %arg9[%c5_150, %c0_151, %c0_152] : memref<9x144x32xbf16, #tpu.memory_space<vmem>>, vector<1x128x32xbf16>
    %155 = vector.shape_cast %154 : vector<1x128x32xbf16> to vector<128x32xbf16>
    %c6_153 = arith.constant 6 : index
    %c0_154 = arith.constant 0 : index
    %c0_155 = arith.constant 0 : index
    %156 = vector.load %arg4[%c6_153, %c0_154, %c0_155] : memref<16x32x64xbf16, #tpu.memory_space<vmem>>, vector<1x32x64xbf16>
    %157 = vector.shape_cast %156 : vector<1x32x64xbf16> to vector<32x64xbf16>
    %cst_156 = arith.constant dense<0.000000e+00> : vector<128x64xf32>
    %158 = tpu.matmul %155, %157, %cst_156 {dimension_numbers = #tpu.dot_dimension_numbers<[1], [0], [0], [1], [0, 0, 1, 1], [], []>} : vector<128x32xbf16>, vector<32x64xbf16>, vector<128x64xf32> -> vector<128x64xf32>
    %159 = arith.addf %153, %158 : vector<128x64xf32>
    %c3_157 = arith.constant 3 : index
    %c1_158 = arith.constant 1 : index
    %c0_159 = arith.constant 0 : index
    %160 = vector.load %arg9[%c3_157, %c1_158, %c0_159] : memref<9x144x32xbf16, #tpu.memory_space<vmem>>, vector<1x128x32xbf16>
    %161 = vector.shape_cast %160 : vector<1x128x32xbf16> to vector<128x32xbf16>
    %c7_160 = arith.constant 7 : index
    %c0_161 = arith.constant 0 : index
    %c0_162 = arith.constant 0 : index
    %162 = vector.load %arg4[%c7_160, %c0_161, %c0_162] : memref<16x32x64xbf16, #tpu.memory_space<vmem>>, vector<1x32x64xbf16>
    %163 = vector.shape_cast %162 : vector<1x32x64xbf16> to vector<32x64xbf16>
    %cst_163 = arith.constant dense<0.000000e+00> : vector<128x64xf32>
    %164 = tpu.matmul %161, %163, %cst_163 {dimension_numbers = #tpu.dot_dimension_numbers<[1], [0], [0], [1], [0, 0, 1, 1], [], []>} : vector<128x32xbf16>, vector<32x64xbf16>, vector<128x64xf32> -> vector<128x64xf32>
    %165 = arith.addf %159, %164 : vector<128x64xf32>
    %c6_164 = arith.constant 6 : index
    %c0_165 = arith.constant 0 : index
    %c0_166 = arith.constant 0 : index
    %166 = vector.load %arg9[%c6_164, %c0_165, %c0_166] : memref<9x144x32xbf16, #tpu.memory_space<vmem>>, vector<1x128x32xbf16>
    %167 = vector.shape_cast %166 : vector<1x128x32xbf16> to vector<128x32xbf16>
    %c8_167 = arith.constant 8 : index
    %c0_168 = arith.constant 0 : index
    %c0_169 = arith.constant 0 : index
    %168 = vector.load %arg4[%c8_167, %c0_168, %c0_169] : memref<16x32x64xbf16, #tpu.memory_space<vmem>>, vector<1x32x64xbf16>
    %169 = vector.shape_cast %168 : vector<1x32x64xbf16> to vector<32x64xbf16>
    %cst_170 = arith.constant dense<0.000000e+00> : vector<128x64xf32>
    %170 = tpu.matmul %167, %169, %cst_170 {dimension_numbers = #tpu.dot_dimension_numbers<[1], [0], [0], [1], [0, 0, 1, 1], [], []>} : vector<128x32xbf16>, vector<32x64xbf16>, vector<128x64xf32> -> vector<128x64xf32>
    %171 = arith.addf %165, %170 : vector<128x64xf32>
    %c7_171 = arith.constant 7 : index
    %c0_172 = arith.constant 0 : index
    %c0_173 = arith.constant 0 : index
    %172 = vector.load %arg9[%c7_171, %c0_172, %c0_173] : memref<9x144x32xbf16, #tpu.memory_space<vmem>>, vector<1x128x32xbf16>
    %173 = vector.shape_cast %172 : vector<1x128x32xbf16> to vector<128x32xbf16>
    %c9 = arith.constant 9 : index
    %c0_174 = arith.constant 0 : index
    %c0_175 = arith.constant 0 : index
    %174 = vector.load %arg4[%c9, %c0_174, %c0_175] : memref<16x32x64xbf16, #tpu.memory_space<vmem>>, vector<1x32x64xbf16>
    %175 = vector.shape_cast %174 : vector<1x32x64xbf16> to vector<32x64xbf16>
    %cst_176 = arith.constant dense<0.000000e+00> : vector<128x64xf32>
    %176 = tpu.matmul %173, %175, %cst_176 {dimension_numbers = #tpu.dot_dimension_numbers<[1], [0], [0], [1], [0, 0, 1, 1], [], []>} : vector<128x32xbf16>, vector<32x64xbf16>, vector<128x64xf32> -> vector<128x64xf32>
    %177 = arith.addf %171, %176 : vector<128x64xf32>
    %c8_177 = arith.constant 8 : index
    %c0_178 = arith.constant 0 : index
    %c0_179 = arith.constant 0 : index
    %178 = vector.load %arg9[%c8_177, %c0_178, %c0_179] : memref<9x144x32xbf16, #tpu.memory_space<vmem>>, vector<1x128x32xbf16>
    %179 = vector.shape_cast %178 : vector<1x128x32xbf16> to vector<128x32xbf16>
    %c10 = arith.constant 10 : index
    %c0_180 = arith.constant 0 : index
    %c0_181 = arith.constant 0 : index
    %180 = vector.load %arg4[%c10, %c0_180, %c0_181] : memref<16x32x64xbf16, #tpu.memory_space<vmem>>, vector<1x32x64xbf16>
    %181 = vector.shape_cast %180 : vector<1x32x64xbf16> to vector<32x64xbf16>
    %cst_182 = arith.constant dense<0.000000e+00> : vector<128x64xf32>
    %182 = tpu.matmul %179, %181, %cst_182 {dimension_numbers = #tpu.dot_dimension_numbers<[1], [0], [0], [1], [0, 0, 1, 1], [], []>} : vector<128x32xbf16>, vector<32x64xbf16>, vector<128x64xf32> -> vector<128x64xf32>
    %183 = arith.addf %177, %182 : vector<128x64xf32>
    %c6_183 = arith.constant 6 : index
    %c1_184 = arith.constant 1 : index
    %c0_185 = arith.constant 0 : index
    %184 = vector.load %arg9[%c6_183, %c1_184, %c0_185] : memref<9x144x32xbf16, #tpu.memory_space<vmem>>, vector<1x128x32xbf16>
    %185 = vector.shape_cast %184 : vector<1x128x32xbf16> to vector<128x32xbf16>
    %c11 = arith.constant 11 : index
    %c0_186 = arith.constant 0 : index
    %c0_187 = arith.constant 0 : index
    %186 = vector.load %arg4[%c11, %c0_186, %c0_187] : memref<16x32x64xbf16, #tpu.memory_space<vmem>>, vector<1x32x64xbf16>
    %187 = vector.shape_cast %186 : vector<1x32x64xbf16> to vector<32x64xbf16>
    %cst_188 = arith.constant dense<0.000000e+00> : vector<128x64xf32>
    %188 = tpu.matmul %185, %187, %cst_188 {dimension_numbers = #tpu.dot_dimension_numbers<[1], [0], [0], [1], [0, 0, 1, 1], [], []>} : vector<128x32xbf16>, vector<32x64xbf16>, vector<128x64xf32> -> vector<128x64xf32>
    %189 = arith.addf %183, %188 : vector<128x64xf32>
    %c0_189 = arith.constant 0 : index
    %c11_190 = arith.constant 11 : index
    %c0_191 = arith.constant 0 : index
    %190 = vector.load %arg9[%c0_189, %c11_190, %c0_191] : memref<9x144x32xbf16, #tpu.memory_space<vmem>>, vector<1x128x32xbf16>
    %191 = vector.shape_cast %190 : vector<1x128x32xbf16> to vector<128x32xbf16>
    %c12 = arith.constant 12 : index
    %c0_192 = arith.constant 0 : index
    %c0_193 = arith.constant 0 : index
    %192 = vector.load %arg4[%c12, %c0_192, %c0_193] : memref<16x32x64xbf16, #tpu.memory_space<vmem>>, vector<1x32x64xbf16>
    %193 = vector.shape_cast %192 : vector<1x32x64xbf16> to vector<32x64xbf16>
    %cst_194 = arith.constant dense<0.000000e+00> : vector<128x64xf32>
    %194 = tpu.matmul %191, %193, %cst_194 {dimension_numbers = #tpu.dot_dimension_numbers<[1], [0], [0], [1], [0, 0, 1, 1], [], []>} : vector<128x32xbf16>, vector<32x64xbf16>, vector<128x64xf32> -> vector<128x64xf32>
    %195 = arith.addf %189, %194 : vector<128x64xf32>
    %c1_195 = arith.constant 1 : index
    %c11_196 = arith.constant 11 : index
    %c0_197 = arith.constant 0 : index
    %196 = vector.load %arg9[%c1_195, %c11_196, %c0_197] : memref<9x144x32xbf16, #tpu.memory_space<vmem>>, vector<1x128x32xbf16>
    %197 = vector.shape_cast %196 : vector<1x128x32xbf16> to vector<128x32xbf16>
    %c13 = arith.constant 13 : index
    %c0_198 = arith.constant 0 : index
    %c0_199 = arith.constant 0 : index
    %198 = vector.load %arg4[%c13, %c0_198, %c0_199] : memref<16x32x64xbf16, #tpu.memory_space<vmem>>, vector<1x32x64xbf16>
    %199 = vector.shape_cast %198 : vector<1x32x64xbf16> to vector<32x64xbf16>
    %cst_200 = arith.constant dense<0.000000e+00> : vector<128x64xf32>
    %200 = tpu.matmul %197, %199, %cst_200 {dimension_numbers = #tpu.dot_dimension_numbers<[1], [0], [0], [1], [0, 0, 1, 1], [], []>} : vector<128x32xbf16>, vector<32x64xbf16>, vector<128x64xf32> -> vector<128x64xf32>
    %201 = arith.addf %195, %200 : vector<128x64xf32>
    %c2_201 = arith.constant 2 : index
    %c11_202 = arith.constant 11 : index
    %c0_203 = arith.constant 0 : index
    %202 = vector.load %arg9[%c2_201, %c11_202, %c0_203] : memref<9x144x32xbf16, #tpu.memory_space<vmem>>, vector<1x128x32xbf16>
    %203 = vector.shape_cast %202 : vector<1x128x32xbf16> to vector<128x32xbf16>
    %c14 = arith.constant 14 : index
    %c0_204 = arith.constant 0 : index
    %c0_205 = arith.constant 0 : index
    %204 = vector.load %arg4[%c14, %c0_204, %c0_205] : memref<16x32x64xbf16, #tpu.memory_space<vmem>>, vector<1x32x64xbf16>
    %205 = vector.shape_cast %204 : vector<1x32x64xbf16> to vector<32x64xbf16>
    %cst_206 = arith.constant dense<0.000000e+00> : vector<128x64xf32>
    %206 = tpu.matmul %203, %205, %cst_206 {dimension_numbers = #tpu.dot_dimension_numbers<[1], [0], [0], [1], [0, 0, 1, 1], [], []>} : vector<128x32xbf16>, vector<32x64xbf16>, vector<128x64xf32> -> vector<128x64xf32>
    %207 = arith.addf %201, %206 : vector<128x64xf32>
    %c0_207 = arith.constant 0 : index
    %c12_208 = arith.constant 12 : index
    %c0_209 = arith.constant 0 : index
    %208 = vector.load %arg9[%c0_207, %c12_208, %c0_209] : memref<9x144x32xbf16, #tpu.memory_space<vmem>>, vector<1x128x32xbf16>
    %209 = vector.shape_cast %208 : vector<1x128x32xbf16> to vector<128x32xbf16>
    %c15 = arith.constant 15 : index
    %c0_210 = arith.constant 0 : index
    %c0_211 = arith.constant 0 : index
    %210 = vector.load %arg4[%c15, %c0_210, %c0_211] : memref<16x32x64xbf16, #tpu.memory_space<vmem>>, vector<1x32x64xbf16>
    %211 = vector.shape_cast %210 : vector<1x32x64xbf16> to vector<32x64xbf16>
    %cst_212 = arith.constant dense<0.000000e+00> : vector<128x64xf32>
    %212 = tpu.matmul %209, %211, %cst_212 {dimension_numbers = #tpu.dot_dimension_numbers<[1], [0], [0], [1], [0, 0, 1, 1], [], []>} : vector<128x32xbf16>, vector<32x64xbf16>, vector<128x64xf32> -> vector<128x64xf32>
    %213 = arith.addf %207, %212 : vector<128x64xf32>
    %c0_213 = arith.constant 0 : index
    %c0_214 = arith.constant 0 : index
    %214 = vector.load %arg5[%c0_213, %c0_214] : memref<1x64xf32, #tpu.memory_space<vmem>>, vector<1x64xf32>
    %215 = vector.broadcast %214 : vector<1x64xf32> to vector<128x64xf32>
    %216 = arith.addf %213, %215 : vector<128x64xf32>
    %cst_215 = arith.constant 0.000000e+00 : f32
    %217 = vector.broadcast %cst_215 : f32 to vector<128x64xf32>
    %218 = arith.maximumf %216, %217 : vector<128x64xf32>
    %219 = arith.truncf %218 : vector<128x64xf32> to vector<128x64xbf16>
    %cst_216 = arith.constant 0.000000e+00 : f32
    %220 = vector.broadcast %cst_216 : f32 to vector<88x64xf32>
    %221 = vector.extract_strided_slice %219 {offsets = [0, 0], sizes = [88, 64], strides = [1, 1]} : vector<128x64xbf16> to vector<88x64xbf16>
    %c0_217 = arith.constant 0 : index
    %c0_218 = arith.constant 0 : index
    %c0_219 = arith.constant 0 : index
    %222 = vector.load %arg6[%c0_217, %c0_218, %c0_219] : memref<9x64x64xbf16, #tpu.memory_space<vmem>>, vector<1x64x64xbf16>
    %223 = vector.shape_cast %222 : vector<1x64x64xbf16> to vector<64x64xbf16>
    %cst_220 = arith.constant dense<0.000000e+00> : vector<88x64xf32>
    %224 = tpu.matmul %221, %223, %cst_220 {dimension_numbers = #tpu.dot_dimension_numbers<[1], [0], [0], [1], [0, 0, 1, 1], [], []>} : vector<88x64xbf16>, vector<64x64xbf16>, vector<88x64xf32> -> vector<88x64xf32>
    %225 = arith.addf %220, %224 : vector<88x64xf32>
    %226 = vector.extract_strided_slice %219 {offsets = [1, 0], sizes = [88, 64], strides = [1, 1]} : vector<128x64xbf16> to vector<88x64xbf16>
    %c1_221 = arith.constant 1 : index
    %c0_222 = arith.constant 0 : index
    %c0_223 = arith.constant 0 : index
    %227 = vector.load %arg6[%c1_221, %c0_222, %c0_223] : memref<9x64x64xbf16, #tpu.memory_space<vmem>>, vector<1x64x64xbf16>
    %228 = vector.shape_cast %227 : vector<1x64x64xbf16> to vector<64x64xbf16>
    %cst_224 = arith.constant dense<0.000000e+00> : vector<88x64xf32>
    %229 = tpu.matmul %226, %228, %cst_224 {dimension_numbers = #tpu.dot_dimension_numbers<[1], [0], [0], [1], [0, 0, 1, 1], [], []>} : vector<88x64xbf16>, vector<64x64xbf16>, vector<88x64xf32> -> vector<88x64xf32>
    %230 = arith.addf %225, %229 : vector<88x64xf32>
    %231 = vector.extract_strided_slice %219 {offsets = [2, 0], sizes = [88, 64], strides = [1, 1]} : vector<128x64xbf16> to vector<88x64xbf16>
    %c2_225 = arith.constant 2 : index
    %c0_226 = arith.constant 0 : index
    %c0_227 = arith.constant 0 : index
    %232 = vector.load %arg6[%c2_225, %c0_226, %c0_227] : memref<9x64x64xbf16, #tpu.memory_space<vmem>>, vector<1x64x64xbf16>
    %233 = vector.shape_cast %232 : vector<1x64x64xbf16> to vector<64x64xbf16>
    %cst_228 = arith.constant dense<0.000000e+00> : vector<88x64xf32>
    %234 = tpu.matmul %231, %233, %cst_228 {dimension_numbers = #tpu.dot_dimension_numbers<[1], [0], [0], [1], [0, 0, 1, 1], [], []>} : vector<88x64xbf16>, vector<64x64xbf16>, vector<88x64xf32> -> vector<88x64xf32>
    %235 = arith.addf %230, %234 : vector<88x64xf32>
    %236 = vector.extract_strided_slice %219 {offsets = [11, 0], sizes = [88, 64], strides = [1, 1]} : vector<128x64xbf16> to vector<88x64xbf16>
    %c3_229 = arith.constant 3 : index
    %c0_230 = arith.constant 0 : index
    %c0_231 = arith.constant 0 : index
    %237 = vector.load %arg6[%c3_229, %c0_230, %c0_231] : memref<9x64x64xbf16, #tpu.memory_space<vmem>>, vector<1x64x64xbf16>
    %238 = vector.shape_cast %237 : vector<1x64x64xbf16> to vector<64x64xbf16>
    %cst_232 = arith.constant dense<0.000000e+00> : vector<88x64xf32>
    %239 = tpu.matmul %236, %238, %cst_232 {dimension_numbers = #tpu.dot_dimension_numbers<[1], [0], [0], [1], [0, 0, 1, 1], [], []>} : vector<88x64xbf16>, vector<64x64xbf16>, vector<88x64xf32> -> vector<88x64xf32>
    %240 = arith.addf %235, %239 : vector<88x64xf32>
    %241 = vector.extract_strided_slice %219 {offsets = [12, 0], sizes = [88, 64], strides = [1, 1]} : vector<128x64xbf16> to vector<88x64xbf16>
    %c4_233 = arith.constant 4 : index
    %c0_234 = arith.constant 0 : index
    %c0_235 = arith.constant 0 : index
    %242 = vector.load %arg6[%c4_233, %c0_234, %c0_235] : memref<9x64x64xbf16, #tpu.memory_space<vmem>>, vector<1x64x64xbf16>
    %243 = vector.shape_cast %242 : vector<1x64x64xbf16> to vector<64x64xbf16>
    %cst_236 = arith.constant dense<0.000000e+00> : vector<88x64xf32>
    %244 = tpu.matmul %241, %243, %cst_236 {dimension_numbers = #tpu.dot_dimension_numbers<[1], [0], [0], [1], [0, 0, 1, 1], [], []>} : vector<88x64xbf16>, vector<64x64xbf16>, vector<88x64xf32> -> vector<88x64xf32>
    %245 = arith.addf %240, %244 : vector<88x64xf32>
    %246 = vector.extract_strided_slice %219 {offsets = [13, 0], sizes = [88, 64], strides = [1, 1]} : vector<128x64xbf16> to vector<88x64xbf16>
    %c5_237 = arith.constant 5 : index
    %c0_238 = arith.constant 0 : index
    %c0_239 = arith.constant 0 : index
    %247 = vector.load %arg6[%c5_237, %c0_238, %c0_239] : memref<9x64x64xbf16, #tpu.memory_space<vmem>>, vector<1x64x64xbf16>
    %248 = vector.shape_cast %247 : vector<1x64x64xbf16> to vector<64x64xbf16>
    %cst_240 = arith.constant dense<0.000000e+00> : vector<88x64xf32>
    %249 = tpu.matmul %246, %248, %cst_240 {dimension_numbers = #tpu.dot_dimension_numbers<[1], [0], [0], [1], [0, 0, 1, 1], [], []>} : vector<88x64xbf16>, vector<64x64xbf16>, vector<88x64xf32> -> vector<88x64xf32>
    %250 = arith.addf %245, %249 : vector<88x64xf32>
    %251 = vector.extract_strided_slice %219 {offsets = [22, 0], sizes = [88, 64], strides = [1, 1]} : vector<128x64xbf16> to vector<88x64xbf16>
    %c6_241 = arith.constant 6 : index
    %c0_242 = arith.constant 0 : index
    %c0_243 = arith.constant 0 : index
    %252 = vector.load %arg6[%c6_241, %c0_242, %c0_243] : memref<9x64x64xbf16, #tpu.memory_space<vmem>>, vector<1x64x64xbf16>
    %253 = vector.shape_cast %252 : vector<1x64x64xbf16> to vector<64x64xbf16>
    %cst_244 = arith.constant dense<0.000000e+00> : vector<88x64xf32>
    %254 = tpu.matmul %251, %253, %cst_244 {dimension_numbers = #tpu.dot_dimension_numbers<[1], [0], [0], [1], [0, 0, 1, 1], [], []>} : vector<88x64xbf16>, vector<64x64xbf16>, vector<88x64xf32> -> vector<88x64xf32>
    %255 = arith.addf %250, %254 : vector<88x64xf32>
    %256 = vector.extract_strided_slice %219 {offsets = [23, 0], sizes = [88, 64], strides = [1, 1]} : vector<128x64xbf16> to vector<88x64xbf16>
    %c7_245 = arith.constant 7 : index
    %c0_246 = arith.constant 0 : index
    %c0_247 = arith.constant 0 : index
    %257 = vector.load %arg6[%c7_245, %c0_246, %c0_247] : memref<9x64x64xbf16, #tpu.memory_space<vmem>>, vector<1x64x64xbf16>
    %258 = vector.shape_cast %257 : vector<1x64x64xbf16> to vector<64x64xbf16>
    %cst_248 = arith.constant dense<0.000000e+00> : vector<88x64xf32>
    %259 = tpu.matmul %256, %258, %cst_248 {dimension_numbers = #tpu.dot_dimension_numbers<[1], [0], [0], [1], [0, 0, 1, 1], [], []>} : vector<88x64xbf16>, vector<64x64xbf16>, vector<88x64xf32> -> vector<88x64xf32>
    %260 = arith.addf %255, %259 : vector<88x64xf32>
    %261 = vector.extract_strided_slice %219 {offsets = [24, 0], sizes = [88, 64], strides = [1, 1]} : vector<128x64xbf16> to vector<88x64xbf16>
    %c8_249 = arith.constant 8 : index
    %c0_250 = arith.constant 0 : index
    %c0_251 = arith.constant 0 : index
    %262 = vector.load %arg6[%c8_249, %c0_250, %c0_251] : memref<9x64x64xbf16, #tpu.memory_space<vmem>>, vector<1x64x64xbf16>
    %263 = vector.shape_cast %262 : vector<1x64x64xbf16> to vector<64x64xbf16>
    %cst_252 = arith.constant dense<0.000000e+00> : vector<88x64xf32>
    %264 = tpu.matmul %261, %263, %cst_252 {dimension_numbers = #tpu.dot_dimension_numbers<[1], [0], [0], [1], [0, 0, 1, 1], [], []>} : vector<88x64xbf16>, vector<64x64xbf16>, vector<88x64xf32> -> vector<88x64xf32>
    %265 = arith.addf %260, %264 : vector<88x64xf32>
    %c0_253 = arith.constant 0 : index
    %c0_254 = arith.constant 0 : index
    %266 = vector.load %arg7[%c0_253, %c0_254] : memref<1x64xf32, #tpu.memory_space<vmem>>, vector<1x64xf32>
    %267 = vector.broadcast %266 : vector<1x64xf32> to vector<88x64xf32>
    %268 = arith.addf %265, %267 : vector<88x64xf32>
    %cst_255 = arith.constant 0.000000e+00 : f32
    %269 = vector.broadcast %cst_255 : f32 to vector<88x64xf32>
    %270 = arith.maximumf %268, %269 : vector<88x64xf32>
    %271 = arith.truncf %270 : vector<88x64xf32> to vector<88x64xbf16>
    %272 = vector.extract_strided_slice %271 {offsets = [0, 0], sizes = [8, 64], strides = [1, 1]} : vector<88x64xbf16> to vector<8x64xbf16>
    %c0_256 = arith.constant 0 : index
    %c0_257 = arith.constant 0 : index
    %c0_258 = arith.constant 0 : index
    %273 = vector.load %arg8[%c0_256, %c0_257, %c0_258] : memref<1x64x64xbf16, #tpu.memory_space<vmem>>, vector<1x8x64xbf16>
    %274 = vector.shape_cast %273 : vector<1x8x64xbf16> to vector<8x64xbf16>
    %275 = vector.shape_cast %272 : vector<8x64xbf16> to vector<1x8x64xbf16>
    tpu.vector_store %arg8[%c0_256, %c0_257, %c0_258], %275 {strides = array<i32>} : memref<1x64x64xbf16, #tpu.memory_space<vmem>>, vector<1x8x64xbf16>,
    %276 = vector.extract_strided_slice %271 {offsets = [11, 0], sizes = [8, 64], strides = [1, 1]} : vector<88x64xbf16> to vector<8x64xbf16>
    %c0_259 = arith.constant 0 : index
    %c8_260 = arith.constant 8 : index
    %c0_261 = arith.constant 0 : index
    %277 = vector.load %arg8[%c0_259, %c8_260, %c0_261] : memref<1x64x64xbf16, #tpu.memory_space<vmem>>, vector<1x8x64xbf16>
    %278 = vector.shape_cast %277 : vector<1x8x64xbf16> to vector<8x64xbf16>
    %279 = vector.shape_cast %276 : vector<8x64xbf16> to vector<1x8x64xbf16>
    tpu.vector_store %arg8[%c0_259, %c8_260, %c0_261], %279 {strides = array<i32>} : memref<1x64x64xbf16, #tpu.memory_space<vmem>>, vector<1x8x64xbf16>,
    %280 = vector.extract_strided_slice %271 {offsets = [22, 0], sizes = [8, 64], strides = [1, 1]} : vector<88x64xbf16> to vector<8x64xbf16>
    %c0_262 = arith.constant 0 : index
    %c16 = arith.constant 16 : index
    %c0_263 = arith.constant 0 : index
    %281 = vector.load %arg8[%c0_262, %c16, %c0_263] : memref<1x64x64xbf16, #tpu.memory_space<vmem>>, vector<1x8x64xbf16>
    %282 = vector.shape_cast %281 : vector<1x8x64xbf16> to vector<8x64xbf16>
    %283 = vector.shape_cast %280 : vector<8x64xbf16> to vector<1x8x64xbf16>
    tpu.vector_store %arg8[%c0_262, %c16, %c0_263], %283 {strides = array<i32>} : memref<1x64x64xbf16, #tpu.memory_space<vmem>>, vector<1x8x64xbf16>,
    %284 = vector.extract_strided_slice %271 {offsets = [33, 0], sizes = [8, 64], strides = [1, 1]} : vector<88x64xbf16> to vector<8x64xbf16>
    %c0_264 = arith.constant 0 : index
    %c24 = arith.constant 24 : index
    %c0_265 = arith.constant 0 : index
    %285 = vector.load %arg8[%c0_264, %c24, %c0_265] : memref<1x64x64xbf16, #tpu.memory_space<vmem>>, vector<1x8x64xbf16>
    %286 = vector.shape_cast %285 : vector<1x8x64xbf16> to vector<8x64xbf16>
    %287 = vector.shape_cast %284 : vector<8x64xbf16> to vector<1x8x64xbf16>
    tpu.vector_store %arg8[%c0_264, %c24, %c0_265], %287 {strides = array<i32>} : memref<1x64x64xbf16, #tpu.memory_space<vmem>>, vector<1x8x64xbf16>,
    %288 = vector.extract_strided_slice %271 {offsets = [44, 0], sizes = [8, 64], strides = [1, 1]} : vector<88x64xbf16> to vector<8x64xbf16>
    %c0_266 = arith.constant 0 : index
    %c32 = arith.constant 32 : index
    %c0_267 = arith.constant 0 : index
    %289 = vector.load %arg8[%c0_266, %c32, %c0_267] : memref<1x64x64xbf16, #tpu.memory_space<vmem>>, vector<1x8x64xbf16>
    %290 = vector.shape_cast %289 : vector<1x8x64xbf16> to vector<8x64xbf16>
    %291 = vector.shape_cast %288 : vector<8x64xbf16> to vector<1x8x64xbf16>
    tpu.vector_store %arg8[%c0_266, %c32, %c0_267], %291 {strides = array<i32>} : memref<1x64x64xbf16, #tpu.memory_space<vmem>>, vector<1x8x64xbf16>,
    %292 = vector.extract_strided_slice %271 {offsets = [55, 0], sizes = [8, 64], strides = [1, 1]} : vector<88x64xbf16> to vector<8x64xbf16>
    %c0_268 = arith.constant 0 : index
    %c40 = arith.constant 40 : index
    %c0_269 = arith.constant 0 : index
    %293 = vector.load %arg8[%c0_268, %c40, %c0_269] : memref<1x64x64xbf16, #tpu.memory_space<vmem>>, vector<1x8x64xbf16>
    %294 = vector.shape_cast %293 : vector<1x8x64xbf16> to vector<8x64xbf16>
    %295 = vector.shape_cast %292 : vector<8x64xbf16> to vector<1x8x64xbf16>
    tpu.vector_store %arg8[%c0_268, %c40, %c0_269], %295 {strides = array<i32>} : memref<1x64x64xbf16, #tpu.memory_space<vmem>>, vector<1x8x64xbf16>,
    %296 = vector.extract_strided_slice %271 {offsets = [66, 0], sizes = [8, 64], strides = [1, 1]} : vector<88x64xbf16> to vector<8x64xbf16>
    %c0_270 = arith.constant 0 : index
    %c48 = arith.constant 48 : index
    %c0_271 = arith.constant 0 : index
    %297 = vector.load %arg8[%c0_270, %c48, %c0_271] : memref<1x64x64xbf16, #tpu.memory_space<vmem>>, vector<1x8x64xbf16>
    %298 = vector.shape_cast %297 : vector<1x8x64xbf16> to vector<8x64xbf16>
    %299 = vector.shape_cast %296 : vector<8x64xbf16> to vector<1x8x64xbf16>
    tpu.vector_store %arg8[%c0_270, %c48, %c0_271], %299 {strides = array<i32>} : memref<1x64x64xbf16, #tpu.memory_space<vmem>>, vector<1x8x64xbf16>,
    %300 = vector.extract_strided_slice %271 {offsets = [77, 0], sizes = [8, 64], strides = [1, 1]} : vector<88x64xbf16> to vector<8x64xbf16>
    %c0_272 = arith.constant 0 : index
    %c56 = arith.constant 56 : index
    %c0_273 = arith.constant 0 : index
    %301 = vector.load %arg8[%c0_272, %c56, %c0_273] : memref<1x64x64xbf16, #tpu.memory_space<vmem>>, vector<1x8x64xbf16>
    %302 = vector.shape_cast %301 : vector<1x8x64xbf16> to vector<8x64xbf16>
    %303 = vector.shape_cast %300 : vector<8x64xbf16> to vector<1x8x64xbf16>
    tpu.vector_store %arg8[%c0_272, %c56, %c0_273], %303 {strides = array<i32>} : memref<1x64x64xbf16, #tpu.memory_space<vmem>>, vector<1x8x64xbf16>,
    return
  }
  func.func @transform_0(%arg0: i32) -> (i32, i32, i32, i32) {
    %c0_i32 = arith.constant 0 : i32
    %c0_i32_0 = arith.constant 0 : i32
    %c0_i32_1 = arith.constant 0 : i32
    %c0_i32_2 = arith.constant 0 : i32
    return %arg0, %c0_i32, %c0_i32_0, %c0_i32_1 : i32, i32, i32, i32
  }
  func.func @transform_1(%arg0: i32) -> (i32, i32) {
    %c0_i32 = arith.constant 0 : i32
    %c0_i32_0 = arith.constant 0 : i32
    %c0_i32_1 = arith.constant 0 : i32
    return %c0_i32, %c0_i32_0 : i32, i32
  }
  func.func @transform_2(%arg0: i32) -> (i32, i32) {
    %c0_i32 = arith.constant 0 : i32
    %c0_i32_0 = arith.constant 0 : i32
    %c0_i32_1 = arith.constant 0 : i32
    return %c0_i32, %c0_i32_0 : i32, i32
  }
  func.func @transform_3(%arg0: i32) -> (i32, i32, i32) {
    %c0_i32 = arith.constant 0 : i32
    %c0_i32_0 = arith.constant 0 : i32
    %c0_i32_1 = arith.constant 0 : i32
    %c0_i32_2 = arith.constant 0 : i32
    return %c0_i32, %c0_i32_0, %c0_i32_1 : i32, i32, i32
  }
  func.func @transform_4(%arg0: i32) -> (i32, i32) {
    %c0_i32 = arith.constant 0 : i32
    %c0_i32_0 = arith.constant 0 : i32
    %c0_i32_1 = arith.constant 0 : i32
    return %c0_i32, %c0_i32_0 : i32, i32
  }
  func.func @transform_5(%arg0: i32) -> (i32, i32, i32) {
    %c0_i32 = arith.constant 0 : i32
    %c0_i32_0 = arith.constant 0 : i32
    %c0_i32_1 = arith.constant 0 : i32
    %c0_i32_2 = arith.constant 0 : i32
    return %c0_i32, %c0_i32_0, %c0_i32_1 : i32, i32, i32
  }
  func.func @transform_6(%arg0: i32) -> (i32, i32) {
    %c0_i32 = arith.constant 0 : i32
    %c0_i32_0 = arith.constant 0 : i32
    %c0_i32_1 = arith.constant 0 : i32
    return %c0_i32, %c0_i32_0 : i32, i32
  }
  func.func @transform_7(%arg0: i32) -> (i32, i32, i32) {
    %c0_i32 = arith.constant 0 : i32
    %c0_i32_0 = arith.constant 0 : i32
    %c0_i32_1 = arith.constant 0 : i32
    return %arg0, %c0_i32, %c0_i32_0 : i32, i32, i32
  }
}

module attributes {stable_mosaic.version = 11 : i64} {
  func.func @_fc_stack_kernel(%arg0: i32, %arg1: memref<2x1024xbf16, #tpu.memory_space<vmem>>, %arg2: memref<1024x512xbf16, #tpu.memory_space<vmem>>, %arg3: memref<1x512xf32, #tpu.memory_space<vmem>>, %arg4: memref<512x128xbf16, #tpu.memory_space<vmem>>, %arg5: memref<1x128xf32, #tpu.memory_space<vmem>>, %arg6: memref<128x128xbf16, #tpu.memory_space<vmem>>, %arg7: memref<1x128xf32, #tpu.memory_space<vmem>>, %arg8: memref<2x128xf32, #tpu.memory_space<vmem>>, %arg9: memref<2x512xf32, #tpu.memory_space<vmem>>) attributes {dimension_semantics = [#tpu.dimension_semantics<arbitrary>], iteration_bounds = array<i64: 4>, scalar_prefetch = 0 : i64, scratch_operands = 1 : i64, tpu.core_type = #tpu.core_type<tc>, window_params = [{transform_indices = @transform_0, window_bounds = array<i64: 2, 1024>}, {transform_indices = @transform_1, window_bounds = array<i64: 1024, 512>}, {pipeline_mode = #tpu.pipeline_mode<synchronous>, transform_indices = @transform_2, window_bounds = array<i64: 1, 512>}, {pipeline_mode = #tpu.pipeline_mode<synchronous>, transform_indices = @transform_3, window_bounds = array<i64: 512, 128>}, {pipeline_mode = #tpu.pipeline_mode<synchronous>, transform_indices = @transform_4, window_bounds = array<i64: 1, 128>}, {pipeline_mode = #tpu.pipeline_mode<synchronous>, transform_indices = @transform_5, window_bounds = array<i64: 128, 128>}, {pipeline_mode = #tpu.pipeline_mode<synchronous>, transform_indices = @transform_6, window_bounds = array<i64: 1, 128>}, {pipeline_mode = #tpu.pipeline_mode<synchronous>, transform_indices = @transform_7, window_bounds = array<i64: 2, 128>}]} {
    %c0_i32 = arith.constant 0 : i32
    %0 = arith.cmpi eq, %arg0, %c0_i32 : i32
    %1 = arith.extui %0 : i1 to i32
    %c0_i32_0 = arith.constant 0 : i32
    %2 = arith.cmpi ne, %1, %c0_i32_0 : i32
    scf.if %2 {
      %cst_9 = arith.constant 0.000000e+00 : f32
      %12 = vector.broadcast %cst_9 : f32 to vector<2x512xf32>
      %c0_10 = arith.constant 0 : index
      %c0_11 = arith.constant 0 : index
      %13 = vector.load %arg9[%c0_10, %c0_11] : memref<2x512xf32, #tpu.memory_space<vmem>>, vector<2x512xf32>
      tpu.vector_store %arg9[%c0_10, %c0_11], %12 {strides = array<i32>} : memref<2x512xf32, #tpu.memory_space<vmem>>, vector<2x512xf32>,
    } else {
    }
    %c0 = arith.constant 0 : index
    %c0_1 = arith.constant 0 : index
    %3 = vector.load %arg9[%c0, %c0_1] : memref<2x512xf32, #tpu.memory_space<vmem>>, vector<2x512xf32>
    %c0_2 = arith.constant 0 : index
    %c0_3 = arith.constant 0 : index
    %4 = vector.load %arg1[%c0_2, %c0_3] : memref<2x1024xbf16, #tpu.memory_space<vmem>>, vector<2x1024xbf16>
    %c0_4 = arith.constant 0 : index
    %c0_5 = arith.constant 0 : index
    %5 = vector.load %arg2[%c0_4, %c0_5] : memref<1024x512xbf16, #tpu.memory_space<vmem>>, vector<1024x512xbf16>
    %cst = arith.constant dense<0.000000e+00> : vector<2x512xf32>
    %6 = tpu.matmul %4, %5, %cst {dimension_numbers = #tpu.dot_dimension_numbers<[1], [0], [0], [1], [0, 0, 1, 1], [], []>} : vector<2x1024xbf16>, vector<1024x512xbf16>, vector<2x512xf32> -> vector<2x512xf32>
    %7 = arith.addf %3, %6 : vector<2x512xf32>
    %c0_6 = arith.constant 0 : index
    %c0_7 = arith.constant 0 : index
    %8 = vector.load %arg9[%c0_6, %c0_7] : memref<2x512xf32, #tpu.memory_space<vmem>>, vector<2x512xf32>
    tpu.vector_store %arg9[%c0_6, %c0_7], %7 {strides = array<i32>} : memref<2x512xf32, #tpu.memory_space<vmem>>, vector<2x512xf32>,
    %c3_i32 = arith.constant 3 : i32
    %9 = arith.cmpi eq, %arg0, %c3_i32 : i32
    %10 = arith.extui %9 : i1 to i32
    %c0_i32_8 = arith.constant 0 : i32
    %11 = arith.cmpi ne, %10, %c0_i32_8 : i32
    scf.if %11 {
      %c0_9 = arith.constant 0 : index
      %c0_10 = arith.constant 0 : index
      %12 = vector.load %arg9[%c0_9, %c0_10] : memref<2x512xf32, #tpu.memory_space<vmem>>, vector<2x512xf32>
      %c0_11 = arith.constant 0 : index
      %c0_12 = arith.constant 0 : index
      %13 = vector.load %arg3[%c0_11, %c0_12] : memref<1x512xf32, #tpu.memory_space<vmem>>, vector<1x512xf32>
      %14 = vector.broadcast %13 : vector<1x512xf32> to vector<2x512xf32>
      %15 = arith.addf %12, %14 : vector<2x512xf32>
      %cst_13 = arith.constant 0.000000e+00 : f32
      %16 = vector.broadcast %cst_13 : f32 to vector<2x512xf32>
      %17 = arith.maximumf %15, %16 : vector<2x512xf32>
      %18 = arith.truncf %17 : vector<2x512xf32> to vector<2x512xbf16>
      %c0_14 = arith.constant 0 : index
      %c0_15 = arith.constant 0 : index
      %19 = vector.load %arg4[%c0_14, %c0_15] : memref<512x128xbf16, #tpu.memory_space<vmem>>, vector<512x128xbf16>
      %cst_16 = arith.constant dense<0.000000e+00> : vector<2x128xf32>
      %20 = tpu.matmul %18, %19, %cst_16 {dimension_numbers = #tpu.dot_dimension_numbers<[1], [0], [0], [1], [0, 0, 1, 1], [], []>} : vector<2x512xbf16>, vector<512x128xbf16>, vector<2x128xf32> -> vector<2x128xf32>
      %c0_17 = arith.constant 0 : index
      %c0_18 = arith.constant 0 : index
      %21 = vector.load %arg5[%c0_17, %c0_18] : memref<1x128xf32, #tpu.memory_space<vmem>>, vector<1x128xf32>
      %22 = vector.broadcast %21 : vector<1x128xf32> to vector<2x128xf32>
      %23 = arith.addf %20, %22 : vector<2x128xf32>
      %cst_19 = arith.constant 0.000000e+00 : f32
      %24 = vector.broadcast %cst_19 : f32 to vector<2x128xf32>
      %25 = arith.maximumf %23, %24 : vector<2x128xf32>
      %26 = arith.truncf %25 : vector<2x128xf32> to vector<2x128xbf16>
      %c0_20 = arith.constant 0 : index
      %c0_21 = arith.constant 0 : index
      %27 = vector.load %arg6[%c0_20, %c0_21] : memref<128x128xbf16, #tpu.memory_space<vmem>>, vector<128x128xbf16>
      %cst_22 = arith.constant dense<0.000000e+00> : vector<2x128xf32>
      %28 = tpu.matmul %26, %27, %cst_22 {dimension_numbers = #tpu.dot_dimension_numbers<[1], [0], [0], [1], [0, 0, 1, 1], [], []>} : vector<2x128xbf16>, vector<128x128xbf16>, vector<2x128xf32> -> vector<2x128xf32>
      %c0_23 = arith.constant 0 : index
      %c0_24 = arith.constant 0 : index
      %29 = vector.load %arg7[%c0_23, %c0_24] : memref<1x128xf32, #tpu.memory_space<vmem>>, vector<1x128xf32>
      %30 = vector.broadcast %29 : vector<1x128xf32> to vector<2x128xf32>
      %31 = arith.addf %28, %30 : vector<2x128xf32>
      %c0_25 = arith.constant 0 : index
      %c0_26 = arith.constant 0 : index
      %32 = vector.load %arg8[%c0_25, %c0_26] : memref<2x128xf32, #tpu.memory_space<vmem>>, vector<2x128xf32>
      tpu.vector_store %arg8[%c0_25, %c0_26], %31 {strides = array<i32>} : memref<2x128xf32, #tpu.memory_space<vmem>>, vector<2x128xf32>,
    } else {
    }
    return
  }
  func.func @transform_0(%arg0: i32) -> (i32, i32) {
    %c0_i32 = arith.constant 0 : i32
    %c0_i32_0 = arith.constant 0 : i32
    return %c0_i32, %arg0 : i32, i32
  }
  func.func @transform_1(%arg0: i32) -> (i32, i32) {
    %c0_i32 = arith.constant 0 : i32
    %c0_i32_0 = arith.constant 0 : i32
    return %arg0, %c0_i32 : i32, i32
  }
  func.func @transform_2(%arg0: i32) -> (i32, i32) {
    %c0_i32 = arith.constant 0 : i32
    %c0_i32_0 = arith.constant 0 : i32
    %c0_i32_1 = arith.constant 0 : i32
    return %c0_i32, %c0_i32_0 : i32, i32
  }
  func.func @transform_3(%arg0: i32) -> (i32, i32) {
    %c0_i32 = arith.constant 0 : i32
    %c0_i32_0 = arith.constant 0 : i32
    %c0_i32_1 = arith.constant 0 : i32
    return %c0_i32, %c0_i32_0 : i32, i32
  }
  func.func @transform_4(%arg0: i32) -> (i32, i32) {
    %c0_i32 = arith.constant 0 : i32
    %c0_i32_0 = arith.constant 0 : i32
    %c0_i32_1 = arith.constant 0 : i32
    return %c0_i32, %c0_i32_0 : i32, i32
  }
  func.func @transform_5(%arg0: i32) -> (i32, i32) {
    %c0_i32 = arith.constant 0 : i32
    %c0_i32_0 = arith.constant 0 : i32
    %c0_i32_1 = arith.constant 0 : i32
    return %c0_i32, %c0_i32_0 : i32, i32
  }
  func.func @transform_6(%arg0: i32) -> (i32, i32) {
    %c0_i32 = arith.constant 0 : i32
    %c0_i32_0 = arith.constant 0 : i32
    %c0_i32_1 = arith.constant 0 : i32
    return %c0_i32, %c0_i32_0 : i32, i32
  }
  func.func @transform_7(%arg0: i32) -> (i32, i32) {
    %c0_i32 = arith.constant 0 : i32
    %c0_i32_0 = arith.constant 0 : i32
    %c0_i32_1 = arith.constant 0 : i32
    return %c0_i32, %c0_i32_0 : i32, i32
  }
}

</mosaic_0001>

<bundles_post_ra>
// kernel: convnet_forward.3
= control target key start
LH: loop header
LB: loop body
LE: loop exit
PB: predicated region body
PF: predicated region fallthrough
CT: control target
= control target key end

     0   :  { %s3704_s24 = smov 0   ;;  %s4167_s0 = inlined_call_operand.vmem [shape: bf16[2,4096], index: 0, kind: input, shape index: {}]   ;;  %s4168_s1 = inlined_call_operand.vmem [shape: bf16[4096,512], index: 1, kind: input, shape index: {}]   ;;  %s4169_s2 = inlined_call_operand.vmem [shape: f32[1,512], index: 2, kind: input, shape index: {}]   ;;  %s4170_s3 = inlined_call_operand.vmem [shape: bf16[512,128], index: 3, kind: input, shape index: {}]   ;;  %s4171_s4 = inlined_call_operand.vmem [shape: f32[1,128], index: 4, kind: input, shape index: {}]   ;;  %s4172_s5 = inlined_call_operand.vmem [shape: bf16[128,128], index: 5, kind: input, shape index: {}]   ;;  %s4173_s6 = inlined_call_operand.vmem [shape: f32[1,128], index: 6, kind: input, shape index: {}]   ;;  %s4174_s7 = inlined_call_operand.vmem [shape: f32[2,128], index: 7, kind: output, shape index: {}]  }
   0x1 LB: > { %s3710_s25 = sadd.s32 4294967295, %s3657_s24   ;;  %p2808_p0 = scmp.ge.s32.totalorder %s3657_s24, 1  ;;  %s3657_s24 = sphi %s3704_s24, %s17_s24  }
   0x2   : > { %p244_p1 = scmp.lt.s32.totalorder %s3657_s24, 5 }
   0x4   : > { %p245_p2 = pnand %p2808_p0, %p244_p1 }
   0x5   : > { %s2809_s26 = sshll.u32 (!%p245_p2), %s3710_s25, 3  ;;  %s2810_s27 = sshll.u32 (!%p245_p2), %s3710_s25, 7 }
   0x6   : > { %248 = sbr.rel (%p245_p2) target bundleno = 957 (0x3bd), region = 48  ;;  %p277_p3 = scmp.lt.s32.totalorder (!%p245_p2), %s2809_s26, 31 }
   0x7   : > { %p282_p4 = scmp.lt.s32.totalorder (!%p245_p2), %s2810_s27, 511  ;;  %p2813_p5 = scmp.ne.s32.totalorder (!%p245_p2), %s3710_s25, 0 }
   0xd   : > { %s4176_s26 = smov (!%p277_p3, %s2809_s26), 31  ;;  %s4178_s27 = smov (!%p282_p4, %s2810_s27), 511 }
   0xe   : > { %s279_s30 = scalar_lea.vmem %s4167_s0, %s4176_s26  ;;  %s3115_s8 = sshll.u32 %s4178_s27, 4  ;;  %v3659_v0 = vmov (!%p2813_p5), 0.0  }
   0xf   : > { %s3725_s11 = scalar_lea.vmem %s4168_s1, %s3115_s8  ;;  %292 = sbr.rel (%p2813_p5) target bundleno = 22 (0x16), region = 52  ;;  %293 = vst [vmem:[#allocation2] sm:$0xff] (!%p2813_p5), %v3659_v0 }
  0x16 PF: > { %v3226_v1 = vld [vmem:[%s3725_s11 + $0x4] ss:$16 sps:$4 sm:$0xff]   ;;  %v3228_v2 = vld [vmem:[%s3725_s11 + $0xc] ss:$16 sps:$4 sm:$0xff]   ;;  %v3230_v3 = vld [vmem:[%s3725_s11] ss:$16 sps:$4 sm:$0xff]   ;;  %v557_v39 = vlaneseq }
  0x17   : > { %1890 = vmatprep.subr.bf16.mxu0 %v3226_v1  ;;  %v3231_v4 = vld [vmem:[%s3725_s11 + $0x8] ss:$16 sps:$4 sm:$0xff]   ;;  %2054 = vmatprep.subr.bf16.mxu1 %v3228_v2  ;;  %v3232_v5 = vld [vmem:[%s3725_s11 + $0x24] ss:$16 sps:$4 sm:$0xff]   ;;  %v3234_v6 = vld [vmem:[%s3725_s11 + $0x2c] ss:$16 sps:$4 sm:$0xff]  }
  0x18   : > { %1891 = vmatpush1.bf16.msra.mxu0 %v3230_v3  ;;  %2055 = vmatpush1.bf16.msra.mxu1 %v3231_v4  ;;  %v3236_v7 = vld [vmem:[%s3725_s11 + $0x20] ss:$16 sps:$4 sm:$0xff]   ;;  %v3237_v8 = vld [vmem:[%s3725_s11 + $0x28] ss:$16 sps:$4 sm:$0xff]   ;;  %v3238_v9 = vld [vmem:[%s3725_s11 + $0x44] ss:$16 sps:$4 sm:$0xff]  }
  0x19   : > { %1892 = vmatprep.subr.bf16.mxu0 %v3232_v5  ;;  %2056 = vmatprep.subr.bf16.mxu1 %v3234_v6  ;;  %v3240_v10 = vld [vmem:[%s3725_s11 + $0x4c] ss:$16 sps:$4 sm:$0xff]   ;;  %v3242_v11 = vld [vmem:[%s3725_s11 + $0x40] ss:$16 sps:$4 sm:$0xff]   ;;  %v3243_v12 = vld [vmem:[%s3725_s11 + $0x48] ss:$16 sps:$4 sm:$0xff]  }
  0x1a   : > { %v3244_v13 = vld [vmem:[%s3725_s11 + $0x64] ss:$16 sps:$4 sm:$0xff]   ;;  %v3246_v14 = vld [vmem:[%s3725_s11 + $0x6c] ss:$16 sps:$4 sm:$0xff]   ;;  %v3248_v15 = vld [vmem:[%s3725_s11 + $0x60] ss:$16 sps:$4 sm:$0xff]  }
  0x1b   : > { %v3249_v16 = vld [vmem:[%s3725_s11 + $0x68] ss:$16 sps:$4 sm:$0xff]   ;;  %v3250_v17 = vld [vmem:[%s3725_s11 + $0x84] ss:$16 sps:$4 sm:$0xff]   ;;  %v3252_v18 = vld [vmem:[%s3725_s11 + $0x8c] ss:$16 sps:$4 sm:$0xff]  }
  0x1c   : > { %1893 = vmatpush1.bf16.msra.mxu0 %v3236_v7  ;;  %2057 = vmatpush1.bf16.msra.mxu1 %v3237_v8  ;;  %v3254_v19 = vld [vmem:[%s3725_s11 + $0x80] ss:$16 sps:$4 sm:$0xff]   ;;  %v3255_v20 = vld [vmem:[%s3725_s11 + $0x88] ss:$16 sps:$4 sm:$0xff]   ;;  %v3256_v21 = vld [vmem:[%s3725_s11 + $0xa4] ss:$16 sps:$4 sm:$0xff]  }
  0x1d   : > { %1894 = vmatprep.subr.bf16.mxu0 %v3238_v9  ;;  %2058 = vmatprep.subr.bf16.mxu1 %v3240_v10  ;;  %v3258_v22 = vld [vmem:[%s3725_s11 + $0xac] ss:$16 sps:$4 sm:$0xff]   ;;  %v3260_v23 = vld [vmem:[%s3725_s11 + $0xa0] ss:$16 sps:$4 sm:$0xff]   ;;  %v3261_v24 = vld [vmem:[%s3725_s11 + $0xa8] ss:$16 sps:$4 sm:$0xff]  }
  0x1e   : > { %v3262_v25 = vld [vmem:[%s3725_s11 + $0xc4] ss:$16 sps:$4 sm:$0xff]   ;;  %v3264_v26 = vld [vmem:[%s3725_s11 + $0xcc] ss:$16 sps:$4 sm:$0xff]   ;;  %v3266_v27 = vld [vmem:[%s3725_s11 + $0xc0] ss:$16 sps:$4 sm:$0xff]  }
  0x1f   : > { %v3267_v28 = vld [vmem:[%s3725_s11 + $0xc8] ss:$16 sps:$4 sm:$0xff]   ;;  %v3268_v29 = vld [vmem:[%s3725_s11 + $0xe4] ss:$16 sps:$4 sm:$0xff]   ;;  %v3270_v30 = vld [vmem:[%s3725_s11 + $0xec] ss:$16 sps:$4 sm:$0xff]  }
  0x20   : > { %1895 = vmatpush1.bf16.msra.mxu0 %v3242_v11  ;;  %2059 = vmatpush1.bf16.msra.mxu1 %v3243_v12  ;;  %v3272_v31 = vld [vmem:[%s3725_s11 + $0xe0] ss:$16 sps:$4 sm:$0xff]   ;;  %v3273_v32 = vld [vmem:[%s3725_s11 + $0xe8] ss:$16 sps:$4 sm:$0xff]   ;;  %v3274_v33 = vld [vmem:[%s3725_s11 + $0x104] ss:$16 sps:$4 sm:$0xff]  }
  0x21   : > { %1896 = vmatprep.subr.bf16.mxu0 %v3244_v13  ;;  %2060 = vmatprep.subr.bf16.mxu1 %v3246_v14  ;;  %v3276_v34 = vld [vmem:[%s3725_s11 + $0x10c] ss:$16 sps:$4 sm:$0xff]   ;;  %v3278_v35 = vld [vmem:[%s3725_s11 + $0x100] ss:$16 sps:$4 sm:$0xff]   ;;  %v3279_v36 = vld [vmem:[%s3725_s11 + $0x108] ss:$16 sps:$4 sm:$0xff]  }
  0x22   : > { %v3660_v37 = vmov 1966171168   ;;  %v3280_v40 = vld [vmem:[%s3725_s11 + $0x124] ss:$16 sps:$4 sm:$0xff]   ;;  %v3282_v41 = vld [vmem:[%s3725_s11 + $0x12c] ss:$16 sps:$4 sm:$0xff]  }
  0x23   : > { %v555_v38 = vunpack.c.l.s4 %v3660_v37  ;;  %v3284_v42 = vld [vmem:[%s3725_s11 + $0x120] ss:$16 sps:$4 sm:$0xff]   ;;  %v3767_v44 = vshrl.u32 %v557_v39, 7  ;;  %v3285_v45 = vld [vmem:[%s3725_s11 + $0x128] ss:$16 sps:$4 sm:$0xff]   ;;  %p3070_p6 = scmp.ne.s32.totalorder %s3710_s25, 3 }
  0x24   : > { %1897 = vmatpush1.bf16.msra.mxu0 %v3248_v15  ;;  %2061 = vmatpush1.bf16.msra.mxu1 %v3249_v16  ;;  %v3286_v46 = vld [vmem:[%s3725_s11 + $0x144] ss:$16 sps:$4 sm:$0xff]   ;;  %v3288_v47 = vld [vmem:[%s3725_s11 + $0x14c] ss:$16 sps:$4 sm:$0xff]   ;;  %v3290_v48 = vld [vmem:[%s3725_s11 + $0x140] ss:$16 sps:$4 sm:$0xff]  }
  0x25   : > { %1898 = vmatprep.subr.bf16.mxu0 %v3250_v17  ;;  %2062 = vmatprep.subr.bf16.mxu1 %v3252_v18  ;;  %v556_v43 = vunpack.c.0.s8 %v555_v38  ;;  %v3291_v49 = vld [vmem:[%s3725_s11 + $0x148] ss:$16 sps:$4 sm:$0xff]   ;;  %v3292_v51 = vld [vmem:[%s3725_s11 + $0x164] ss:$16 sps:$4 sm:$0xff]   ;;  %v3294_v52 = vld [vmem:[%s3725_s11 + $0x16c] ss:$16 sps:$4 sm:$0xff]  }
  0x26   : > { %v295_v53 = vld [vmem:[%s279_s30] sm:$0xff]  ;;  %v3297_v56 = vld [vmem:[%s3725_s11 + $0x168] ss:$16 sps:$4 sm:$0xff]   ;;  %v3300_v58 = vld [vmem:[%s3725_s11 + $0x18c] ss:$16 sps:$4 sm:$0xff]   ;;  %vm3663_vm0 = vmmov (!%p3070_p6), 0  }
  0x27   : > { %v3775_v50 = vsub.s32 %v556_v43, %v3767_v44  ;;  %v3296_v54 = vld [vmem:[%s3725_s11 + $0x160] ss:$16 sps:$4 sm:$0xff]   ;;  %v3298_v57 = vld [vmem:[%s3725_s11 + $0x184] ss:$16 sps:$4 sm:$0xff]   ;;  %v3303_v62 = vld [vmem:[%s3725_s11 + $0x188] ss:$16 sps:$4 sm:$0xff]   ;;  %v553_v10 = vcombine.high %v295_v53, %v295_v53 }
  0x28   : > { %1899 = vmatpush1.bf16.msra.mxu0 %v3254_v19  ;;  %2063 = vmatpush1.bf16.msra.mxu1 %v3255_v20  ;;  %v3302_v60 = vld [vmem:[%s3725_s11 + $0x180] ss:$16 sps:$4 sm:$0xff]   ;;  %v3304_v63 = vld [vmem:[%s3725_s11 + $0x1a4] ss:$16 sps:$4 sm:$0xff]   ;;  %v3306_v0 = vld [vmem:[%s3725_s11 + $0x1ac] ss:$16 sps:$4 sm:$0xff]  }
  0x29   : > { %1900 = vmatprep.subr.bf16.mxu0 %v3256_v21  ;;  %2064 = vmatprep.subr.bf16.mxu1 %v3258_v22  ;;  %v560_v55 = vrot.slane %v295_v53, %v3775_v50  ;;  %v3308_v1 = vld [vmem:[%s3725_s11 + $0x1a0] ss:$16 sps:$4 sm:$0xff]   ;;  %v3309_v2 = vld [vmem:[%s3725_s11 + $0x1a8] ss:$16 sps:$4 sm:$0xff]   ;;  %v3310_v3 = vld [vmem:[%s3725_s11 + $0x1c4] ss:$16 sps:$4 sm:$0xff]   ;;  %v567_v14 = vrot.slane %v553_v10, %v3775_v50 }
  0x2a   : > { %v3312_v4 = vld [vmem:[%s3725_s11 + $0x1cc] ss:$16 sps:$4 sm:$0xff]   ;;  %v3314_v5 = vld [vmem:[%s3725_s11 + $0x1c0] ss:$16 sps:$4 sm:$0xff]   ;;  %v3315_v6 = vld [vmem:[%s3725_s11 + $0x1c8] ss:$16 sps:$4 sm:$0xff]  }
  0x2b   : > { %v568_v59 = vcombine.high %v560_v55, %v560_v55  ;;  %v3316_v7 = vld [vmem:[%s3725_s11 + $0x1e4] ss:$16 sps:$4 sm:$0xff]   ;;  %v3318_v8 = vld [vmem:[%s3725_s11 + $0x1ec] ss:$16 sps:$4 sm:$0xff]   ;;  %v3320_v9 = vld [vmem:[%s3725_s11 + $0x1e0] ss:$16 sps:$4 sm:$0xff]   ;;  %v3809_v16 = vrot.slane %v560_v55, %v3775_v50  ;;  %v569_v17 = vcombine.high %v567_v14, %v567_v14  ;;  %v3818_v22 = vrot.slane %v567_v14, %v3775_v50 }
  0x2c   : > { %1901 = vmatpush1.bf16.msra.mxu0 %v3260_v23  ;;  %2065 = vmatpush1.bf16.msra.mxu1 %v3261_v24  ;;  %v3321_v11 = vld [vmem:[%s3725_s11 + $0x1e8] ss:$16 sps:$4 sm:$0xff]   ;;  %v3324_v12 = vld [vmem:[%s3725_s11 + $0x204] ss:$16 sps:$4 sm:$0xff]   ;;  %v3327_v13 = vld [vmem:[%s3725_s11 + $0x20c] ss:$16 sps:$4 sm:$0xff]  }
  0x2d   : > { %1902 = vmatprep.subr.bf16.mxu0 %v3262_v25  ;;  %2066 = vmatprep.subr.bf16.mxu1 %v3264_v26  ;;  %v590_v61 = vrot.slane %v568_v59, %v3775_v50  ;;  %v3322_v15 = vld [vmem:[%s3725_s11 + $0x200] ss:$16 sps:$4 sm:$0xff]   ;;  %v3325_v18 = vld [vmem:[%s3725_s11 + $0x208] ss:$16 sps:$4 sm:$0xff]   ;;  %v3330_v19 = vld [vmem:[%s3725_s11 + $0x224] ss:$16 sps:$4 sm:$0xff]   ;;  %v3815_v21 = vrot.slane %v569_v17, %v3775_v50 }
  0x2e   : > { %v3333_v20 = vld [vmem:[%s3725_s11 + $0x22c] ss:$16 sps:$4 sm:$0xff]   ;;  %v3328_v24 = vld [vmem:[%s3725_s11 + $0x220] ss:$16 sps:$4 sm:$0xff]   ;;  %v3331_v25 = vld [vmem:[%s3725_s11 + $0x228] ss:$16 sps:$4 sm:$0xff]  }
  0x2f   : > { %1922 = vmatprep.mubr.bf16.mxu0 %v590_v61  ;;  %2086 = vmatprep.mubr.bf16.mxu1 %v590_v61  ;;  %v600_v23 = vcombine.high %v590_v61, %v590_v61  ;;  %v3336_v26 = vld [vmem:[%s3725_s11 + $0x244] ss:$16 sps:$4 sm:$0xff]   ;;  %v3349_v37 = vld [vmem:[%s3725_s11 + $0x288] ss:$16 sps:$4 sm:$0xff]   ;;  %v3357_v39 = vld [vmem:[%s3725_s11 + $0x2ac] ss:$16 sps:$4 sm:$0xff]  }
  0x30   : > { %1903 = vmatpush1.bf16.msra.mxu0 %v3266_v27  ;;  %2067 = vmatpush1.bf16.msra.mxu1 %v3267_v28  ;;  %v3339_v27 = vld [vmem:[%s3725_s11 + $0x24c] ss:$16 sps:$4 sm:$0xff]   ;;  %v3334_v28 = vld [vmem:[%s3725_s11 + $0x240] ss:$16 sps:$4 sm:$0xff]   ;;  %v3354_v38 = vld [vmem:[%s3725_s11 + $0x2a4] ss:$16 sps:$4 sm:$0xff]  }
  0x31   : > { %1904 = vmatprep.subr.bf16.mxu0 %v3268_v29  ;;  %2068 = vmatprep.subr.bf16.mxu1 %v3270_v30  ;;  %v3337_v29 = vld [vmem:[%s3725_s11 + $0x248] ss:$16 sps:$4 sm:$0xff]   ;;  %v3342_v30 = vld [vmem:[%s3725_s11 + $0x264] ss:$16 sps:$4 sm:$0xff]   ;;  %v3363_v43 = vld [vmem:[%s3725_s11 + $0x2cc] ss:$16 sps:$4 sm:$0xff]  }
  0x32   : > { %v3367_v50 = vld [vmem:[%s3725_s11 + $0x2e8] ss:$16 sps:$4 sm:$0xff]   ;;  %v3370_v53 = vld [vmem:[%s3725_s11 + $0x300] ss:$16 sps:$4 sm:$0xff]   ;;  %v3378_v55 = vld [vmem:[%s3725_s11 + $0x324] ss:$16 sps:$4 sm:$0xff]  }
  0x33   : > { %v3384_v59 = vld [vmem:[%s3725_s11 + $0x344] ss:$16 sps:$4 sm:$0xff]   ;;  %v3382_v61 = vld [vmem:[%s3725_s11 + $0x340] ss:$16 sps:$4 sm:$0xff]   ;;  %v3403_v10 = vld [vmem:[%s3725_s11 + $0x3a8] ss:$16 sps:$4 sm:$0xff]  }
  0x34   : > { %1905 = vmatpush1.bf16.msra.mxu0 %v3272_v31  ;;  %2069 = vmatpush1.bf16.msra.mxu1 %v3273_v32  ;;  %v3345_v31 = vld [vmem:[%s3725_s11 + $0x26c] ss:$16 sps:$4 sm:$0xff]   ;;  %v3340_v32 = vld [vmem:[%s3725_s11 + $0x260] ss:$16 sps:$4 sm:$0xff]   ;;  %v3409_v14 = vld [vmem:[%s3725_s11 + $0x3c8] ss:$16 sps:$4 sm:$0xff]  }
  0x35   : > { %1906 = vmatprep.subr.bf16.mxu0 %v3274_v33  ;;  %2070 = vmatprep.subr.bf16.mxu1 %v3276_v34  ;;  %v3343_v33 = vld [vmem:[%s3725_s11 + $0x268] ss:$16 sps:$4 sm:$0xff]   ;;  %v3348_v34 = vld [vmem:[%s3725_s11 + $0x284] ss:$16 sps:$4 sm:$0xff]   ;;  %v3417_v17 = vld [vmem:[%s3725_s11 + $0x3ec] ss:$16 sps:$4 sm:$0xff]  }
  0x38   : > { %1907 = vmatpush1.bf16.msra.mxu0 %v3278_v35  ;;  %2071 = vmatpush1.bf16.msra.mxu1 %v3279_v36  ;;  %v3351_v35 = vld [vmem:[%s3725_s11 + $0x28c] ss:$16 sps:$4 sm:$0xff]   ;;  %v3346_v36 = vld [vmem:[%s3725_s11 + $0x280] ss:$16 sps:$4 sm:$0xff]  }
  0x39   : > { %1908 = vmatprep.subr.bf16.mxu0 %v3280_v40  ;;  %2072 = vmatprep.subr.bf16.mxu1 %v3282_v41  ;;  %v3352_v40 = vld [vmem:[%s3725_s11 + $0x2a0] ss:$16 sps:$4 sm:$0xff]   ;;  %v3355_v41 = vld [vmem:[%s3725_s11 + $0x2a8] ss:$16 sps:$4 sm:$0xff]  }
  0x3c   : > { %1909 = vmatpush1.bf16.msra.mxu0 %v3284_v42  ;;  %2073 = vmatpush1.bf16.msra.mxu1 %v3285_v45  ;;  %v3360_v42 = vld [vmem:[%s3725_s11 + $0x2c4] ss:$16 sps:$4 sm:$0xff]   ;;  %v3358_v45 = vld [vmem:[%s3725_s11 + $0x2c0] ss:$16 sps:$4 sm:$0xff]  }
  0x3d   : > { %1910 = vmatprep.subr.bf16.mxu0 %v3286_v46  ;;  %2074 = vmatprep.subr.bf16.mxu1 %v3288_v47  ;;  %v3361_v46 = vld [vmem:[%s3725_s11 + $0x2c8] ss:$16 sps:$4 sm:$0xff]   ;;  %v3366_v47 = vld [vmem:[%s3725_s11 + $0x2e4] ss:$16 sps:$4 sm:$0xff]  }
  0x40   : > { %1911 = vmatpush1.bf16.msra.mxu0 %v3290_v48  ;;  %2075 = vmatpush1.bf16.msra.mxu1 %v3291_v49  ;;  %v3369_v48 = vld [vmem:[%s3725_s11 + $0x2ec] ss:$16 sps:$4 sm:$0xff]   ;;  %v3364_v49 = vld [vmem:[%s3725_s11 + $0x2e0] ss:$16 sps:$4 sm:$0xff]  }
  0x41   : > { %1912 = vmatprep.subr.bf16.mxu0 %v3292_v51  ;;  %2076 = vmatprep.subr.bf16.mxu1 %v3294_v52  ;;  %v3372_v51 = vld [vmem:[%s3725_s11 + $0x304] ss:$16 sps:$4 sm:$0xff]   ;;  %v3375_v52 = vld [vmem:[%s3725_s11 + $0x30c] ss:$16 sps:$4 sm:$0xff]  }
  0x44   : > { %1913 = vmatpush1.bf16.msra.mxu0 %v3296_v54  ;;  %2077 = vmatpush1.bf16.msra.mxu1 %v3297_v56  ;;  %v3373_v54 = vld [vmem:[%s3725_s11 + $0x308] ss:$16 sps:$4 sm:$0xff]   ;;  %v3381_v56 = vld [vmem:[%s3725_s11 + $0x32c] ss:$16 sps:$4 sm:$0xff]  }
  0x45   : > { %1914 = vmatprep.subr.bf16.mxu0 %v3298_v57  ;;  %2078 = vmatprep.subr.bf16.mxu1 %v3300_v58  ;;  %v3376_v57 = vld [vmem:[%s3725_s11 + $0x320] ss:$16 sps:$4 sm:$0xff]   ;;  %v3379_v58 = vld [vmem:[%s3725_s11 + $0x328] ss:$16 sps:$4 sm:$0xff]  }
  0x48   : > { %1915 = vmatpush1.bf16.msra.mxu0 %v3302_v60  ;;  %2079 = vmatpush1.bf16.msra.mxu1 %v3303_v62  ;;  %v3387_v60 = vld [vmem:[%s3725_s11 + $0x34c] ss:$16 sps:$4 sm:$0xff]   ;;  %v3385_v62 = vld [vmem:[%s3725_s11 + $0x348] ss:$16 sps:$4 sm:$0xff]  }
  0x49   : > { %1916 = vmatprep.subr.bf16.mxu0 %v3304_v63  ;;  %2080 = vmatprep.subr.bf16.mxu1 %v3306_v0  ;;  %v3390_v63 = vld [vmem:[%s3725_s11 + $0x364] ss:$16 sps:$4 sm:$0xff]   ;;  %v3393_v0 = vld [vmem:[%s3725_s11 + $0x36c] ss:$16 sps:$4 sm:$0xff]  }
  0x4c   : > { %1917 = vmatpush1.bf16.msra.mxu0 %v3308_v1  ;;  %2081 = vmatpush1.bf16.msra.mxu1 %v3309_v2  ;;  %v3388_v1 = vld [vmem:[%s3725_s11 + $0x360] ss:$16 sps:$4 sm:$0xff]   ;;  %v3391_v2 = vld [vmem:[%s3725_s11 + $0x368] ss:$16 sps:$4 sm:$0xff]  }
  0x4d   : > { %1918 = vmatprep.subr.bf16.mxu0 %v3310_v3  ;;  %2082 = vmatprep.subr.bf16.mxu1 %v3312_v4  ;;  %v3396_v3 = vld [vmem:[%s3725_s11 + $0x384] ss:$16 sps:$4 sm:$0xff]   ;;  %v3399_v4 = vld [vmem:[%s3725_s11 + $0x38c] ss:$16 sps:$4 sm:$0xff]  }
  0x50   : > { %1919 = vmatpush1.bf16.msra.mxu0 %v3314_v5  ;;  %2083 = vmatpush1.bf16.msra.mxu1 %v3315_v6  ;;  %v3394_v5 = vld [vmem:[%s3725_s11 + $0x380] ss:$16 sps:$4 sm:$0xff]   ;;  %v3397_v6 = vld [vmem:[%s3725_s11 + $0x388] ss:$16 sps:$4 sm:$0xff]  }
  0x51   : > { %1920 = vmatprep.subr.bf16.mxu0 %v3316_v7  ;;  %2084 = vmatprep.subr.bf16.mxu1 %v3318_v8  ;;  %v3402_v7 = vld [vmem:[%s3725_s11 + $0x3a4] ss:$16 sps:$4 sm:$0xff]   ;;  %v3405_v8 = vld [vmem:[%s3725_s11 + $0x3ac] ss:$16 sps:$4 sm:$0xff]  }
  0x54   : > { %1921 = vmatpush1.bf16.msra.mxu0 %v3320_v9  ;;  %2085 = vmatpush1.bf16.msra.mxu1 %v3321_v11  ;;  %v3400_v9 = vld [vmem:[%s3725_s11 + $0x3a0] ss:$16 sps:$4 sm:$0xff]   ;;  %v3408_v11 = vld [vmem:[%s3725_s11 + $0x3c4] ss:$16 sps:$4 sm:$0xff]  }
  0x55   : > { %1931 = vmatprep.subr.bf16.mxu0 %v3324_v12  ;;  %2095 = vmatprep.subr.bf16.mxu1 %v3327_v13  ;;  %v3411_v12 = vld [vmem:[%s3725_s11 + $0x3cc] ss:$16 sps:$4 sm:$0xff]   ;;  %v3406_v13 = vld [vmem:[%s3725_s11 + $0x3c0] ss:$16 sps:$4 sm:$0xff]  }
  0x57   : > { %1923 = vmatmul.mubr.bf16.vlgmr.msra.gmra.mrb[0].mxu0 %v3809_v16  ;;  %2087 = vmatmul.mubr.bf16.vlgmr.msra.gmra.mrb[0].mxu1 %v3809_v16 }
  0x58   : > { %1932 = vmatpush1.bf16.msra.mxu0 %v3322_v15  ;;  %2096 = vmatpush1.bf16.msra.mxu1 %v3325_v18  ;;  %v3414_v15 = vld [vmem:[%s3725_s11 + $0x3e4] ss:$16 sps:$4 sm:$0xff]   ;;  %v3412_v18 = vld [vmem:[%s3725_s11 + $0x3e0] ss:$16 sps:$4 sm:$0xff]  }
  0x59   : > { %1933 = vmatprep.subr.bf16.mxu0 %v3330_v19  ;;  %2097 = vmatprep.subr.bf16.mxu1 %v3333_v20  ;;  %v3415_v19 = vld [vmem:[%s3725_s11 + $0x3e8] ss:$16 sps:$4 sm:$0xff]   ;;  %v3420_v20 = vld [vmem:[%s3725_s11 + $0x404] ss:$16 sps:$4 sm:$0xff]  }
  0x5a   : > { %1963 = vmatprep.mubr.bf16.mxu0 %v600_v23  ;;  %2127 = vmatprep.mubr.bf16.mxu1 %v600_v23  ;;  %v3423_v23 = vld [vmem:[%s3725_s11 + $0x40c] ss:$16 sps:$4 sm:$0xff]  }
  0x5c   : > { %1934 = vmatpush1.bf16.msra.mxu0 %v3328_v24  ;;  %2098 = vmatpush1.bf16.msra.mxu1 %v3331_v25  ;;  %v3418_v24 = vld [vmem:[%s3725_s11 + $0x400] ss:$16 sps:$4 sm:$0xff]   ;;  %v598_v25 = vcombine.high %v3809_v16, %v3809_v16  ;;  %v3427_v16 = vld [vmem:[%s3725_s11 + $0x428] ss:$16 sps:$4 sm:$0xff]  }
  0x5d   : > { %1935 = vmatprep.subr.bf16.mxu0 %v3336_v26  ;;  %2099 = vmatprep.subr.bf16.mxu1 %v3339_v27  ;;  %v3421_v26 = vld [vmem:[%s3725_s11 + $0x408] ss:$16 sps:$4 sm:$0xff]   ;;  %v3426_v27 = vld [vmem:[%s3725_s11 + $0x424] ss:$16 sps:$4 sm:$0xff]  }
  0x60   : > { %1936 = vmatpush1.bf16.msra.mxu0 %v3334_v28  ;;  %2100 = vmatpush1.bf16.msra.mxu1 %v3337_v29  ;;  %v3429_v28 = vld [vmem:[%s3725_s11 + $0x42c] ss:$16 sps:$4 sm:$0xff]   ;;  %v3424_v29 = vld [vmem:[%s3725_s11 + $0x420] ss:$16 sps:$4 sm:$0xff]  }
  0x61   : > { %1937 = vmatprep.subr.bf16.mxu0 %v3342_v30  ;;  %2101 = vmatprep.subr.bf16.mxu1 %v3345_v31  ;;  %v3432_v30 = vld [vmem:[%s3725_s11 + $0x444] ss:$16 sps:$4 sm:$0xff]   ;;  %v3435_v31 = vld [vmem:[%s3725_s11 + $0x44c] ss:$16 sps:$4 sm:$0xff]  }
  0x64   : > { %1938 = vmatpush1.bf16.msra.mxu0 %v3340_v32  ;;  %2102 = vmatpush1.bf16.msra.mxu1 %v3343_v33  ;;  %v3430_v32 = vld [vmem:[%s3725_s11 + $0x440] ss:$16 sps:$4 sm:$0xff]   ;;  %v3433_v33 = vld [vmem:[%s3725_s11 + $0x448] ss:$16 sps:$4 sm:$0xff]  }
  0x65   : > { %1939 = vmatprep.subr.bf16.mxu0 %v3348_v34  ;;  %2103 = vmatprep.subr.bf16.mxu1 %v3351_v35  ;;  %v3438_v34 = vld [vmem:[%s3725_s11 + $0x464] ss:$16 sps:$4 sm:$0xff]   ;;  %v3441_v35 = vld [vmem:[%s3725_s11 + $0x46c] ss:$16 sps:$4 sm:$0xff]  }
  0x68   : > { %1940 = vmatpush1.bf16.msra.mxu0 %v3346_v36  ;;  %2104 = vmatpush1.bf16.msra.mxu1 %v3349_v37  ;;  %v3436_v36 = vld [vmem:[%s3725_s11 + $0x460] ss:$16 sps:$4 sm:$0xff]   ;;  %v3439_v37 = vld [vmem:[%s3725_s11 + $0x468] ss:$16 sps:$4 sm:$0xff]  }
  0x69   : > { %1941 = vmatprep.subr.bf16.mxu0 %v3354_v38  ;;  %2105 = vmatprep.subr.bf16.mxu1 %v3357_v39  ;;  %v3444_v38 = vld [vmem:[%s3725_s11 + $0x484] ss:$16 sps:$4 sm:$0xff]   ;;  %v3447_v39 = vld [vmem:[%s3725_s11 + $0x48c] ss:$16 sps:$4 sm:$0xff]  }
  0x6c   : > { %1942 = vmatpush1.bf16.msra.mxu0 %v3352_v40  ;;  %2106 = vmatpush1.bf16.msra.mxu1 %v3355_v41  ;;  %v3442_v40 = vld [vmem:[%s3725_s11 + $0x480] ss:$16 sps:$4 sm:$0xff]   ;;  %v3445_v41 = vld [vmem:[%s3725_s11 + $0x488] ss:$16 sps:$4 sm:$0xff]  }
  0x6d   : > { %1943 = vmatprep.subr.bf16.mxu0 %v3360_v42  ;;  %2107 = vmatprep.subr.bf16.mxu1 %v3363_v43  ;;  %v3450_v42 = vld [vmem:[%s3725_s11 + $0x4a4] ss:$16 sps:$4 sm:$0xff]   ;;  %v3453_v43 = vld [vmem:[%s3725_s11 + $0x4ac] ss:$16 sps:$4 sm:$0xff]  }
  0x70   : > { %1944 = vmatpush1.bf16.msra.mxu0 %v3358_v45  ;;  %2108 = vmatpush1.bf16.msra.mxu1 %v3361_v46  ;;  %v3448_v45 = vld [vmem:[%s3725_s11 + $0x4a0] ss:$16 sps:$4 sm:$0xff]   ;;  %v3451_v46 = vld [vmem:[%s3725_s11 + $0x4a8] ss:$16 sps:$4 sm:$0xff]  }
  0x71   : > { %1945 = vmatprep.subr.bf16.mxu0 %v3366_v47  ;;  %2109 = vmatprep.subr.bf16.mxu1 %v3369_v48  ;;  %v3456_v47 = vld [vmem:[%s3725_s11 + $0x4c4] ss:$16 sps:$4 sm:$0xff]   ;;  %v3459_v48 = vld [vmem:[%s3725_s11 + $0x4cc] ss:$16 sps:$4 sm:$0xff]  }
  0x74   : > { %1946 = vmatpush1.bf16.msra.mxu0 %v3364_v49  ;;  %2110 = vmatpush1.bf16.msra.mxu1 %v3367_v50  ;;  %v3454_v49 = vld [vmem:[%s3725_s11 + $0x4c0] ss:$16 sps:$4 sm:$0xff]   ;;  %v3457_v50 = vld [vmem:[%s3725_s11 + $0x4c8] ss:$16 sps:$4 sm:$0xff]  }
  0x75   : > { %1947 = vmatprep.subr.bf16.mxu0 %v3372_v51  ;;  %2111 = vmatprep.subr.bf16.mxu1 %v3375_v52  ;;  %v3462_v51 = vld [vmem:[%s3725_s11 + $0x4e4] ss:$16 sps:$4 sm:$0xff]   ;;  %v3465_v52 = vld [vmem:[%s3725_s11 + $0x4ec] ss:$16 sps:$4 sm:$0xff]  }
  0x78   : > { %1948 = vmatpush1.bf16.msra.mxu0 %v3370_v53  ;;  %2112 = vmatpush1.bf16.msra.mxu1 %v3373_v54  ;;  %v3460_v53 = vld [vmem:[%s3725_s11 + $0x4e0] ss:$16 sps:$4 sm:$0xff]   ;;  %v3463_v54 = vld [vmem:[%s3725_s11 + $0x4e8] ss:$16 sps:$4 sm:$0xff]  }
  0x79   : > { %1949 = vmatprep.subr.bf16.mxu0 %v3378_v55  ;;  %2113 = vmatprep.subr.bf16.mxu1 %v3381_v56  ;;  %v3468_v55 = vld [vmem:[%s3725_s11 + $0x504] ss:$16 sps:$4 sm:$0xff]   ;;  %v3471_v56 = vld [vmem:[%s3725_s11 + $0x50c] ss:$16 sps:$4 sm:$0xff]  }
  0x7c   : > { %1950 = vmatpush1.bf16.msra.mxu0 %v3376_v57  ;;  %2114 = vmatpush1.bf16.msra.mxu1 %v3379_v58  ;;  %v3466_v57 = vld [vmem:[%s3725_s11 + $0x500] ss:$16 sps:$4 sm:$0xff]   ;;  %v3469_v58 = vld [vmem:[%s3725_s11 + $0x508] ss:$16 sps:$4 sm:$0xff]  }
  0x7d   : > { %1951 = vmatprep.subr.bf16.mxu0 %v3384_v59  ;;  %2115 = vmatprep.subr.bf16.mxu1 %v3387_v60  ;;  %v3474_v59 = vld [vmem:[%s3725_s11 + $0x524] ss:$16 sps:$4 sm:$0xff]   ;;  %v3477_v60 = vld [vmem:[%s3725_s11 + $0x52c] ss:$16 sps:$4 sm:$0xff]  }
  0x80   : > { %1952 = vmatpush1.bf16.msra.mxu0 %v3382_v61  ;;  %2116 = vmatpush1.bf16.msra.mxu1 %v3385_v62  ;;  %v3472_v61 = vld [vmem:[%s3725_s11 + $0x520] ss:$16 sps:$4 sm:$0xff]   ;;  %v3475_v62 = vld [vmem:[%s3725_s11 + $0x528] ss:$16 sps:$4 sm:$0xff]  }
  0x81   : > { %1953 = vmatprep.subr.bf16.mxu0 %v3390_v63  ;;  %2117 = vmatprep.subr.bf16.mxu1 %v3393_v0  ;;  %v3480_v63 = vld [vmem:[%s3725_s11 + $0x544] ss:$16 sps:$4 sm:$0xff]   ;;  %v3483_v0 = vld [vmem:[%s3725_s11 + $0x54c] ss:$16 sps:$4 sm:$0xff]  }
  0x84   : > { %1954 = vmatpush1.bf16.msra.mxu0 %v3388_v1  ;;  %2118 = vmatpush1.bf16.msra.mxu1 %v3391_v2  ;;  %v3478_v1 = vld [vmem:[%s3725_s11 + $0x540] ss:$16 sps:$4 sm:$0xff]   ;;  %v3481_v2 = vld [vmem:[%s3725_s11 + $0x548] ss:$16 sps:$4 sm:$0xff]  }
  0x85   : > { %1955 = vmatprep.subr.bf16.mxu0 %v3396_v3  ;;  %2119 = vmatprep.subr.bf16.mxu1 %v3399_v4  ;;  %v3486_v3 = vld [vmem:[%s3725_s11 + $0x564] ss:$16 sps:$4 sm:$0xff]   ;;  %v3489_v4 = vld [vmem:[%s3725_s11 + $0x56c] ss:$16 sps:$4 sm:$0xff]  }
  0x88   : > { %1956 = vmatpush1.bf16.msra.mxu0 %v3394_v5  ;;  %2120 = vmatpush1.bf16.msra.mxu1 %v3397_v6  ;;  %v3484_v5 = vld [vmem:[%s3725_s11 + $0x560] ss:$16 sps:$4 sm:$0xff]   ;;  %v3487_v6 = vld [vmem:[%s3725_s11 + $0x568] ss:$16 sps:$4 sm:$0xff]  }
  0x89   : > { %1957 = vmatprep.subr.bf16.mxu0 %v3402_v7  ;;  %2121 = vmatprep.subr.bf16.mxu1 %v3405_v8  ;;  %v3492_v7 = vld [vmem:[%s3725_s11 + $0x584] ss:$16 sps:$4 sm:$0xff]   ;;  %v3495_v8 = vld [vmem:[%s3725_s11 + $0x58c] ss:$16 sps:$4 sm:$0xff]  }
  0x8c   : > { %1958 = vmatpush1.bf16.msra.mxu0 %v3400_v9  ;;  %2122 = vmatpush1.bf16.msra.mxu1 %v3403_v10  ;;  %v3490_v9 = vld [vmem:[%s3725_s11 + $0x580] ss:$16 sps:$4 sm:$0xff]   ;;  %v3493_v10 = vld [vmem:[%s3725_s11 + $0x588] ss:$16 sps:$4 sm:$0xff]  }
  0x8d   : > { %1959 = vmatprep.subr.bf16.mxu0 %v3408_v11  ;;  %2123 = vmatprep.subr.bf16.mxu1 %v3411_v12  ;;  %v3498_v11 = vld [vmem:[%s3725_s11 + $0x5a4] ss:$16 sps:$4 sm:$0xff]   ;;  %v3501_v12 = vld [vmem:[%s3725_s11 + $0x5ac] ss:$16 sps:$4 sm:$0xff]  }
  0x90   : > { %1960 = vmatpush1.bf16.msra.mxu0 %v3406_v13  ;;  %2124 = vmatpush1.bf16.msra.mxu1 %v3409_v14  ;;  %v3496_v13 = vld [vmem:[%s3725_s11 + $0x5a0] ss:$16 sps:$4 sm:$0xff]   ;;  %v3499_v14 = vld [vmem:[%s3725_s11 + $0x5a8] ss:$16 sps:$4 sm:$0xff]  }
  0x91   : > { %1961 = vmatprep.subr.bf16.mxu0 %v3414_v15  ;;  %2125 = vmatprep.subr.bf16.mxu1 %v3417_v17  ;;  %v3504_v15 = vld [vmem:[%s3725_s11 + $0x5c4] ss:$16 sps:$4 sm:$0xff]   ;;  %v3507_v17 = vld [vmem:[%s3725_s11 + $0x5cc] ss:$16 sps:$4 sm:$0xff]  }
  0x94   : > { %1962 = vmatpush1.bf16.msra.mxu0 %v3412_v18  ;;  %2126 = vmatpush1.bf16.msra.mxu1 %v3415_v19  ;;  %v3502_v18 = vld [vmem:[%s3725_s11 + $0x5c0] ss:$16 sps:$4 sm:$0xff]   ;;  %v3505_v19 = vld [vmem:[%s3725_s11 + $0x5c8] ss:$16 sps:$4 sm:$0xff]  }
  0x95   : > { %1972 = vmatprep.subr.bf16.mxu0 %v3420_v20  ;;  %2136 = vmatprep.subr.bf16.mxu1 %v3423_v23  ;;  %v3510_v20 = vld [vmem:[%s3725_s11 + $0x5e4] ss:$16 sps:$4 sm:$0xff]   ;;  %v3513_v23 = vld [vmem:[%s3725_s11 + $0x5ec] ss:$16 sps:$4 sm:$0xff]  }
  0x97   : > { %1964 = vmatmul.mubr.bf16.vlgmr.msra.gmra.mrb[0].mxu0 %v598_v25  ;;  %2128 = vmatmul.mubr.bf16.vlgmr.msra.gmra.mrb[0].mxu1 %v598_v25  ;;  %v3511_v25 = vld [vmem:[%s3725_s11 + $0x5e8] ss:$16 sps:$4 sm:$0xff]  }
  0x98   : > { %1973 = vmatpush1.bf16.msra.mxu0 %v3418_v24  ;;  %2137 = vmatpush1.bf16.msra.mxu1 %v3421_v26  ;;  %v3508_v24 = vld [vmem:[%s3725_s11 + $0x5e0] ss:$16 sps:$4 sm:$0xff]   ;;  %v3517_v26 = vld [vmem:[%s3725_s11 + $0x604] ss:$16 sps:$4 sm:$0xff]  }
  0x99   : > { %1974 = vmatprep.subr.bf16.mxu0 %v3426_v27  ;;  %2138 = vmatprep.subr.bf16.mxu1 %v3429_v28  ;;  %v3520_v27 = vld [vmem:[%s3725_s11 + $0x60c] ss:$16 sps:$4 sm:$0xff]   ;;  %v3515_v28 = vld [vmem:[%s3725_s11 + $0x600] ss:$16 sps:$4 sm:$0xff]  }
  0x9a   : > { %2004 = vmatprep.mubr.bf16.mxu0 %v3815_v21  ;;  %2168 = vmatprep.mubr.bf16.mxu1 %v3815_v21 }
  0x9c   : > { %1975 = vmatpush1.bf16.msra.mxu0 %v3424_v29  ;;  %2139 = vmatpush1.bf16.msra.mxu1 %v3427_v16  ;;  %v3518_v29 = vld [vmem:[%s3725_s11 + $0x608] ss:$16 sps:$4 sm:$0xff]   ;;  %v3523_v16 = vld [vmem:[%s3725_s11 + $0x624] ss:$16 sps:$4 sm:$0xff]  }
  0x9d   : > { %1976 = vmatprep.subr.bf16.mxu0 %v3432_v30  ;;  %2140 = vmatprep.subr.bf16.mxu1 %v3435_v31  ;;  %v3526_v30 = vld [vmem:[%s3725_s11 + $0x62c] ss:$16 sps:$4 sm:$0xff]   ;;  %v601_v31 = vcombine.high %v3815_v21, %v3815_v21  ;;  %v3527_v21 = vld [vmem:[%s3725_s11 + $0x640] ss:$16 sps:$4 sm:$0xff]  }
  0xa0   : > { %1977 = vmatpush1.bf16.msra.mxu0 %v3430_v32  ;;  %2141 = vmatpush1.bf16.msra.mxu1 %v3433_v33  ;;  %v3521_v32 = vld [vmem:[%s3725_s11 + $0x620] ss:$16 sps:$4 sm:$0xff]   ;;  %v3524_v33 = vld [vmem:[%s3725_s11 + $0x628] ss:$16 sps:$4 sm:$0xff]  }
  0xa1   : > { %1978 = vmatprep.subr.bf16.mxu0 %v3438_v34  ;;  %2142 = vmatprep.subr.bf16.mxu1 %v3441_v35  ;;  %v3529_v34 = vld [vmem:[%s3725_s11 + $0x644] ss:$16 sps:$4 sm:$0xff]   ;;  %v3532_v35 = vld [vmem:[%s3725_s11 + $0x64c] ss:$16 sps:$4 sm:$0xff]  }
  0xa4   : > { %1979 = vmatpush1.bf16.msra.mxu0 %v3436_v36  ;;  %2143 = vmatpush1.bf16.msra.mxu1 %v3439_v37  ;;  %v3530_v36 = vld [vmem:[%s3725_s11 + $0x648] ss:$16 sps:$4 sm:$0xff]   ;;  %v3535_v37 = vld [vmem:[%s3725_s11 + $0x664] ss:$16 sps:$4 sm:$0xff]  }
  0xa5   : > { %1980 = vmatprep.subr.bf16.mxu0 %v3444_v38  ;;  %2144 = vmatprep.subr.bf16.mxu1 %v3447_v39  ;;  %v3538_v38 = vld [vmem:[%s3725_s11 + $0x66c] ss:$16 sps:$4 sm:$0xff]   ;;  %v3533_v39 = vld [vmem:[%s3725_s11 + $0x660] ss:$16 sps:$4 sm:$0xff]  }
  0xa8   : > { %1981 = vmatpush1.bf16.msra.mxu0 %v3442_v40  ;;  %2145 = vmatpush1.bf16.msra.mxu1 %v3445_v41  ;;  %v3536_v40 = vld [vmem:[%s3725_s11 + $0x668] ss:$16 sps:$4 sm:$0xff]   ;;  %v3541_v41 = vld [vmem:[%s3725_s11 + $0x684] ss:$16 sps:$4 sm:$0xff]  }
  0xa9   : > { %1982 = vmatprep.subr.bf16.mxu0 %v3450_v42  ;;  %2146 = vmatprep.subr.bf16.mxu1 %v3453_v43  ;;  %v3544_v42 = vld [vmem:[%s3725_s11 + $0x68c] ss:$16 sps:$4 sm:$0xff]   ;;  %v3539_v43 = vld [vmem:[%s3725_s11 + $0x680] ss:$16 sps:$4 sm:$0xff]  }
  0xac   : > { %1983 = vmatpush1.bf16.msra.mxu0 %v3448_v45  ;;  %2147 = vmatpush1.bf16.msra.mxu1 %v3451_v46  ;;  %v3542_v45 = vld [vmem:[%s3725_s11 + $0x688] ss:$16 sps:$4 sm:$0xff]   ;;  %v3547_v46 = vld [vmem:[%s3725_s11 + $0x6a4] ss:$16 sps:$4 sm:$0xff]  }
  0xad   : > { %1984 = vmatprep.subr.bf16.mxu0 %v3456_v47  ;;  %2148 = vmatprep.subr.bf16.mxu1 %v3459_v48  ;;  %v3550_v47 = vld [vmem:[%s3725_s11 + $0x6ac] ss:$16 sps:$4 sm:$0xff]   ;;  %v3545_v48 = vld [vmem:[%s3725_s11 + $0x6a0] ss:$16 sps:$4 sm:$0xff]  }
  0xb0   : > { %1985 = vmatpush1.bf16.msra.mxu0 %v3454_v49  ;;  %2149 = vmatpush1.bf16.msra.mxu1 %v3457_v50  ;;  %v3548_v49 = vld [vmem:[%s3725_s11 + $0x6a8] ss:$16 sps:$4 sm:$0xff]   ;;  %v3553_v50 = vld [vmem:[%s3725_s11 + $0x6c4] ss:$16 sps:$4 sm:$0xff]  }
  0xb1   : > { %1986 = vmatprep.subr.bf16.mxu0 %v3462_v51  ;;  %2150 = vmatprep.subr.bf16.mxu1 %v3465_v52  ;;  %v3556_v51 = vld [vmem:[%s3725_s11 + $0x6cc] ss:$16 sps:$4 sm:$0xff]   ;;  %v3551_v52 = vld [vmem:[%s3725_s11 + $0x6c0] ss:$16 sps:$4 sm:$0xff]  }
  0xb4   : > { %1987 = vmatpush1.bf16.msra.mxu0 %v3460_v53  ;;  %2151 = vmatpush1.bf16.msra.mxu1 %v3463_v54  ;;  %v3554_v53 = vld [vmem:[%s3725_s11 + $0x6c8] ss:$16 sps:$4 sm:$0xff]   ;;  %v3559_v54 = vld [vmem:[%s3725_s11 + $0x6e4] ss:$16 sps:$4 sm:$0xff]  }
  0xb5   : > { %1988 = vmatprep.subr.bf16.mxu0 %v3468_v55  ;;  %2152 = vmatprep.subr.bf16.mxu1 %v3471_v56  ;;  %v3562_v55 = vld [vmem:[%s3725_s11 + $0x6ec] ss:$16 sps:$4 sm:$0xff]   ;;  %v3557_v56 = vld [vmem:[%s3725_s11 + $0x6e0] ss:$16 sps:$4 sm:$0xff]  }
  0xb8   : > { %1989 = vmatpush1.bf16.msra.mxu0 %v3466_v57  ;;  %2153 = vmatpush1.bf16.msra.mxu1 %v3469_v58  ;;  %v3560_v57 = vld [vmem:[%s3725_s11 + $0x6e8] ss:$16 sps:$4 sm:$0xff]   ;;  %v3565_v58 = vld [vmem:[%s3725_s11 + $0x704] ss:$16 sps:$4 sm:$0xff]  }
  0xb9   : > { %1990 = vmatprep.subr.bf16.mxu0 %v3474_v59  ;;  %2154 = vmatprep.subr.bf16.mxu1 %v3477_v60  ;;  %v3568_v59 = vld [vmem:[%s3725_s11 + $0x70c] ss:$16 sps:$4 sm:$0xff]   ;;  %v3563_v60 = vld [vmem:[%s3725_s11 + $0x700] ss:$16 sps:$4 sm:$0xff]  }
  0xbc   : > { %1991 = vmatpush1.bf16.msra.mxu0 %v3472_v61  ;;  %2155 = vmatpush1.bf16.msra.mxu1 %v3475_v62  ;;  %v3566_v61 = vld [vmem:[%s3725_s11 + $0x708] ss:$16 sps:$4 sm:$0xff]   ;;  %v3571_v62 = vld [vmem:[%s3725_s11 + $0x724] ss:$16 sps:$4 sm:$0xff]  }
  0xbd   : > { %1992 = vmatprep.subr.bf16.mxu0 %v3480_v63  ;;  %2156 = vmatprep.subr.bf16.mxu1 %v3483_v0  ;;  %v3574_v63 = vld [vmem:[%s3725_s11 + $0x72c] ss:$16 sps:$4 sm:$0xff]   ;;  %v3569_v0 = vld [vmem:[%s3725_s11 + $0x720] ss:$16 sps:$4 sm:$0xff]  }
  0xc0   : > { %1993 = vmatpush1.bf16.msra.mxu0 %v3478_v1  ;;  %2157 = vmatpush1.bf16.msra.mxu1 %v3481_v2  ;;  %v3572_v1 = vld [vmem:[%s3725_s11 + $0x728] ss:$16 sps:$4 sm:$0xff]   ;;  %v3577_v2 = vld [vmem:[%s3725_s11 + $0x744] ss:$16 sps:$4 sm:$0xff]  }
  0xc1   : > { %1994 = vmatprep.subr.bf16.mxu0 %v3486_v3  ;;  %2158 = vmatprep.subr.bf16.mxu1 %v3489_v4  ;;  %v3580_v3 = vld [vmem:[%s3725_s11 + $0x74c] ss:$16 sps:$4 sm:$0xff]   ;;  %v3575_v4 = vld [vmem:[%s3725_s11 + $0x740] ss:$16 sps:$4 sm:$0xff]  }
  0xc4   : > { %1995 = vmatpush1.bf16.msra.mxu0 %v3484_v5  ;;  %2159 = vmatpush1.bf16.msra.mxu1 %v3487_v6  ;;  %v3578_v5 = vld [vmem:[%s3725_s11 + $0x748] ss:$16 sps:$4 sm:$0xff]   ;;  %v3583_v6 = vld [vmem:[%s3725_s11 + $0x764] ss:$16 sps:$4 sm:$0xff]  }
  0xc5   : > { %1996 = vmatprep.subr.bf16.mxu0 %v3492_v7  ;;  %2160 = vmatprep.subr.bf16.mxu1 %v3495_v8  ;;  %v3586_v7 = vld [vmem:[%s3725_s11 + $0x76c] ss:$16 sps:$4 sm:$0xff]   ;;  %v3581_v8 = vld [vmem:[%s3725_s11 + $0x760] ss:$16 sps:$4 sm:$0xff]  }
  0xc8   : > { %1997 = vmatpush1.bf16.msra.mxu0 %v3490_v9  ;;  %2161 = vmatpush1.bf16.msra.mxu1 %v3493_v10  ;;  %v3584_v9 = vld [vmem:[%s3725_s11 + $0x768] ss:$16 sps:$4 sm:$0xff]   ;;  %v3589_v10 = vld [vmem:[%s3725_s11 + $0x784] ss:$16 sps:$4 sm:$0xff]  }
  0xc9   : > { %1998 = vmatprep.subr.bf16.mxu0 %v3498_v11  ;;  %2162 = vmatprep.subr.bf16.mxu1 %v3501_v12  ;;  %v3592_v11 = vld [vmem:[%s3725_s11 + $0x78c] ss:$16 sps:$4 sm:$0xff]   ;;  %v3587_v12 = vld [vmem:[%s3725_s11 + $0x780] ss:$16 sps:$4 sm:$0xff]  }
  0xcc   : > { %1999 = vmatpush1.bf16.msra.mxu0 %v3496_v13  ;;  %2163 = vmatpush1.bf16.msra.mxu1 %v3499_v14  ;;  %v3590_v13 = vld [vmem:[%s3725_s11 + $0x788] ss:$16 sps:$4 sm:$0xff]   ;;  %v3595_v14 = vld [vmem:[%s3725_s11 + $0x7a4] ss:$16 sps:$4 sm:$0xff]  }
  0xcd   : > { %2000 = vmatprep.subr.bf16.mxu0 %v3504_v15  ;;  %2164 = vmatprep.subr.bf16.mxu1 %v3507_v17  ;;  %v3598_v15 = vld [vmem:[%s3725_s11 + $0x7ac] ss:$16 sps:$4 sm:$0xff]   ;;  %v3593_v17 = vld [vmem:[%s3725_s11 + $0x7a0] ss:$16 sps:$4 sm:$0xff]  }
  0xd0   : > { %2001 = vmatpush1.bf16.msra.mxu0 %v3502_v18  ;;  %2165 = vmatpush1.bf16.msra.mxu1 %v3505_v19  ;;  %v3596_v18 = vld [vmem:[%s3725_s11 + $0x7a8] ss:$16 sps:$4 sm:$0xff]   ;;  %v3601_v19 = vld [vmem:[%s3725_s11 + $0x7c4] ss:$16 sps:$4 sm:$0xff]  }
  0xd1   : > { %2002 = vmatprep.subr.bf16.mxu0 %v3510_v20  ;;  %2166 = vmatprep.subr.bf16.mxu1 %v3513_v23  ;;  %v3604_v20 = vld [vmem:[%s3725_s11 + $0x7cc] ss:$16 sps:$4 sm:$0xff]   ;;  %v3599_v23 = vld [vmem:[%s3725_s11 + $0x7c0] ss:$16 sps:$4 sm:$0xff]  }
  0xd4   : > { %2003 = vmatpush1.bf16.msra.mxu0 %v3508_v24  ;;  %2167 = vmatpush1.bf16.msra.mxu1 %v3511_v25  ;;  %v3602_v24 = vld [vmem:[%s3725_s11 + $0x7c8] ss:$16 sps:$4 sm:$0xff]   ;;  %v3607_v25 = vld [vmem:[%s3725_s11 + $0x7e4] ss:$16 sps:$4 sm:$0xff]  }
  0xd5   : > { %2013 = vmatprep.subr.bf16.mxu0 %v3517_v26  ;;  %2177 = vmatprep.subr.bf16.mxu1 %v3520_v27  ;;  %v3610_v26 = vld [vmem:[%s3725_s11 + $0x7ec] ss:$16 sps:$4 sm:$0xff]   ;;  %v3605_v27 = vld [vmem:[%s3725_s11 + $0x7e0] ss:$16 sps:$4 sm:$0xff]  }
  0xd7   : > { %2005 = vmatmul.mubr.bf16.vlgmr.msra.gmra.mrb[0].mxu0 %v3818_v22  ;;  %2169 = vmatmul.mubr.bf16.vlgmr.msra.gmra.mrb[0].mxu1 %v3818_v22 }
  0xd8   : > { %2014 = vmatpush1.bf16.msra.mxu0 %v3515_v28  ;;  %2178 = vmatpush1.bf16.msra.mxu1 %v3518_v29  ;;  %v3608_v28 = vld [vmem:[%s3725_s11 + $0x7e8] ss:$16 sps:$4 sm:$0xff]   ;;  %v599_v29 = vcombine.high %v3818_v22, %v3818_v22 }
  0xd9   : > { %2015 = vmatprep.subr.bf16.mxu0 %v3523_v16  ;;  %2179 = vmatprep.subr.bf16.mxu1 %v3526_v30  ;;  %v3661_v16 = vmov 1983009808  }
  0xda   : > { %2045 = vmatprep.mubr.bf16.mxu0 %v601_v31  ;;  %2209 = vmatprep.mubr.bf16.mxu1 %v601_v31  ;;  %v2225_v30 = vunpack.c.l.s4 %v3661_v16 }
  0xdc   : > { %2016 = vmatpush1.bf16.msra.mxu0 %v3521_v32  ;;  %2180 = vmatpush1.bf16.msra.mxu1 %v3524_v33  ;;  %v2226_v31 = vunpack.c.0.s8 %v2225_v30 }
  0xdd   : > { %2017 = vmatprep.subr.bf16.mxu0 %v3529_v34  ;;  %2181 = vmatprep.subr.bf16.mxu1 %v3532_v35 }
  0xde   : > { %v4019_v34 = vsub.s32 %v2226_v31, %v3767_v44 }
  0xe0   : > { %2018 = vmatpush1.bf16.msra.mxu0 %v3527_v21  ;;  %2182 = vmatpush1.bf16.msra.mxu1 %v3530_v36 }
  0xe1   : > { %2019 = vmatprep.subr.bf16.mxu0 %v3535_v37  ;;  %2183 = vmatprep.subr.bf16.mxu1 %v3538_v38 }
  0xe4   : > { %2020 = vmatpush1.bf16.msra.mxu0 %v3533_v39  ;;  %2184 = vmatpush1.bf16.msra.mxu1 %v3536_v40 }
  0xe5   : > { %2021 = vmatprep.subr.bf16.mxu0 %v3541_v41  ;;  %2185 = vmatprep.subr.bf16.mxu1 %v3544_v42 }
  0xe8   : > { %2022 = vmatpush1.bf16.msra.mxu0 %v3539_v43  ;;  %2186 = vmatpush1.bf16.msra.mxu1 %v3542_v45  ;;  %v294_v43 = vld [vmem:[#allocation2] sm:$0xff] }
  0xe9   : > { %2023 = vmatprep.subr.bf16.mxu0 %v3547_v46  ;;  %2187 = vmatprep.subr.bf16.mxu1 %v3550_v47  ;;  %v3611_v47 = vld [vmem:[%s4170_s3 + $0x40] sm:$0xff] (!%p3070_p6)  }
  0xec   : > { %2024 = vmatpush1.bf16.msra.mxu0 %v3545_v48  ;;  %2188 = vmatpush1.bf16.msra.mxu1 %v3548_v49  ;;  %v3612_v48 = vld [vmem:[%s4170_s3 + $0xc0] sm:$0xff] (!%p3070_p6)  }
  0xed   : > { %2025 = vmatprep.subr.bf16.mxu0 %v3553_v50  ;;  %2189 = vmatprep.subr.bf16.mxu1 %v3556_v51  ;;  %v3613_v49 = vld [vmem:[%s4170_s3] sm:$0xff] (!%p3070_p6)   ;;  %v3615_v51 = vld [vmem:[%s4170_s3 + $0x48] sm:$0xff] (!%p3070_p6)  }
  0xee   : > { %v3614_v50 = vld [vmem:[%s4170_s3 + $0x80] sm:$0xff] (!%p3070_p6)  }
  0xf0   : > { %2026 = vmatpush1.bf16.msra.mxu0 %v3551_v52  ;;  %2190 = vmatpush1.bf16.msra.mxu1 %v3554_v53  ;;  %v3616_v52 = vld [vmem:[%s4170_s3 + $0xc8] sm:$0xff] (!%p3070_p6)  }
  0xf1   : > { %2027 = vmatprep.subr.bf16.mxu0 %v3559_v54  ;;  %2191 = vmatprep.subr.bf16.mxu1 %v3562_v55  ;;  %v3617_v53 = vld [vmem:[%s4170_s3 + $0x8] sm:$0xff] (!%p3070_p6)   ;;  %v3619_v55 = vld [vmem:[%s4170_s3 + $0x50] sm:$0xff] (!%p3070_p6)  }
  0xf2   : > { %v3618_v54 = vld [vmem:[%s4170_s3 + $0x88] sm:$0xff] (!%p3070_p6)  }
  0xf4   : > { %2028 = vmatpush1.bf16.msra.mxu0 %v3557_v56  ;;  %2192 = vmatpush1.bf16.msra.mxu1 %v3560_v57  ;;  %v3620_v56 = vld [vmem:[%s4170_s3 + $0xd0] sm:$0xff] (!%p3070_p6)  }
  0xf5   : > { %2029 = vmatprep.subr.bf16.mxu0 %v3565_v58  ;;  %2193 = vmatprep.subr.bf16.mxu1 %v3568_v59  ;;  %v3621_v57 = vld [vmem:[%s4170_s3 + $0x10] sm:$0xff] (!%p3070_p6)   ;;  %v3623_v59 = vld [vmem:[%s4170_s3 + $0x58] sm:$0xff] (!%p3070_p6)  }
  0xf6   : > { %v3622_v58 = vld [vmem:[%s4170_s3 + $0x90] sm:$0xff] (!%p3070_p6)  }
  0xf8   : > { %2030 = vmatpush1.bf16.msra.mxu0 %v3563_v60  ;;  %2194 = vmatpush1.bf16.msra.mxu1 %v3566_v61  ;;  %v3624_v60 = vld [vmem:[%s4170_s3 + $0xd8] sm:$0xff] (!%p3070_p6)  }
  0xf9   : > { %2031 = vmatprep.subr.bf16.mxu0 %v3571_v62  ;;  %2195 = vmatprep.subr.bf16.mxu1 %v3574_v63  ;;  %v3625_v61 = vld [vmem:[%s4170_s3 + $0x18] sm:$0xff] (!%p3070_p6)   ;;  %v3627_v63 = vld [vmem:[%s4170_s3 + $0x60] sm:$0xff] (!%p3070_p6)  }
  0xfa   : > { %v3626_v62 = vld [vmem:[%s4170_s3 + $0x98] sm:$0xff] (!%p3070_p6)  }
  0xfc   : > { %2032 = vmatpush1.bf16.msra.mxu0 %v3569_v0  ;;  %2196 = vmatpush1.bf16.msra.mxu1 %v3572_v1  ;;  %v3628_v0 = vld [vmem:[%s4170_s3 + $0xe0] sm:$0xff] (!%p3070_p6)  }
  0xfd   : > { %2033 = vmatprep.subr.bf16.mxu0 %v3577_v2  ;;  %2197 = vmatprep.subr.bf16.mxu1 %v3580_v3  ;;  %v3629_v1 = vld [vmem:[%s4170_s3 + $0x20] sm:$0xff] (!%p3070_p6)   ;;  %v3631_v3 = vld [vmem:[%s4170_s3 + $0x68] sm:$0xff] (!%p3070_p6)  }
  0xfe   : > { %v3630_v2 = vld [vmem:[%s4170_s3 + $0xa0] sm:$0xff] (!%p3070_p6)  }
 0x100   : > { %2034 = vmatpush1.bf16.msra.mxu0 %v3575_v4  ;;  %2198 = vmatpush1.bf16.msra.mxu1 %v3578_v5  ;;  %v3632_v4 = vld [vmem:[%s4170_s3 + $0xe8] sm:$0xff] (!%p3070_p6)  }
 0x101   : > { %2035 = vmatprep.subr.bf16.mxu0 %v3583_v6  ;;  %2199 = vmatprep.subr.bf16.mxu1 %v3586_v7  ;;  %v3633_v5 = vld [vmem:[%s4170_s3 + $0x28] sm:$0xff] (!%p3070_p6)   ;;  %v3635_v7 = vld [vmem:[%s4170_s3 + $0x70] sm:$0xff] (!%p3070_p6)  }
 0x102   : > { %v3634_v6 = vld [vmem:[%s4170_s3 + $0xa8] sm:$0xff] (!%p3070_p6)  }
 0x104   : > { %2036 = vmatpush1.bf16.msra.mxu0 %v3581_v8  ;;  %2200 = vmatpush1.bf16.msra.mxu1 %v3584_v9  ;;  %v3636_v8 = vld [vmem:[%s4170_s3 + $0xf0] sm:$0xff] (!%p3070_p6)  }
 0x105   : > { %2037 = vmatprep.subr.bf16.mxu0 %v3589_v10  ;;  %2201 = vmatprep.subr.bf16.mxu1 %v3592_v11  ;;  %v3637_v9 = vld [vmem:[%s4170_s3 + $0x30] sm:$0xff] (!%p3070_p6)   ;;  %v2251_v10 = vsub.s32 (!%p3070_p6), 0, %v3767_v44 }
 0x106   : > { %v3638_v11 = vld [vmem:[%s4170_s3 + $0xb0] sm:$0xff] (!%p3070_p6)  }
 0x108   : > { %2038 = vmatpush1.bf16.msra.mxu0 %v3587_v12  ;;  %2202 = vmatpush1.bf16.msra.mxu1 %v3590_v13  ;;  %v2255_v12 = vsub.s32 (!%p3070_p6), 1, %v3767_v44  ;;  %v3639_v13 = vld [vmem:[%s4170_s3 + $0x78] sm:$0xff] (!%p3070_p6)  }
 0x109   : > { %2039 = vmatprep.subr.bf16.mxu0 %v3595_v14  ;;  %2203 = vmatprep.subr.bf16.mxu1 %v3598_v15  ;;  %v2259_v14 = vsub.s32 (!%p3070_p6), 2, %v3767_v44  ;;  %v3640_v15 = vld [vmem:[%s4170_s3 + $0xf8] sm:$0xff] (!%p3070_p6)  }
 0x10c   : > { %2040 = vmatpush1.bf16.msra.mxu0 %v3593_v17  ;;  %2204 = vmatpush1.bf16.msra.mxu1 %v3596_v18  ;;  %v2263_v17 = vsub.s32 (!%p3070_p6), 3, %v3767_v44  ;;  %v3641_v18 = vld [vmem:[%s4170_s3 + $0x38] sm:$0xff] (!%p3070_p6)  }
 0x10d   : > { %2041 = vmatprep.subr.bf16.mxu0 %v3601_v19  ;;  %2205 = vmatprep.subr.bf16.mxu1 %v3604_v20  ;;  %v3642_v19 = vld [vmem:[%s4170_s3 + $0xb8] sm:$0xff] (!%p3070_p6)   ;;  %v2247_v20 = vld [vmem:[%s4169_s2] sm:$0xf] (!%p3070_p6) }
 0x10e   : > { %v2264_v44 = vrot.slane (!%p3070_p6), %v2247_v20, %v2263_v17 }
 0x110   : > { %2042 = vmatpush1.bf16.msra.mxu0 %v3599_v23  ;;  %2206 = vmatpush1.bf16.msra.mxu1 %v3602_v24  ;;  %v2252_v23 = vrot.slane (!%p3070_p6), %v2247_v20, %v2251_v10  ;;  %v2256_v24 = vrot.slane (!%p3070_p6), %v2247_v20, %v2255_v12 }
 0x111   : > { %2043 = vmatprep.subr.bf16.mxu0 %v3607_v25  ;;  %2207 = vmatprep.subr.bf16.mxu1 %v3610_v26  ;;  %v2260_v25 = vrot.slane (!%p3070_p6), %v2247_v20, %v2259_v14  ;;  %v3662_v26 = vmov (!%p3070_p6), 0.0  }
 0x114   : > { %2044 = vmatpush1.bf16.msra.mxu0 %v3605_v27  ;;  %2208 = vmatpush1.bf16.msra.mxu1 %v3608_v28  ;;  %v2265_v27 = vcombine.low (!%p3070_p6), %v2252_v23, %v2256_v24  ;;  %v2266_v28 = vcombine.low (!%p3070_p6), %v2260_v25, %v2264_v44 }
 0x115   : > { %3116 = vmatprep.subr.bf16.mxu0 (!%p3070_p6), %v3611_v47  ;;  %3138 = vmatprep.subr.bf16.mxu1 (!%p3070_p6), %v3612_v48  ;;  %v3648_v47 = vld [vmem:[%s4172_s5 + $0x28] sm:$0xff] (!%p3070_p6)   ;;  %v3649_v48 = vld [vmem:[%s4172_s5 + $0x30] sm:$0xff] (!%p3070_p6)  }
 0x116   : > { %v2273_v16 = vrot.slane (!%p3070_p6), %v2265_v27, %v4019_v34  ;;  %v2280_v30 = vrot.slane (!%p3070_p6), %v2266_v28, %v4019_v34 }
 0x117   : > { %2046 = vmatmul.mubr.bf16.vlgmr.msra.gmra.mrb[0].mxu0 %v599_v29  ;;  %2210 = vmatmul.mubr.bf16.vlgmr.msra.gmra.mrb[0].mxu1 %v599_v29 }
 0x118   : > { %3117 = vmatpush3.bf16.msra.mxu0 (!%p3070_p6), %v3613_v49  ;;  %3139 = vmatpush3.bf16.msra.mxu1 (!%p3070_p6), %v3614_v50  ;;  %v2281_v31 = vcombine.low (!%p3070_p6), %v2273_v16, %v2280_v30  ;;  %v3650_v49 = vld [vmem:[%s4172_s5 + $0x38] sm:$0xff] (!%p3070_p6)  }
 0x119   : > { %3118 = vmatprep.subr.bf16.mxu0 (!%p3070_p6), %v3615_v51  ;;  %3140 = vmatprep.subr.bf16.mxu1 (!%p3070_p6), %v3616_v52  ;;  %v3071_v51 = vld [vmem:[%s4171_s4] ss:$0 sm:$0xff] (!%p3070_p6) }
 0x11c   : > { %3119 = vmatpush3.bf16.msra.mxu0 (!%p3070_p6), %v3617_v53  ;;  %3141 = vmatpush3.bf16.msra.mxu1 (!%p3070_p6), %v3618_v54 }
 0x11d   : > { %3120 = vmatprep.subr.bf16.mxu0 (!%p3070_p6), %v3619_v55  ;;  %3142 = vmatprep.subr.bf16.mxu1 (!%p3070_p6), %v3620_v56 }
 0x120   : > { %3121 = vmatpush3.bf16.msra.mxu0 (!%p3070_p6), %v3621_v57  ;;  %3143 = vmatpush3.bf16.msra.mxu1 (!%p3070_p6), %v3622_v58 }
 0x121   : > { %3122 = vmatprep.subr.bf16.mxu0 (!%p3070_p6), %v3623_v59  ;;  %3144 = vmatprep.subr.bf16.mxu1 (!%p3070_p6), %v3624_v60 }
 0x124   : > { %3123 = vmatpush3.bf16.msra.mxu0 (!%p3070_p6), %v3625_v61  ;;  %3145 = vmatpush3.bf16.msra.mxu1 (!%p3070_p6), %v3626_v62 }
 0x125   : > { %3124 = vmatprep.subr.bf16.mxu0 (!%p3070_p6), %v3627_v63  ;;  %3146 = vmatprep.subr.bf16.mxu1 (!%p3070_p6), %v3628_v0 }
 0x128   : > { %3125 = vmatpush3.bf16.msra.mxu0 (!%p3070_p6), %v3629_v1  ;;  %3147 = vmatpush3.bf16.msra.mxu1 (!%p3070_p6), %v3630_v2  ;;  %v3104_v1 = vld [vmem:[%s4173_s6] ss:$0 sm:$0xff] (!%p3070_p6) }
 0x129   : > { %3126 = vmatprep.subr.bf16.mxu0 (!%p3070_p6), %v3631_v3  ;;  %3148 = vmatprep.subr.bf16.mxu1 (!%p3070_p6), %v3632_v4 }
 0x12c   : > { %3127 = vmatpush3.bf16.msra.mxu0 (!%p3070_p6), %v3633_v5  ;;  %3149 = vmatpush3.bf16.msra.mxu1 (!%p3070_p6), %v3634_v6 }
 0x12d   : > { %3128 = vmatprep.subr.bf16.mxu0 (!%p3070_p6), %v3635_v7  ;;  %3150 = vmatprep.subr.bf16.mxu1 (!%p3070_p6), %v3636_v8 }
 0x130   : > { %3129 = vmatpush3.bf16.msra.mxu0 (!%p3070_p6), %v3637_v9  ;;  %3151 = vmatpush3.bf16.msra.mxu1 (!%p3070_p6), %v3638_v11 }
 0x131   : > { %3130 = vmatprep.subr.bf16.mxu0 (!%p3070_p6), %v3639_v13  ;;  %3152 = vmatprep.subr.bf16.mxu1 (!%p3070_p6), %v3640_v15 }
 0x134   : > { %3131 = vmatpush3.bf16.msra.mxu0 (!%p3070_p6), %v3641_v18  ;;  %3153 = vmatpush3.bf16.msra.mxu1 (!%p3070_p6), %v3642_v19 }
 0x135   : > { %3169 = vmatprep.subr.bf16.mxu0 (!%p3070_p6), %v3662_v26 }
 0x1ea   : > { %v2047_v32 = vpop.f32.mrb[0].mxu0  ;;  %v2211_v33 = vpop.f32.mrb[0].mxu1 }
 0x1eb   : > { %v2049_v35 = vpop.f32.mrb[1].mxu0  ;;  %v2213_v21 = vpop.f32.mrb[1].mxu1 }
 0x1ec   : > { %v2222_v36 = vcombine.low %v2047_v32, %v2049_v35  ;;  %v2223_v37 = vcombine.low %v2211_v33, %v2213_v21  ;;  %v2051_v38 = vpop.f32.mrb[2].mxu0  ;;  %v2215_v39 = vpop.f32.mrb[2].mxu1 }
 0x1ed   : > { %v2052_v40 = vpop.f32.mrb[3].mxu0  ;;  %v2216_v22 = vpop.f32.mrb[3].mxu1 }
 0x1ee   : > { %v2230_v41 = vrot.slane %v2222_v36, %v4019_v34  ;;  %v2237_v42 = vrot.slane %v2223_v37, %v4019_v34  ;;  %2245 = sbr.rel (%p3070_p6) target bundleno = 957 (0x3bd), region = 56  ;;  %v3643_v22 = vld [vmem:[%s4172_s5] sm:$0xff] (!%p3070_p6)  }
 0x1f0   : > { %v2238_v45 = vcombine.low %v2230_v41, %v2237_v42 }
 0x1f2   : > { %v2240_v46 = vadd.f32 %v2238_v45, %v294_v43  ;;  %v3644_v43 = vld [vmem:[%s4172_s5 + $0x8] sm:$0xff] (!%p3070_p6)   ;;  %v3646_v45 = vld [vmem:[%s4172_s5 + $0x18] sm:$0xff] (!%p3070_p6)  }
 0x1f4   : > { %2241 = vst [vmem:[#allocation2] sm:$0xff] %v2240_v46  ;;  %v3647_v46 = vld [vmem:[%s4172_s5 + $0x20] sm:$0xff] (!%p3070_p6)  }
 0x1fb   : > { %v2246_v29 = vld [vmem:[#allocation2] sm:$0xff] }
 0x1fc   : > { %v2283_v32 = vadd.f32 %v2281_v31, %v2246_v29 }
 0x1fe   : > { %v2284_v33 = vmax.f32 %v2283_v32, 0.0 }
 0x200   : > { %v2293_v35 = vrot.slane %v2284_v33, %v4019_v34  ;;  %v2286_v21 = vcombine.high %v2284_v33, %v2284_v33 }
 0x202   : > { %v2301_v36 = vcombine.high %v2293_v35, %v2293_v35  ;;  %v2300_v37 = vrot.slane %v2286_v21, %v4019_v34  ;;  %v2307_v38 = vpack.c.bf16 %v2293_v35, %v2293_v35  ;;  %v3645_v34 = vld [vmem:[%s4172_s5 + $0x10] sm:$0xff]  }
 0x204   : > { %v2308_v39 = vpack.c.bf16 %v2301_v36, %v2301_v36  ;;  %v2302_v40 = vcombine.high %v2300_v37, %v2300_v37  ;;  %v2309_v41 = vpack.c.bf16 %v2300_v37, %v2300_v37 }
 0x206   : > { %2606 = vmatprep.mubr.bf16.mxu0 %v2308_v39  ;;  %v2310_v42 = vpack.c.bf16 %v2302_v40, %v2302_v40 }
 0x207   : > { %2607 = vmatmul.mubr.bf16.vlgmr.msra.gmra.mrb[0].mxu0 %v2307_v38 }
 0x208   : > { %2646 = vmatprep.mubr.bf16.mxu1 %v2310_v42  ;;  %3170 = vmatpush3.bf16.msra.mxu0 %v3643_v22 }
 0x209   : > { %2647 = vmatmul.mubr.bf16.vlgmr.msra.gmra.mrb[0].mxu1 %v2309_v41  ;;  %3171 = vmatprep.subr.bf16.mxu0 %v3662_v26 }
 0x20a   : > { %3185 = vmatprep.mubr.msk.bf16.mxu0 %vm3663_vm0, %v3662_v26 }
 0x20c   : > { %3172 = vmatpush3.bf16.msra.mxu0 %v3644_v43 }
 0x20d   : > { %3173 = vmatprep.subr.bf16.mxu0 %v3662_v26 }
 0x210   : > { %3174 = vmatpush3.bf16.msra.mxu0 %v3645_v34 }
 0x211   : > { %3175 = vmatprep.subr.bf16.mxu0 %v3662_v26 }
 0x214   : > { %3176 = vmatpush3.bf16.msra.mxu0 %v3646_v45 }
 0x215   : > { %3177 = vmatprep.subr.bf16.mxu0 %v3662_v26 }
 0x218   : > { %3178 = vmatpush3.bf16.msra.mxu0 %v3647_v46 }
 0x219   : > { %3179 = vmatprep.subr.bf16.mxu0 %v3662_v26 }
 0x21c   : > { %3180 = vmatpush3.bf16.msra.mxu0 %v3648_v47 }
 0x21d   : > { %3181 = vmatprep.subr.bf16.mxu0 %v3662_v26 }
 0x220   : > { %3182 = vmatpush3.bf16.msra.mxu0 %v3649_v48 }
 0x221   : > { %3183 = vmatprep.subr.bf16.mxu0 %v3662_v26 }
 0x224   : > { %3184 = vmatpush3.bf16.msra.mxu0 %v3650_v49 }
 0x2da   : > { %v3132_v50 = vpop.f32.mrb[0].mxu0 }
 0x2db   : > { %v3133_v52 = vpop.f32.mrb[1].mxu0 }
 0x2dc   : > { %v3154_v53 = vpop.f32.mrb[0].mxu1  ;;  %v3134_v54 = vadd.f32 %v3133_v52, %v3132_v50  ;;  %v3135_v55 = vpop.f32.mrb[2].mxu0 }
 0x2dd   : > { %v3155_v56 = vpop.f32.mrb[1].mxu1  ;;  %v3136_v57 = vpop.f32.mrb[3].mxu0 }
 0x2de   : > { %v2609_v58 = vadd.f32 %v3134_v54, %v3071_v51  ;;  %v3156_v59 = vadd.f32 %v3155_v56, %v3154_v53  ;;  %v3157_v60 = vpop.f32.mrb[2].mxu1 }
 0x2df   : > { %v3158_v61 = vpop.f32.mrb[3].mxu1 }
 0x2e0   : > { %v2649_v62 = vadd.f32 %v3156_v59, %v2609_v58 }
 0x2e2   : > { %v2654_v63 = vmax.f32 %v2649_v62, 0.0 }
 0x2e4   : > { %v2655_v0 = vpack.c.bf16 %v2654_v63, %v2654_v63 }
 0x2e6   : > { %3186 = vmatmul.mubr.bf16.vlgmr.msra.gmra.mrb[4].mxu0 %v2655_v0 }
 0x3b9   : > { %v2761_v2 = vpop.f32.mrb[4].mxu0 }
 0x3ba   : > { %v2762_v3 = vadd.f32 %v3104_v1, %v2761_v2  ;;  %v3187_v4 = vpop.f32.mrb[5].mxu0 }
 0x3bb   : > { %v2764_v5 = vpop.f32.mrb[6].mxu0 }
 0x3bc   : > { %2767 = vst [vmem:[%s4174_s7] sm:$0x3] %v2762_v3  ;;  %v3188_v6 = vpop.f32.mrb[7].mxu0 }
 0x3bd PF: > { %s17_s24 = sadd.s32 1, %s3657_s24  }
 0x3be   : > { %p14_p7 = scmp.ge.s32.totalorder %s17_s24, 6  }
 0x3c0   :  { %16 = sbr.rel (!%p14_p7) target bundleno = 1 (0x1), region = 85 }

// kernel: convnet_forward.2
= control target key start
LH: loop header
LB: loop body
LE: loop exit
PB: predicated region body
PF: predicated region fallthrough
CT: control target
= control target key end

     0   :  { %s11397_s24 = smov 0   ;;  %s13540_s0 = inlined_call_operand.vmem [shape: bf16[2,9,144,256], index: 0, kind: input, shape index: {}]   ;;  %s13541_s1 = inlined_call_operand.vmem [shape: bf16[256,32], index: 1, kind: input, shape index: {}]   ;;  %s13542_s2 = inlined_call_operand.vmem [shape: f32[1,32], index: 2, kind: input, shape index: {}]   ;;  %s13543_s3 = inlined_call_operand.vmem [shape: bf16[16,32,64], index: 3, kind: input, shape index: {}]   ;;  %s13544_s4 = inlined_call_operand.vmem [shape: f32[1,64], index: 4, kind: input, shape index: {}]   ;;  %s13545_s5 = inlined_call_operand.vmem [shape: bf16[9,64,64], index: 5, kind: input, shape index: {}]   ;;  %s13546_s6 = inlined_call_operand.vmem [shape: f32[1,64], index: 6, kind: input, shape index: {}]   ;;  %s13547_s7 = inlined_call_operand.vmem [shape: bf16[2,64,64], index: 7, kind: output, shape index: {}]  }
   0x1 LB: > { %s8386_s25 = sadd.s32 4294967295, %s11355_s24   ;;  %p8390_p0 = scmp.ge.s32.totalorder %s11355_s24, 1  ;;  %s11355_s24 = sphi %s11397_s24, %s17_s24  }
   0x2   : > { %p237_p1 = scmp.lt.s32.totalorder %s11355_s24, 3 }
   0x4   : > { %p238_p2 = pnand %p8390_p0, %p237_p1 }
   0x5   : > { %v10905_v0 = vld [vmem:[%s13541_s1 + $0x40] sm:$0xff] (!%p238_p2)   ;;  %v10907_v2 = vld [vmem:[%s13541_s1 + $0x48] sm:$0xff] (!%p238_p2)   ;;  %p269_p3 = scmp.lt.s32.totalorder (!%p238_p2), %s8386_s25, 1  ;;  %v10909_v4 = vld [vmem:[%s13541_s1 + $0x50] sm:$0xff] (!%p238_p2)   ;;  %vm655_vm0 = vcmask (!%p238_p2), 261120   ;;  %vm6519_vm3 = vcmask (!%p238_p2), 1041408  }
   0x6   : > { %241 = sbr.rel (%p238_p2) target bundleno = 1552 (0x610), region = 48  ;;  %v10906_v1 = vld [vmem:[%s13541_s1] sm:$0xff] (!%p238_p2)   ;;  %9256 = vmatprep.subr.bf16.mxu0 (!%p238_p2), %v10905_v0  ;;  %v10908_v3 = vld [vmem:[%s13541_s1 + $0x8] sm:$0xff] (!%p238_p2)   ;;  %v10910_v5 = vld [vmem:[%s13541_s1 + $0x10] sm:$0xff] (!%p238_p2)   ;;  %vm5835_vm1 = vsmask.f32 (!%p238_p2), 2304 }
   0x7   : > { %9257 = vmatpush3.bf16.msra.mxu0 (!%p238_p2), %v10906_v1  ;;  %v10911_v6 = vld [vmem:[%s13541_s1 + $0x58] sm:$0xff] (!%p238_p2)   ;;  %v10913_v8 = vld [vmem:[%s13541_s1 + $0x60] sm:$0xff] (!%p238_p2)   ;;  %v10915_v10 = vld [vmem:[%s13541_s1 + $0x68] sm:$0xff] (!%p238_p2)   ;;  %vm4212_vm2 = vsmask.f32 (!%p238_p2), 7424  ;;  %vm6812_vm4 = vcmask (!%p238_p2), 523264  }
   0x8   : > { %9258 = vmatprep.subr.bf16.mxu0 (!%p238_p2), %v10907_v2  ;;  %v10912_v7 = vld [vmem:[%s13541_s1 + $0x18] sm:$0xff] (!%p238_p2)   ;;  %v10914_v9 = vld [vmem:[%s13541_s1 + $0x20] sm:$0xff] (!%p238_p2)   ;;  %v10916_v12 = vld [vmem:[%s13541_s1 + $0x28] sm:$0xff] (!%p238_p2)   ;;  %vm7042_vm5 = vcmask (!%p238_p2), 1046528   ;;  %vm7526_vm6 = vsmask.f32 (!%p238_p2), 1280 }
   0x9   : > { %v10917_v13 = vld [vmem:[%s13541_s1 + $0x70] sm:$0xff] (!%p238_p2)   ;;  %v10919_v15 = vld [vmem:[%s13541_s1 + $0x78] sm:$0xff] (!%p238_p2)   ;;  %v10924_v17 = vld [vmem:[%s13541_s1 + $0x40] sm:$0xff] (!%p238_p2)   ;;  %vm7696_vm7 = vcmask (!%p238_p2), 1044480   ;;  %vm7850_vm8 = vsmask.f32 (!%p238_p2), 4352 }
   0xa   : > { %v10918_v14 = vld [vmem:[%s13541_s1 + $0x30] sm:$0xff] (!%p238_p2)   ;;  %v10920_v16 = vld [vmem:[%s13541_s1 + $0x38] sm:$0xff] (!%p238_p2)   ;;  %v10925_v19 = vld [vmem:[%s13541_s1] sm:$0xff] (!%p238_p2)   ;;  %vm8016_vm9 = vcmask (!%p238_p2), 1043456   ;;  %vm8228_vm10 = vcmask (!%p238_p2), 1040384   ;;  %vm8229_vm11 = vcmask (!%p238_p2), 1044484  }
   0xb   : > { %9259 = vmatpush3.bf16.msra.mxu0 (!%p238_p2), %v10908_v3  ;;  %v10929_v21 = vld [vmem:[%s13541_s1 + $0x48] sm:$0xff] (!%p238_p2)   ;;  %v10934_v23 = vld [vmem:[%s13541_s1 + $0x50] sm:$0xff] (!%p238_p2)   ;;  %v10939_v27 = vld [vmem:[%s13541_s1 + $0x58] sm:$0xff] (!%p238_p2)   ;;  %vm8196_vm12 = vcmask (!%p238_p2), 519168   ;;  %vm8204_vm14 = vsmask.f32 (!%p238_p2), 6416 }
   0xc   : > { %9260 = vmatprep.subr.bf16.mxu0 (!%p238_p2), %v10909_v4  ;;  %v10930_v22 = vld [vmem:[%s13541_s1 + $0x8] sm:$0xff] (!%p238_p2)   ;;  %v10935_v26 = vld [vmem:[%s13541_s1 + $0x10] sm:$0xff] (!%p238_p2)   ;;  %v10940_v28 = vld [vmem:[%s13541_s1 + $0x18] sm:$0xff] (!%p238_p2)   ;;  %vm8274_vm15 = vsmask.f32 (!%p238_p2), 256 }
   0xd   : > { %s13553_s25 = smov (!%p269_p3, %s8386_s25), 1  ;;  %v10944_v29 = vld [vmem:[%s13541_s1 + $0x60] sm:$0xff]   ;;  %v10949_v33 = vld [vmem:[%s13541_s1 + $0x68] sm:$0xff]   ;;  %v10954_v35 = vld [vmem:[%s13541_s1 + $0x70] sm:$0xff]  }
   0xe   : > { %s10896_s17 = smul.u32 1296, %s13553_s25  ;;  %v10945_v32 = vld [vmem:[%s13541_s1 + $0x20] sm:$0xff]   ;;  %v10950_v34 = vld [vmem:[%s13541_s1 + $0x28] sm:$0xff]   ;;  %v10957_v38 = vld [vmem:[%s13541_s1 + $0x30] sm:$0xff]   ;;  %s9245_s27 = sshll.u32 %s13553_s25, 5 }
   0xf   : > { %9261 = vmatpush3.bf16.msra.mxu0 %v10910_v5  ;;  %v10961_v39 = vld [vmem:[%s13541_s1 + $0x78] sm:$0xff]   ;;  %v11518_v40 = vld [vmem:[%s13541_s1 + $0x40] sm:$0xff]   ;;  %v11536_v45 = vld [vmem:[%s13541_s1 + $0x48] sm:$0xff]   ;;  %s13488_s30 = scalar_lea.vmem %s13547_s7, %s9245_s27 }
  0x10   : > { %9262 = vmatprep.subr.bf16.mxu0 %v10911_v6  ;;  %s11438_s26 = scalar_lea.vmem %s13540_s0, %s10896_s17  ;;  %v10963_v41 = vld [vmem:[%s13541_s1 + $0x38] sm:$0xff]   ;;  %v10967_v43 = vld [vmem:[%s13541_s1 + $0x40] sm:$0xff]   ;;  %10636 = vmatprep.subr.bf16.mxu1 %v11518_v40  ;;  %v11542_v46 = vld [vmem:[%s13541_s1 + $0x8] sm:$0xff]  }
  0x11   : > { %v10923_v11 = vld [vmem:[%s11438_s26 + $0x4] ss:$8 sps:$4 sm:$0xff]   ;;  %v10921_v18 = vld [vmem:[%s11438_s26] ss:$8 sps:$4 sm:$0xff]   ;;  %v10926_v20 = vld [vmem:[%s11438_s26 + $0x14] ss:$8 sps:$4 sm:$0xff]  }
  0x12   : > { %555 = vmatprep.mubr.bf16.mxu0 %v10923_v11  ;;  %v10928_v24 = vld [vmem:[%s11438_s26 + $0x10] ss:$8 sps:$4 sm:$0xff]   ;;  %v10931_v25 = vld [vmem:[%s11438_s26 + $0x24] ss:$8 sps:$4 sm:$0xff]   ;;  %v10933_v30 = vld [vmem:[%s11438_s26 + $0x20] ss:$8 sps:$4 sm:$0xff]  }
  0x13   : > { %9263 = vmatpush3.bf16.msra.mxu0 %v10912_v7  ;;  %v10936_v31 = vld [vmem:[%s11438_s26 + $0x34] ss:$8 sps:$4 sm:$0xff]   ;;  %v10938_v36 = vld [vmem:[%s11438_s26 + $0x30] ss:$8 sps:$4 sm:$0xff]   ;;  %v10941_v37 = vld [vmem:[%s11438_s26 + $0x44] ss:$8 sps:$4 sm:$0xff]  }
  0x14   : > { %9264 = vmatprep.subr.bf16.mxu0 %v10913_v8  ;;  %v10943_v42 = vld [vmem:[%s11438_s26 + $0x40] ss:$8 sps:$4 sm:$0xff]   ;;  %v10946_v47 = vld [vmem:[%s11438_s26 + $0x54] ss:$8 sps:$4 sm:$0xff]   ;;  %v10948_v51 = vld [vmem:[%s11438_s26 + $0x50] ss:$8 sps:$4 sm:$0xff]  }
  0x15   : > { %v11531_v44 = vld [vmem:[%s13541_s1] sm:$0xff]   ;;  %v11549_v48 = vld [vmem:[%s13541_s1 + $0x50] sm:$0xff]   ;;  %v11561_v50 = vld [vmem:[%s13541_s1 + $0x58] sm:$0xff]  }
  0x16   : > { %10644 = vmatpush3.bf16.msra.mxu1 %v11531_v44  ;;  %v11556_v49 = vld [vmem:[%s13541_s1 + $0x10] sm:$0xff]   ;;  %v11568_v52 = vld [vmem:[%s13541_s1 + $0x18] sm:$0xff]   ;;  %v10951_v53 = vld [vmem:[%s11438_s26 + $0x64] ss:$8 sps:$4 sm:$0xff]  }
  0x17   : > { %9265 = vmatpush3.bf16.msra.mxu0 %v10914_v9  ;;  %10637 = vmatprep.subr.bf16.mxu1 %v11536_v45  ;;  %v11575_v54 = vld [vmem:[%s13541_s1 + $0x60] sm:$0xff]   ;;  %v11588_v57 = vld [vmem:[%s13541_s1 + $0x68] sm:$0xff]   ;;  %v10955_v58 = vld [vmem:[%s11438_s26 + $0x74] ss:$8 sps:$4 sm:$0xff]  }
  0x18   : > { %9266 = vmatprep.subr.bf16.mxu0 %v10915_v10  ;;  %v11581_v55 = vld [vmem:[%s13541_s1 + $0x20] sm:$0xff]   ;;  %v11595_v59 = vld [vmem:[%s13541_s1 + $0x28] sm:$0xff]   ;;  %v11601_v60 = vld [vmem:[%s13541_s1 + $0x70] sm:$0xff]  }
  0x19   : > { %v10953_v56 = vld [vmem:[%s11438_s26 + $0x60] ss:$8 sps:$4 sm:$0xff]   ;;  %v11607_v61 = vld [vmem:[%s13541_s1 + $0x30] sm:$0xff]   ;;  %v11613_v62 = vld [vmem:[%s13541_s1 + $0x78] sm:$0xff]  }
  0x1a   : > { %10645 = vmatpush3.bf16.msra.mxu1 %v11542_v46  ;;  %v10958_v63 = vld [vmem:[%s11438_s26 + $0x70] ss:$8 sps:$4 sm:$0xff]   ;;  %v10959_v0 = vld [vmem:[%s11438_s26 + $0x84] ss:$8 sps:$4 sm:$0xff]   ;;  %v11018_v4 = vld [vmem:[%s11438_s26 + $0x200] ss:$8 sps:$4 sm:$0xff]  }
  0x1b   : > { %9267 = vmatpush3.bf16.msra.mxu0 %v10916_v12  ;;  %10638 = vmatprep.subr.bf16.mxu1 %v11549_v48  ;;  %v11020_v1 = vld [vmem:[%s11438_s26 + $0x204] ss:$8 sps:$4 sm:$0xff]   ;;  %v11622_v2 = vld [vmem:[%s13541_s1 + $0x38] sm:$0xff]   ;;  %v10962_v6 = vld [vmem:[%s11438_s26 + $0x80] ss:$8 sps:$4 sm:$0xff]  }
  0x1c   : > { %9268 = vmatprep.subr.bf16.mxu0 %v10917_v13  ;;  %1753 = vmatprep.mubr.bf16.mxu1 %v11020_v1  ;;  %v11021_v3 = vld [vmem:[%s13541_s1 + $0x40] sm:$0xff]   ;;  %v11028_v7 = vld [vmem:[%s13541_s1 + $0x48] sm:$0xff]   ;;  %v10966_v8 = vld [vmem:[%s11438_s26 + $0x94] ss:$8 sps:$4 sm:$0xff]  }
  0x1d   : > { %v11025_v5 = vld [vmem:[%s13541_s1] sm:$0xff]   ;;  %v11029_v9 = vld [vmem:[%s13541_s1 + $0x8] sm:$0xff]   ;;  %v11030_v10 = vld [vmem:[%s11438_s26 + $0x214] ss:$8 sps:$4 sm:$0xff]  }
  0x1e   : > { %10646 = vmatpush3.bf16.msra.mxu1 %v11556_v49  ;;  %v11033_v11 = vld [vmem:[%s13541_s1 + $0x50] sm:$0xff]   ;;  %vm13490_vm13 = vmor %vm8228_vm10, %vm8229_vm11  ;;  %vm8298_vm10 = vcmask 1046532  }
  0x1f   : > { %9269 = vmatpush3.bf16.msra.mxu0 %v10918_v14  ;;  %10639 = vmatprep.subr.bf16.mxu1 %v11561_v50  ;;  %v11032_v12 = vld [vmem:[%s11438_s26 + $0x210] ss:$8 sps:$4 sm:$0xff]   ;;  %v10985_v1 = vld [vmem:[%s11438_s26 + $0xd4] ss:$8 sps:$4 sm:$0xff]  }
  0x20   : > { %9270 = vmatprep.subr.bf16.mxu0 %v10919_v15  ;;  %v11037_v13 = vld [vmem:[%s13541_s1 + $0x10] sm:$0xff]   ;;  %v11038_v14 = vld [vmem:[%s13541_s1 + $0x58] sm:$0xff]  }
  0x21   : > { %v10964_v15 = vld [vmem:[%s11438_s26 + $0x90] ss:$8 sps:$4 sm:$0xff]  }
  0x22   : > { %10647 = vmatpush3.bf16.msra.mxu1 %v11568_v52 }
  0x23   : > { %9271 = vmatpush3.bf16.msra.mxu0 %v10920_v16  ;;  %10640 = vmatprep.subr.bf16.mxu1 %v11575_v54  ;;  %v11040_v16 = vld [vmem:[%s11438_s26 + $0x224] ss:$8 sps:$4 sm:$0xff]  }
  0x24   : > { %9326 = vmatprep.subr.bf16.mxu0 %v10924_v17  ;;  %v10968_v17 = vld [vmem:[%s13541_s1] sm:$0xff]  }
  0x26   : > { %556 = vmatmul.mubr.bf16.vlgmr.msra.gmra.mrb[0].mxu0 %v10921_v18  ;;  %10648 = vmatpush3.bf16.msra.mxu1 %v11581_v55  ;;  %v11039_v18 = vld [vmem:[%s13541_s1 + $0x18] sm:$0xff]  }
  0x27   : > { %9327 = vmatpush3.bf16.msra.mxu0 %v10925_v19  ;;  %563 = vmatprep.mubr.bf16.mxu0 %v10926_v20  ;;  %v10969_v19 = vld [vmem:[%s11438_s26 + $0xa4] ss:$8 sps:$4 sm:$0xff]  }
  0x28   : > { %9328 = vmatprep.subr.bf16.mxu0 %v10929_v21  ;;  %10641 = vmatprep.subr.bf16.mxu1 %v11588_v57  ;;  %v10972_v20 = vld [vmem:[%s13541_s1 + $0x48] sm:$0xff]   ;;  %v11043_v21 = vld [vmem:[%s13541_s1 + $0x60] sm:$0xff]  }
  0x2a   : > { %10649 = vmatpush3.bf16.msra.mxu1 %v11595_v59 }
  0x2b   : > { %9329 = vmatpush3.bf16.msra.mxu0 %v10930_v22  ;;  %10642 = vmatprep.subr.bf16.mxu1 %v11601_v60  ;;  %v10973_v22 = vld [vmem:[%s13541_s1 + $0x8] sm:$0xff]  }
  0x2c   : > { %9330 = vmatprep.subr.bf16.mxu0 %v10934_v23  ;;  %v11042_v23 = vld [vmem:[%s11438_s26 + $0x220] ss:$8 sps:$4 sm:$0xff]  }
  0x2e   : > { %564 = vmatmul.mubr.bf16.gmra.mrb[4].mxu0 %v10928_v24  ;;  %10650 = vmatpush3.bf16.msra.mxu1 %v11607_v61  ;;  %v11046_v24 = vld [vmem:[%s13541_s1 + $0x20] sm:$0xff]  }
  0x2f   : > { %571 = vmatprep.mubr.bf16.mxu0 %v10931_v25  ;;  %9331 = vmatpush3.bf16.msra.mxu0 %v10935_v26  ;;  %v11048_v25 = vld [vmem:[%s13541_s1 + $0x68] sm:$0xff]   ;;  %v11050_v26 = vld [vmem:[%s11438_s26 + $0x234] ss:$8 sps:$4 sm:$0xff]  }
  0x30   : > { %9332 = vmatprep.subr.bf16.mxu0 %v10939_v27  ;;  %10643 = vmatprep.subr.bf16.mxu1 %v11613_v62  ;;  %v10971_v27 = vld [vmem:[%s11438_s26 + $0xa0] ss:$8 sps:$4 sm:$0xff]  }
  0x32   : > { %10651 = vmatpush3.bf16.msra.mxu1 %v11622_v2 }
  0x33   : > { %9333 = vmatpush3.bf16.msra.mxu0 %v10940_v28  ;;  %9606 = vmatprep.subr.bf16.mxu1 %v11021_v3  ;;  %v10977_v28 = vld [vmem:[%s13541_s1 + $0x50] sm:$0xff]  }
  0x34   : > { %9334 = vmatprep.subr.bf16.mxu0 %v10944_v29  ;;  %v10974_v29 = vld [vmem:[%s11438_s26 + $0xb4] ss:$8 sps:$4 sm:$0xff]  }
  0x35   : > { %1754 = vmatmul.mubr.bf16.vlgmr.msra.gmra.mrb[0].mxu1 %v11018_v4  ;;  %v11013_v3 = vld [vmem:[%s13541_s1 + $0x30] sm:$0xff]   ;;  %v11024_v4 = vld [vmem:[%s13541_s1 + $0x78] sm:$0xff]  }
  0x36   : > { %572 = vmatmul.mubr.bf16.gmra.mrb[8].mxu0 %v10933_v30  ;;  %9607 = vmatpush3.bf16.msra.mxu1 %v11025_v5  ;;  %v10978_v30 = vld [vmem:[%s13541_s1 + $0x10] sm:$0xff]   ;;  %v11068_v5 = vld [vmem:[%s11438_s26 + $0x2e0] ss:$8 sps:$4 sm:$0xff]  }
  0x37   : > { %579 = vmatprep.mubr.bf16.mxu0 %v10936_v31  ;;  %9335 = vmatpush3.bf16.msra.mxu0 %v10945_v32  ;;  %v11049_v31 = vld [vmem:[%s13541_s1 + $0x28] sm:$0xff]   ;;  %v10982_v32 = vld [vmem:[%s13541_s1 + $0x58] sm:$0xff]  }
  0x38   : > { %9336 = vmatprep.subr.bf16.mxu0 %v10949_v33  ;;  %9608 = vmatprep.subr.bf16.mxu1 %v11028_v7  ;;  %v11053_v33 = vld [vmem:[%s13541_s1 + $0x70] sm:$0xff]  }
  0x39   : > { %1761 = vmatprep.mubr.bf16.mxu1 %v11030_v10  ;;  %v11072_v7 = vld [vmem:[%s11438_s26 + $0x2f4] ss:$8 sps:$4 sm:$0xff]   ;;  %v11098_v10 = vld [vmem:[%s13541_s1 + $0x48] sm:$0xff]  }
  0x3a   : > { %9609 = vmatpush3.bf16.msra.mxu1 %v11029_v9  ;;  %v11027_v9 = vld [vmem:[%s13541_s1 + $0x38] sm:$0xff]  }
  0x3b   : > { %9337 = vmatpush3.bf16.msra.mxu0 %v10950_v34  ;;  %9610 = vmatprep.subr.bf16.mxu1 %v11033_v11  ;;  %v11052_v34 = vld [vmem:[%s11438_s26 + $0x230] ss:$8 sps:$4 sm:$0xff]   ;;  %v11099_v11 = vld [vmem:[%s13541_s1 + $0x8] sm:$0xff]  }
  0x3c   : > { %9338 = vmatprep.subr.bf16.mxu0 %v10954_v35  ;;  %v11056_v35 = vld [vmem:[%s13541_s1 + $0x30] sm:$0xff]  }
  0x3d   : > { %1762 = vmatmul.mubr.bf16.gmra.mrb[4].mxu1 %v11032_v12  ;;  %v10988_v12 = vld [vmem:[%s11438_s26 + $0xd0] ss:$8 sps:$4 sm:$0xff]  }
  0x3e   : > { %580 = vmatmul.mubr.bf16.gmra.mrb[12].mxu0 %v10938_v36  ;;  %9611 = vmatpush3.bf16.msra.mxu1 %v11037_v13  ;;  %v11062_v36 = vld [vmem:[%s11438_s26 + $0x2d4] ss:$8 sps:$4 sm:$0xff]   ;;  %v10994_v13 = vld [vmem:[%s11438_s26 + $0xe4] ss:$8 sps:$4 sm:$0xff]  }
  0x3f   : > { %587 = vmatprep.mubr.bf16.mxu0 %v10941_v37  ;;  %9339 = vmatpush3.bf16.msra.mxu0 %v10957_v38  ;;  %v10983_v37 = vld [vmem:[%s13541_s1 + $0x18] sm:$0xff]  }
  0x40   : > { %9340 = vmatprep.subr.bf16.mxu0 %v10961_v39  ;;  %1769 = vmatprep.mubr.bf16.mxu1 %v11040_v16  ;;  %v11058_v38 = vld [vmem:[%s13541_s1 + $0x78] sm:$0xff]   ;;  %v10991_v39 = vld [vmem:[%s13541_s1 + $0x60] sm:$0xff]   ;;  %v11106_v16 = vld [vmem:[%s13541_s1 + $0x10] sm:$0xff]  }
  0x41   : > { %9612 = vmatprep.subr.bf16.mxu1 %v11038_v14  ;;  %v11102_v14 = vld [vmem:[%s13541_s1 + $0x50] sm:$0xff]  }
  0x42   : > { %9613 = vmatpush3.bf16.msra.mxu1 %v11039_v18  ;;  %v11109_v18 = vld [vmem:[%s13541_s1 + $0x58] sm:$0xff]  }
  0x43   : > { %9341 = vmatpush3.bf16.msra.mxu0 %v10963_v41  ;;  %9614 = vmatprep.subr.bf16.mxu1 %v11043_v21  ;;  %v10976_v41 = vld [vmem:[%s11438_s26 + $0xb0] ss:$8 sps:$4 sm:$0xff]   ;;  %v11080_v21 = vld [vmem:[%s11438_s26 + $0x300] ss:$8 sps:$4 sm:$0xff]  }
  0x44   : > { %9396 = vmatprep.subr.bf16.mxu0 %v10967_v43  ;;  %v10979_v43 = vld [vmem:[%s11438_s26 + $0xc4] ss:$8 sps:$4 sm:$0xff]  }
  0x45   : > { %1770 = vmatmul.mubr.bf16.gmra.mrb[8].mxu1 %v11042_v23  ;;  %v11084_v23 = vld [vmem:[%s11438_s26 + $0x314] ss:$8 sps:$4 sm:$0xff]  }
  0x46   : > { %588 = vmatmul.mubr.bf16.gmra.mrb[16].mxu0 %v10943_v42  ;;  %9615 = vmatpush3.bf16.msra.mxu1 %v11046_v24  ;;  %v11059_v42 = vld [vmem:[%s13541_s1 + $0x38] sm:$0xff]   ;;  %v11118_v24 = vld [vmem:[%s13541_s1 + $0x20] sm:$0xff]  }
  0x47   : > { %595 = vmatprep.mubr.bf16.mxu0 %v10946_v47  ;;  %1777 = vmatprep.mubr.bf16.mxu1 %v11050_v26  ;;  %v10992_v47 = vld [vmem:[%s13541_s1 + $0x20] sm:$0xff]   ;;  %v11121_v26 = vld [vmem:[%s13541_s1 + $0x68] sm:$0xff]  }
  0x48   : > { %9616 = vmatprep.subr.bf16.mxu1 %v11048_v25  ;;  %v11006_v25 = vld [vmem:[%s11438_s26 + $0xf0] ss:$8 sps:$4 sm:$0xff]  }
  0x4a   : > { %9617 = vmatpush3.bf16.msra.mxu1 %v11049_v31  ;;  %v11126_v31 = vld [vmem:[%s13541_s1 + $0x70] sm:$0xff]  }
  0x4b   : > { %9618 = vmatprep.subr.bf16.mxu1 %v11053_v33  ;;  %v11130_v33 = vld [vmem:[%s13541_s1 + $0x30] sm:$0xff]  }
  0x4d   : > { %1778 = vmatmul.mubr.bf16.gmra.mrb[12].mxu1 %v11052_v34  ;;  %v11022_v34 = vld [vmem:[%s11438_s26 + $0x114] ss:$8 sps:$4 sm:$0xff]  }
  0x4e   : > { %596 = vmatmul.mubr.bf16.gmra.mrb[20].mxu0 %v10948_v51  ;;  %9619 = vmatpush3.bf16.msra.mxu1 %v11056_v35  ;;  %v11000_v51 = vld [vmem:[%s13541_s1 + $0x68] sm:$0xff]   ;;  %v11133_v35 = vld [vmem:[%s13541_s1 + $0x78] sm:$0xff]  }
  0x4f   : > { %603 = vmatprep.mubr.bf16.mxu0 %v10951_v53  ;;  %2485 = vmatprep.mubr.bf16.mxu1 %v11062_v36  ;;  %v11060_v53 = vld [vmem:[%s11438_s26 + $0x2d0] ss:$8 sps:$4 sm:$0xff]  }
  0x50   : > { %9620 = vmatprep.subr.bf16.mxu1 %v11058_v38  ;;  %v11134_v36 = vld [vmem:[%s13541_s1 + $0x38] sm:$0xff]  }
  0x51   : > { %v11100_v38 = vld [vmem:[%s11438_s26 + $0x334] ss:$8 sps:$4 sm:$0xff]  }
  0x52   : > { %9621 = vmatpush3.bf16.msra.mxu1 %v11059_v42  ;;  %v8654_v42 = vld [vmem:[%s11438_s26 + $0x338] sm:$0xff] }
  0x55   : > { %2486 = vmatmul.mubr.bf16.vlgmr.msra.gmra.mrb[16].mxu1 %v11060_v53  ;;  %v11034_v53 = vld [vmem:[%s11438_s26 + $0x120] ss:$8 sps:$4 sm:$0xff]  }
  0x56   : > { %604 = vmatmul.mubr.bf16.gmra.mrb[24].mxu0 %v10953_v56  ;;  %v11066_v56 = vld [vmem:[%s11438_s26 + $0x2e4] ss:$8 sps:$4 sm:$0xff]  }
  0x57   : > { %611 = vmatprep.mubr.bf16.mxu0 %v10955_v58  ;;  %v11001_v58 = vld [vmem:[%s13541_s1 + $0x28] sm:$0xff]   ;;  %2493 = vmatprep.mubr.bf16.mxu1 %v11066_v56  ;;  %v8655_v56 = vld [vmem:[%s11438_s26 + $0x340] sm:$0xff] }
  0x5d   : > { %2494 = vmatmul.mubr.bf16.gmra.mrb[20].mxu1 %v11068_v5  ;;  %v8658_v5 = vld [vmem:[%s11438_s26 + $0x358] sm:$0xff] }
  0x5e   : > { %612 = vmatmul.mubr.bf16.gmra.mrb[28].mxu0 %v10958_v63  ;;  %v11009_v63 = vld [vmem:[%s13541_s1 + $0x70] sm:$0xff]   ;;  %2501 = vmatprep.mubr.bf16.mxu1 %v11072_v7 }
  0x5f   : > { %619 = vmatprep.mubr.bf16.mxu0 %v10959_v0  ;;  %v10981_v0 = vld [vmem:[%s11438_s26 + $0xc0] ss:$8 sps:$4 sm:$0xff]  }
  0x66   : > { %620 = vmatmul.mubr.bf16.gmra.mrb[32].mxu0 %v10962_v6  ;;  %v11093_v6 = vld [vmem:[%s13541_s1 + $0x40] sm:$0xff]  }
  0x67   : > { %941 = vmatprep.mubr.bf16.mxu0 %v10966_v8  ;;  %9746 = vmatprep.subr.bf16.mxu1 %v11093_v6  ;;  %v11096_v8 = vld [vmem:[%s13541_s1] sm:$0xff]  }
  0x68   : > { %9747 = vmatpush3.bf16.msra.mxu1 %v11096_v8  ;;  %v11054_v6 = vld [vmem:[%s11438_s26 + $0x144] ss:$8 sps:$4 sm:$0xff]   ;;  %v11139_v8 = vld [vmem:[%s11438_s26 + $0x3f4] ss:$8 sps:$4 sm:$0xff]  }
  0x69   : > { %9748 = vmatprep.subr.bf16.mxu1 %v11098_v10  ;;  %v11154_v10 = vld [vmem:[%s11438_s26 + $0x414] ss:$8 sps:$4 sm:$0xff]  }
  0x6c   : > { %9749 = vmatpush3.bf16.msra.mxu1 %v11099_v11  ;;  %v8752_v11 = vld [vmem:[%s11438_s26 + $0x418] sm:$0xff] }
  0x6d   : > { %9750 = vmatprep.subr.bf16.mxu1 %v11102_v14  ;;  %v11077_v14 = vld [vmem:[%s11438_s26 + $0x170] ss:$8 sps:$4 sm:$0xff]  }
  0x6e   : > { %942 = vmatmul.mubr.bf16.vlgmr.msra.gmra.mrb[36].mxu0 %v10964_v15  ;;  %v11074_v15 = vld [vmem:[%s11438_s26 + $0x2f0] ss:$8 sps:$4 sm:$0xff]  }
  0x6f   : > { %9397 = vmatpush3.bf16.msra.mxu0 %v10968_v17  ;;  %949 = vmatprep.mubr.bf16.mxu0 %v10969_v19  ;;  %v11078_v17 = vld [vmem:[%s11438_s26 + $0x304] ss:$8 sps:$4 sm:$0xff]   ;;  %v10997_v19 = vld [vmem:[%s11438_s26 + $0xe0] ss:$8 sps:$4 sm:$0xff]  }
  0x70   : > { %9398 = vmatprep.subr.bf16.mxu0 %v10972_v20  ;;  %9751 = vmatpush3.bf16.msra.mxu1 %v11106_v16  ;;  %v11003_v20 = vld [vmem:[%s11438_s26 + $0xf4] ss:$8 sps:$4 sm:$0xff]   ;;  %v8754_v16 = vld [vmem:[%s11438_s26 + $0x428] sm:$0xff] }
  0x71   : > { %2502 = vmatmul.mubr.bf16.gmra.mrb[24].mxu1 %v11074_v15  ;;  %9752 = vmatprep.subr.bf16.mxu1 %v11109_v18  ;;  %v8753_v15 = vld [vmem:[%s11438_s26 + $0x420] sm:$0xff] }
  0x72   : > { %2509 = vmatprep.mubr.bf16.mxu1 %v11078_v17  ;;  %v11164_v17 = vld [vmem:[%s11438_s26 + $0x434] ss:$8 sps:$4 sm:$0xff]   ;;  %v8772_v18 = vcombine.low %v8753_v15, %v8754_v16 }
  0x73   : > { %9399 = vmatpush3.bf16.msra.mxu0 %v10973_v22  ;;  %v11115_v22 = vld [vmem:[%s13541_s1 + $0x60] sm:$0xff]  }
  0x74   : > { %9400 = vmatprep.subr.bf16.mxu0 %v10977_v28  ;;  %v11086_v28 = vld [vmem:[%s11438_s26 + $0x310] ss:$8 sps:$4 sm:$0xff]  }
  0x76   : > { %950 = vmatmul.mubr.bf16.gmra.mrb[40].mxu0 %v10971_v27  ;;  %v11011_v27 = vld [vmem:[%s11438_s26 + $0x104] ss:$8 sps:$4 sm:$0xff]  }
  0x77   : > { %957 = vmatprep.mubr.bf16.mxu0 %v10974_v29  ;;  %9401 = vmatpush3.bf16.msra.mxu0 %v10978_v30  ;;  %v11123_v29 = vld [vmem:[%s13541_s1 + $0x28] sm:$0xff]  }
  0x78   : > { %9402 = vmatprep.subr.bf16.mxu0 %v10982_v32  ;;  %v11090_v30 = vld [vmem:[%s11438_s26 + $0x324] ss:$8 sps:$4 sm:$0xff]   ;;  %v11015_v32 = vld [vmem:[%s11438_s26 + $0x100] ss:$8 sps:$4 sm:$0xff]  }
  0x79   : > { %2510 = vmatmul.mubr.bf16.gmra.mrb[28].mxu1 %v11080_v21  ;;  %v11087_v21 = vld [vmem:[%s11438_s26 + $0x194] ss:$8 sps:$4 sm:$0xff]  }
  0x7a   : > { %2517 = vmatprep.mubr.bf16.mxu1 %v11084_v23  ;;  %v11171_v23 = vld [vmem:[%s11438_s26 + $0x444] ss:$8 sps:$4 sm:$0xff]  }
  0x7b   : > { %9403 = vmatpush3.bf16.msra.mxu0 %v10983_v37  ;;  %v11092_v37 = vld [vmem:[%s11438_s26 + $0x320] ss:$8 sps:$4 sm:$0xff]  }
  0x7c   : > { %9404 = vmatprep.subr.bf16.mxu0 %v10991_v39  ;;  %v11026_v39 = vld [vmem:[%s11438_s26 + $0x110] ss:$8 sps:$4 sm:$0xff]  }
  0x7e   : > { %958 = vmatmul.mubr.bf16.gmra.mrb[44].mxu0 %v10976_v41  ;;  %v8653_v41 = vld [vmem:[%s11438_s26 + $0x330] sm:$0xff] }
  0x7f   : > { %965 = vmatprep.mubr.bf16.mxu0 %v10979_v43  ;;  %9405 = vmatpush3.bf16.msra.mxu0 %v10992_v47  ;;  %v11036_v43 = vld [vmem:[%s11438_s26 + $0x124] ss:$8 sps:$4 sm:$0xff]   ;;  %v8672_v47 = vcombine.low %v8653_v41, %v8654_v42 }
  0x80   : > { %9406 = vmatprep.subr.bf16.mxu0 %v11000_v51  ;;  %v11112_v51 = vld [vmem:[%s11438_s26 + $0x344] ss:$8 sps:$4 sm:$0xff]  }
  0x81   : > { %2518 = vmatmul.mubr.bf16.gmra.mrb[32].mxu1 %v11086_v28  ;;  %v11116_v42 = vld [vmem:[%s11438_s26 + $0x1c4] ss:$8 sps:$4 sm:$0xff]  }
  0x82   : > { %2525 = vmatprep.mubr.bf16.mxu1 %v11090_v30  ;;  %v11097_v30 = vld [vmem:[%s11438_s26 + $0x1a0] ss:$8 sps:$4 sm:$0xff]  }
  0x83   : > { %9407 = vmatpush3.bf16.msra.mxu0 %v11001_v58  ;;  %v8656_v58 = vld [vmem:[%s11438_s26 + $0x348] sm:$0xff] }
  0x84   : > { %9408 = vmatprep.subr.bf16.mxu0 %v11009_v63  ;;  %v11044_v63 = vld [vmem:[%s11438_s26 + $0x134] ss:$8 sps:$4 sm:$0xff]  }
  0x86   : > { %966 = vmatmul.mubr.bf16.gmra.mrb[48].mxu0 %v10981_v0  ;;  %v8674_v0 = vcombine.low %v8655_v56, %v8656_v58  ;;  %v11111_v58 = vld [vmem:[%s13541_s1 + $0x48] sm:$0xff]  }
  0x87   : > { %973 = vmatprep.mubr.bf16.mxu0 %v10985_v1  ;;  %9409 = vmatpush3.bf16.msra.mxu0 %v11013_v3  ;;  %v11124_v1 = vld [vmem:[%s11438_s26 + $0x354] ss:$8 sps:$4 sm:$0xff]   ;;  %v11047_v3 = vld [vmem:[%s11438_s26 + $0x130] ss:$8 sps:$4 sm:$0xff]  }
  0x88   : > { %9410 = vmatprep.subr.bf16.mxu0 %v11024_v4  ;;  %v8657_v4 = vld [vmem:[%s11438_s26 + $0x350] sm:$0xff] }
  0x89   : > { %2526 = vmatmul.mubr.bf16.gmra.mrb[36].mxu1 %v11092_v37  ;;  %v8676_v7 = vcombine.low %v8657_v4, %v8658_v5  ;;  %v11103_v37 = vld [vmem:[%s11438_s26 + $0x1b0] ss:$8 sps:$4 sm:$0xff]   ;;  %v11114_v5 = vld [vmem:[%s13541_s1 + $0x8] sm:$0xff]  }
  0x8a   : > { %2533 = vmatprep.mubr.bf16.mxu1 %v11100_v38  ;;  %v8761_v38 = vld [vmem:[%s11438_s26 + $0x460] sm:$0xff] }
  0x8b   : > { %9411 = vmatpush3.bf16.msra.mxu0 %v11027_v9  ;;  %v8750_v9 = vld [vmem:[%s11438_s26 + $0x408] sm:$0xff] }
  0x8c   : > { %9466 = vmatprep.subr.bf16.mxu0 %v11518_v40  ;;  %v11110_v40 = vld [vmem:[%s13541_s1 + $0x18] sm:$0xff]  }
  0x8d   : > { %9753 = vmatpush3.bf16.msra.mxu1 %v11110_v40  ;;  %v11083_v40 = vld [vmem:[%s11438_s26 + $0x180] ss:$8 sps:$4 sm:$0xff]  }
  0x8e   : > { %974 = vmatmul.mubr.bf16.gmra.mrb[52].mxu0 %v10988_v12  ;;  %9754 = vmatprep.subr.bf16.mxu1 %v11115_v22  ;;  %v11075_v12 = vld [vmem:[%s11438_s26 + $0x174] ss:$8 sps:$4 sm:$0xff]  }
  0x8f   : > { %981 = vmatprep.mubr.bf16.mxu0 %v10994_v13 }
  0x91   : > { %9755 = vmatpush3.bf16.msra.mxu1 %v11118_v24  ;;  %v11089_v24 = vld [vmem:[%s11438_s26 + $0x190] ss:$8 sps:$4 sm:$0xff]  }
  0x92   : > { %9756 = vmatprep.subr.bf16.mxu1 %v11121_v26  ;;  %2534 = vmatmul.mubr.bf16.gmra.mrb[40].mxu1 %v8672_v47  ;;  %v8757_v26 = vld [vmem:[%s11438_s26 + $0x440] sm:$0xff] }
  0x93   : > { %2541 = vmatprep.mubr.bf16.mxu1 %v11112_v51 }
  0x95   : > { %9757 = vmatpush3.bf16.msra.mxu1 %v11123_v29  ;;  %v11178_v29 = vld [vmem:[%s11438_s26 + $0x454] ss:$8 sps:$4 sm:$0xff]  }
  0x96   : > { %982 = vmatmul.mubr.bf16.gmra.mrb[56].mxu0 %v10997_v19  ;;  %9758 = vmatprep.subr.bf16.mxu1 %v11126_v31  ;;  %v8755_v19 = vld [vmem:[%s11438_s26 + $0x430] sm:$0xff] }
  0x97   : > { %989 = vmatprep.mubr.bf16.mxu0 %v11003_v20  ;;  %v8756_v20 = vld [vmem:[%s11438_s26 + $0x438] sm:$0xff]  ;;  %v8759_v31 = vld [vmem:[%s11438_s26 + $0x450] sm:$0xff] }
  0x98   : > { %v8774_v22 = vcombine.low %v8755_v19, %v8756_v20 }
  0x99   : > { %9759 = vmatpush3.bf16.msra.mxu1 %v11130_v33  ;;  %v8760_v33 = vld [vmem:[%s11438_s26 + $0x458] sm:$0xff] }
  0x9a   : > { %9760 = vmatprep.subr.bf16.mxu1 %v11133_v35  ;;  %2542 = vmatmul.mubr.bf16.gmra.mrb[44].mxu1 %v8674_v0  ;;  %v8778_v35 = vcombine.low %v8759_v31, %v8760_v33  ;;  %v11148_v33 = vld [vmem:[%s11438_s26 + $0x1f4] ss:$8 sps:$4 sm:$0xff]  }
  0x9b   : > { %2549 = vmatprep.mubr.bf16.mxu1 %v11124_v1 }
  0x9d   : > { %9761 = vmatpush3.bf16.msra.mxu1 %v11134_v36  ;;  %v11882_v36 = vld [vmem:[%s13542_s2] ss:$0 sm:$0xff] }
  0x9e   : > { %990 = vmatmul.mubr.bf16.gmra.mrb[60].mxu0 %v11006_v25  ;;  %v11094_v25 = vld [vmem:[%s11438_s26 + $0x1a4] ss:$8 sps:$4 sm:$0xff]  }
  0x9f   : > { %997 = vmatprep.mubr.bf16.mxu0 %v11011_v27  ;;  %v8758_v27 = vld [vmem:[%s11438_s26 + $0x448] sm:$0xff] }
  0xa0   : > { %v8776_v28 = vcombine.low %v8757_v26, %v8758_v27  ;;  %v11144_v27 = vld [vmem:[%s13541_s1 + $0x28] sm:$0xff]  }
  0xa2   : > { %2550 = vmatmul.mubr.bf16.gmra.mrb[48].mxu1 %v8676_v7  ;;  %v11119_v7 = vld [vmem:[%s11438_s26 + $0x1c0] ss:$8 sps:$4 sm:$0xff]  }
  0xa3   : > { %3257 = vmatprep.mubr.bf16.mxu1 %v11139_v8  ;;  %v11120_v8 = vld [vmem:[%s13541_s1 + $0x50] sm:$0xff]  }
  0xa6   : > { %998 = vmatmul.mubr.bf16.gmra.mrb[64].mxu0 %v11015_v32  ;;  %v11105_v32 = vld [vmem:[%s11438_s26 + $0x1b4] ss:$8 sps:$4 sm:$0xff]  }
  0xa7   : > { %1005 = vmatprep.mubr.bf16.mxu0 %v11022_v34  ;;  %v11186_v34 = vld [vmem:[%s11438_s26 + $0x464] ss:$8 sps:$4 sm:$0xff]  }
  0xae   : > { %1006 = vmatmul.mubr.bf16.gmra.mrb[68].mxu0 %v11026_v39  ;;  %v8762_v39 = vld [vmem:[%s11438_s26 + $0x468] sm:$0xff] }
  0xaf   : > { %1327 = vmatprep.mubr.bf16.mxu0 %v11036_v43 }
  0xb6   : > { %1328 = vmatmul.mubr.bf16.vlgmr.msra.gmra.mrb[72].mxu0 %v11034_v53  ;;  %v11108_v53 = vld [vmem:[%s13541_s1] sm:$0xff]  }
  0xb7   : > { %9467 = vmatpush3.bf16.msra.mxu0 %v11531_v44  ;;  %1335 = vmatprep.mubr.bf16.mxu0 %v11044_v63  ;;  %v11057_v44 = vld [vmem:[%s11438_s26 + $0x140] ss:$8 sps:$4 sm:$0xff]   ;;  %v11193_v63 = vld [vmem:[%s11438_s26 + $0x474] ss:$8 sps:$4 sm:$0xff]  }
  0xb8   : > { %9468 = vmatprep.subr.bf16.mxu0 %v11536_v45  ;;  %v11063_v45 = vld [vmem:[%s11438_s26 + $0x154] ss:$8 sps:$4 sm:$0xff]  }
  0xbb   : > { %9469 = vmatpush3.bf16.msra.mxu0 %v11542_v46  ;;  %v11137_v46 = vld [vmem:[%s11438_s26 + $0x3f0] ss:$8 sps:$4 sm:$0xff]  }
  0xbc   : > { %9470 = vmatprep.subr.bf16.mxu0 %v11549_v48  ;;  %v11145_v48 = vld [vmem:[%s11438_s26 + $0x404] ss:$8 sps:$4 sm:$0xff]   ;;  %3258 = vmatmul.mubr.bf16.vlgmr.msra.gmra.mrb[52].mxu1 %v11137_v46 }
  0xbd   : > { %3265 = vmatprep.mubr.bf16.mxu1 %v11145_v48  ;;  %v11127_v48 = vld [vmem:[%s11438_s26 + $0x1d4] ss:$8 sps:$4 sm:$0xff]  }
  0xbe   : > { %1336 = vmatmul.mubr.bf16.gmra.mrb[76].mxu0 %v11047_v3  ;;  %v8780_v3 = vcombine.low %v8761_v38, %v8762_v39 }
  0xbf   : > { %1343 = vmatprep.mubr.bf16.mxu0 %v11054_v6  ;;  %9471 = vmatpush3.bf16.msra.mxu0 %v11556_v49  ;;  %v11065_v49 = vld [vmem:[%s11438_s26 + $0x150] ss:$8 sps:$4 sm:$0xff]  }
  0xc0   : > { %9472 = vmatprep.subr.bf16.mxu0 %v11561_v50  ;;  %v8749_v50 = vld [vmem:[%s11438_s26 + $0x400] sm:$0xff] }
  0xc3   : > { %9473 = vmatpush3.bf16.msra.mxu0 %v11568_v52  ;;  %v11069_v52 = vld [vmem:[%s11438_s26 + $0x164] ss:$8 sps:$4 sm:$0xff]  }
  0xc4   : > { %9474 = vmatprep.subr.bf16.mxu0 %v11575_v54  ;;  %v8768_v54 = vcombine.low %v8749_v50, %v8750_v9  ;;  %v8764_v50 = vld [vmem:[%s11438_s26 + $0x478] sm:$0xff] }
  0xc6   : > { %1344 = vmatmul.mubr.bf16.gmra.mrb[80].mxu0 %v11057_v44  ;;  %3266 = vmatmul.mubr.bf16.gmra.mrb[56].mxu1 %v8768_v54  ;;  %v8763_v44 = vld [vmem:[%s11438_s26 + $0x470] sm:$0xff] }
  0xc7   : > { %1351 = vmatprep.mubr.bf16.mxu0 %v11063_v45  ;;  %9475 = vmatpush3.bf16.msra.mxu0 %v11581_v55  ;;  %v11182_v55 = vld [vmem:[%s13543_s3 + $0x10] sm:$0xff]  }
  0xc8   : > { %9476 = vmatprep.subr.bf16.mxu0 %v11588_v57  ;;  %v11107_v57 = vld [vmem:[%s13541_s1 + $0x40] sm:$0xff]   ;;  %10136 = vmatprep.subr.bf16.mxu1 %v11182_v55 }
  0xc9   : > { %3273 = vmatprep.mubr.bf16.mxu1 %v11154_v10  ;;  %10137 = vmatpush3.bf16.msra.mxu1 %v11182_v55  ;;  %v11122_v10 = vld [vmem:[%s13541_s1 + $0x10] sm:$0xff]  }
  0xcb   : > { %9477 = vmatpush3.bf16.msra.mxu0 %v11595_v59  ;;  %v11071_v59 = vld [vmem:[%s11438_s26 + $0x160] ss:$8 sps:$4 sm:$0xff]  }
  0xcc   : > { %9478 = vmatprep.subr.bf16.mxu0 %v11601_v60  ;;  %v8751_v60 = vld [vmem:[%s11438_s26 + $0x410] sm:$0xff] }
  0xcd   : > { %v8770_v13 = vcombine.low %v8751_v60, %v8752_v11  ;;  %v8782_v11 = vcombine.low %v8763_v44, %v8764_v50 }
  0xce   : > { %1352 = vmatmul.mubr.bf16.gmra.mrb[84].mxu0 %v11065_v49 }
  0xcf   : > { %1359 = vmatprep.mubr.bf16.mxu0 %v11069_v52  ;;  %9479 = vmatpush3.bf16.msra.mxu0 %v11607_v61  ;;  %v11159_v61 = vld [vmem:[%s11438_s26 + $0x424] ss:$8 sps:$4 sm:$0xff]  }
  0xd0   : > { %9480 = vmatprep.subr.bf16.mxu0 %v11613_v62  ;;  %v11198_v62 = vld [vmem:[%s13543_s3 + $0x18] sm:$0xff]   ;;  %3274 = vmatmul.mubr.bf16.gmra.mrb[60].mxu1 %v8770_v13 }
  0xd1   : > { %10138 = vmatprep.subr.bf16.mxu1 %v11198_v62  ;;  %3281 = vmatprep.mubr.bf16.mxu1 %v11159_v61  ;;  %v11132_v13 = vld [vmem:[%s13541_s1 + $0x18] sm:$0xff]  }
  0xd2   : > { %10139 = vmatpush3.bf16.msra.mxu1 %v11198_v62  ;;  %v11131_v62 = vld [vmem:[%s11438_s26 + $0x1d0] ss:$8 sps:$4 sm:$0xff]  }
  0xd3   : > { %9481 = vmatpush3.bf16.msra.mxu0 %v11622_v2  ;;  %v11081_v2 = vld [vmem:[%s11438_s26 + $0x184] ss:$8 sps:$4 sm:$0xff]  }
  0xd4   : > { %9536 = vmatprep.subr.bf16.mxu0 %v11107_v57  ;;  %v11129_v57 = vld [vmem:[%s13541_s1 + $0x58] sm:$0xff]  }
  0xd6   : > { %1360 = vmatmul.mubr.bf16.gmra.mrb[88].mxu0 %v11071_v59 }
  0xd7   : > { %1367 = vmatprep.mubr.bf16.mxu0 %v11075_v12 }
  0xd8   : > { %3282 = vmatmul.mubr.bf16.gmra.mrb[64].mxu1 %v8772_v18  ;;  %v11136_v18 = vld [vmem:[%s13541_s1 + $0x20] sm:$0xff]  }
  0xd9   : > { %3289 = vmatprep.mubr.bf16.mxu1 %v11164_v17 }
  0xde   : > { %1368 = vmatmul.mubr.bf16.gmra.mrb[92].mxu0 %v11077_v14  ;;  %v11135_v14 = vld [vmem:[%s13541_s1 + $0x60] sm:$0xff]  }
  0xdf   : > { %1375 = vmatprep.mubr.bf16.mxu0 %v11081_v2  ;;  %v11140_v2 = vld [vmem:[%s11438_s26 + $0x1e4] ss:$8 sps:$4 sm:$0xff]  }
  0xe0   : > { %3290 = vmatmul.mubr.bf16.gmra.mrb[68].mxu1 %v8774_v22 }
  0xe1   : > { %3297 = vmatprep.mubr.bf16.mxu1 %v11171_v23  ;;  %v11143_v23 = vld [vmem:[%s13541_s1 + $0x68] sm:$0xff]  }
  0xe6   : > { %1376 = vmatmul.mubr.bf16.gmra.mrb[96].mxu0 %v11083_v40 }
  0xe7   : > { %1383 = vmatprep.mubr.bf16.mxu0 %v11087_v21  ;;  %v11930_v21 = vld [vmem:[%s13543_s3] sm:$0xff]  }
  0xe8   : > { %3298 = vmatmul.mubr.bf16.gmra.mrb[72].mxu1 %v8776_v28  ;;  %10156 = vmatprep.subr.bf16.mxu1 %v11930_v21 }
  0xe9   : > { %3305 = vmatprep.mubr.bf16.mxu1 %v11178_v29  ;;  %v11142_v29 = vld [vmem:[%s11438_s26 + $0x1e0] ss:$8 sps:$4 sm:$0xff]  }
  0xee   : > { %1384 = vmatmul.mubr.bf16.gmra.mrb[100].mxu0 %v11089_v24 }
  0xef   : > { %1391 = vmatprep.mubr.bf16.mxu0 %v11094_v25 }
  0xf0   : > { %3306 = vmatmul.mubr.bf16.gmra.mrb[76].mxu1 %v8778_v35  ;;  %v11150_v35 = vld [vmem:[%s13541_s1 + $0x30] sm:$0xff]  }
  0xf1   : > { %3313 = vmatprep.mubr.bf16.mxu1 %v11186_v34 }
  0xf6   : > { %1392 = vmatmul.mubr.bf16.gmra.mrb[104].mxu0 %v11097_v30  ;;  %v11147_v30 = vld [vmem:[%s13541_s1 + $0x70] sm:$0xff]  }
  0xf7   : > { %1713 = vmatprep.mubr.bf16.mxu0 %v11105_v32 }
  0xf8   : > { %3314 = vmatmul.mubr.bf16.gmra.mrb[80].mxu1 %v8780_v3  ;;  %v11151_v3 = vld [vmem:[%s11438_s26 + $0x1f0] ss:$8 sps:$4 sm:$0xff]  }
  0xf9   : > { %v9272_v41 = vpop.f32.mrb[0].mxu0  ;;  %3321 = vmatprep.mubr.bf16.mxu1 %v11193_v63  ;;  %v11153_v63 = vld [vmem:[%s13541_s1 + $0x38] sm:$0xff]  }
  0xfa   : > { %v9273_v43 = vpop.f32.mrb[1].mxu0 }
  0xfb   : > { %v9274_v47 = vadd.f32 %v9273_v43, %v9272_v41  ;;  %v9275_v51 = vpop.f32.mrb[2].mxu0  ;;  %v11152_v41 = vld [vmem:[%s13541_s1 + $0x78] sm:$0xff]  }
  0xfc   : > { %v9276_v56 = vpop.f32.mrb[3].mxu0 }
  0xfd   : > { %v558_v0 = vadd.f32 %v9274_v47, %v11882_v36  ;;  %v9277_v1 = vadd.f32 %v9276_v56, %v9275_v51 }
  0xfe   : > { %1714 = vmatmul.mubr.bf16.vlgmr.msra.gmra.mrb[108].mxu0 %v11103_v37 }
  0xff   : > { %v561_v4 = vadd.f32 %v9277_v1, %v11882_v36  ;;  %9537 = vmatpush3.bf16.msra.mxu0 %v11108_v53  ;;  %1721 = vmatprep.mubr.bf16.mxu0 %v11116_v42  ;;  %v628_v6 = vmax.f32 %v558_v0, 0.0 }
 0x100   : > { %9538 = vmatprep.subr.bf16.mxu0 %v11111_v58  ;;  %3322 = vmatmul.mubr.bf16.gmra.mrb[84].mxu1 %v8782_v11  ;;  %v11156_v11 = vld [vmem:[%s11438_s26 + $0x240] ss:$8 sps:$4 sm:$0xff]  }
 0x101   : > { %v629_v45 = vmax.f32 %v561_v4, 0.0  ;;  %v9278_v46 = vpop.f32.mrb[4].mxu0  ;;  %v11169_v4 = vld [vmem:[%s13541_s1 + $0x40] sm:$0xff]  }
 0x102   : > { %v9279_v49 = vpop.f32.mrb[5].mxu0 }
 0x103   : > { %v646_v9 = vpack.c.bf16 %v629_v45, %v628_v6  ;;  %v9280_v52 = vadd.f32 %v9279_v49, %v9278_v46  ;;  %v9281_v54 = vpop.f32.mrb[6].mxu0  ;;  %9539 = vmatpush3.bf16.msra.mxu0 %v11114_v5 }
 0x104   : > { %v9282_v55 = vpop.f32.mrb[7].mxu0  ;;  %9540 = vmatprep.subr.bf16.mxu0 %v11120_v8  ;;  %v11158_v8 = vld [vmem:[%s11438_s26 + $0x244] ss:$8 sps:$4 sm:$0xff]  }
 0x105   : > { %656 = vst.msk [vmem:[#allocation2] sm:$0xff] %vm655_vm0, %v646_v9  ;;  %v566_v59 = vadd.f32 %v9280_v52, %v11882_v36  ;;  %v9283_v60 = vadd.f32 %v9282_v55, %v9281_v54 }
 0x106   : > { %1722 = vmatmul.mubr.bf16.gmra.mrb[112].mxu0 %v11119_v7 }
 0x107   : > { %v569_v12 = vadd.f32 %v9283_v60, %v11882_v36  ;;  %9541 = vmatpush3.bf16.msra.mxu0 %v11122_v10  ;;  %1729 = vmatprep.mubr.bf16.mxu0 %v11127_v48  ;;  %v630_v61 = vmax.f32 %v566_v59, 0.0 }
 0x108   : > { %9542 = vmatprep.subr.bf16.mxu0 %v11129_v57 }
 0x109   : > { %v631_v15 = vmax.f32 %v569_v12, 0.0  ;;  %v9284_v16 = vpop.f32.mrb[8].mxu0 }
 0x10a   : > { %v9285_v17 = vpop.f32.mrb[9].mxu0 }
 0x10b   : > { %v647_v40 = vpack.c.bf16 %v631_v15, %v630_v61  ;;  %v9286_v19 = vadd.f32 %v9285_v17, %v9284_v16  ;;  %v9287_v20 = vpop.f32.mrb[10].mxu0  ;;  %9543 = vmatpush3.bf16.msra.mxu0 %v11132_v13 }
 0x10c   : > { %v9288_v22 = vpop.f32.mrb[11].mxu0  ;;  %9544 = vmatprep.subr.bf16.mxu0 %v11135_v14 }
 0x10d   : > { %657 = vst.msk [vmem:[#allocation2 + $0x8] sm:$0xff] %vm655_vm0, %v647_v40  ;;  %v574_v24 = vadd.f32 %v9286_v19, %v11882_v36  ;;  %v9289_v25 = vadd.f32 %v9288_v22, %v9287_v20  ;;  %v11176_v19 = vld [vmem:[%s13541_s1 + $0x48] sm:$0xff]  }
 0x10e   : > { %1730 = vmatmul.mubr.bf16.gmra.mrb[116].mxu0 %v11131_v62  ;;  %v11161_v62 = vld [vmem:[%s11438_s26 + $0x254] ss:$8 sps:$4 sm:$0xff]  }
 0x10f   : > { %v577_v26 = vadd.f32 %v9289_v25, %v11882_v36  ;;  %9545 = vmatpush3.bf16.msra.mxu0 %v11136_v18  ;;  %1737 = vmatprep.mubr.bf16.mxu0 %v11140_v2  ;;  %v632_v28 = vmax.f32 %v574_v24, 0.0  ;;  %v11170_v18 = vld [vmem:[%s13541_s1] sm:$0xff]  }
 0x110   : > { %9546 = vmatprep.subr.bf16.mxu0 %v11143_v23 }
 0x111   : > { %v633_v31 = vmax.f32 %v577_v26, 0.0  ;;  %v9290_v32 = vpop.f32.mrb[12].mxu0 }
 0x112   : > { %v9291_v34 = vpop.f32.mrb[13].mxu0 }
 0x113   : > { %v648_v37 = vpack.c.bf16 %v633_v31, %v632_v28  ;;  %v9292_v38 = vadd.f32 %v9291_v34, %v9290_v32  ;;  %v9293_v39 = vpop.f32.mrb[14].mxu0  ;;  %9547 = vmatpush3.bf16.msra.mxu0 %v11144_v27  ;;  %v11177_v28 = vld [vmem:[%s13541_s1 + $0x8] sm:$0xff]  }
 0x114   : > { %v9294_v42 = vpop.f32.mrb[15].mxu0  ;;  %9548 = vmatprep.subr.bf16.mxu0 %v11147_v30  ;;  %v11953_v43 = vld [vmem:[#allocation2 + $0x8] sm:$0xff]  ;;  %v11184_v30 = vld [vmem:[%s13541_s1 + $0x50] sm:$0xff]  }
 0x115   : > { %658 = vst.msk [vmem:[#allocation2 + $0x10] sm:$0xff] %vm655_vm0, %v648_v37  ;;  %v582_v47 = vadd.f32 %v9292_v38, %v11882_v36  ;;  %v9295_v51 = vadd.f32 %v9294_v42, %v9293_v39  ;;  %v4221_v53 = vshll.u32 %v11953_v43, 16  ;;  %v4225_v56 = vshrl.u32 %v11953_v43, 16  ;;  %v11163_v37 = vld [vmem:[%s11438_s26 + $0x250] ss:$8 sps:$4 sm:$0xff]   ;;  %v11269_v43 = vld [vmem:[%s13543_s3 + $0x48] sm:$0xff]  }
 0x116   : > { %1738 = vmatmul.mubr.bf16.gmra.mrb[120].mxu0 %v11142_v29 }
 0x117   : > { %v585_v58 = vadd.f32 %v9295_v51, %v11882_v36  ;;  %1745 = vmatprep.mubr.bf16.mxu0 %v11148_v33  ;;  %9549 = vmatpush3.bf16.msra.mxu0 %v11150_v35  ;;  %v5844_v0 = vrot.slane %v4225_v56, 5  ;;  %v634_v1 = vmax.f32 %v582_v47, 0.0  ;;  %v5845_v5 = vrot.slane %v4221_v53, 6  ;;  %v11166_v47 = vld [vmem:[%s11438_s26 + $0x264] ss:$8 sps:$4 sm:$0xff]   ;;  %v11185_v51 = vld [vmem:[%s13541_s1 + $0x10] sm:$0xff]  }
 0x118   : > { %9550 = vmatprep.subr.bf16.mxu0 %v11152_v41 }
 0x119   : > { %v635_v6 = vmax.f32 %v585_v58, 0.0  ;;  %v9296_v7 = vpop.f32.mrb[16].mxu0  ;;  %v11972_v45 = vor.u32 %v5845_v5, %v5844_v0 }
 0x11a   : > { %v9297_v44 = vpop.f32.mrb[17].mxu0 }
 0x11b   : > { %v649_v46 = vpack.c.bf16 %v635_v6, %v634_v1  ;;  %v9298_v48 = vadd.f32 %v9297_v44, %v9296_v7  ;;  %v9299_v49 = vpop.f32.mrb[18].mxu0  ;;  %9551 = vmatpush3.bf16.msra.mxu0 %v11153_v63  ;;  %v11191_v63 = vld [vmem:[%s13541_s1 + $0x58] sm:$0xff]  }
 0x11c   : > { %v9300_v50 = vpop.f32.mrb[19].mxu0  ;;  %9676 = vmatprep.subr.bf16.mxu0 %v11169_v4  ;;  %v11974_v9 = vld [vmem:[#allocation2 + $0x10] sm:$0xff] }
 0x11d   : > { %659 = vst.msk [vmem:[#allocation2 + $0x18] sm:$0xff] %vm655_vm0, %v649_v46  ;;  %v590_v52 = vadd.f32 %v9298_v48, %v11882_v36  ;;  %v9301_v54 = vadd.f32 %v9300_v50, %v9299_v49  ;;  %v4229_v10 = vshll.u32 %v11974_v9, 16  ;;  %v4233_v55 = vshrl.u32 %v11974_v9, 16  ;;  %v11199_v46 = vld [vmem:[%s13541_s1 + $0x60] sm:$0xff]  }
 0x11e   : > { %1746 = vmatmul.mubr.bf16.gmra.mrb[124].mxu0 %v11151_v3 }
 0x11f   : > { %v593_v57 = vadd.f32 %v9301_v54, %v11882_v36  ;;  %2099 = vmatprep.mubr.bf16.mxu0 %v11158_v8  ;;  %v5848_v59 = vrot.slane %v4233_v55, 5  ;;  %v636_v60 = vmax.f32 %v590_v52, 0.0  ;;  %v5849_v12 = vrot.slane %v4229_v10, 6  ;;  %v11192_v8 = vld [vmem:[%s13541_s1 + $0x18] sm:$0xff]  }
 0x121   : > { %v637_v13 = vmax.f32 %v593_v57, 0.0  ;;  %v9302_v61 = vpop.f32.mrb[20].mxu0  ;;  %v5850_v15 = vor.u32 %v5849_v12, %v5848_v59  ;;  %v11168_v57 = vld [vmem:[%s11438_s26 + $0x260] ss:$8 sps:$4 sm:$0xff]  }
 0x122   : > { %v9303_v14 = vpop.f32.mrb[21].mxu0 }
 0x123   : > { %v650_v16 = vpack.c.bf16 %v637_v13, %v636_v60  ;;  %v9304_v2 = vadd.f32 %v9303_v14, %v9302_v61  ;;  %v9305_v17 = vpop.f32.mrb[22].mxu0  ;;  %v11997_v22 = vsel %vm5835_vm1, %v11972_v45, %v5850_v15  ;;  %v11173_v13 = vld [vmem:[%s11438_s26 + $0x274] ss:$8 sps:$4 sm:$0xff]   ;;  %v11200_v61 = vld [vmem:[%s13541_s1 + $0x20] sm:$0xff]   ;;  %v11204_v14 = vld [vmem:[%s13541_s1 + $0x68] sm:$0xff]  }
 0x124   : > { %v9306_v40 = vpop.f32.mrb[23].mxu0  ;;  %v11993_v20 = vld [vmem:[#allocation2 + $0x18] sm:$0xff] }
 0x125   : > { %660 = vst.msk [vmem:[#allocation2 + $0x20] sm:$0xff] %vm655_vm0, %v650_v16  ;;  %v598_v23 = vadd.f32 %v9304_v2, %v11882_v36  ;;  %v9307_v24 = vadd.f32 %v9306_v40, %v9305_v17  ;;  %v4237_v25 = vshll.u32 %v11993_v20, 16  ;;  %v4241_v26 = vshrl.u32 %v11993_v20, 16  ;;  %v9512_v16 = vpop.f32.mrb[0].mxu1 }
 0x126   : > { %2100 = vmatmul.mubr.bf16.vlgmr.msra.gmra.mrb[128].mxu0 %v11156_v11  ;;  %v9513_v40 = vpop.f32.mrb[1].mxu1 }
 0x127   : > { %v601_v27 = vadd.f32 %v9307_v24, %v11882_v36  ;;  %2107 = vmatprep.mubr.bf16.mxu0 %v11161_v62  ;;  %9677 = vmatpush3.bf16.msra.mxu0 %v11170_v18  ;;  %v5852_v29 = vrot.slane %v4241_v26, 5  ;;  %v5853_v31 = vrot.slane %v4237_v25, 6  ;;  %v638_v32 = vmax.f32 %v598_v23, 0.0 }
 0x128   : > { %9678 = vmatprep.subr.bf16.mxu0 %v11176_v19  ;;  %v9514_v24 = vadd.f32 %v9513_v40, %v9512_v16  ;;  %v11217_v40 = vld [vmem:[%s13541_s1 + $0x40] sm:$0xff]  }
 0x129   : > { %v639_v33 = vmax.f32 %v601_v27, 0.0  ;;  %v9308_v34 = vpop.f32.mrb[24].mxu0  ;;  %v5854_v38 = vor.u32 %v5853_v31, %v5852_v29  ;;  %v9515_v27 = vpop.f32.mrb[2].mxu1  ;;  %v11205_v29 = vld [vmem:[%s13541_s1 + $0x28] sm:$0xff]  }
 0x12a   : > { %v9309_v35 = vpop.f32.mrb[25].mxu0  ;;  %v9516_v31 = vpop.f32.mrb[3].mxu1 }
 0x12b   : > { %v651_v39 = vpack.c.bf16 %v639_v33, %v638_v32  ;;  %v9310_v41 = vadd.f32 %v9309_v35, %v9308_v34  ;;  %v9311_v42 = vpop.f32.mrb[26].mxu0  ;;  %9679 = vmatpush3.bf16.msra.mxu0 %v11177_v28  ;;  %v12025_v1 = vsel %vm5835_vm1, %v5850_v15, %v5854_v38  ;;  %v11208_v33 = vld [vmem:[%s13541_s1 + $0x70] sm:$0xff]   ;;  %v9517_v35 = vadd.f32 %v9516_v31, %v9515_v27 }
 0x12c   : > { %v9312_v58 = vpop.f32.mrb[27].mxu0  ;;  %9680 = vmatprep.subr.bf16.mxu0 %v11184_v30  ;;  %v12022_v0 = vld [vmem:[#allocation2 + $0x20] sm:$0xff] }
 0x12d   : > { %661 = vst.msk [vmem:[#allocation2 + $0x28] sm:$0xff] %vm655_vm0, %v651_v39  ;;  %v606_v3 = vadd.f32 %v9310_v41, %v11882_v36  ;;  %v9313_v4 = vadd.f32 %v9312_v58, %v9311_v42  ;;  %v4245_v5 = vshll.u32 %v12022_v0, 16  ;;  %v4249_v6 = vshrl.u32 %v12022_v0, 16  ;;  %v12066_v30 = vld [vmem:[%s13542_s2] ss:$0 sm:$0xff] }
 0x12e   : > { %2108 = vmatmul.mubr.bf16.gmra.mrb[132].mxu0 %v11163_v37  ;;  %v1756_v34 = vadd.f32 %v9514_v24, %v12066_v30  ;;  %v1759_v58 = vadd.f32 %v9517_v35, %v12066_v30 }
 0x12f   : > { %v609_v7 = vadd.f32 %v9313_v4, %v11882_v36  ;;  %2115 = vmatprep.mubr.bf16.mxu0 %v11166_v47  ;;  %9681 = vmatpush3.bf16.msra.mxu0 %v11185_v51  ;;  %v5856_v44 = vrot.slane %v4249_v6, 5  ;;  %v5857_v48 = vrot.slane %v4245_v5, 6  ;;  %v640_v49 = vmax.f32 %v606_v3, 0.0  ;;  %v11175_v47 = vld [vmem:[%s11438_s26 + $0x270] ss:$8 sps:$4 sm:$0xff]  }
 0x130   : > { %9682 = vmatprep.subr.bf16.mxu0 %v11191_v63  ;;  %v1796_v51 = vmax.f32 %v1756_v34, 0.0  ;;  %v11183_v34 = vld [vmem:[%s11438_s26 + $0x280] ss:$8 sps:$4 sm:$0xff]  }
 0x131   : > { %v641_v50 = vmax.f32 %v609_v7, 0.0  ;;  %v9314_v52 = vpop.f32.mrb[28].mxu0  ;;  %v5858_v59 = vor.u32 %v5857_v48, %v5856_v44  ;;  %v11209_v44 = vld [vmem:[%s13541_s1 + $0x30] sm:$0xff]   ;;  %v11210_v48 = vld [vmem:[%s13541_s1 + $0x78] sm:$0xff]  }
 0x132   : > { %v9315_v54 = vpop.f32.mrb[29].mxu0 }
 0x133   : > { %v652_v60 = vpack.c.bf16 %v641_v50, %v640_v49  ;;  %v9316_v11 = vadd.f32 %v9315_v54, %v9314_v52  ;;  %v9317_v12 = vpop.f32.mrb[30].mxu0  ;;  %9683 = vmatpush3.bf16.msra.mxu0 %v11192_v8  ;;  %v12053_v2 = vsel %vm5835_vm1, %v5854_v38, %v5858_v59  ;;  %v11180_v8 = vld [vmem:[%s11438_s26 + $0x284] ss:$8 sps:$4 sm:$0xff]   ;;  %v1797_v50 = vmax.f32 %v1759_v58, 0.0  ;;  %v9518_v52 = vpop.f32.mrb[4].mxu1 }
 0x134   : > { %v9318_v62 = vpop.f32.mrb[31].mxu0  ;;  %9684 = vmatprep.subr.bf16.mxu0 %v11199_v46  ;;  %v12050_v15 = vld [vmem:[#allocation2 + $0x28] sm:$0xff] }
 0x135   : > { %662 = vst.msk [vmem:[#allocation2 + $0x30] sm:$0xff] %vm655_vm0, %v652_v60  ;;  %v614_v17 = vadd.f32 %v9316_v11, %v11882_v36  ;;  %v9319_v18 = vadd.f32 %v9318_v62, %v9317_v12  ;;  %v4253_v19 = vshll.u32 %v12050_v15, 16  ;;  %v4257_v23 = vshrl.u32 %v12050_v15, 16  ;;  %v9519_v11 = vpop.f32.mrb[5].mxu1 }
 0x136   : > { %2116 = vmatmul.mubr.bf16.gmra.mrb[136].mxu0 %v11168_v57  ;;  %v9520_v62 = vadd.f32 %v9519_v11, %v9518_v52 }
 0x137   : > { %v617_v28 = vadd.f32 %v9319_v18, %v11882_v36  ;;  %2123 = vmatprep.mubr.bf16.mxu0 %v11173_v13  ;;  %9685 = vmatpush3.bf16.msra.mxu0 %v11200_v61  ;;  %v5860_v32 = vrot.slane %v4257_v23, 5  ;;  %v5861_v37 = vrot.slane %v4253_v19, 6  ;;  %v642_v38 = vmax.f32 %v614_v17, 0.0 }
 0x138   : > { %9686 = vmatprep.subr.bf16.mxu0 %v11204_v14  ;;  %v1809_v61 = vpack.c.bf16 %v1797_v50, %v1796_v51  ;;  %v9521_v14 = vpop.f32.mrb[6].mxu1  ;;  %v1764_v24 = vadd.f32 %v9520_v62, %v12066_v30 }
 0x139   : > { %v643_v39 = vmax.f32 %v617_v28, 0.0  ;;  %v9320_v41 = vpop.f32.mrb[32].mxu0  ;;  %v5862_v63 = vor.u32 %v5861_v37, %v5860_v32  ;;  %v9522_v17 = vpop.f32.mrb[7].mxu1 }
 0x13a   : > { %v9321_v42 = vpop.f32.mrb[33].mxu0  ;;  %1819 = vst.msk [vmem:[#allocation2 + $0x100] sm:$0xff] %vm655_vm0, %v1809_v61  ;;  %v9523_v27 = vadd.f32 %v9522_v17, %v9521_v14  ;;  %v1798_v35 = vmax.f32 %v1764_v24, 0.0 }
 0x13b   : > { %v653_v3 = vpack.c.bf16 %v643_v39, %v642_v38  ;;  %v9322_v4 = vadd.f32 %v9321_v42, %v9320_v41  ;;  %v9323_v7 = vpop.f32.mrb[34].mxu0  ;;  %9687 = vmatpush3.bf16.msra.mxu0 %v11205_v29  ;;  %v12088_v54 = vsel %vm5835_vm1, %v5858_v59, %v5862_v63  ;;  %v11211_v59 = vld [vmem:[%s13541_s1 + $0x38] sm:$0xff]  }
 0x13c   : > { %v9324_v46 = vpop.f32.mrb[35].mxu0  ;;  %9688 = vmatprep.subr.bf16.mxu0 %v11208_v33  ;;  %v12085_v49 = vld [vmem:[#allocation2 + $0x30] sm:$0xff]  ;;  %v1767_v37 = vadd.f32 %v9523_v27, %v12066_v30 }
 0x13d   : > { %663 = vst.msk [vmem:[#allocation2 + $0x38] sm:$0xff] %vm655_vm0, %v653_v3  ;;  %v622_v57 = vadd.f32 %v9322_v4, %v11882_v36  ;;  %v9325_v60 = vadd.f32 %v9324_v46, %v9323_v7  ;;  %v4261_v12 = vshll.u32 %v12085_v49, 16  ;;  %v4265_v13 = vshrl.u32 %v12085_v49, 16  ;;  %v9524_v4 = vpop.f32.mrb[8].mxu1 }
 0x13e   : > { %2124 = vmatmul.mubr.bf16.gmra.mrb[140].mxu0 %v11175_v47  ;;  %v11188_v47 = vld [vmem:[%s11438_s26 + $0x294] ss:$8 sps:$4 sm:$0xff]   ;;  %v1799_v3 = vmax.f32 %v1767_v37, 0.0  ;;  %v9525_v46 = vpop.f32.mrb[9].mxu1 }
 0x13f   : > { %v625_v16 = vadd.f32 %v9325_v60, %v11882_v36  ;;  %2131 = vmatprep.mubr.bf16.mxu0 %v11180_v8  ;;  %9689 = vmatpush3.bf16.msra.mxu0 %v11209_v44  ;;  %v5864_v18 = vrot.slane %v4265_v13, 5  ;;  %v5865_v28 = vrot.slane %v4261_v12, 6  ;;  %v644_v29 = vmax.f32 %v622_v57, 0.0  ;;  %v9527_v57 = vpop.f32.mrb[10].mxu1 }
 0x140   : > { %9690 = vmatprep.subr.bf16.mxu0 %v11210_v48  ;;  %v1810_v50 = vpack.c.bf16 %v1799_v3, %v1798_v35  ;;  %v9526_v52 = vadd.f32 %v9525_v46, %v9524_v4 }
 0x141   : > { %v645_v31 = vmax.f32 %v625_v16, 0.0  ;;  %v9342_v32 = vpop.f32.mrb[36].mxu0  ;;  %v5866_v38 = vor.u32 %v5865_v28, %v5864_v18 }
 0x142   : > { %v9343_v33 = vpop.f32.mrb[37].mxu0  ;;  %1820 = vst.msk [vmem:[#allocation2 + $0x108] sm:$0xff] %vm655_vm0, %v1810_v50  ;;  %v1772_v61 = vadd.f32 %v9526_v52, %v12066_v30 }
 0x143   : > { %v654_v39 = vpack.c.bf16 %v645_v31, %v644_v29  ;;  %v9344_v41 = vadd.f32 %v9343_v33, %v9342_v32  ;;  %v9345_v42 = vpop.f32.mrb[38].mxu0  ;;  %9691 = vmatpush3.bf16.msra.mxu0 %v11211_v59  ;;  %v12113_v7 = vsel %vm5835_vm1, %v5862_v63, %v5866_v38  ;;  %v9528_v63 = vpop.f32.mrb[11].mxu1  ;;  %v11195_v33 = vld [vmem:[%s11438_s26 + $0x2a4] ss:$8 sps:$4 sm:$0xff]  }
 0x144   : > { %v9346_v51 = vpop.f32.mrb[39].mxu0  ;;  %9816 = vmatprep.subr.bf16.mxu0 %v11217_v40  ;;  %v12110_v58 = vld [vmem:[#allocation2 + $0x38] sm:$0xff]  ;;  %v9529_v62 = vadd.f32 %v9528_v63, %v9527_v57  ;;  %v1800_v24 = vmax.f32 %v1772_v61, 0.0  ;;  %v9530_v37 = vpop.f32.mrb[12].mxu1 }
 0x145   : > { %664 = vst.msk [vmem:[#allocation2 + $0x40] sm:$0xff] %vm655_vm0, %v654_v39  ;;  %v944_v8 = vadd.f32 %v9344_v41, %v11882_v36  ;;  %v9347_v44 = vadd.f32 %v9346_v51, %v9345_v42  ;;  %v4273_v48 = vshrl.u32 %v12110_v58, 16  ;;  %v4269_v60 = vshll.u32 %v12110_v58, 16  ;;  %v11190_v40 = vld [vmem:[%s11438_s26 + $0x290] ss:$8 sps:$4 sm:$0xff]  }
 0x146   : > { %2132 = vmatmul.mubr.bf16.gmra.mrb[144].mxu0 %v11183_v34  ;;  %v1775_v27 = vadd.f32 %v9529_v62, %v12066_v30  ;;  %v11197_v62 = vld [vmem:[%s11438_s26 + $0x2a0] ss:$8 sps:$4 sm:$0xff]  }
 0x147   : > { %v947_v11 = vadd.f32 %v9347_v44, %v11882_v36  ;;  %2139 = vmatprep.mubr.bf16.mxu0 %v11188_v47  ;;  %v5868_v14 = vrot.slane %v4273_v48, 5  ;;  %v1014_v16 = vmax.f32 %v944_v8, 0.0  ;;  %v5869_v28 = vrot.slane %v4269_v60, 6  ;;  %v9531_v47 = vpop.f32.mrb[13].mxu1 }
 0x148   : > { %v1801_v35 = vmax.f32 %v1775_v27, 0.0  ;;  %v9532_v3 = vadd.f32 %v9531_v47, %v9530_v37  ;;  %v9533_v4 = vpop.f32.mrb[14].mxu1 }
 0x149   : > { %v1015_v59 = vmax.f32 %v947_v11, 0.0  ;;  %v9348_v17 = vpop.f32.mrb[40].mxu0  ;;  %v12129_v39 = vor.u32 %v5869_v28, %v5868_v14  ;;  %v9534_v46 = vpop.f32.mrb[15].mxu1 }
 0x14a   : > { %v9349_v18 = vpop.f32.mrb[41].mxu0  ;;  %v1811_v51 = vpack.c.bf16 %v1801_v35, %v1800_v24  ;;  %v1780_v50 = vadd.f32 %v9532_v3, %v12066_v30  ;;  %v9535_v52 = vadd.f32 %v9534_v46, %v9533_v4  ;;  %v9622_v28 = vpop.f32.mrb[16].mxu1  ;;  %v11203_v46 = vld [vmem:[%s11438_s26 + $0x2b0] ss:$8 sps:$4 sm:$0xff]  }
 0x14b   : > { %v1032_v29 = vpack.c.bf16 %v1015_v59, %v1014_v16  ;;  %v9350_v31 = vadd.f32 %v9349_v18, %v9348_v17  ;;  %v9351_v32 = vpop.f32.mrb[42].mxu0  ;;  %v12135_v8 = vsel %vm5835_vm1, %v5866_v38, %v12129_v39  ;;  %v11201_v18 = vld [vmem:[%s11438_s26 + $0x2b4] ss:$8 sps:$4 sm:$0xff]  }
 0x14c   : > { %v9352_v34 = vpop.f32.mrb[43].mxu0  ;;  %1821 = vst.msk [vmem:[#allocation2 + $0x110] sm:$0xff] %vm655_vm0, %v1811_v51  ;;  %v1802_v14 = vmax.f32 %v1780_v50, 0.0  ;;  %v1783_v16 = vadd.f32 %v9535_v52, %v12066_v30 }
 0x14d   : > { %1042 = vst.msk [vmem:[#allocation2 + $0x48] sm:$0xff] %vm655_vm0, %v1032_v29  ;;  %v952_v41 = vadd.f32 %v9350_v31, %v11882_v36  ;;  %v9353_v42 = vadd.f32 %v9352_v34, %v9351_v32  ;;  %v9623_v32 = vpop.f32.mrb[17].mxu1 }
 0x14e   : > { %2140 = vmatmul.mubr.bf16.gmra.mrb[148].mxu0 %v11190_v40  ;;  %v1803_v27 = vmax.f32 %v1783_v16, 0.0  ;;  %v9624_v34 = vadd.f32 %v9623_v32, %v9622_v28  ;;  %v9625_v35 = vpop.f32.mrb[18].mxu1  ;;  %v8605_v32 = vld [vmem:[%s11438_s26 + $0x2c8] sm:$0xff] }
 0x14f   : > { %v955_v44 = vadd.f32 %v9353_v42, %v11882_v36  ;;  %2147 = vmatprep.mubr.bf16.mxu0 %v11195_v33  ;;  %v1016_v57 = vmax.f32 %v952_v41, 0.0  ;;  %v9626_v41 = vpop.f32.mrb[19].mxu1 }
 0x150   : > { %v1812_v33 = vpack.c.bf16 %v1803_v27, %v1802_v14  ;;  %v2488_v42 = vadd.f32 %v9624_v34, %v12066_v30  ;;  %v9627_v47 = vadd.f32 %v9626_v41, %v9625_v35 }
 0x151   : > { %v1017_v11 = vmax.f32 %v955_v44, 0.0  ;;  %v9354_v63 = vpop.f32.mrb[44].mxu0 }
 0x152   : > { %v9355_v61 = vpop.f32.mrb[45].mxu0  ;;  %1822 = vst.msk [vmem:[#allocation2 + $0x118] sm:$0xff] %vm655_vm0, %v1812_v33  ;;  %v2558_v50 = vmax.f32 %v2488_v42, 0.0  ;;  %v2491_v52 = vadd.f32 %v9627_v47, %v12066_v30  ;;  %v12165_v33 = vld [vmem:[%s13543_s3 + $0x20] sm:$0xff]  }
 0x153   : > { %v1033_v38 = vpack.c.bf16 %v1017_v11, %v1016_v57  ;;  %v9356_v59 = vadd.f32 %v9355_v61, %v9354_v63  ;;  %v9357_v17 = vpop.f32.mrb[46].mxu0  ;;  %v11206_v61 = vld [vmem:[%s11438_s26 + $0x2c4] ss:$8 sps:$4 sm:$0xff]  }
 0x154   : > { %v9358_v40 = vpop.f32.mrb[47].mxu0  ;;  %v3765_v24 = vld [vmem:[#allocation2 + $0x48] sm:$0xff] }
 0x155   : > { %1043 = vst.msk [vmem:[#allocation2 + $0x50] sm:$0xff] %vm655_vm0, %v1033_v38  ;;  %v960_v29 = vadd.f32 %v9356_v59, %v11882_v36  ;;  %v9359_v31 = vadd.f32 %v9358_v40, %v9357_v17  ;;  %10140 = vmatprep.mubr.msk.bf16.mxu1 %vm655_vm0, %v3765_v24  ;;  %v2559_v38 = vmax.f32 %v2491_v52, 0.0  ;;  %v9628_v59 = vpop.f32.mrb[20].mxu1  ;;  %v11214_v52 = vld [vmem:[%s11438_s26 + $0x364] ss:$8 sps:$4 sm:$0xff]  }
 0x156   : > { %2148 = vmatmul.mubr.bf16.gmra.mrb[152].mxu0 %v11197_v62  ;;  %v11228_v62 = vld [vmem:[%s13543_s3 + $0x8] sm:$0xff]   ;;  %v9629_v40 = vpop.f32.mrb[21].mxu1 }
 0x157   : > { %v963_v37 = vadd.f32 %v9359_v31, %v11882_v36  ;;  %2155 = vmatprep.mubr.bf16.mxu0 %v11201_v18  ;;  %v1018_v51 = vmax.f32 %v960_v29, 0.0  ;;  %v2576_v24 = vpack.c.bf16 %v2559_v38, %v2558_v50  ;;  %v9630_v27 = vadd.f32 %v9629_v40, %v9628_v59  ;;  %v9631_v28 = vpop.f32.mrb[22].mxu1  ;;  %v8604_v31 = vld [vmem:[%s11438_s26 + $0x2c0] sm:$0xff] }
 0x158   : > { %v9632_v34 = vpop.f32.mrb[23].mxu1 }
 0x159   : > { %v1019_v3 = vmax.f32 %v963_v37, 0.0  ;;  %v9360_v4 = vpop.f32.mrb[48].mxu0  ;;  %2586 = vst.msk [vmem:[#allocation2 + $0x168] sm:$0xff] %vm655_vm0, %v2576_v24  ;;  %v9633_v35 = vadd.f32 %v9632_v34, %v9631_v28  ;;  %v11212_v34 = vld [vmem:[%s11438_s26 + $0x360] ss:$8 sps:$4 sm:$0xff]  }
 0x15a   : > { %v9361_v44 = vpop.f32.mrb[49].mxu0 }
 0x15b   : > { %v1034_v57 = vpack.c.bf16 %v1019_v3, %v1018_v51  ;;  %v9362_v11 = vadd.f32 %v9361_v44, %v9360_v4  ;;  %v9363_v63 = vpop.f32.mrb[50].mxu0  ;;  %v8623_v51 = vcombine.low %v8604_v31, %v8605_v32  ;;  %v2499_v4 = vadd.f32 %v9633_v35, %v12066_v30 }
 0x15c   : > { %v9364_v14 = vpop.f32.mrb[51].mxu0  ;;  %v3766_v16 = vld [vmem:[#allocation2 + $0x50] sm:$0xff] }
 0x15d   : > { %1044 = vst.msk [vmem:[#allocation2 + $0x58] sm:$0xff] %vm655_vm0, %v1034_v57  ;;  %v968_v17 = vadd.f32 %v9362_v11, %v11882_v36  ;;  %v9365_v18 = vadd.f32 %v9364_v14, %v9363_v63  ;;  %10141 = vmatmul.mubr.msk.bf16.vlgmr.msra.gmra.mrb[88].mxu1 %vm655_vm0, %v3766_v16  ;;  %v2561_v63 = vmax.f32 %v2499_v4, 0.0  ;;  %v11221_v4 = vld [vmem:[%s13541_s1 + $0x48] sm:$0xff]  }
 0x15e   : > { %2156 = vmatmul.mubr.bf16.gmra.mrb[156].mxu0 %v11203_v46  ;;  %10157 = vmatpush3.bf16.msra.mxu1 %v11930_v21  ;;  %v2496_v21 = vadd.f32 %v9630_v27, %v12066_v30 }
 0x15f   : > { %v971_v29 = vadd.f32 %v9365_v18, %v11882_v36  ;;  %2163 = vmatprep.mubr.bf16.mxu0 %v11206_v61  ;;  %10158 = vmatprep.subr.bf16.mxu1 %v11228_v62  ;;  %v1020_v37 = vmax.f32 %v968_v17, 0.0  ;;  %v9634_v61 = vpop.f32.mrb[24].mxu1 }
 0x160   : > { %v2560_v3 = vmax.f32 %v2496_v21, 0.0 }
 0x161   : > { %v1021_v41 = vmax.f32 %v971_v29, 0.0  ;;  %v9366_v42 = vpop.f32.mrb[52].mxu0 }
 0x162   : > { %v9367_v47 = vpop.f32.mrb[53].mxu0  ;;  %10159 = vmatpush3.bf16.msra.mxu1 %v11228_v62  ;;  %v9635_v62 = vpop.f32.mrb[25].mxu1  ;;  %v2577_v38 = vpack.c.bf16 %v2561_v63, %v2560_v3 }
 0x163   : > { %v1035_v44 = vpack.c.bf16 %v1021_v41, %v1020_v37  ;;  %v9368_v46 = vadd.f32 %v9367_v47, %v9366_v42  ;;  %v9369_v50 = vpop.f32.mrb[54].mxu0  ;;  %10176 = vmatprep.subr.bf16.mxu1 %v12165_v33  ;;  %v9636_v59 = vadd.f32 %v9635_v62, %v9634_v61  ;;  %v9637_v17 = vpop.f32.mrb[26].mxu1  ;;  %v11218_v47 = vld [vmem:[%s13541_s1] sm:$0xff]   ;;  %v8696_v62 = vld [vmem:[%s11438_s26 + $0x370] sm:$0xff] }
 0x164   : > { %v9370_v57 = vpop.f32.mrb[55].mxu0  ;;  %v3767_v11 = vld [vmem:[#allocation2 + $0x58] sm:$0xff]  ;;  %v9638_v40 = vpop.f32.mrb[27].mxu1  ;;  %2587 = vst.msk [vmem:[#allocation2 + $0x170] sm:$0xff] %vm655_vm0, %v2577_v38 }
 0x165   : > { %1045 = vst.msk [vmem:[#allocation2 + $0x60] sm:$0xff] %vm655_vm0, %v1035_v44  ;;  %v976_v14 = vadd.f32 %v9368_v46, %v11882_v36  ;;  %v9371_v16 = vadd.f32 %v9370_v57, %v9369_v50  ;;  %10144 = vmatprep.mubr.msk.bf16.mxu1 %vm655_vm0, %v3767_v11  ;;  %v2504_v24 = vadd.f32 %v9636_v59, %v12066_v30  ;;  %v9640_v46 = vpop.f32.mrb[28].mxu1  ;;  %v12191_v50 = vld [vmem:[%s13542_s2] ss:$0 sm:$0xff]  ;;  %v8697_v38 = vld [vmem:[%s11438_s26 + $0x378] sm:$0xff]  ;;  %v11222_v59 = vld [vmem:[%s13541_s1 + $0x8] sm:$0xff]  }
 0x166   : > { %2164 = vmatmul.mubr.bf16.gmra.mrb[160].mxu0 %v8623_v51  ;;  %v9639_v27 = vadd.f32 %v9638_v40, %v9637_v17  ;;  %v9641_v11 = vpop.f32.mrb[29].mxu1 }
 0x167   : > { %v979_v18 = vadd.f32 %v9371_v16, %v11882_v36  ;;  %2871 = vmatprep.mubr.bf16.mxu0 %v11214_v52  ;;  %v1022_v28 = vmax.f32 %v976_v14, 0.0  ;;  %v2562_v21 = vmax.f32 %v2504_v24, 0.0  ;;  %v11215_v36 = vld [vmem:[%s11438_s26 + $0x374] ss:$8 sps:$4 sm:$0xff]   ;;  %v9642_v61 = vadd.f32 %v9641_v11, %v9640_v46  ;;  %v9643_v14 = vpop.f32.mrb[30].mxu1 }
 0x168   : > { %v2507_v35 = vadd.f32 %v9639_v27, %v12066_v30  ;;  %v9644_v17 = vpop.f32.mrb[31].mxu1 }
 0x169   : > { %v1023_v29 = vmax.f32 %v979_v18, 0.0  ;;  %v9372_v31 = vpop.f32.mrb[56].mxu0  ;;  %v11226_v18 = vld [vmem:[%s13541_s1 + $0x50] sm:$0xff]   ;;  %v2512_v40 = vadd.f32 %v9642_v61, %v12066_v30  ;;  %v9645_v24 = vadd.f32 %v9644_v17, %v9643_v14  ;;  %v11235_v17 = vld [vmem:[%s13541_s1 + $0x60] sm:$0xff]  }
 0x16a   : > { %v9373_v32 = vpop.f32.mrb[57].mxu0  ;;  %v2563_v44 = vmax.f32 %v2507_v35, 0.0 }
 0x16b   : > { %v1036_v37 = vpack.c.bf16 %v1023_v29, %v1022_v28  ;;  %v9374_v41 = vadd.f32 %v9373_v32, %v9372_v31  ;;  %v9375_v42 = vpop.f32.mrb[58].mxu0  ;;  %v8715_v32 = vcombine.low %v8696_v62, %v8697_v38  ;;  %v8699_v62 = vld [vmem:[%s11438_s26 + $0x388] sm:$0xff]  ;;  %v11232_v38 = vld [vmem:[%s13541_s1 + $0x18] sm:$0xff]  }
 0x16c   : > { %v9376_v51 = vpop.f32.mrb[59].mxu0  ;;  %v3768_v3 = vld [vmem:[#allocation2 + $0x60] sm:$0xff]  ;;  %v2578_v63 = vpack.c.bf16 %v2563_v44, %v2562_v21  ;;  %v2515_v21 = vadd.f32 %v9645_v24, %v12066_v30  ;;  %v9646_v44 = vpop.f32.mrb[32].mxu1 }
 0x16d   : > { %1046 = vst.msk [vmem:[#allocation2 + $0x68] sm:$0xff] %vm655_vm0, %v1036_v37  ;;  %v984_v52 = vadd.f32 %v12191_v50, %v9374_v41  ;;  %v9377_v57 = vadd.f32 %v9376_v51, %v9375_v42  ;;  %10145 = vmatmul.mubr.msk.bf16.gmra.mrb[92].mxu1 %vm655_vm0, %v3768_v3  ;;  %v11219_v42 = vld [vmem:[%s11438_s26 + $0x384] ss:$8 sps:$4 sm:$0xff]   ;;  %v11231_v3 = vld [vmem:[%s13541_s1 + $0x58] sm:$0xff]  }
 0x16e   : > { %2872 = vmatmul.mubr.bf16.vlgmr.msra.gmra.mrb[164].mxu0 %v11212_v34  ;;  %2588 = vst.msk [vmem:[#allocation2 + $0x178] sm:$0xff] %vm655_vm0, %v2578_v63  ;;  %v2564_v34 = vmax.f32 %v2512_v40, 0.0 }
 0x16f   : > { %v987_v16 = vadd.f32 %v12191_v50, %v9377_v57  ;;  %2879 = vmatprep.mubr.bf16.mxu0 %v11215_v36  ;;  %9817 = vmatpush3.bf16.msra.mxu0 %v11218_v47  ;;  %v1024_v27 = vmax.f32 %v984_v52, 0.0  ;;  %v11227_v36 = vld [vmem:[%s13541_s1 + $0x10] sm:$0xff]   ;;  %v9647_v57 = vpop.f32.mrb[33].mxu1 }
 0x170   : > { %9818 = vmatprep.subr.bf16.mxu0 %v11221_v4  ;;  %v2565_v4 = vmax.f32 %v2515_v21, 0.0  ;;  %v9648_v63 = vadd.f32 %v9647_v57, %v9646_v44  ;;  %v9649_v61 = vpop.f32.mrb[34].mxu1 }
 0x171   : > { %v1025_v28 = vmax.f32 %v987_v16, 0.0  ;;  %v9378_v29 = vpop.f32.mrb[60].mxu0  ;;  %v8698_v16 = vld [vmem:[%s11438_s26 + $0x380] sm:$0xff] }
 0x172   : > { %v9379_v31 = vpop.f32.mrb[61].mxu0  ;;  %v2579_v11 = vpack.c.bf16 %v2565_v4, %v2564_v34 }
 0x173   : > { %v1037_v35 = vpack.c.bf16 %v1025_v28, %v1024_v27  ;;  %v9380_v37 = vadd.f32 %v9379_v31, %v9378_v29  ;;  %v9381_v41 = vpop.f32.mrb[62].mxu0  ;;  %9819 = vmatpush3.bf16.msra.mxu0 %v11222_v59  ;;  %v9650_v59 = vpop.f32.mrb[35].mxu1  ;;  %v8717_v31 = vcombine.low %v8698_v16, %v8699_v62  ;;  %v8701_v16 = vld [vmem:[%s11438_s26 + $0x398] sm:$0xff]  ;;  %v11242_v62 = vld [vmem:[%s13541_s1 + $0x28] sm:$0xff]  }
 0x174   : > { %v9382_v47 = vpop.f32.mrb[63].mxu0  ;;  %v3769_v51 = vld [vmem:[#allocation2 + $0x68] sm:$0xff]  ;;  %9820 = vmatprep.subr.bf16.mxu0 %v11226_v18  ;;  %2589 = vst.msk [vmem:[#allocation2 + $0x180] sm:$0xff] %vm655_vm0, %v2579_v11  ;;  %v2520_v18 = vadd.f32 %v9648_v63, %v12066_v30  ;;  %v9651_v40 = vadd.f32 %v9650_v59, %v9649_v61  ;;  %v9652_v4 = vpop.f32.mrb[36].mxu1  ;;  %v11247_v59 = vld [vmem:[%s13541_s1 + $0x70] sm:$0xff]  }
 0x175   : > { %1047 = vst.msk [vmem:[#allocation2 + $0x70] sm:$0xff] %vm655_vm0, %v1037_v35  ;;  %v992_v46 = vadd.f32 %v12191_v50, %v9380_v37  ;;  %v9383_v52 = vadd.f32 %v9382_v47, %v9381_v41  ;;  %10148 = vmatprep.mubr.msk.bf16.mxu1 %vm655_vm0, %v3769_v51  ;;  %v11223_v41 = vld [vmem:[%s11438_s26 + $0x394] ss:$8 sps:$4 sm:$0xff]   ;;  %v11241_v51 = vld [vmem:[%s13541_s1 + $0x68] sm:$0xff]  }
 0x176   : > { %2880 = vmatmul.mubr.bf16.gmra.mrb[168].mxu0 %v8715_v32  ;;  %v2566_v32 = vmax.f32 %v2520_v18, 0.0  ;;  %v2523_v34 = vadd.f32 %v9651_v40, %v12066_v30 }
 0x177   : > { %v995_v14 = vadd.f32 %v12191_v50, %v9383_v52  ;;  %2887 = vmatprep.mubr.bf16.mxu0 %v11219_v42  ;;  %9821 = vmatpush3.bf16.msra.mxu0 %v11227_v36  ;;  %v1026_v24 = vmax.f32 %v992_v46, 0.0  ;;  %v11238_v42 = vld [vmem:[%s13541_s1 + $0x20] sm:$0xff]   ;;  %v9653_v52 = vpop.f32.mrb[37].mxu1 }
 0x178   : > { %9822 = vmatprep.subr.bf16.mxu0 %v11231_v3  ;;  %v2567_v3 = vmax.f32 %v2523_v34, 0.0  ;;  %v9654_v11 = vadd.f32 %v9653_v52, %v9652_v4  ;;  %v9655_v63 = vpop.f32.mrb[38].mxu1 }
 0x179   : > { %v1027_v27 = vmax.f32 %v995_v14, 0.0  ;;  %v9384_v28 = vpop.f32.mrb[64].mxu0  ;;  %v8700_v14 = vld [vmem:[%s11438_s26 + $0x390] sm:$0xff] }
 0x17a   : > { %v9385_v29 = vpop.f32.mrb[65].mxu0  ;;  %v2580_v57 = vpack.c.bf16 %v2567_v3, %v2566_v32 }
 0x17b   : > { %v1038_v21 = vpack.c.bf16 %v1027_v27, %v1026_v24  ;;  %v9386_v35 = vadd.f32 %v9385_v29, %v9384_v28  ;;  %v9387_v37 = vpop.f32.mrb[66].mxu0  ;;  %9823 = vmatpush3.bf16.msra.mxu0 %v11232_v38  ;;  %v9656_v38 = vpop.f32.mrb[39].mxu1  ;;  %v8719_v29 = vcombine.low %v8700_v14, %v8701_v16  ;;  %v8703_v14 = vld [vmem:[%s11438_s26 + $0x3a8] sm:$0xff]  ;;  %v11250_v16 = vld [vmem:[%s13541_s1 + $0x38] sm:$0xff]  }
 0x17c   : > { %v9388_v36 = vpop.f32.mrb[67].mxu0  ;;  %v3770_v47 = vld [vmem:[#allocation2 + $0x70] sm:$0xff]  ;;  %9824 = vmatprep.subr.bf16.mxu0 %v11235_v17  ;;  %2590 = vst.msk [vmem:[#allocation2 + $0x188] sm:$0xff] %vm655_vm0, %v2580_v57  ;;  %v2528_v17 = vadd.f32 %v9654_v11, %v12066_v30  ;;  %v9657_v18 = vadd.f32 %v9656_v38, %v9655_v63  ;;  %v9658_v3 = vpop.f32.mrb[40].mxu1 }
 0x17d   : > { %1048 = vst.msk [vmem:[#allocation2 + $0x78] sm:$0xff] %vm655_vm0, %v1038_v21  ;;  %v1000_v44 = vadd.f32 %v12191_v50, %v9386_v35  ;;  %v9389_v46 = vadd.f32 %v9388_v36, %v9387_v37  ;;  %10149 = vmatmul.mubr.msk.bf16.gmra.mrb[96].mxu1 %vm655_vm0, %v3770_v47  ;;  %v11229_v37 = vld [vmem:[%s11438_s26 + $0x3a4] ss:$8 sps:$4 sm:$0xff]   ;;  %v11249_v47 = vld [vmem:[%s13541_s1 + $0x78] sm:$0xff]  }
 0x17e   : > { %2888 = vmatmul.mubr.bf16.gmra.mrb[172].mxu0 %v8717_v31  ;;  %v2568_v31 = vmax.f32 %v2528_v17, 0.0  ;;  %v2531_v32 = vadd.f32 %v9657_v18, %v12066_v30 }
 0x17f   : > { %v1003_v61 = vadd.f32 %v12191_v50, %v9389_v46  ;;  %2895 = vmatprep.mubr.bf16.mxu0 %v11223_v41  ;;  %9825 = vmatpush3.bf16.msra.mxu0 %v11238_v42  ;;  %v1028_v40 = vmax.f32 %v1000_v44, 0.0  ;;  %v11248_v41 = vld [vmem:[%s13541_s1 + $0x30] sm:$0xff]   ;;  %v9659_v46 = vpop.f32.mrb[41].mxu1 }
 0x180   : > { %9826 = vmatprep.subr.bf16.mxu0 %v11241_v51  ;;  %v2569_v51 = vmax.f32 %v2531_v32, 0.0  ;;  %v9660_v57 = vadd.f32 %v9659_v46, %v9658_v3  ;;  %v9661_v11 = vpop.f32.mrb[42].mxu1 }
 0x181   : > { %v1029_v24 = vmax.f32 %v1003_v61, 0.0  ;;  %v9390_v27 = vpop.f32.mrb[68].mxu0  ;;  %v8702_v61 = vld [vmem:[%s11438_s26 + $0x3a0] sm:$0xff] }
 0x182   : > { %v9391_v28 = vpop.f32.mrb[69].mxu0  ;;  %v2581_v52 = vpack.c.bf16 %v2569_v51, %v2568_v31  ;;  %v2536_v38 = vadd.f32 %v9660_v57, %v12066_v30  ;;  %v8705_v57 = vld [vmem:[%s11438_s26 + $0x3b8] sm:$0xff] }
 0x183   : > { %v1039_v34 = vpack.c.bf16 %v1029_v24, %v1028_v40  ;;  %v9392_v21 = vadd.f32 %v9391_v28, %v9390_v27  ;;  %v9393_v35 = vpop.f32.mrb[70].mxu0  ;;  %9827 = vmatpush3.bf16.msra.mxu0 %v11242_v62  ;;  %v9662_v62 = vpop.f32.mrb[43].mxu1  ;;  %v8721_v24 = vcombine.low %v8702_v61, %v8703_v14 }
 0x184   : > { %v9394_v42 = vpop.f32.mrb[71].mxu0  ;;  %v3771_v36 = vld [vmem:[#allocation2 + $0x78] sm:$0xff]  ;;  %9828 = vmatprep.subr.bf16.mxu0 %v11247_v59  ;;  %2591 = vst.msk [vmem:[#allocation2 + $0x190] sm:$0xff] %vm655_vm0, %v2581_v52  ;;  %v9663_v59 = vadd.f32 %v9662_v62, %v9661_v11  ;;  %v2570_v27 = vmax.f32 %v2536_v38, 0.0  ;;  %v8704_v52 = vld [vmem:[%s11438_s26 + $0x3b0] sm:$0xff] }
 0x185   : > { %1049 = vst.msk [vmem:[#allocation2 + $0x80] sm:$0xff] %vm655_vm0, %v1039_v34  ;;  %v1008_v4 = vadd.f32 %v12191_v50, %v9392_v21  ;;  %v9395_v44 = vadd.f32 %v9394_v42, %v9393_v35  ;;  %10152 = vmatprep.mubr.msk.bf16.mxu1 %vm655_vm0, %v3771_v36  ;;  %v11233_v34 = vld [vmem:[%s11438_s26 + $0x3b4] ss:$8 sps:$4 sm:$0xff]  }
 0x186   : > { %2896 = vmatmul.mubr.bf16.gmra.mrb[176].mxu0 %v8719_v29  ;;  %v2539_v28 = vadd.f32 %v9663_v59, %v12066_v30  ;;  %v8723_v59 = vcombine.low %v8704_v52, %v8705_v57 }
 0x187   : > { %v1011_v63 = vadd.f32 %v12191_v50, %v9395_v44  ;;  %2903 = vmatprep.mubr.bf16.mxu0 %v11229_v37  ;;  %9829 = vmatpush3.bf16.msra.mxu0 %v11248_v41  ;;  %v1030_v17 = vmax.f32 %v1008_v4, 0.0  ;;  %v9664_v41 = vpop.f32.mrb[44].mxu1 }
 0x188   : > { %9830 = vmatprep.subr.bf16.mxu0 %v11249_v47  ;;  %v2571_v37 = vmax.f32 %v2539_v28, 0.0  ;;  %v12274_v47 = vld [vmem:[#allocation2] sm:$0xff]  ;;  %v9665_v51 = vpop.f32.mrb[45].mxu1 }
 0x189   : > { %v1031_v18 = vmax.f32 %v1011_v63, 0.0  ;;  %v9412_v40 = vpop.f32.mrb[72].mxu0  ;;  %v9666_v4 = vadd.f32 %v9665_v51, %v9664_v41  ;;  %v9667_v44 = vpop.f32.mrb[46].mxu1  ;;  %v11335_v41 = vld [vmem:[#allocation2 + $0x10] sm:$0xff] }
 0x18a   : > { %v9413_v50 = vpop.f32.mrb[73].mxu0  ;;  %v2582_v3 = vpack.c.bf16 %v2571_v37, %v2570_v27  ;;  %v9668_v11 = vpop.f32.mrb[47].mxu1  ;;  %v11236_v27 = vld [vmem:[%s11438_s26 + $0x3c4] ss:$8 sps:$4 sm:$0xff]  }
 0x18b   : > { %v1040_v29 = vpack.c.bf16 %v1031_v18, %v1030_v17  ;;  %v9414_v31 = vadd.f32 %v9413_v50, %v9412_v40  ;;  %v9415_v32 = vpop.f32.mrb[74].mxu0  ;;  %9831 = vmatpush3.bf16.msra.mxu0 %v11250_v16  ;;  %v2544_v63 = vadd.f32 %v9666_v4, %v12066_v30  ;;  %v9669_v61 = vadd.f32 %v9668_v11, %v9667_v44  ;;  %v8707_v4 = vld [vmem:[%s11438_s26 + $0x3c8] sm:$0xff] }
 0x18c   : > { %v9416_v21 = vpop.f32.mrb[75].mxu0  ;;  %v3772_v35 = vld [vmem:[#allocation2 + $0x80] sm:$0xff]  ;;  %2592 = vst.msk [vmem:[#allocation2 + $0x198] sm:$0xff] %vm655_vm0, %v2582_v3 }
 0x18d   : > { %1050 = vst.msk [vmem:[#allocation2 + $0x88] sm:$0xff] %vm655_vm0, %v1040_v29  ;;  %v1330_v42 = vadd.f32 %v9414_v31, %v12066_v30  ;;  %v9417_v36 = vadd.f32 %v9416_v21, %v9415_v32  ;;  %10153 = vmatmul.mubr.msk.bf16.gmra.mrb[100].mxu1 %vm655_vm0, %v3772_v35  ;;  %v2572_v17 = vmax.f32 %v2544_v63, 0.0  ;;  %v2547_v18 = vadd.f32 %v9669_v61, %v12066_v30  ;;  %v11244_v29 = vld [vmem:[%s13543_s3 + $0x28] sm:$0xff]   ;;  %v9670_v32 = vpop.f32.mrb[48].mxu1  ;;  %v8706_v3 = vld [vmem:[%s11438_s26 + $0x3c0] sm:$0xff] }
 0x18e   : > { %10160 = vmatprep.mubr.msk.bf16.mxu1 %vm655_vm0, %v12274_v47  ;;  %2904 = vmatmul.mubr.bf16.gmra.mrb[180].mxu0 %v8721_v24  ;;  %v11334_v35 = vld [vmem:[#allocation2 + $0x8] sm:$0xff]  ;;  %v9671_v37 = vpop.f32.mrb[49].mxu1  ;;  %v8725_v61 = vcombine.low %v8706_v3, %v8707_v4  ;;  %v8709_v32 = vld [vmem:[%s11438_s26 + $0x3d8] sm:$0xff] }
 0x18f   : > { %v1333_v46 = vadd.f32 %v9417_v36, %v12066_v30  ;;  %2911 = vmatprep.mubr.bf16.mxu0 %v11233_v34  ;;  %v1400_v14 = vmax.f32 %v1330_v42, 0.0  ;;  %v2573_v31 = vmax.f32 %v2547_v18, 0.0  ;;  %v9673_v36 = vpop.f32.mrb[50].mxu1 }
 0x190   : > { %v9674_v44 = vpop.f32.mrb[51].mxu1 }
 0x191   : > { %v1401_v16 = vmax.f32 %v1333_v46, 0.0  ;;  %v9418_v62 = vpop.f32.mrb[76].mxu0  ;;  %v2583_v42 = vpack.c.bf16 %v2573_v31, %v2572_v17  ;;  %v12299_v46 = vld [vmem:[%s13543_s3 + $0x30] sm:$0xff]  }
 0x192   : > { %v9419_v38 = vpop.f32.mrb[77].mxu0  ;;  %v8708_v31 = vld [vmem:[%s11438_s26 + $0x3d0] sm:$0xff] }
 0x193   : > { %v1418_v40 = vpack.c.bf16 %v1401_v16, %v1400_v14  ;;  %v9420_v50 = vadd.f32 %v9419_v38, %v9418_v62  ;;  %v9421_v24 = vpop.f32.mrb[78].mxu0  ;;  %2593 = vst.msk [vmem:[#allocation2 + $0x1a0] sm:$0xff] %vm655_vm0, %v2583_v42  ;;  %v11239_v38 = vld [vmem:[%s11438_s26 + $0x3d4] ss:$8 sps:$4 sm:$0xff]   ;;  %v8727_v3 = vcombine.low %v8708_v31, %v8709_v32 }
 0x194   : > { %v9422_v28 = vpop.f32.mrb[79].mxu0 }
 0x195   : > { %1428 = vst.msk [vmem:[#allocation2 + $0x90] sm:$0xff] %vm655_vm0, %v1418_v40  ;;  %v1338_v34 = vadd.f32 %v9420_v50, %v12066_v30  ;;  %v9423_v21 = vadd.f32 %v9422_v28, %v9421_v24  ;;  %10161 = vmatmul.mubr.msk.bf16.vlgmr.msra.gmra.mrb[88].mxu1 %vm655_vm0, %v11334_v35  ;;  %v11336_v40 = vld [vmem:[#allocation2 + $0x18] sm:$0xff]  ;;  %v11337_v24 = vld [vmem:[#allocation2 + $0x20] sm:$0xff] }
 0x196   : > { %10164 = vmatprep.mubr.msk.bf16.mxu1 %vm655_vm0, %v11335_v41  ;;  %2912 = vmatmul.mubr.bf16.gmra.mrb[184].mxu0 %v8723_v59  ;;  %v9762_v59 = vpop.f32.mrb[52].mxu1 }
 0x197   : > { %v1341_v51 = vadd.f32 %v9423_v21, %v12066_v30  ;;  %2919 = vmatprep.mubr.bf16.mxu0 %v11236_v27  ;;  %10177 = vmatpush3.bf16.msra.mxu1 %v12165_v33  ;;  %v1402_v52 = vmax.f32 %v1338_v34, 0.0  ;;  %v9763_v50 = vpop.f32.mrb[53].mxu1  ;;  %v12314_v34 = vld [vmem:[%s13542_s2] ss:$0 sm:$0xff] }
 0x198   : > { %10178 = vmatprep.subr.bf16.mxu1 %v11244_v29  ;;  %v9764_v27 = vadd.f32 %v9763_v50, %v9762_v59  ;;  %v9765_v28 = vpop.f32.mrb[54].mxu1 }
 0x199   : > { %v1403_v57 = vmax.f32 %v1341_v51, 0.0  ;;  %v9424_v11 = vpop.f32.mrb[80].mxu0  ;;  %v9766_v21 = vpop.f32.mrb[55].mxu1 }
 0x19a   : > { %v9425_v63 = vpop.f32.mrb[81].mxu0  ;;  %v3260_v35 = vadd.f32 %v9764_v27, %v12314_v34  ;;  %v9767_v37 = vadd.f32 %v9766_v21, %v9765_v28  ;;  %v8711_v27 = vld [vmem:[%s11438_s26 + $0x3e8] sm:$0xff] }
 0x19b   : > { %v1419_v14 = vpack.c.bf16 %v1403_v57, %v1402_v52  ;;  %v9426_v16 = vadd.f32 %v9425_v63, %v9424_v11  ;;  %v9427_v62 = vpop.f32.mrb[82].mxu0  ;;  %10179 = vmatpush3.bf16.msra.mxu1 %v11244_v29  ;;  %v11245_v63 = vld [vmem:[%s11438_s26 + $0x3e4] ss:$8 sps:$4 sm:$0xff]  }
 0x19c   : > { %v9428_v33 = vpop.f32.mrb[83].mxu0  ;;  %10196 = vmatprep.subr.bf16.mxu1 %v12299_v46  ;;  %v3330_v4 = vmax.f32 %v3260_v35, 0.0  ;;  %v3263_v44 = vadd.f32 %v9767_v37, %v12314_v34 }
 0x19d   : > { %1429 = vst.msk [vmem:[#allocation2 + $0x98] sm:$0xff] %vm655_vm0, %v1419_v14  ;;  %v1346_v17 = vadd.f32 %v9426_v16, %v12066_v30  ;;  %v9429_v18 = vadd.f32 %v9428_v33, %v9427_v62  ;;  %10165 = vmatmul.mubr.msk.bf16.gmra.mrb[92].mxu1 %vm655_vm0, %v11336_v40  ;;  %v9768_v16 = vpop.f32.mrb[56].mxu1  ;;  %v11338_v33 = vld [vmem:[#allocation2 + $0x28] sm:$0xff] }
 0x19e   : > { %10168 = vmatprep.mubr.msk.bf16.mxu1 %vm655_vm0, %v11337_v24  ;;  %2920 = vmatmul.mubr.bf16.gmra.mrb[188].mxu0 %v8725_v61  ;;  %v3331_v14 = vmax.f32 %v3263_v44, 0.0  ;;  %v9769_v59 = vpop.f32.mrb[57].mxu1  ;;  %v8710_v24 = vld [vmem:[%s11438_s26 + $0x3e0] sm:$0xff] }
 0x19f   : > { %v1349_v29 = vadd.f32 %v9429_v18, %v12066_v30  ;;  %2927 = vmatprep.mubr.bf16.mxu0 %v11239_v38  ;;  %v1404_v41 = vmax.f32 %v1346_v17, 0.0  ;;  %v9770_v18 = vadd.f32 %v9769_v59, %v9768_v16  ;;  %v9771_v40 = vpop.f32.mrb[58].mxu1 }
 0x1a0   : > { %v3348_v17 = vpack.c.bf16 %v3331_v14, %v3330_v4  ;;  %v9772_v28 = vpop.f32.mrb[59].mxu1  ;;  %v11253_v4 = vld [vmem:[%s11438_s26 + $0x484] ss:$8 sps:$4 sm:$0xff]   ;;  %v4040_v14 = vld [vmem:[#allocation2 + $0x90] sm:$0xff] }
 0x1a1   : > { %v1405_v42 = vmax.f32 %v1349_v29, 0.0  ;;  %v9430_v36 = vpop.f32.mrb[84].mxu0  ;;  %v3268_v29 = vadd.f32 %v9770_v18, %v12314_v34  ;;  %v9773_v31 = vadd.f32 %v9772_v28, %v9771_v40 }
 0x1a2   : > { %v9431_v51 = vpop.f32.mrb[85].mxu0  ;;  %3358 = vst.msk [vmem:[#allocation2 + $0x1f8] sm:$0xff] %vm655_vm0, %v3348_v17 }
 0x1a3   : > { %v1420_v52 = vpack.c.bf16 %v1405_v42, %v1404_v41  ;;  %v9432_v57 = vadd.f32 %v9431_v51, %v9430_v36  ;;  %v9433_v11 = vpop.f32.mrb[86].mxu0  ;;  %v8729_v41 = vcombine.low %v8710_v24, %v8711_v27  ;;  %v3332_v42 = vmax.f32 %v3268_v29, 0.0  ;;  %v11251_v29 = vld [vmem:[%s11438_s26 + $0x480] ss:$8 sps:$4 sm:$0xff]  }
 0x1a4   : > { %v9434_v61 = vpop.f32.mrb[87].mxu0  ;;  %v3271_v36 = vadd.f32 %v9773_v31, %v12314_v34 }
 0x1a5   : > { %1430 = vst.msk [vmem:[#allocation2 + $0xa0] sm:$0xff] %vm655_vm0, %v1420_v52  ;;  %v1354_v62 = vadd.f32 %v9432_v57, %v12066_v30  ;;  %v9435_v38 = vadd.f32 %v9434_v61, %v9433_v11  ;;  %10169 = vmatmul.mubr.msk.bf16.gmra.mrb[96].mxu1 %vm655_vm0, %v11338_v33  ;;  %v9774_v57 = vpop.f32.mrb[60].mxu1  ;;  %v12335_v11 = vld [vmem:[%s13542_s2] ss:$0 sm:$0xff] }
 0x1a6   : > { %10172 = vmatprep.mubr.msk.bf16.mxu1 %vm655_vm0, %v12085_v49  ;;  %2928 = vmatmul.mubr.bf16.gmra.mrb[192].mxu0 %v8727_v3  ;;  %v3333_v52 = vmax.f32 %v3271_v36, 0.0  ;;  %v9775_v16 = vpop.f32.mrb[61].mxu1  ;;  %v4041_v36 = vld [vmem:[#allocation2 + $0x98] sm:$0xff] }
 0x1a7   : > { %v1357_v50 = vadd.f32 %v9435_v38, %v12066_v30  ;;  %2935 = vmatprep.mubr.bf16.mxu0 %v11245_v63  ;;  %v1406_v32 = vmax.f32 %v1354_v62, 0.0  ;;  %v9776_v38 = vadd.f32 %v9775_v16, %v9774_v57  ;;  %v9777_v33 = vpop.f32.mrb[62].mxu1 }
 0x1a8   : > { %v3349_v62 = vpack.c.bf16 %v3333_v52, %v3332_v42  ;;  %v9778_v17 = vpop.f32.mrb[63].mxu1 }
 0x1a9   : > { %v1407_v21 = vmax.f32 %v1357_v50, 0.0  ;;  %v9436_v35 = vpop.f32.mrb[88].mxu0  ;;  %v3276_v18 = vadd.f32 %v9776_v38, %v12314_v34  ;;  %v9779_v40 = vadd.f32 %v9778_v17, %v9777_v33  ;;  %v8803_v38 = vld [vmem:[%s11438_s26 + $0x498] sm:$0xff] }
 0x1aa   : > { %v9437_v37 = vpop.f32.mrb[89].mxu0  ;;  %3359 = vst.msk [vmem:[#allocation2 + $0x200] sm:$0xff] %vm655_vm0, %v3349_v62  ;;  %v8802_v62 = vld [vmem:[%s11438_s26 + $0x490] sm:$0xff] }
 0x1ab   : > { %v1421_v51 = vpack.c.bf16 %v1407_v21, %v1406_v32  ;;  %v9438_v30 = vadd.f32 %v9437_v37, %v9436_v35  ;;  %v9439_v3 = vpop.f32.mrb[90].mxu0  ;;  %v3334_v31 = vmax.f32 %v3276_v18, 0.0  ;;  %v3279_v32 = vadd.f32 %v9779_v40, %v12314_v34 }
 0x1ac   : > { %v9440_v44 = vpop.f32.mrb[91].mxu0  ;;  %v4042_v52 = vld [vmem:[#allocation2 + $0xa0] sm:$0xff] }
 0x1ad   : > { %1431 = vst.msk [vmem:[#allocation2 + $0xa8] sm:$0xff] %vm655_vm0, %v1421_v51  ;;  %v1362_v63 = vadd.f32 %v12335_v11, %v9438_v30  ;;  %v9441_v61 = vadd.f32 %v9440_v44, %v9439_v3  ;;  %10173 = vmatmul.mubr.msk.bf16.gmra.mrb[104].mxu1 %vm655_vm0, %v12110_v58  ;;  %v11259_v51 = vld [vmem:[%s13543_s3 + $0x38] sm:$0xff]   ;;  %v3335_v30 = vmax.f32 %v3279_v32, 0.0  ;;  %v9780_v3 = vpop.f32.mrb[64].mxu1 }
 0x1ae   : > { %10180 = vmatprep.mubr.msk.bf16.mxu1 %vm655_vm0, %v4040_v14  ;;  %2936 = vmatmul.mubr.bf16.gmra.mrb[196].mxu0 %v8729_v41  ;;  %v11254_v41 = vld [vmem:[%s11438_s26 + $0x494] ss:$8 sps:$4 sm:$0xff]   ;;  %v9781_v57 = vpop.f32.mrb[65].mxu1 }
 0x1af   : > { %v1365_v59 = vadd.f32 %v12335_v11, %v9441_v61  ;;  %3643 = vmatprep.mubr.bf16.mxu0 %v11253_v4  ;;  %v1408_v50 = vmax.f32 %v1362_v63, 0.0  ;;  %v3350_v63 = vpack.c.bf16 %v3335_v30, %v3334_v31  ;;  %v9782_v61 = vadd.f32 %v9781_v57, %v9780_v3  ;;  %v9783_v14 = vpop.f32.mrb[66].mxu1 }
 0x1b0   : > { %v9784_v33 = vpop.f32.mrb[67].mxu1 }
 0x1b1   : > { %v1409_v24 = vmax.f32 %v1365_v59, 0.0  ;;  %v9442_v27 = vpop.f32.mrb[92].mxu0  ;;  %v12361_v59 = vld [vmem:[%s13543_s3 + $0x40] sm:$0xff]   ;;  %3360 = vst.msk [vmem:[#allocation2 + $0x208] sm:$0xff] %vm655_vm0, %v3350_v63  ;;  %v3284_v17 = vadd.f32 %v9782_v61, %v12314_v34  ;;  %v9785_v18 = vadd.f32 %v9784_v33, %v9783_v14  ;;  %v8805_v14 = vld [vmem:[%s11438_s26 + $0x4a8] sm:$0xff] }
 0x1b2   : > { %v9443_v28 = vpop.f32.mrb[93].mxu0  ;;  %v8804_v61 = vld [vmem:[%s11438_s26 + $0x4a0] sm:$0xff] }
 0x1b3   : > { %v1422_v21 = vpack.c.bf16 %v1409_v24, %v1408_v50  ;;  %v9444_v35 = vadd.f32 %v9443_v28, %v9442_v27  ;;  %v9445_v37 = vpop.f32.mrb[94].mxu0  ;;  %v8821_v28 = vcombine.low %v8802_v62, %v8803_v38  ;;  %v9786_v30 = vpop.f32.mrb[68].mxu1 }
 0x1b4   : > { %v9446_v42 = vpop.f32.mrb[95].mxu0 }
 0x1b5   : > { %1432 = vst.msk [vmem:[#allocation2 + $0xb0] sm:$0xff] %vm655_vm0, %v1422_v21  ;;  %v1370_v4 = vadd.f32 %v12335_v11, %v9444_v35  ;;  %v9447_v44 = vadd.f32 %v9446_v42, %v9445_v37  ;;  %10181 = vmatmul.mubr.msk.bf16.vlgmr.msra.gmra.mrb[88].mxu1 %vm655_vm0, %v4041_v36  ;;  %v11257_v35 = vld [vmem:[%s11438_s26 + $0x4a4] ss:$8 sps:$4 sm:$0xff]  }
 0x1b6   : > { %10184 = vmatprep.mubr.msk.bf16.mxu1 %vm655_vm0, %v4042_v52  ;;  %3644 = vmatmul.mubr.bf16.vlgmr.msra.gmra.mrb[200].mxu0 %v11251_v29  ;;  %v3336_v29 = vmax.f32 %v3284_v17, 0.0 }
 0x1b7   : > { %v1373_v16 = vadd.f32 %v12335_v11, %v9447_v44  ;;  %3651 = vmatprep.mubr.bf16.mxu0 %v11254_v41  ;;  %10197 = vmatpush3.bf16.msra.mxu1 %v12299_v46  ;;  %v1410_v40 = vmax.f32 %v1370_v4, 0.0  ;;  %v3287_v46 = vadd.f32 %v9785_v18, %v12314_v34  ;;  %v4043_v41 = vld [vmem:[#allocation2 + $0xa8] sm:$0xff]  ;;  %v9787_v44 = vpop.f32.mrb[69].mxu1 }
 0x1b8   : > { %10198 = vmatprep.subr.bf16.mxu1 %v11259_v51  ;;  %v9788_v52 = vadd.f32 %v9787_v44, %v9786_v30  ;;  %v9789_v57 = vpop.f32.mrb[70].mxu1 }
 0x1b9   : > { %v1411_v50 = vmax.f32 %v1373_v16, 0.0  ;;  %v9448_v24 = vpop.f32.mrb[96].mxu0  ;;  %v3337_v36 = vmax.f32 %v3287_v46, 0.0  ;;  %v9790_v16 = vpop.f32.mrb[71].mxu1 }
 0x1ba   : > { %v9449_v27 = vpop.f32.mrb[97].mxu0  ;;  %v3292_v62 = vadd.f32 %v9788_v52, %v12314_v34  ;;  %v9791_v38 = vadd.f32 %v9790_v16, %v9789_v57  ;;  %v8807_v52 = vld [vmem:[%s11438_s26 + $0x4b8] sm:$0xff] }
 0x1bb   : > { %v1423_v31 = vpack.c.bf16 %v1411_v50, %v1410_v40  ;;  %v9450_v32 = vadd.f32 %v9449_v27, %v9448_v24  ;;  %v9451_v21 = vpop.f32.mrb[98].mxu0  ;;  %10199 = vmatpush3.bf16.msra.mxu1 %v11259_v51  ;;  %v3351_v51 = vpack.c.bf16 %v3337_v36, %v3336_v29  ;;  %v8823_v50 = vcombine.low %v8804_v61, %v8805_v14 }
 0x1bc   : > { %v9452_v37 = vpop.f32.mrb[99].mxu0  ;;  %v4044_v42 = vld [vmem:[#allocation2 + $0xb0] sm:$0xff]  ;;  %10216 = vmatprep.subr.bf16.mxu1 %v12361_v59  ;;  %v3338_v24 = vmax.f32 %v3292_v62, 0.0  ;;  %v3295_v27 = vadd.f32 %v9791_v38, %v12314_v34 }
 0x1bd   : > { %1433 = vst.msk [vmem:[#allocation2 + $0xb8] sm:$0xff] %vm655_vm0, %v1423_v31  ;;  %v1378_v3 = vadd.f32 %v12335_v11, %v9450_v32  ;;  %v9453_v4 = vadd.f32 %v9452_v37, %v9451_v21  ;;  %10185 = vmatmul.mubr.msk.bf16.gmra.mrb[92].mxu1 %vm655_vm0, %v4043_v41  ;;  %3361 = vst.msk [vmem:[#allocation2 + $0x210] sm:$0xff] %vm655_vm0, %v3351_v51  ;;  %v11260_v31 = vld [vmem:[%s11438_s26 + $0x4b4] ss:$8 sps:$4 sm:$0xff]   ;;  %v9792_v37 = vpop.f32.mrb[72].mxu1 }
 0x1be   : > { %10188 = vmatprep.mubr.msk.bf16.mxu1 %vm655_vm0, %v4044_v42  ;;  %3652 = vmatmul.mubr.bf16.gmra.mrb[204].mxu0 %v8821_v28  ;;  %v9793_v36 = vpop.f32.mrb[73].mxu1  ;;  %v8806_v51 = vld [vmem:[%s11438_s26 + $0x4b0] sm:$0xff] }
 0x1bf   : > { %v1381_v63 = vadd.f32 %v12335_v11, %v9453_v4  ;;  %3659 = vmatprep.mubr.bf16.mxu0 %v11257_v35  ;;  %v1412_v33 = vmax.f32 %v1378_v3, 0.0  ;;  %v3339_v35 = vmax.f32 %v3295_v27, 0.0  ;;  %v9794_v3 = vadd.f32 %v9793_v36, %v9792_v37  ;;  %v9795_v4 = vpop.f32.mrb[74].mxu1 }
 0x1c0   : > { %v9796_v57 = vpop.f32.mrb[75].mxu1  ;;  %v4216_v27 = vshll.u32 %v12274_v47, 16 }
 0x1c1   : > { %v1413_v17 = vmax.f32 %v1381_v63, 0.0  ;;  %v9454_v18 = vpop.f32.mrb[100].mxu0  ;;  %v3352_v30 = vpack.c.bf16 %v3339_v35, %v3338_v24  ;;  %v3300_v63 = vadd.f32 %v9794_v3, %v12314_v34  ;;  %v9797_v61 = vadd.f32 %v9796_v57, %v9795_v4  ;;  %v8808_v4 = vld [vmem:[%s11438_s26 + $0x4c0] sm:$0xff] }
 0x1c2   : > { %v9455_v40 = vpop.f32.mrb[101].mxu0  ;;  %v4218_v3 = vrot.slane %v4216_v27, 1 }
 0x1c3   : > { %v1424_v28 = vpack.c.bf16 %v1413_v17, %v1412_v33  ;;  %v9456_v29 = vadd.f32 %v9455_v40, %v9454_v18  ;;  %v9457_v46 = vpop.f32.mrb[102].mxu0  ;;  %3362 = vst.msk [vmem:[#allocation2 + $0x218] sm:$0xff] %vm655_vm0, %v3352_v30  ;;  %v8825_v33 = vcombine.low %v8806_v51, %v8807_v52  ;;  %v3340_v17 = vmax.f32 %v3300_v63, 0.0 }
 0x1c4   : > { %v9458_v32 = vpop.f32.mrb[103].mxu0  ;;  %v4045_v21 = vld [vmem:[#allocation2 + $0xb8] sm:$0xff]  ;;  %v3303_v18 = vadd.f32 %v9797_v61, %v12314_v34 }
 0x1c5   : > { %1434 = vst.msk [vmem:[#allocation2 + $0xc0] sm:$0xff] %vm655_vm0, %v1424_v28  ;;  %v1386_v41 = vadd.f32 %v12335_v11, %v9456_v29  ;;  %v9459_v42 = vadd.f32 %v9458_v32, %v9457_v46  ;;  %10189 = vmatmul.mubr.msk.bf16.gmra.mrb[96].mxu1 %vm655_vm0, %v4045_v21  ;;  %v11262_v28 = vld [vmem:[%s11438_s26 + $0x4c4] ss:$8 sps:$4 sm:$0xff]   ;;  %v9798_v32 = vpop.f32.mrb[76].mxu1 }
 0x1c6   : > { %3660 = vmatmul.mubr.bf16.gmra.mrb[208].mxu0 %v8823_v50  ;;  %v9799_v37 = vpop.f32.mrb[77].mxu1 }
 0x1c7   : > { %v1389_v44 = vadd.f32 %v12335_v11, %v9459_v42  ;;  %3667 = vmatprep.mubr.bf16.mxu0 %v11260_v31  ;;  %v1414_v14 = vmax.f32 %v1386_v41, 0.0  ;;  %v3341_v31 = vmax.f32 %v3303_v18, 0.0  ;;  %v9800_v42 = vadd.f32 %v9799_v37, %v9798_v32  ;;  %v9801_v36 = vpop.f32.mrb[78].mxu1 }
 0x1c8   : > { %v9802_v51 = vpop.f32.mrb[79].mxu1 }
 0x1c9   : > { %v1415_v16 = vmax.f32 %v1389_v44, 0.0  ;;  %v9460_v62 = vpop.f32.mrb[104].mxu0  ;;  %v3353_v41 = vpack.c.bf16 %v3341_v31, %v3340_v17  ;;  %v8809_v44 = vld [vmem:[%s11438_s26 + $0x4c8] sm:$0xff]  ;;  %v3308_v52 = vadd.f32 %v9800_v42, %v12314_v34  ;;  %v9803_v57 = vadd.f32 %v9802_v51, %v9801_v36 }
 0x1ca   : > { %v9461_v38 = vpop.f32.mrb[105].mxu0 }
 0x1cb   : > { %v1425_v40 = vpack.c.bf16 %v1415_v16, %v1414_v14  ;;  %v9462_v50 = vadd.f32 %v9461_v38, %v9460_v62  ;;  %v9463_v24 = vpop.f32.mrb[106].mxu0  ;;  %3363 = vst.msk [vmem:[#allocation2 + $0x220] sm:$0xff] %vm655_vm0, %v3353_v41  ;;  %v4214_v16 = vshrl.u32 %v12274_v47, 16  ;;  %v4223_v62 = vrot.slane %v4221_v53, 1  ;;  %v9804_v47 = vpop.f32.mrb[80].mxu1 }
 0x1cc   : > { %v9464_v29 = vpop.f32.mrb[107].mxu0  ;;  %v4046_v46 = vld [vmem:[#allocation2 + $0xc0] sm:$0xff]  ;;  %v3342_v17 = vmax.f32 %v3308_v52, 0.0  ;;  %v3311_v18 = vadd.f32 %v9803_v57, %v12314_v34 }
 0x1cd   : > { %1435 = vst.msk [vmem:[#allocation2 + $0xc8] sm:$0xff] %vm655_vm0, %v1425_v40  ;;  %v1394_v21 = vadd.f32 %v12335_v11, %v9462_v50  ;;  %v9465_v35 = vadd.f32 %v9464_v29, %v9463_v24  ;;  %10192 = vmatprep.mubr.msk.bf16.mxu1 %vm655_vm0, %v4046_v46  ;;  %v4219_v27 = vor.u32 %v4218_v3, %v4214_v16  ;;  %v8810_v3 = vld [vmem:[%s11438_s26 + $0x4d0] sm:$0xff] }
 0x1ce   : > { %3668 = vmatmul.mubr.bf16.gmra.mrb[212].mxu0 %v8825_v33  ;;  %v8827_v33 = vcombine.low %v8808_v4, %v8809_v44  ;;  %v3343_v31 = vmax.f32 %v3311_v18, 0.0  ;;  %v8811_v4 = vld [vmem:[%s11438_s26 + $0x4d8] sm:$0xff]  ;;  %v4227_v16 = vor.u32 %v4225_v56, %v4223_v62 }
 0x1cf   : > { %v1397_v30 = vadd.f32 %v12335_v11, %v9465_v35  ;;  %3675 = vmatprep.mubr.bf16.mxu0 %v11262_v28  ;;  %v1416_v63 = vmax.f32 %v1394_v21, 0.0  ;;  %v11264_v28 = vld [vmem:[%s11438_s26 + $0x4d4] ss:$8 sps:$4 sm:$0xff]   ;;  %v4224_v21 = vsel %vm4212_vm2, %v4219_v27, %v4223_v62  ;;  %v9805_v35 = vpop.f32.mrb[81].mxu1  ;;  %v11267_v27 = vld [vmem:[%s11438_s26 + $0x4e4] ss:$8 sps:$4 sm:$0xff]  }
 0x1d0   : > { %v3354_v37 = vpack.c.bf16 %v3343_v31, %v3342_v17  ;;  %v9806_v41 = vadd.f32 %v9805_v35, %v9804_v47  ;;  %v9807_v42 = vpop.f32.mrb[82].mxu1  ;;  %v8813_v35 = vld [vmem:[%s11438_s26 + $0x4e8] sm:$0xff] }
 0x1d1   : > { %v1417_v61 = vmax.f32 %v1397_v30, 0.0  ;;  %v9482_v14 = vpop.f32.mrb[108].mxu0  ;;  %v4231_v30 = vrot.slane %v4229_v10, 1  ;;  %v9808_v44 = vpop.f32.mrb[83].mxu1 }
 0x1d2   : > { %v9483_v38 = vpop.f32.mrb[109].mxu0  ;;  %3364 = vst.msk [vmem:[#allocation2 + $0x228] sm:$0xff] %vm655_vm0, %v3354_v37  ;;  %v3316_v51 = vadd.f32 %v9806_v41, %v12314_v34  ;;  %v9809_v52 = vadd.f32 %v9808_v44, %v9807_v42  ;;  %v12441_v41 = vld [vmem:[%s13543_s3 + $0x50] sm:$0xff]  }
 0x1d3   : > { %v1426_v40 = vpack.c.bf16 %v1417_v61, %v1416_v63  ;;  %v9484_v50 = vadd.f32 %v9483_v38, %v9482_v14  ;;  %v9485_v24 = vpop.f32.mrb[110].mxu0  ;;  %v4239_v14 = vrot.slane %v4237_v25, 1  ;;  %v8829_v38 = vcombine.low %v8810_v3, %v8811_v4  ;;  %v9810_v25 = vpop.f32.mrb[84].mxu1 }
 0x1d4   : > { %v9486_v29 = vpop.f32.mrb[111].mxu0  ;;  %v4047_v46 = vld [vmem:[#allocation2 + $0xc8] sm:$0xff]  ;;  %v3319_v17 = vadd.f32 %v9809_v52, %v12314_v34 }
 0x1d5   : > { %1436 = vst.msk [vmem:[#allocation2 + $0xd0] sm:$0xff] %vm655_vm0, %v1426_v40  ;;  %v1716_v53 = vadd.f32 %v12335_v11, %v9484_v50  ;;  %v9487_v32 = vadd.f32 %v9486_v29, %v9485_v24  ;;  %10193 = vmatmul.mubr.msk.bf16.gmra.mrb[108].mxu1 %vm655_vm0, %v4047_v46  ;;  %v4235_v24 = vor.u32 %v4233_v55, %v4231_v30  ;;  %v9811_v55 = vpop.f32.mrb[85].mxu1 }
 0x1d6   : > { %10200 = vmatprep.mubr.msk.bf16.mxu1 %vm655_vm0, %v4224_v21  ;;  %3676 = vmatmul.mubr.bf16.gmra.mrb[216].mxu0 %v8827_v33  ;;  %v3344_v33 = vmax.f32 %v3316_v51, 0.0  ;;  %v4232_v29 = vsel %vm4212_vm2, %v4227_v16, %v4231_v30  ;;  %v3345_v56 = vmax.f32 %v3319_v17, 0.0  ;;  %v9813_v47 = vpop.f32.mrb[86].mxu1  ;;  %v8812_v21 = vld [vmem:[%s11438_s26 + $0x4e0] sm:$0xff]  ;;  %v4243_v3 = vor.u32 %v4241_v26, %v4239_v14 }
 0x1d7   : > { %v1719_v36 = vadd.f32 %v12335_v11, %v9487_v32  ;;  %3683 = vmatprep.mubr.bf16.mxu0 %v11264_v28  ;;  %v1786_v57 = vmax.f32 %v1716_v53, 0.0  ;;  %v4240_v9 = vsel %vm4212_vm2, %v4235_v24, %v4239_v14  ;;  %v4247_v32 = vrot.slane %v4245_v5, 1  ;;  %v9814_v37 = vpop.f32.mrb[87].mxu1  ;;  %v8814_v14 = vld [vmem:[%s11438_s26 + $0x4f0] sm:$0xff]  ;;  %v4206_v24 = vld [vmem:[#allocation2 + $0x40] sm:$0x1] }
 0x1d8   : > { %v3355_v31 = vpack.c.bf16 %v3345_v56, %v3344_v33  ;;  %v4255_v5 = vrot.slane %v4253_v19, 1  ;;  %v8831_v4 = vcombine.low %v8812_v21, %v8813_v35  ;;  %v4271_v17 = vrot.slane %v4269_v60, 1 }
 0x1d9   : > { %v1787_v63 = vmax.f32 %v1719_v36, 0.0  ;;  %v9488_v61 = vpop.f32.mrb[112].mxu0  ;;  %v4248_v16 = vsel %vm4212_vm2, %v4243_v3, %v4247_v32  ;;  %v4277_v55 = vshll.u32 %v4206_v24, 16 }
 0x1da   : > { %v9489_v10 = vpop.f32.mrb[113].mxu0  ;;  %3365 = vst.msk [vmem:[#allocation2 + $0x230] sm:$0xff] %vm655_vm0, %v3355_v31 }
 0x1db   : > { %v1804_v18 = vpack.c.bf16 %v1787_v63, %v1786_v57  ;;  %v9490_v40 = vadd.f32 %v9489_v10, %v9488_v61  ;;  %v9491_v50 = vpop.f32.mrb[114].mxu0  ;;  %v4251_v57 = vor.u32 %v4249_v6, %v4247_v32  ;;  %v11270_v63 = vld [vmem:[%s11438_s26 + $0x4f4] ss:$8 sps:$4 sm:$0xff]   ;;  %v4263_v6 = vrot.slane %v4261_v12, 1 }
 0x1dc   : > { %v9492_v28 = vpop.f32.mrb[115].mxu0  ;;  %v4279_v21 = vrot.slane %v4277_v55, 1 }
 0x1dd   : > { %1814 = vst.msk [vmem:[#allocation2 + $0xd8] sm:$0xff] %vm655_vm0, %v1804_v18  ;;  %v1724_v62 = vadd.f32 %v12335_v11, %v9490_v40  ;;  %v9493_v46 = vadd.f32 %v9492_v28, %v9491_v50  ;;  %10201 = vmatmul.mubr.msk.bf16.vlgmr.msra.gmra.mrb[88].mxu1 %vm655_vm0, %v4232_v29  ;;  %v4256_v0 = vsel %vm4212_vm2, %v4251_v57, %v4255_v5 }
 0x1de   : > { %10204 = vmatprep.mubr.msk.bf16.mxu1 %vm655_vm0, %v4240_v9  ;;  %3684 = vmatmul.mubr.bf16.gmra.mrb[220].mxu0 %v8829_v38  ;;  %v8815_v38 = vld [vmem:[%s11438_s26 + $0x4f8] sm:$0xff]  ;;  %v4259_v28 = vor.u32 %v4257_v23, %v4255_v5  ;;  %v4267_v12 = vor.u32 %v4265_v13, %v4263_v6  ;;  %v4275_v5 = vor.u32 %v4273_v48, %v4271_v17 }
 0x1df   : > { %v1727_v53 = vadd.f32 %v12335_v11, %v9493_v46  ;;  %10217 = vmatpush3.bf16.msra.mxu1 %v12361_v59  ;;  %3691 = vmatprep.mubr.bf16.mxu0 %v11267_v27  ;;  %v1788_v42 = vmax.f32 %v1724_v62, 0.0  ;;  %v8833_v29 = vcombine.low %v8814_v14, %v8815_v38 }
 0x1e0   : > { %10218 = vmatprep.subr.bf16.mxu1 %v11269_v43  ;;  %v4264_v9 = vsel %vm4212_vm2, %v4259_v28, %v4263_v6  ;;  %v4272_v60 = vsel %vm4212_vm2, %v4267_v12, %v4271_v17  ;;  %v12507_v12 = vld [vmem:[%s13543_s3 + $0x60] sm:$0xff]  }
 0x1e1   : > { %v1789_v36 = vmax.f32 %v1727_v53, 0.0  ;;  %v9494_v30 = vpop.f32.mrb[116].mxu0 }
 0x1e2   : > { %v9495_v59 = vpop.f32.mrb[117].mxu0 }
 0x1e3   : > { %v1805_v44 = vpack.c.bf16 %v1789_v36, %v1788_v42  ;;  %v9496_v51 = vadd.f32 %v9495_v59, %v9494_v30  ;;  %v9497_v52 = vpop.f32.mrb[118].mxu0  ;;  %10219 = vmatpush3.bf16.msra.mxu1 %v11269_v43 }
 0x1e4   : > { %v9498_v61 = vpop.f32.mrb[119].mxu0  ;;  %v12452_v10 = vld [vmem:[#allocation2 + $0xd8] sm:$0xff]  ;;  %10236 = vmatprep.subr.bf16.mxu1 %v12441_v41 }
 0x1e5   : > { %1815 = vst.msk [vmem:[#allocation2 + $0xe0] sm:$0xff] %vm655_vm0, %v1805_v44  ;;  %v1732_v20 = vadd.f32 %v12335_v11, %v9496_v51  ;;  %v9499_v26 = vadd.f32 %v9498_v61, %v9497_v52  ;;  %10205 = vmatmul.mubr.msk.bf16.gmra.mrb[92].mxu1 %vm655_vm0, %v4248_v16  ;;  %v4917_v33 = vshll.u32 %v12452_v10, 16  ;;  %v4915_v49 = vshrl.u32 %v12452_v10, 16 }
 0x1e6   : > { %10208 = vmatprep.mubr.msk.bf16.mxu1 %vm655_vm0, %v4256_v0  ;;  %3692 = vmatmul.mubr.bf16.gmra.mrb[224].mxu0 %v8831_v4  ;;  %v4280_v51 = vsel %vm4212_vm2, %v4275_v5, %v4279_v21 }
 0x1e7   : > { %v1735_v19 = vadd.f32 %v12335_v11, %v9499_v26  ;;  %3699 = vmatprep.mubr.bf16.mxu0 %v11270_v63  ;;  %v1790_v18 = vmax.f32 %v1732_v20, 0.0  ;;  %v4919_v62 = vrot.slane %v4917_v33, 1 }
 0x1e9   : > { %v1791_v40 = vmax.f32 %v1735_v19, 0.0  ;;  %v9500_v50 = vpop.f32.mrb[120].mxu0  ;;  %v4920_v53 = vor.u32 %v4919_v62, %v4915_v49 }
 0x1ea   : > { %v9501_v27 = vpop.f32.mrb[121].mxu0 }
 0x1eb   : > { %v1806_v43 = vpack.c.bf16 %v1791_v40, %v1790_v18  ;;  %v9502_v56 = vadd.f32 %v9501_v27, %v9500_v50  ;;  %v9503_v25 = vpop.f32.mrb[122].mxu0  ;;  %v11273_v18 = vld [vmem:[%s13543_s3 + $0x58] sm:$0xff]  }
 0x1ec   : > { %v9504_v46 = vpop.f32.mrb[123].mxu0  ;;  %v4427_v31 = vld [vmem:[#allocation2 + $0xe0] sm:$0xff] }
 0x1ed   : > { %1816 = vst.msk [vmem:[#allocation2 + $0xe8] sm:$0xff] %vm655_vm0, %v1806_v43  ;;  %v1740_v15 = vadd.f32 %v12335_v11, %v9502_v56  ;;  %v9505_v23 = vadd.f32 %v9504_v46, %v9503_v25  ;;  %10209 = vmatmul.mubr.msk.bf16.gmra.mrb[96].mxu1 %vm655_vm0, %v4264_v9  ;;  %v4922_v13 = vshll.u32 %v4427_v31, 16  ;;  %v4926_v61 = vshrl.u32 %v4427_v31, 16 }
 0x1ee   : > { %10212 = vmatprep.mubr.msk.bf16.mxu1 %vm655_vm0, %v4272_v60  ;;  %3700 = vmatmul.mubr.bf16.gmra.mrb[228].mxu0 %v8833_v29 }
 0x1ef   : > { %v1743_v47 = vadd.f32 %v12335_v11, %v9505_v23  ;;  %v4924_v32 = vrot.slane %v4922_v13, 1  ;;  %v1792_v35 = vmax.f32 %v1740_v15, 0.0 }
 0x1f1   : > { %v1793_v37 = vmax.f32 %v1743_v47, 0.0  ;;  %v9506_v42 = vpop.f32.mrb[124].mxu0  ;;  %v12481_v36 = vsel %vm4212_vm2, %v4920_v53, %v4924_v32  ;;  %v4928_v48 = vor.u32 %v4926_v61, %v4924_v32 }
 0x1f2   : > { %v9507_v30 = vpop.f32.mrb[125].mxu0 }
 0x1f3   : > { %v1807_v59 = vpack.c.bf16 %v1793_v37, %v1792_v35  ;;  %v9508_v3 = vadd.f32 %v9507_v30, %v9506_v42  ;;  %v9509_v4 = vpop.f32.mrb[126].mxu0 }
 0x1f4   : > { %v9510_v44 = vpop.f32.mrb[127].mxu0  ;;  %v4428_v52 = vld [vmem:[#allocation2 + $0xe8] sm:$0xff] }
 0x1f5   : > { %1817 = vst.msk [vmem:[#allocation2 + $0xf0] sm:$0xff] %vm655_vm0, %v1807_v59  ;;  %v1748_v57 = vadd.f32 %v12335_v11, %v9508_v3  ;;  %v9511_v63 = vadd.f32 %v9510_v44, %v9509_v4  ;;  %10213 = vmatmul.mubr.msk.bf16.gmra.mrb[112].mxu1 %vm655_vm0, %v4280_v51  ;;  %v4930_v16 = vshll.u32 %v4428_v52, 16  ;;  %v4934_v24 = vshrl.u32 %v4428_v52, 16  ;;  %v12528_v51 = vld [vmem:[#allocation2 + $0x100] sm:$0xff] }
 0x1f6   : > { %10220 = vmatprep.mubr.msk.bf16.mxu1 %vm655_vm0, %v12452_v10 }
 0x1f7   : > { %v1751_v58 = vadd.f32 %v12335_v11, %v9511_v63  ;;  %v4932_v20 = vrot.slane %v4930_v16, 1  ;;  %v1794_v26 = vmax.f32 %v1748_v57, 0.0  ;;  %v12534_v63 = vld [vmem:[#allocation2 + $0x108] sm:$0xff] }
 0x1f9   : > { %v1795_v0 = vmax.f32 %v1751_v58, 0.0  ;;  %v9552_v6 = vpop.f32.mrb[128].mxu0  ;;  %v12493_v19 = vsel %vm4212_vm2, %v4928_v48, %v4932_v20  ;;  %v4936_v29 = vor.u32 %v4934_v24, %v4932_v20 }
 0x1fa   : > { %v9553_v14 = vpop.f32.mrb[129].mxu0 }
 0x1fb   : > { %v1808_v38 = vpack.c.bf16 %v1795_v0, %v1794_v26  ;;  %v9554_v33 = vadd.f32 %v9553_v14, %v9552_v6  ;;  %v9555_v17 = vpop.f32.mrb[130].mxu0 }
 0x1fc   : > { %v9556_v40 = vpop.f32.mrb[131].mxu0  ;;  %v4429_v10 = vld [vmem:[#allocation2 + $0xf0] sm:$0xff] }
 0x1fd   : > { %1818 = vst.msk [vmem:[#allocation2 + $0xf8] sm:$0xff] %vm655_vm0, %v1808_v38  ;;  %v2102_v11 = vadd.f32 %v9554_v33, %v12314_v34  ;;  %v9557_v50 = vadd.f32 %v9556_v40, %v9555_v17  ;;  %10221 = vmatmul.mubr.msk.bf16.vlgmr.msra.gmra.mrb[88].mxu1 %vm655_vm0, %v4427_v31  ;;  %v4938_v27 = vshll.u32 %v4429_v10, 16  ;;  %v4942_v13 = vshrl.u32 %v4429_v10, 16  ;;  %v12539_v38 = vld [vmem:[#allocation2 + $0x110] sm:$0xff] }
 0x1fe   : > { %10224 = vmatprep.mubr.msk.bf16.mxu1 %vm655_vm0, %v4428_v52  ;;  %10237 = vmatpush3.bf16.msra.mxu1 %v12441_v41 }
 0x1ff   : > { %v2105_v28 = vadd.f32 %v9557_v50, %v12314_v34  ;;  %10238 = vmatprep.subr.bf16.mxu1 %v11273_v18  ;;  %v4940_v43 = vrot.slane %v4938_v27, 1  ;;  %v2172_v56 = vmax.f32 %v2102_v11, 0.0 }
 0x201   : > { %v2173_v25 = vmax.f32 %v2105_v28, 0.0  ;;  %v9558_v62 = vpop.f32.mrb[132].mxu0  ;;  %v12510_v46 = vsel %vm4212_vm2, %v4936_v29, %v4940_v43  ;;  %v4944_v32 = vor.u32 %v4942_v13, %v4940_v43  ;;  %v11275_v43 = vld [vmem:[%s13543_s3 + $0x68] sm:$0xff]  }
 0x202   : > { %v9559_v9 = vpop.f32.mrb[133].mxu0  ;;  %10239 = vmatpush3.bf16.msra.mxu1 %v11273_v18 }
 0x203   : > { %v2190_v60 = vpack.c.bf16 %v2173_v25, %v2172_v56  ;;  %v9560_v41 = vadd.f32 %v9559_v9, %v9558_v62  ;;  %v9561_v55 = vpop.f32.mrb[134].mxu0  ;;  %10256 = vmatprep.subr.bf16.mxu1 %v12507_v12 }
 0x204   : > { %v9562_v31 = vpop.f32.mrb[135].mxu0  ;;  %v12513_v15 = vld [vmem:[#allocation2 + $0xf8] sm:$0xff] }
 0x205   : > { %2200 = vst.msk [vmem:[#allocation2 + $0x120] sm:$0xff] %vm655_vm0, %v2190_v60  ;;  %v2110_v23 = vadd.f32 %v9560_v41, %v12314_v34  ;;  %v9563_v49 = vadd.f32 %v9562_v31, %v9561_v55  ;;  %10225 = vmatmul.mubr.msk.bf16.gmra.mrb[92].mxu1 %vm655_vm0, %v4429_v10  ;;  %v4946_v47 = vshll.u32 %v12513_v15, 16  ;;  %v12559_v55 = vld [vmem:[%s13543_s3 + $0x70] sm:$0xff]  }
 0x206   : > { %10228 = vmatprep.mubr.msk.bf16.mxu1 %vm655_vm0, %v12513_v15 }
 0x207   : > { %v2113_v53 = vadd.f32 %v9563_v49, %v12314_v34  ;;  %v12522_v21 = vrot.slane %v4946_v47, 1  ;;  %v2174_v35 = vmax.f32 %v2110_v23, 0.0 }
 0x209   : > { %v2175_v37 = vmax.f32 %v2113_v53, 0.0  ;;  %v9564_v42 = vpop.f32.mrb[136].mxu0  ;;  %v12526_v30 = vsel %vm4212_vm2, %v4944_v32, %v12522_v21 }
 0x20a   : > { %v9565_v5 = vpop.f32.mrb[137].mxu0 }
 0x20b   : > { %v2191_v59 = vpack.c.bf16 %v2175_v37, %v2174_v35  ;;  %v9566_v3 = vadd.f32 %v9565_v5, %v9564_v42  ;;  %v9567_v4 = vpop.f32.mrb[138].mxu0 }
 0x20c   : > { %v9568_v44 = vpop.f32.mrb[139].mxu0  ;;  %v4584_v18 = vld [vmem:[#allocation2 + $0x120] sm:$0xff] }
 0x20d   : > { %2201 = vst.msk [vmem:[#allocation2 + $0x128] sm:$0xff] %vm655_vm0, %v2191_v59  ;;  %v2118_v52 = vadd.f32 %v9566_v3, %v12314_v34  ;;  %v9569_v57 = vadd.f32 %v9568_v44, %v9567_v4  ;;  %10229 = vmatmul.mubr.msk.bf16.gmra.mrb[96].mxu1 %vm655_vm0, %v12528_v51 }
 0x20e   : > { %10232 = vmatprep.mubr.msk.bf16.mxu1 %vm655_vm0, %v12534_v63 }
 0x20f   : > { %v2121_v61 = vadd.f32 %v9569_v57, %v12314_v34  ;;  %v2176_v16 = vmax.f32 %v2118_v52, 0.0 }
 0x211   : > { %v2177_v58 = vmax.f32 %v2121_v61, 0.0  ;;  %v9570_v48 = vpop.f32.mrb[140].mxu0 }
 0x212   : > { %v9571_v20 = vpop.f32.mrb[141].mxu0 }
 0x213   : > { %v2192_v26 = vpack.c.bf16 %v2177_v58, %v2176_v16  ;;  %v9572_v0 = vadd.f32 %v9571_v20, %v9570_v48  ;;  %v9573_v6 = vpop.f32.mrb[142].mxu0 }
 0x214   : > { %v9574_v14 = vpop.f32.mrb[143].mxu0  ;;  %v4585_v25 = vld [vmem:[#allocation2 + $0x128] sm:$0xff] }
 0x215   : > { %2202 = vst.msk [vmem:[#allocation2 + $0x130] sm:$0xff] %vm655_vm0, %v2192_v26  ;;  %v2126_v33 = vadd.f32 %v9572_v0, %v12314_v34  ;;  %v9575_v17 = vadd.f32 %v9574_v14, %v9573_v6  ;;  %10233 = vmatmul.mubr.msk.bf16.gmra.mrb[116].mxu1 %vm655_vm0, %v12539_v38 }
 0x216   : > { %10240 = vmatprep.mubr.msk.bf16.mxu1 %vm655_vm0, %v4584_v18 }
 0x217   : > { %v2129_v40 = vadd.f32 %v9575_v17, %v12314_v34  ;;  %v2178_v10 = vmax.f32 %v2126_v33, 0.0 }
 0x219   : > { %v2179_v11 = vmax.f32 %v2129_v40, 0.0  ;;  %v9576_v50 = vpop.f32.mrb[144].mxu0 }
 0x21a   : > { %v9577_v24 = vpop.f32.mrb[145].mxu0 }
 0x21b   : > { %v2193_v27 = vpack.c.bf16 %v2179_v11, %v2178_v10  ;;  %v9578_v28 = vadd.f32 %v9577_v24, %v9576_v50  ;;  %v9579_v29 = vpop.f32.mrb[146].mxu0  ;;  %v12574_v50 = vld [vmem:[%s13542_s2] ss:$0 sm:$0xff] }
 0x21c   : > { %v9580_v56 = vpop.f32.mrb[147].mxu0  ;;  %v4586_v62 = vld [vmem:[#allocation2 + $0x130] sm:$0xff] }
 0x21d   : > { %2203 = vst.msk [vmem:[#allocation2 + $0x138] sm:$0xff] %vm655_vm0, %v2193_v27  ;;  %v2134_v9 = vadd.f32 %v9578_v28, %v12314_v34  ;;  %v9581_v60 = vadd.f32 %v9580_v56, %v9579_v29  ;;  %10241 = vmatmul.mubr.msk.bf16.vlgmr.msra.gmra.mrb[88].mxu1 %vm655_vm0, %v4585_v25 }
 0x21e   : > { %10244 = vmatprep.mubr.msk.bf16.mxu1 %vm655_vm0, %v4586_v62  ;;  %10257 = vmatpush3.bf16.msra.mxu1 %v12507_v12 }
 0x21f   : > { %v2137_v41 = vadd.f32 %v9581_v60, %v12314_v34  ;;  %10258 = vmatprep.subr.bf16.mxu1 %v11275_v43  ;;  %v2180_v31 = vmax.f32 %v2134_v9, 0.0 }
 0x221   : > { %v2181_v23 = vmax.f32 %v2137_v41, 0.0  ;;  %v9582_v49 = vpop.f32.mrb[148].mxu0 }
 0x222   : > { %v9583_v13 = vpop.f32.mrb[149].mxu0  ;;  %10259 = vmatpush3.bf16.msra.mxu1 %v11275_v43 }
 0x223   : > { %v2194_v47 = vpack.c.bf16 %v2181_v23, %v2180_v31  ;;  %v9584_v53 = vadd.f32 %v9583_v13, %v9582_v49  ;;  %v9585_v32 = vpop.f32.mrb[150].mxu0  ;;  %10276 = vmatprep.subr.bf16.mxu1 %v12559_v55 }
 0x224   : > { %v9586_v35 = vpop.f32.mrb[151].mxu0  ;;  %v4587_v12 = vld [vmem:[#allocation2 + $0x138] sm:$0xff] }
 0x225   : > { %2204 = vst.msk [vmem:[#allocation2 + $0x140] sm:$0xff] %vm655_vm0, %v2194_v47  ;;  %v2142_v37 = vadd.f32 %v9584_v53, %v12314_v34  ;;  %v9587_v42 = vadd.f32 %v9586_v35, %v9585_v32  ;;  %10245 = vmatmul.mubr.msk.bf16.gmra.mrb[92].mxu1 %vm655_vm0, %v4587_v12  ;;  %v4742_v53 = vld [vmem:[#allocation2 + $0x168] sm:$0xff] }
 0x227   : > { %v2145_v5 = vadd.f32 %v9587_v42, %v12314_v34  ;;  %v2182_v59 = vmax.f32 %v2142_v37, 0.0 }
 0x229   : > { %v2183_v3 = vmax.f32 %v2145_v5, 0.0  ;;  %v9588_v4 = vpop.f32.mrb[152].mxu0 }
 0x22a   : > { %v9589_v44 = vpop.f32.mrb[153].mxu0 }
 0x22b   : > { %v2195_v52 = vpack.c.bf16 %v2183_v3, %v2182_v59  ;;  %v9590_v57 = vadd.f32 %v9589_v44, %v9588_v4  ;;  %v9591_v61 = vpop.f32.mrb[154].mxu0 }
 0x22c   : > { %v9592_v16 = vpop.f32.mrb[155].mxu0  ;;  %v4588_v58 = vld [vmem:[#allocation2 + $0x140] sm:$0xff] }
 0x22d   : > { %2205 = vst.msk [vmem:[#allocation2 + $0x148] sm:$0xff] %vm655_vm0, %v2195_v52  ;;  %v2150_v48 = vadd.f32 %v9590_v57, %v12314_v34  ;;  %v9593_v20 = vadd.f32 %v9592_v16, %v9591_v61  ;;  %10248 = vmatprep.mubr.msk.bf16.mxu1 %vm655_vm0, %v4588_v58  ;;  %v11277_v52 = vld [vmem:[%s13543_s3 + $0x78] sm:$0xff]   ;;  %v4743_v57 = vld [vmem:[#allocation2 + $0x170] sm:$0xff] }
 0x22e   : > { %v4744_v16 = vld [vmem:[#allocation2 + $0x178] sm:$0xff] }
 0x22f   : > { %v2153_v26 = vadd.f32 %v9593_v20, %v12314_v34  ;;  %v2184_v0 = vmax.f32 %v2150_v48, 0.0 }
 0x231   : > { %v2185_v6 = vmax.f32 %v2153_v26, 0.0  ;;  %v9594_v14 = vpop.f32.mrb[156].mxu0 }
 0x232   : > { %v9595_v33 = vpop.f32.mrb[157].mxu0 }
 0x233   : > { %v2196_v17 = vpack.c.bf16 %v2185_v6, %v2184_v0  ;;  %v9596_v18 = vadd.f32 %v9595_v33, %v9594_v14  ;;  %v9597_v40 = vpop.f32.mrb[158].mxu0  ;;  %v12597_v0 = vld [vmem:[%s13543_s3 + $0x80] sm:$0xff]  }
 0x234   : > { %v9598_v10 = vpop.f32.mrb[159].mxu0  ;;  %v4589_v11 = vld [vmem:[#allocation2 + $0x148] sm:$0xff] }
 0x235   : > { %2206 = vst.msk [vmem:[#allocation2 + $0x150] sm:$0xff] %vm655_vm0, %v2196_v17  ;;  %v2158_v24 = vadd.f32 %v12574_v50, %v9596_v18  ;;  %v9599_v27 = vadd.f32 %v9598_v10, %v9597_v40  ;;  %10249 = vmatmul.mubr.msk.bf16.gmra.mrb[96].mxu1 %vm655_vm0, %v4589_v11  ;;  %v4745_v10 = vld [vmem:[#allocation2 + $0x180] sm:$0xff] }
 0x237   : > { %v2161_v34 = vadd.f32 %v12574_v50, %v9599_v27  ;;  %v2186_v28 = vmax.f32 %v2158_v24, 0.0  ;;  %v4746_v24 = vld [vmem:[#allocation2 + $0x188] sm:$0xff] }
 0x239   : > { %v2187_v29 = vmax.f32 %v2161_v34, 0.0  ;;  %v9600_v43 = vpop.f32.mrb[160].mxu0 }
 0x23a   : > { %v9601_v56 = vpop.f32.mrb[161].mxu0 }
 0x23b   : > { %v2197_v25 = vpack.c.bf16 %v2187_v29, %v2186_v28  ;;  %v9603_v62 = vpop.f32.mrb[162].mxu0 }
 0x23c   : > { %v4590_v9 = vld [vmem:[#allocation2 + $0x150] sm:$0xff]  ;;  %v9604_v60 = vpop.f32.mrb[163].mxu0 }
 0x23d   : > { %2207 = vst.msk [vmem:[#allocation2 + $0x158] sm:$0xff] %vm655_vm0, %v2197_v25  ;;  %10252 = vmatprep.mubr.msk.bf16.mxu1 %vm655_vm0, %v4590_v9 }
 0x241   : > { %v9692_v41 = vpop.f32.mrb[164].mxu0 }
 0x242   : > { %v9693_v31 = vpop.f32.mrb[165].mxu0 }
 0x243   : > { %v9694_v23 = vadd.f32 %v9693_v31, %v9692_v41  ;;  %v9695_v49 = vpop.f32.mrb[166].mxu0 }
 0x244   : > { %v4591_v13 = vld [vmem:[#allocation2 + $0x158] sm:$0xff]  ;;  %v9696_v47 = vpop.f32.mrb[167].mxu0 }
 0x245   : > { %10253 = vmatmul.mubr.msk.bf16.gmra.mrb[120].mxu1 %vm655_vm0, %v4591_v13  ;;  %v2874_v32 = vadd.f32 %v12574_v50, %v9694_v23  ;;  %v9697_v35 = vadd.f32 %v9696_v47, %v9695_v49  ;;  %v4747_v49 = vld [vmem:[#allocation2 + $0x190] sm:$0xff] }
 0x246   : > { %10260 = vmatprep.mubr.msk.bf16.mxu1 %vm655_vm0, %v4742_v53  ;;  %v4748_v53 = vld [vmem:[#allocation2 + $0x198] sm:$0xff] }
 0x247   : > { %v2944_v12 = vmax.f32 %v2874_v32, 0.0  ;;  %v2877_v37 = vadd.f32 %v12574_v50, %v9697_v35 }
 0x249   : > { %v2945_v42 = vmax.f32 %v2877_v37, 0.0  ;;  %v9698_v5 = vpop.f32.mrb[168].mxu0 }
 0x24a   : > { %v9699_v59 = vpop.f32.mrb[169].mxu0 }
 0x24b   : > { %v2962_v3 = vpack.c.bf16 %v2945_v42, %v2944_v12  ;;  %v9700_v4 = vadd.f32 %v9699_v59, %v9698_v5  ;;  %v9701_v44 = vpop.f32.mrb[170].mxu0 }
 0x24c   : > { %v9702_v61 = vpop.f32.mrb[171].mxu0 }
 0x24d   : > { %10261 = vmatmul.mubr.msk.bf16.vlgmr.msra.gmra.mrb[88].mxu1 %vm655_vm0, %v4743_v57  ;;  %2972 = vst.msk [vmem:[#allocation2 + $0x1b0] sm:$0xff] %vm655_vm0, %v2962_v3  ;;  %v2882_v58 = vadd.f32 %v12574_v50, %v9700_v4  ;;  %v9703_v48 = vadd.f32 %v9702_v61, %v9701_v44 }
 0x24e   : > { %10264 = vmatprep.mubr.msk.bf16.mxu1 %vm655_vm0, %v4744_v16  ;;  %10277 = vmatpush3.bf16.msra.mxu1 %v12559_v55 }
 0x24f   : > { %v2946_v20 = vmax.f32 %v2882_v58, 0.0  ;;  %v2885_v26 = vadd.f32 %v12574_v50, %v9703_v48  ;;  %10278 = vmatprep.subr.bf16.mxu1 %v11277_v52 }
 0x251   : > { %v2947_v6 = vmax.f32 %v2885_v26, 0.0  ;;  %v9704_v14 = vpop.f32.mrb[172].mxu0 }
 0x252   : > { %v9705_v33 = vpop.f32.mrb[173].mxu0  ;;  %10279 = vmatpush3.bf16.msra.mxu1 %v11277_v52 }
 0x253   : > { %v2963_v17 = vpack.c.bf16 %v2947_v6, %v2946_v20  ;;  %v9706_v18 = vadd.f32 %v9705_v33, %v9704_v14  ;;  %v9707_v40 = vpop.f32.mrb[174].mxu0  ;;  %10296 = vmatprep.subr.bf16.mxu1 %v12597_v0  ;;  %v4749_v14 = vld [vmem:[#allocation2 + $0x1a0] sm:$0xff] }
 0x254   : > { %v9708_v55 = vpop.f32.mrb[175].mxu0  ;;  %v12600_v11 = vld [vmem:[#allocation2 + $0x1b0] sm:$0xff] }
 0x255   : > { %2973 = vst.msk [vmem:[#allocation2 + $0x1b8] sm:$0xff] %vm655_vm0, %v2963_v17  ;;  %10265 = vmatmul.mubr.msk.bf16.gmra.mrb[92].mxu1 %vm655_vm0, %v4745_v10  ;;  %v2890_v27 = vadd.f32 %v12574_v50, %v9706_v18  ;;  %v9709_v34 = vadd.f32 %v9708_v55, %v9707_v40  ;;  %v5618_v28 = vshll.u32 %v12600_v11, 16  ;;  %v5616_v62 = vshrl.u32 %v12600_v11, 16 }
 0x256   : > { %10268 = vmatprep.mubr.msk.bf16.mxu1 %vm655_vm0, %v4746_v24 }
 0x257   : > { %v2948_v29 = vmax.f32 %v2890_v27, 0.0  ;;  %v2893_v43 = vadd.f32 %v12574_v50, %v9709_v34  ;;  %v5620_v9 = vrot.slane %v5618_v28, 1 }
 0x259   : > { %v2949_v56 = vmax.f32 %v2893_v43, 0.0  ;;  %v9710_v25 = vpop.f32.mrb[176].mxu0  ;;  %v5621_v12 = vor.u32 %v5620_v9, %v5616_v62 }
 0x25a   : > { %v9711_v60 = vpop.f32.mrb[177].mxu0 }
 0x25b   : > { %v2964_v41 = vpack.c.bf16 %v2949_v56, %v2948_v29  ;;  %v9712_v31 = vadd.f32 %v9711_v60, %v9710_v25  ;;  %v9713_v23 = vpop.f32.mrb[178].mxu0 }
 0x25c   : > { %v9714_v13 = vpop.f32.mrb[179].mxu0  ;;  %v12609_v47 = vld [vmem:[#allocation2 + $0x1b8] sm:$0xff] }
 0x25d   : > { %2974 = vst.msk [vmem:[#allocation2 + $0x1c0] sm:$0xff] %vm655_vm0, %v2964_v41  ;;  %10269 = vmatmul.mubr.msk.bf16.gmra.mrb[96].mxu1 %vm655_vm0, %v4747_v49  ;;  %v2898_v32 = vadd.f32 %v12574_v50, %v9712_v31  ;;  %v9715_v35 = vadd.f32 %v9714_v13, %v9713_v23  ;;  %v5623_v37 = vshll.u32 %v12609_v47, 16  ;;  %v5627_v61 = vshrl.u32 %v12609_v47, 16  ;;  %v11279_v41 = vld [vmem:[%s13543_s3 + $0x88] sm:$0xff]  }
 0x25e   : > { %10272 = vmatprep.mubr.msk.bf16.mxu1 %vm655_vm0, %v4748_v53 }
 0x25f   : > { %v2950_v42 = vmax.f32 %v2898_v32, 0.0  ;;  %v2901_v5 = vadd.f32 %v12574_v50, %v9715_v35  ;;  %v5625_v59 = vrot.slane %v5623_v37, 1  ;;  %v4950_v32 = vshrl.u32 %v12513_v15, 16 }
 0x260   : > { %v10154_v3 = vpop.f32.mrb[100].mxu1  ;;  %v4954_v35 = vshll.u32 %v12528_v51, 16 }
 0x261   : > { %v12617_v4 = vpop.f32.mrb[101].mxu1  ;;  %v2951_v44 = vmax.f32 %v2901_v5, 0.0  ;;  %v9716_v52 = vpop.f32.mrb[180].mxu0  ;;  %v12620_v57 = vsel %vm4212_vm2, %v5621_v12, %v5625_v59  ;;  %v5629_v10 = vor.u32 %v5627_v61, %v5625_v59  ;;  %v4952_v5 = vor.u32 %v4950_v32, %v12522_v21 }
 0x262   : > { %v10155_v16 = vpop.f32.mrb[102].mxu1  ;;  %v9717_v58 = vpop.f32.mrb[181].mxu0  ;;  %v4956_v3 = vrot.slane %v4954_v35, 1  ;;  %v4974_v32 = vshrl.u32 %v12539_v38, 16 }
 0x263   : > { %v2965_v48 = vpack.c.bf16 %v2951_v44, %v2950_v42  ;;  %v12623_v20 = vpop.f32.mrb[103].mxu1  ;;  %v9718_v26 = vadd.f32 %v9717_v58, %v9716_v52  ;;  %v9719_v6 = vpop.f32.mrb[182].mxu0  ;;  %v4962_v52 = vshll.u32 %v12534_v63, 16 }
 0x264   : > { %v9720_v33 = vpop.f32.mrb[183].mxu0  ;;  %v12625_v17 = vld [vmem:[#allocation2 + $0x1c0] sm:$0xff] }
 0x265   : > { %2975 = vst.msk [vmem:[#allocation2 + $0x1c8] sm:$0xff] %vm655_vm0, %v2965_v48  ;;  %10273 = vmatmul.mubr.msk.bf16.gmra.mrb[124].mxu1 %vm655_vm0, %v4749_v14  ;;  %v2906_v18 = vadd.f32 %v12574_v50, %v9718_v26  ;;  %v9721_v40 = vadd.f32 %v9720_v33, %v9719_v6  ;;  %v5631_v55 = vshll.u32 %v12625_v17, 16  ;;  %v5635_v56 = vshrl.u32 %v12625_v17, 16 }
 0x266   : > { %10280 = vmatprep.mubr.msk.bf16.mxu1 %vm655_vm0, %v12481_v36  ;;  %v4957_v48 = vsel %vm4212_vm2, %v4952_v5, %v4956_v3  ;;  %v4958_v26 = vshrl.u32 %v12528_v51, 16  ;;  %v4966_v6 = vshrl.u32 %v12534_v63, 16  ;;  %v4970_v14 = vshll.u32 %v12539_v38, 16 }
 0x267   : > { %v2952_v24 = vmax.f32 %v2906_v18, 0.0  ;;  %v2909_v27 = vadd.f32 %v12574_v50, %v9721_v40  ;;  %v5633_v34 = vrot.slane %v5631_v55, 1  ;;  %v4964_v51 = vrot.slane %v4962_v52, 1 }
 0x269   : > { %v2953_v28 = vmax.f32 %v2909_v27, 0.0  ;;  %v9722_v29 = vpop.f32.mrb[184].mxu0  ;;  %v12635_v43 = vsel %vm4212_vm2, %v5629_v10, %v5633_v34  ;;  %v5637_v13 = vor.u32 %v5635_v56, %v5633_v34  ;;  %v4960_v34 = vor.u32 %v4958_v26, %v4956_v3 }
 0x26a   : > { %v9723_v25 = vpop.f32.mrb[185].mxu0 }
 0x26b   : > { %v2966_v62 = vpack.c.bf16 %v2953_v28, %v2952_v24  ;;  %v9724_v9 = vadd.f32 %v9723_v25, %v9722_v29  ;;  %v9725_v60 = vpop.f32.mrb[186].mxu0  ;;  %v4968_v28 = vor.u32 %v4966_v6, %v4964_v51  ;;  %v4972_v29 = vrot.slane %v4970_v14, 1 }
 0x26c   : > { %v9726_v36 = vpop.f32.mrb[187].mxu0  ;;  %v12641_v31 = vld [vmem:[#allocation2 + $0x1c8] sm:$0xff] }
 0x26d   : > { %2976 = vst.msk [vmem:[#allocation2 + $0x1d0] sm:$0xff] %vm655_vm0, %v2966_v62  ;;  %10281 = vmatmul.mubr.msk.bf16.vlgmr.msra.gmra.mrb[88].mxu1 %vm655_vm0, %v12493_v19  ;;  %v2914_v23 = vadd.f32 %v12574_v50, %v9724_v9  ;;  %v9727_v49 = vadd.f32 %v9726_v36, %v9725_v60  ;;  %v5639_v53 = vshll.u32 %v12641_v31, 16  ;;  %v12657_v19 = vld [vmem:[%s13543_s3 + $0x90] sm:$0xff]   ;;  %v5643_v15 = vshrl.u32 %v12641_v31, 16  ;;  %v4908_v62 = vld [vmem:[#allocation2 + $0x118] sm:$0x1] }
 0x26e   : > { %10284 = vmatprep.mubr.msk.bf16.mxu1 %vm655_vm0, %v12510_v46  ;;  %10297 = vmatpush3.bf16.msra.mxu1 %v12597_v0  ;;  %v4978_v35 = vshll.u32 %v4908_v62, 16 }
 0x26f   : > { %v2954_v12 = vmax.f32 %v2914_v23, 0.0  ;;  %v2917_v37 = vadd.f32 %v12574_v50, %v9727_v49  ;;  %10298 = vmatprep.subr.bf16.mxu1 %v11279_v41  ;;  %v5641_v42 = vrot.slane %v5639_v53, 1  ;;  %v4965_v49 = vsel %vm4212_vm2, %v4960_v34, %v4964_v51 }
 0x270   : > { %v4980_v52 = vrot.slane %v4978_v35, 1 }
 0x271   : > { %v2955_v59 = vmax.f32 %v2917_v37, 0.0  ;;  %v9728_v46 = vpop.f32.mrb[188].mxu0  ;;  %v12661_v0 = vsel %vm4212_vm2, %v5637_v13, %v5641_v42  ;;  %v5645_v10 = vor.u32 %v5643_v15, %v5641_v42  ;;  %v4973_v13 = vsel %vm4212_vm2, %v4968_v28, %v4972_v29 }
 0x272   : > { %v9729_v44 = vpop.f32.mrb[189].mxu0  ;;  %10299 = vmatpush3.bf16.msra.mxu1 %v11279_v41 }
 0x273   : > { %v2967_v61 = vpack.c.bf16 %v2955_v59, %v2954_v12  ;;  %v9730_v16 = vadd.f32 %v9729_v44, %v9728_v46  ;;  %v9731_v58 = vpop.f32.mrb[190].mxu0  ;;  %10316 = vmatprep.subr.bf16.mxu1 %v12657_v19  ;;  %v4976_v44 = vor.u32 %v4974_v32, %v4972_v29 }
 0x274   : > { %v9732_v21 = vpop.f32.mrb[191].mxu0  ;;  %v12670_v33 = vld [vmem:[#allocation2 + $0x1d0] sm:$0xff] }
 0x275   : > { %2977 = vst.msk [vmem:[#allocation2 + $0x1d8] sm:$0xff] %vm655_vm0, %v2967_v61  ;;  %10285 = vmatmul.mubr.msk.bf16.gmra.mrb[92].mxu1 %vm655_vm0, %v12526_v30  ;;  %v2922_v18 = vadd.f32 %v12574_v50, %v9730_v16  ;;  %v9733_v40 = vadd.f32 %v9732_v21, %v9731_v58  ;;  %v5647_v55 = vshll.u32 %v12670_v33, 16  ;;  %v5651_v9 = vshrl.u32 %v12670_v33, 16 }
 0x276   : > { %10288 = vmatprep.mubr.msk.bf16.mxu1 %vm655_vm0, %v4957_v48 }
 0x277   : > { %v2956_v24 = vmax.f32 %v2922_v18, 0.0  ;;  %v2925_v63 = vadd.f32 %v12574_v50, %v9733_v40  ;;  %v5649_v27 = vrot.slane %v5647_v55, 1 }
 0x279   : > { %v2957_v56 = vmax.f32 %v2925_v63, 0.0  ;;  %v9734_v25 = vpop.f32.mrb[192].mxu0  ;;  %v12680_v30 = vsel %vm4212_vm2, %v5645_v10, %v5649_v27  ;;  %v5653_v5 = vor.u32 %v5651_v9, %v5649_v27 }
 0x27a   : > { %v9735_v60 = vpop.f32.mrb[193].mxu0 }
 0x27b   : > { %v2968_v41 = vpack.c.bf16 %v2957_v56, %v2956_v24  ;;  %v9736_v36 = vadd.f32 %v9735_v60, %v9734_v25  ;;  %v9737_v23 = vpop.f32.mrb[194].mxu0  ;;  %v4981_v24 = vsel %vm4212_vm2, %v4976_v44, %v4980_v52 }
 0x27c   : > { %v9738_v53 = vpop.f32.mrb[195].mxu0  ;;  %v12686_v12 = vld [vmem:[#allocation2 + $0x1d8] sm:$0xff] }
 0x27d   : > { %2978 = vst.msk [vmem:[#allocation2 + $0x1e0] sm:$0xff] %vm655_vm0, %v2968_v41  ;;  %10289 = vmatmul.mubr.msk.bf16.gmra.mrb[96].mxu1 %vm655_vm0, %v4965_v49  ;;  %v2930_v37 = vadd.f32 %v12574_v50, %v9736_v36  ;;  %v9739_v42 = vadd.f32 %v9738_v53, %v9737_v23  ;;  %v5655_v59 = vshll.u32 %v12686_v12, 16  ;;  %v5659_v21 = vshrl.u32 %v12686_v12, 16  ;;  %v12721_v36 = vld [vmem:[%s13542_s2] ss:$0 sm:$0xff] }
 0x27e   : > { %10292 = vmatprep.mubr.msk.bf16.mxu1 %vm655_vm0, %v4973_v13 }
 0x27f   : > { %v2958_v46 = vmax.f32 %v2930_v37, 0.0  ;;  %v2933_v15 = vadd.f32 %v12574_v50, %v9739_v42  ;;  %v5657_v3 = vrot.slane %v5655_v59, 1 }
 0x280   : > { %v10174_v38 = vpop.f32.mrb[104].mxu1 }
 0x281   : > { %v4027_v61 = vpop.f32.mrb[105].mxu1  ;;  %v2959_v16 = vmax.f32 %v2933_v15, 0.0  ;;  %v9740_v58 = vpop.f32.mrb[196].mxu0  ;;  %v12695_v48 = vsel %vm4212_vm2, %v5653_v5, %v5657_v3  ;;  %v5661_v28 = vor.u32 %v5659_v21, %v5657_v3  ;;  %v12740_v15 = vld [vmem:[%s13543_s3 + $0xa0] sm:$0xff]  }
 0x282   : > { %v12699_v26 = vadd.f32 %v4027_v61, %v12617_v4  ;;  %v10175_v6 = vpop.f32.mrb[106].mxu1  ;;  %v9741_v14 = vpop.f32.mrb[197].mxu0 }
 0x283   : > { %v2969_v18 = vpack.c.bf16 %v2959_v16, %v2958_v46  ;;  %v4030_v40 = vpop.f32.mrb[107].mxu1  ;;  %v9742_v10 = vadd.f32 %v9741_v14, %v9740_v58  ;;  %v9743_v55 = vpop.f32.mrb[198].mxu0 }
 0x284   : > { %v12702_v51 = vadd.f32 %v4030_v40, %v12623_v20  ;;  %v9744_v63 = vpop.f32.mrb[199].mxu0  ;;  %v12705_v27 = vld [vmem:[#allocation2 + $0x1e0] sm:$0xff] }
 0x285   : > { %2979 = vst.msk [vmem:[#allocation2 + $0x1e8] sm:$0xff] %vm655_vm0, %v2969_v18  ;;  %10293 = vmatmul.mubr.msk.bf16.gmra.mrb[128].mxu1 %vm655_vm0, %v4981_v24  ;;  %v2938_v4 = vadd.f32 %v12574_v50, %v9742_v10  ;;  %v9745_v34 = vadd.f32 %v9744_v63, %v9743_v55  ;;  %v5663_v29 = vshll.u32 %v12705_v27, 16  ;;  %v5667_v41 = vshrl.u32 %v12705_v27, 16 }
 0x286   : > { %10300 = vmatprep.mubr.msk.bf16.mxu1 %vm655_vm0, %v12600_v11 }
 0x287   : > { %v2960_v20 = vmax.f32 %v2938_v4, 0.0  ;;  %v2941_v56 = vadd.f32 %v12574_v50, %v9745_v34  ;;  %v5665_v25 = vrot.slane %v5663_v29, 1  ;;  %v11281_v50 = vld [vmem:[%s13543_s3 + $0x98] sm:$0xff]  }
 0x289   : > { %v2961_v62 = vmax.f32 %v2941_v56, 0.0  ;;  %v9832_v9 = vpop.f32.mrb[200].mxu0  ;;  %v12715_v60 = vsel %vm4212_vm2, %v5661_v28, %v5665_v25  ;;  %v5669_v42 = vor.u32 %v5667_v41, %v5665_v25 }
 0x28a   : > { %v9833_v23 = vpop.f32.mrb[201].mxu0 }
 0x28b   : > { %v2970_v49 = vpack.c.bf16 %v2961_v62, %v2960_v20  ;;  %v9834_v13 = vadd.f32 %v9833_v23, %v9832_v9  ;;  %v9835_v11 = vpop.f32.mrb[202].mxu0 }
 0x28c   : > { %v9836_v53 = vpop.f32.mrb[203].mxu0  ;;  %v12726_v32 = vld [vmem:[#allocation2 + $0x1e8] sm:$0xff] }
 0x28d   : > { %2980 = vst.msk [vmem:[#allocation2 + $0x1f0] sm:$0xff] %vm655_vm0, %v2970_v49  ;;  %10301 = vmatmul.mubr.msk.bf16.vlgmr.msra.gmra.mrb[88].mxu1 %vm655_vm0, %v12609_v47  ;;  %v3646_v35 = vadd.f32 %v9834_v13, %v12721_v36  ;;  %v9837_v37 = vadd.f32 %v9836_v53, %v9835_v11  ;;  %v5671_v5 = vshll.u32 %v12726_v32, 16 }
 0x28e   : > { %10304 = vmatprep.mubr.msk.bf16.mxu1 %vm655_vm0, %v12625_v17  ;;  %10317 = vmatpush3.bf16.msra.mxu1 %v12657_v19 }
 0x28f   : > { %v3716_v59 = vmax.f32 %v3646_v35, 0.0  ;;  %v3649_v46 = vadd.f32 %v9837_v37, %v12721_v36  ;;  %10318 = vmatprep.subr.bf16.mxu1 %v11281_v50  ;;  %v12742_v47 = vrot.slane %v5671_v5, 1 }
 0x291   : > { %v3717_v3 = vmax.f32 %v3649_v46, 0.0  ;;  %v9838_v38 = vpop.f32.mrb[204].mxu0  ;;  %v12746_v44 = vsel %vm4212_vm2, %v5669_v42, %v12742_v47 }
 0x292   : > { %10319 = vmatpush3.bf16.msra.mxu1 %v11281_v50  ;;  %v9839_v17 = vpop.f32.mrb[205].mxu0 }
 0x293   : > { %v3734_v19 = vpack.c.bf16 %v3717_v3, %v3716_v59  ;;  %v9840_v52 = vadd.f32 %v9839_v17, %v9838_v38  ;;  %v9841_v61 = vpop.f32.mrb[206].mxu0  ;;  %10336 = vmatprep.subr.bf16.mxu1 %v12740_v15  ;;  %v11283_v17 = vld [vmem:[%s13543_s3 + $0xa8] sm:$0xff]  }
 0x294   : > { %v9842_v16 = vpop.f32.mrb[207].mxu0 }
 0x295   : > { %10305 = vmatmul.mubr.msk.bf16.gmra.mrb[92].mxu1 %vm655_vm0, %v12641_v31  ;;  %3744 = vst.msk [vmem:[#allocation2 + $0x240] sm:$0xff] %vm655_vm0, %v3734_v19  ;;  %v3654_v58 = vadd.f32 %v9840_v52, %v12721_v36  ;;  %v9843_v21 = vadd.f32 %v9842_v16, %v9841_v61  ;;  %v5286_v52 = vld [vmem:[#allocation2 + $0x200] sm:$0xff]  ;;  %v5287_v16 = vld [vmem:[#allocation2 + $0x208] sm:$0xff] }
 0x296   : > { %10308 = vmatprep.mubr.msk.bf16.mxu1 %vm655_vm0, %v12670_v33 }
 0x297   : > { %v3718_v6 = vmax.f32 %v3654_v58, 0.0  ;;  %v3657_v14 = vadd.f32 %v9843_v21, %v12721_v36 }
 0x299   : > { %v3719_v18 = vmax.f32 %v3657_v14, 0.0  ;;  %v9844_v40 = vpop.f32.mrb[208].mxu0 }
 0x29a   : > { %v9845_v10 = vpop.f32.mrb[209].mxu0 }
 0x29b   : > { %v3735_v55 = vpack.c.bf16 %v3719_v18, %v3718_v6  ;;  %v9846_v24 = vadd.f32 %v9845_v10, %v9844_v40  ;;  %v9847_v63 = vpop.f32.mrb[210].mxu0 }
 0x29c   : > { %v9848_v4 = vpop.f32.mrb[211].mxu0 }
 0x29d   : > { %10309 = vmatmul.mubr.msk.bf16.gmra.mrb[96].mxu1 %vm655_vm0, %v12686_v12  ;;  %3745 = vst.msk [vmem:[#allocation2 + $0x248] sm:$0xff] %vm655_vm0, %v3735_v55  ;;  %v3662_v31 = vadd.f32 %v9846_v24, %v12721_v36  ;;  %v9849_v34 = vadd.f32 %v9848_v4, %v9847_v63  ;;  %v5285_v12 = vld [vmem:[#allocation2 + $0x1f8] sm:$0xff]  ;;  %v5288_v63 = vld [vmem:[#allocation2 + $0x210] sm:$0xff] }
 0x29e   : > { %10312 = vmatprep.mubr.msk.bf16.mxu1 %vm655_vm0, %v12705_v27  ;;  %v5289_v4 = vld [vmem:[#allocation2 + $0x218] sm:$0xff] }
 0x29f   : > { %v3720_v33 = vmax.f32 %v3662_v31, 0.0  ;;  %v3665_v28 = vadd.f32 %v9849_v34, %v12721_v36 }
 0x2a1   : > { %v3721_v29 = vmax.f32 %v3665_v28, 0.0  ;;  %v9850_v20 = vpop.f32.mrb[212].mxu0 }
 0x2a2   : > { %v9851_v56 = vpop.f32.mrb[213].mxu0 }
 0x2a3   : > { %v3736_v25 = vpack.c.bf16 %v3721_v29, %v3720_v33  ;;  %v9852_v62 = vadd.f32 %v9851_v56, %v9850_v20  ;;  %v9853_v9 = vpop.f32.mrb[214].mxu0 }
 0x2a4   : > { %v9854_v41 = vpop.f32.mrb[215].mxu0 }
 0x2a5   : > { %10313 = vmatmul.mubr.msk.bf16.gmra.mrb[132].mxu1 %vm655_vm0, %v12726_v32  ;;  %3746 = vst.msk [vmem:[#allocation2 + $0x250] sm:$0xff] %vm655_vm0, %v3736_v25  ;;  %v3670_v23 = vadd.f32 %v9852_v62, %v12721_v36  ;;  %v9855_v49 = vadd.f32 %v9854_v41, %v9853_v9  ;;  %v5290_v41 = vld [vmem:[#allocation2 + $0x220] sm:$0xff] }
 0x2a6   : > { %10320 = vmatprep.mubr.msk.bf16.mxu1 %vm655_vm0, %v5285_v12 }
 0x2a7   : > { %v3722_v27 = vmax.f32 %v3670_v23, 0.0  ;;  %v3673_v13 = vadd.f32 %v9855_v49, %v12721_v36  ;;  %v5291_v23 = vld [vmem:[#allocation2 + $0x228] sm:$0xff] }
 0x2a8   : > { %v10194_v11 = vpop.f32.mrb[108].mxu1 }
 0x2a9   : > { %v4171_v50 = vpop.f32.mrb[109].mxu1  ;;  %v3723_v53 = vmax.f32 %v3673_v13, 0.0  ;;  %v9856_v35 = vpop.f32.mrb[216].mxu0 }
 0x2aa   : > { %v12770_v37 = vadd.f32 %v4171_v50, %v12699_v26  ;;  %v10195_v42 = vpop.f32.mrb[110].mxu1  ;;  %v9857_v5 = vpop.f32.mrb[217].mxu0 }
 0x2ab   : > { %v4174_v59 = vpop.f32.mrb[111].mxu1  ;;  %v3737_v46 = vpack.c.bf16 %v3723_v53, %v3722_v27  ;;  %v9858_v3 = vadd.f32 %v9857_v5, %v9856_v35  ;;  %v9859_v38 = vpop.f32.mrb[218].mxu0 }
 0x2ac   : > { %v12776_v19 = vadd.f32 %v4174_v59, %v12702_v51  ;;  %v9860_v61 = vpop.f32.mrb[219].mxu0  ;;  %v12787_v51 = vld [vmem:[%s13543_s3 + $0xb0] sm:$0xff]  }
 0x2ad   : > { %10321 = vmatmul.mubr.msk.bf16.vlgmr.msra.gmra.mrb[88].mxu1 %vm655_vm0, %v5286_v52  ;;  %3747 = vst.msk [vmem:[#allocation2 + $0x258] sm:$0xff] %vm655_vm0, %v3737_v46  ;;  %v3678_v26 = vadd.f32 %v9858_v3, %v12721_v36  ;;  %v9861_v58 = vadd.f32 %v9860_v61, %v9859_v38  ;;  %v5292_v46 = vld [vmem:[#allocation2 + $0x230] sm:$0xff]  ;;  %v5443_v38 = vld [vmem:[#allocation2 + $0x240] sm:$0xff] }
 0x2ae   : > { %10324 = vmatprep.mubr.msk.bf16.mxu1 %vm655_vm0, %v5287_v16  ;;  %10337 = vmatpush3.bf16.msra.mxu1 %v12740_v15 }
 0x2af   : > { %v3724_v21 = vmax.f32 %v3678_v26, 0.0  ;;  %v3681_v6 = vadd.f32 %v9861_v58, %v12721_v36  ;;  %10338 = vmatprep.subr.bf16.mxu1 %v11283_v17 }
 0x2b1   : > { %v3725_v14 = vmax.f32 %v3681_v6, 0.0  ;;  %v9862_v18 = vpop.f32.mrb[220].mxu0 }
 0x2b2   : > { %10339 = vmatpush3.bf16.msra.mxu1 %v11283_v17  ;;  %v9863_v40 = vpop.f32.mrb[221].mxu0 }
 0x2b3   : > { %v3738_v10 = vpack.c.bf16 %v3725_v14, %v3724_v21  ;;  %v9864_v55 = vadd.f32 %v9863_v40, %v9862_v18  ;;  %v9865_v24 = vpop.f32.mrb[222].mxu0  ;;  %10356 = vmatprep.subr.bf16.mxu1 %v12787_v51 }
 0x2b4   : > { %v9866_v15 = vpop.f32.mrb[223].mxu0 }
 0x2b5   : > { %10325 = vmatmul.mubr.msk.bf16.gmra.mrb[92].mxu1 %vm655_vm0, %v5288_v63  ;;  %3748 = vst.msk [vmem:[#allocation2 + $0x260] sm:$0xff] %vm655_vm0, %v3738_v10  ;;  %v3686_v31 = vadd.f32 %v9864_v55, %v12721_v36  ;;  %v9867_v34 = vadd.f32 %v9866_v15, %v9865_v24  ;;  %v11285_v10 = vld [vmem:[%s13543_s3 + $0xb8] sm:$0xff]   ;;  %v5444_v24 = vld [vmem:[#allocation2 + $0x248] sm:$0xff]  ;;  %v5445_v63 = vld [vmem:[#allocation2 + $0x250] sm:$0xff] }
 0x2b6   : > { %10328 = vmatprep.mubr.msk.bf16.mxu1 %vm655_vm0, %v5289_v4 }
 0x2b7   : > { %v3726_v33 = vmax.f32 %v3686_v31, 0.0  ;;  %v3689_v28 = vadd.f32 %v9867_v34, %v12721_v36 }
 0x2b9   : > { %v3727_v29 = vmax.f32 %v3689_v28, 0.0  ;;  %v9868_v20 = vpop.f32.mrb[224].mxu0 }
 0x2ba   : > { %v9869_v56 = vpop.f32.mrb[225].mxu0 }
 0x2bb   : > { %v3739_v25 = vpack.c.bf16 %v3727_v29, %v3726_v33  ;;  %v9870_v62 = vadd.f32 %v9869_v56, %v9868_v20  ;;  %v9871_v9 = vpop.f32.mrb[226].mxu0  ;;  %v11287_v20 = vld [vmem:[%s13543_s3 + $0xc8] sm:$0xff]  }
 0x2bc   : > { %v9872_v12 = vpop.f32.mrb[227].mxu0 }
 0x2bd   : > { %10329 = vmatmul.mubr.msk.bf16.gmra.mrb[96].mxu1 %vm655_vm0, %v5290_v41  ;;  %3749 = vst.msk [vmem:[#allocation2 + $0x268] sm:$0xff] %vm655_vm0, %v3739_v25  ;;  %v3694_v49 = vadd.f32 %v9870_v62, %v12721_v36  ;;  %v9873_v27 = vadd.f32 %v9872_v12, %v9871_v9  ;;  %v5828_v25 = vld [vmem:[#allocation2] sm:$0xe0]  ;;  %v5609_v62 = vld [vmem:[#allocation2 + $0x1f0] sm:$0x1] }
 0x2be   : > { %10332 = vmatprep.mubr.msk.bf16.mxu1 %vm655_vm0, %v5291_v23  ;;  %v5840_v9 = vshll.u32 %v5828_v25, 16  ;;  %v5679_v41 = vshll.u32 %v5609_v62, 16 }
 0x2bf   : > { %v3728_v13 = vmax.f32 %v3694_v49, 0.0  ;;  %v3697_v11 = vadd.f32 %v9873_v27, %v12721_v36 }
 0x2c0   : > { %v5842_v23 = vrot.slane %v5840_v9, 6  ;;  %v5681_v49 = vrot.slane %v5679_v41, 1  ;;  %v6033_v9 = vld [vmem:[#allocation2 + $0x80] sm:$0xff] }
 0x2c1   : > { %v3729_v50 = vmax.f32 %v3697_v11, 0.0  ;;  %v9874_v53 = vpop.f32.mrb[228].mxu0  ;;  %v6026_v11 = vld [vmem:[#allocation2 + $0x48] sm:$0xe0] }
 0x2c2   : > { %v9875_v35 = vpop.f32.mrb[229].mxu0 }
 0x2c3   : > { %v3740_v42 = vpack.c.bf16 %v3729_v50, %v3728_v13  ;;  %v9876_v5 = vadd.f32 %v9875_v35, %v9874_v53  ;;  %v9877_v59 = vpop.f32.mrb[230].mxu0 }
 0x2c4   : > { %v9878_v3 = vpop.f32.mrb[231].mxu0  ;;  %v5448_v15 = vld [vmem:[#allocation2 + $0x268] sm:$0xff] }
 0x2c5   : > { %10333 = vmatmul.mubr.msk.bf16.gmra.mrb[136].mxu1 %vm655_vm0, %v5292_v46  ;;  %3750 = vst.msk [vmem:[#allocation2 + $0x270] sm:$0xff] %vm655_vm0, %v3740_v42  ;;  %v3702_v17 = vadd.f32 %v9876_v5, %v12721_v36  ;;  %v9879_v52 = vadd.f32 %v9878_v3, %v9877_v59  ;;  %v6044_v46 = vshll.u32 %v6026_v11, 16 }
 0x2c6   : > { %10340 = vmatprep.mubr.msk.bf16.mxu1 %vm655_vm0, %v5443_v38 }
 0x2c7   : > { %v3730_v61 = vmax.f32 %v3702_v17, 0.0  ;;  %v3705_v16 = vadd.f32 %v9879_v52, %v12721_v36  ;;  %v11286_v36 = vld [vmem:[%s13543_s3 + $0xc0] sm:$0xff]  }
 0x2c8   : > { %v10214_v26 = vpop.f32.mrb[112].mxu1 }
 0x2c9   : > { %v4399_v58 = vpop.f32.mrb[113].mxu1  ;;  %v3731_v21 = vmax.f32 %v3705_v16, 0.0  ;;  %v6029_v16 = vld [vmem:[#allocation2 + $0x60] sm:$0xff] }
 0x2ca   : > { %v4424_v6 = vadd.f32 %v4399_v58, %v12770_v37  ;;  %v10215_v14 = vpop.f32.mrb[114].mxu1  ;;  %v5446_v37 = vld [vmem:[#allocation2 + $0x258] sm:$0xff]  ;;  %v6046_v58 = vrot.slane %v6044_v46, 6 }
 0x2cb   : > { %v4402_v18 = vpop.f32.mrb[115].mxu1  ;;  %v3741_v40 = vpack.c.bf16 %v3731_v21, %v3730_v61  ;;  %v6028_v61 = vld [vmem:[#allocation2 + $0x58] sm:$0xff] }
 0x2cc   : > { %v4425_v55 = vadd.f32 %v4402_v18, %v12776_v19  ;;  %v5447_v19 = vld [vmem:[#allocation2 + $0x260] sm:$0xff]  ;;  %v5449_v4 = vld [vmem:[#allocation2 + $0x270] sm:$0xff]  ;;  %v6061_v14 = vshll.u32 %v6028_v61, 16 }
 0x2cd   : > { %10341 = vmatmul.mubr.msk.bf16.vlgmr.msra.gmra.mrb[88].mxu1 %vm655_vm0, %v5444_v24  ;;  %3751 = vst.msk [vmem:[#allocation2 + $0x278] sm:$0xff] %vm655_vm0, %v3741_v40  ;;  %v6067_v40 = vshrl.u32 %v6029_v16, 16 }
 0x2ce   : > { %10344 = vmatprep.mubr.msk.bf16.mxu1 %vm655_vm0, %v5445_v63  ;;  %10357 = vmatpush3.bf16.msra.mxu1 %v12787_v51  ;;  %v6063_v63 = vrot.slane %v6061_v14, 6 }
 0x2cf   : > { %10358 = vmatprep.subr.bf16.mxu1 %v11285_v10 }
 0x2d2   : > { %10359 = vmatpush3.bf16.msra.mxu1 %v11285_v10  ;;  %v6070_v10 = vshll.u32 %v6029_v16, 16 }
 0x2d3   : > { %10376 = vmatprep.subr.bf16.mxu1 %v11286_v36 }
 0x2d4   : > { %v5450_v51 = vld [vmem:[#allocation2 + $0x278] sm:$0xff] }
 0x2d5   : > { %10345 = vmatmul.mubr.msk.bf16.gmra.mrb[92].mxu1 %vm655_vm0, %v5446_v37  ;;  %v6072_v37 = vrot.slane %v6070_v10, 6  ;;  %v6267_v10 = vld [vmem:[#allocation2 + $0xa0] sm:$0xff] }
 0x2d6   : > { %10348 = vmatprep.mubr.msk.bf16.mxu1 %vm655_vm0, %v5447_v19  ;;  %v6030_v19 = vld [vmem:[#allocation2 + $0x68] sm:$0xff] }
 0x2dd   : > { %10349 = vmatmul.mubr.msk.bf16.gmra.mrb[96].mxu1 %vm655_vm0, %v5448_v15  ;;  %v6031_v15 = vld [vmem:[#allocation2 + $0x70] sm:$0xff] }
 0x2de   : > { %10352 = vmatprep.mubr.msk.bf16.mxu1 %vm655_vm0, %v5449_v4 }
 0x2e5   : > { %10353 = vmatmul.mubr.msk.bf16.gmra.mrb[140].mxu1 %vm655_vm0, %v5450_v51  ;;  %v6076_v51 = vshrl.u32 %v6030_v19, 16 }
 0x2e6   : > { %10360 = vmatprep.mubr.msk.bf16.mxu1 %vm655_vm0, %v12620_v57  ;;  %v11288_v57 = vld [vmem:[%s13543_s3 + $0xd0] sm:$0xff]  }
 0x2e8   : > { %v10234_v31 = vpop.f32.mrb[116].mxu1 }
 0x2e9   : > { %v4557_v34 = vpop.f32.mrb[117].mxu1  ;;  %v6079_v31 = vshll.u32 %v6030_v19, 16 }
 0x2ea   : > { %v4582_v33 = vadd.f32 %v4557_v34, %v4424_v6  ;;  %v10235_v28 = vpop.f32.mrb[118].mxu1  ;;  %v6058_v6 = vshrl.u32 %v6028_v61, 16 }
 0x2eb   : > { %v4560_v29 = vpop.f32.mrb[119].mxu1  ;;  %v6088_v28 = vshll.u32 %v6031_v15, 16 }
 0x2ec   : > { %v4583_v56 = vadd.f32 %v4560_v29, %v4425_v55 }
 0x2ed   : > { %10361 = vmatmul.mubr.msk.bf16.vlgmr.msra.gmra.mrb[88].mxu1 %vm655_vm0, %v12635_v43  ;;  %v5837_v43 = vshrl.u32 %v5828_v25, 16  ;;  %v6090_v62 = vrot.slane %v6088_v28, 6  ;;  %v6269_v28 = vld [vmem:[#allocation2 + $0xb0] sm:$0xff] }
 0x2ee   : > { %10364 = vmatprep.mubr.msk.bf16.mxu1 %vm655_vm0, %v12661_v0  ;;  %10377 = vmatpush3.bf16.msra.mxu1 %v11286_v36  ;;  %v5675_v0 = vshrl.u32 %v12726_v32, 16 }
 0x2ef   : > { %10378 = vmatprep.subr.bf16.mxu1 %v11287_v20  ;;  %v5839_v12 = vrot.slane %v5837_v43, 5  ;;  %v6032_v43 = vld [vmem:[#allocation2 + $0x78] sm:$0xff] }
 0x2f1   : > { %v5843_v27 = vor.u32 %v5842_v23, %v5839_v12  ;;  %v6094_v12 = vshrl.u32 %v6032_v43, 16  ;;  %v6097_v23 = vshll.u32 %v6032_v43, 16  ;;  %v11293_v43 = vld [vmem:[%s13543_s3 + $0xf8] sm:$0xff]  }
 0x2f2   : > { %10379 = vmatpush3.bf16.msra.mxu1 %v11287_v20  ;;  %v6078_v20 = vrot.slane %v6076_v51, 5 }
 0x2f3   : > { %10396 = vmatprep.subr.bf16.mxu1 %v11288_v57  ;;  %v5847_v32 = vsel %vm5835_vm1, %v5843_v27, %v11972_v45  ;;  %v12864_v45 = vld [vmem:[#allocation2 + $0x40] sm:$0x3f]  ;;  %v6106_v27 = vshll.u32 %v6033_v9, 16 }
 0x2f4   : > { %v5876_v13 = vshll.u32 %v12864_v45, 16 }
 0x2f5   : > { %10365 = vmatmul.mubr.msk.bf16.gmra.mrb[92].mxu1 %vm655_vm0, %v12680_v30  ;;  %v5677_v30 = vor.u32 %v5675_v0, %v12742_v47  ;;  %v12859_v47 = vld [vmem:[%s13543_s3 + $0xe0] sm:$0xff]   ;;  %v12894_v0 = vld [vmem:[%s13543_s3 + $0xf0] sm:$0xff]  }
 0x2f6   : > { %10368 = vmatprep.mubr.msk.bf16.mxu1 %vm655_vm0, %v12695_v48 }
 0x2f7   : > { %v5682_v48 = vsel %vm4212_vm2, %v5677_v30, %v5681_v49  ;;  %v6103_v49 = vshrl.u32 %v6033_v9, 16 }
 0x2fd   : > { %10369 = vmatmul.mubr.msk.bf16.gmra.mrb[96].mxu1 %vm655_vm0, %v12715_v60  ;;  %v11289_v60 = vld [vmem:[%s13543_s3 + $0xd8] sm:$0xff]  }
 0x2fe   : > { %10372 = vmatprep.mubr.msk.bf16.mxu1 %vm655_vm0, %v12746_v44  ;;  %v5873_v44 = vshrl.u32 %v12864_v45, 16 }
 0x300   : > { %v5875_v38 = vrot.slane %v5873_v44, 5  ;;  %v6034_v44 = vld [vmem:[#allocation2 + $0x88] sm:$0x3f] }
 0x305   : > { %10373 = vmatmul.mubr.msk.bf16.gmra.mrb[144].mxu1 %vm655_vm0, %v5682_v48 }
 0x306   : > { %10380 = vmatprep.mubr.msk.bf16.mxu1 %vm655_vm0, %v5847_v32  ;;  %v6096_v32 = vrot.slane %v6094_v12, 5 }
 0x30d   : > { %10381 = vmatmul.mubr.msk.bf16.vlgmr.msra.gmra.mrb[88].mxu1 %vm655_vm0, %v11997_v22  ;;  %v6027_v22 = vld [vmem:[#allocation2 + $0x50] sm:$0xff] }
 0x30e   : > { %10384 = vmatprep.mubr.msk.bf16.mxu1 %vm655_vm0, %v12025_v1  ;;  %10397 = vmatpush3.bf16.msra.mxu1 %v11288_v57  ;;  %v6049_v53 = vshrl.u32 %v6027_v22, 16  ;;  %v6052_v35 = vshll.u32 %v6027_v22, 16  ;;  %v6105_v22 = vrot.slane %v6103_v49, 5 }
 0x30f   : > { %10398 = vmatprep.subr.bf16.mxu1 %v11289_v60 }
 0x310   : > { %v6051_v17 = vrot.slane %v6049_v53, 5  ;;  %v6054_v52 = vrot.slane %v6052_v35, 6  ;;  %v6112_v53 = vshrl.u32 %v6034_v44, 16  ;;  %v6115_v35 = vshll.u32 %v6034_v44, 16 }
 0x312   : > { %10399 = vmatpush3.bf16.msra.mxu1 %v11289_v60  ;;  %v6055_v18 = vor.u32 %v6054_v52, %v6051_v17  ;;  %v6099_v60 = vrot.slane %v6097_v23, 6 }
 0x313   : > { %10416 = vmatprep.subr.bf16.mxu1 %v12859_v47 }
 0x315   : > { %10385 = vmatmul.mubr.msk.bf16.gmra.mrb[92].mxu1 %vm655_vm0, %v12053_v2  ;;  %v6041_v2 = vshrl.u32 %v6026_v11, 16 }
 0x316   : > { %10388 = vmatprep.mubr.msk.bf16.mxu1 %vm655_vm0, %v12088_v54  ;;  %v5878_v54 = vrot.slane %v5876_v13, 6  ;;  %v6266_v13 = vld [vmem:[#allocation2 + $0x98] sm:$0xff] }
 0x317   : > { %v6043_v26 = vrot.slane %v6041_v2, 5  ;;  %v6288_v46 = vshrl.u32 %v6266_v13, 16 }
 0x318   : > { %v10254_v1 = vpop.f32.mrb[120].mxu1  ;;  %v5879_v21 = vor.u32 %v5878_v54, %v5875_v38  ;;  %v6291_v38 = vshll.u32 %v6266_v13, 16 }
 0x319   : > { %v4715_v50 = vpop.f32.mrb[121].mxu1  ;;  %v6047_v55 = vor.u32 %v6046_v58, %v6043_v26  ;;  %v6108_v1 = vrot.slane %v6106_v27, 6  ;;  %v6271_v27 = vld [vmem:[#allocation2 + $0xc0] sm:$0xff] }
 0x31a   : > { %v12870_v42 = vadd.f32 %v4715_v50, %v4582_v33  ;;  %v10255_v5 = vpop.f32.mrb[122].mxu1  ;;  %v5880_v24 = vsel %vm5835_vm1, %v12129_v39, %v5879_v21  ;;  %v6085_v33 = vshrl.u32 %v6031_v15, 16  ;;  %v11291_v39 = vld [vmem:[%s13543_s3 + $0xe8] sm:$0xff]   ;;  %v6100_v50 = vor.u32 %v6099_v60, %v6096_v32 }
 0x31b   : > { %v4718_v59 = vpop.f32.mrb[123].mxu1  ;;  %v6056_v36 = vsel %vm5835_vm1, %v6047_v55, %v6055_v18  ;;  %v6265_v5 = vld [vmem:[#allocation2 + $0x90] sm:$0xe0]  ;;  %v6109_v2 = vor.u32 %v6108_v1, %v6105_v22  ;;  %v6114_v21 = vrot.slane %v6112_v53, 5  ;;  %v6333_v60 = vshrl.u32 %v6271_v27, 16 }
 0x31c   : > { %v12872_v3 = vadd.f32 %v4718_v59, %v4583_v56  ;;  %v6081_v56 = vrot.slane %v6079_v31, 6  ;;  %v6087_v25 = vrot.slane %v6085_v33, 5  ;;  %v6280_v61 = vshrl.u32 %v6265_v5, 16 }
 0x31d   : > { %10389 = vmatmul.mubr.msk.bf16.gmra.mrb[96].mxu1 %vm655_vm0, %v12113_v7  ;;  %v6060_v7 = vrot.slane %v6058_v6, 5  ;;  %v6283_v16 = vshll.u32 %v6265_v5, 16  ;;  %v6117_v6 = vrot.slane %v6115_v35, 6  ;;  %v6110_v14 = vsel %vm5835_vm1, %v6100_v50, %v6109_v2 }
 0x31e   : > { %10392 = vmatprep.mubr.msk.bf16.mxu1 %vm655_vm0, %v12135_v8  ;;  %v6069_v8 = vrot.slane %v6067_v40, 5  ;;  %v6082_v41 = vor.u32 %v6081_v56, %v6078_v20  ;;  %v6091_v30 = vor.u32 %v6090_v62, %v6087_v25  ;;  %v6293_v40 = vrot.slane %v6291_v38, 6 }
 0x31f   : > { %v6064_v4 = vor.u32 %v6063_v63, %v6060_v7  ;;  %v6282_v55 = vrot.slane %v6280_v61, 5  ;;  %v6118_v7 = vor.u32 %v6117_v6, %v6114_v21  ;;  %v6297_v63 = vshrl.u32 %v6267_v10, 16 }
 0x320   : > { %v6073_v34 = vor.u32 %v6072_v37, %v6069_v8  ;;  %v6101_v58 = vsel %vm5835_vm1, %v6091_v30, %v6100_v50  ;;  %v6315_v20 = vshrl.u32 %v6269_v28, 16  ;;  %v6318_v56 = vshll.u32 %v6269_v28, 16 }
 0x321   : > { %v6065_v29 = vsel %vm5835_vm1, %v6055_v18, %v6064_v4  ;;  %v6290_v18 = vrot.slane %v6288_v46, 5  ;;  %v6119_v15 = vsel %vm5835_vm1, %v6109_v2, %v6118_v7 }
 0x322   : > { %v6074_v57 = vsel %vm5835_vm1, %v6064_v4, %v6073_v34  ;;  %v6083_v48 = vsel %vm5835_vm1, %v6073_v34, %v6082_v41  ;;  %v6299_v4 = vrot.slane %v6297_v63, 5  ;;  %v6320_v12 = vrot.slane %v6318_v56, 6  ;;  %v11342_v63 = vld [vmem:[#allocation2 + $0x10] sm:$0xff]  ;;  %v11347_v56 = vld [vmem:[#allocation2 + $0x38] sm:$0xff] }
 0x325   : > { %10393 = vmatmul.mubr.msk.bf16.gmra.mrb[148].mxu1 %vm655_vm0, %v5880_v24  ;;  %v6285_v24 = vrot.slane %v6283_v16, 6 }
 0x326   : > { %10400 = vmatprep.mubr.msk.bf16.mxu1 %vm655_vm0, %v6056_v36  ;;  %v6294_v36 = vor.u32 %v6293_v40, %v6290_v18 }
 0x327   : > { %v6286_v19 = vor.u32 %v6285_v24, %v6282_v55  ;;  %v11341_v55 = vld [vmem:[#allocation2 + $0x8] sm:$0xff] }
 0x328   : > { %v6521_v24 = vrot.slane %v11341_v55, 6 }
 0x329   : > { %v6295_v31 = vsel %vm5835_vm1, %v6286_v19, %v6294_v36 }
 0x32d   : > { %10401 = vmatmul.mubr.msk.bf16.vlgmr.msra.gmra.mrb[88].mxu1 %vm655_vm0, %v6065_v29 }
 0x32e   : > { %10404 = vmatprep.mubr.msk.bf16.mxu1 %vm655_vm0, %v6074_v57  ;;  %10417 = vmatpush3.bf16.msra.mxu1 %v12859_v47  ;;  %v6092_v47 = vsel %vm5835_vm1, %v6082_v41, %v6091_v30  ;;  %v6317_v41 = vrot.slane %v6315_v20, 5 }
 0x32f   : > { %10418 = vmatprep.subr.bf16.mxu1 %v11291_v39 }
 0x330   : > { %v6321_v32 = vor.u32 %v6320_v12, %v6317_v41  ;;  %v11294_v12 = vld [vmem:[%s13545_s5 + $0x20] sm:$0xff]  }
 0x331   : > { %10456 = vmatprep.subr.bf16.mxu0 %v11294_v12 }
 0x332   : > { %10419 = vmatpush3.bf16.msra.mxu1 %v11291_v39  ;;  %v6270_v39 = vld [vmem:[#allocation2 + $0xb8] sm:$0xff]  ;;  %10457 = vmatpush3.bf16.msra.mxu0 %v11294_v12 }
 0x333   : > { %10436 = vmatprep.subr.bf16.mxu1 %v12894_v0  ;;  %v6324_v25 = vshrl.u32 %v6270_v39, 16  ;;  %v6327_v62 = vshll.u32 %v6270_v39, 16  ;;  %v11346_v39 = vld [vmem:[#allocation2 + $0x30] sm:$0xff] }
 0x335   : > { %10405 = vmatmul.mubr.msk.bf16.gmra.mrb[92].mxu1 %vm655_vm0, %v6083_v48  ;;  %v6326_v30 = vrot.slane %v6324_v25, 5  ;;  %v6329_v49 = vrot.slane %v6327_v62, 6  ;;  %v6272_v48 = vld [vmem:[#allocation2 + $0xc8] sm:$0xff] }
 0x336   : > { %10408 = vmatprep.mubr.msk.bf16.mxu1 %vm655_vm0, %v6092_v47  ;;  %v6336_v47 = vshll.u32 %v6271_v27, 16  ;;  %v6342_v1 = vshrl.u32 %v6272_v48, 16  ;;  %v6345_v44 = vshll.u32 %v6272_v48, 16 }
 0x337   : > { %v6330_v22 = vor.u32 %v6329_v49, %v6326_v30  ;;  %v6535_v30 = vrot.slane %v12864_v45, 6  ;;  %v11296_v45 = vld [vmem:[%s13545_s5 + $0x30] sm:$0xff]  }
 0x338   : > { %v10274_v11 = vpop.f32.mrb[124].mxu1  ;;  %v6338_v50 = vrot.slane %v6336_v47, 6  ;;  %v6344_v35 = vrot.slane %v6342_v1, 5  ;;  %v6347_v5 = vrot.slane %v6345_v44, 6  ;;  %v11295_v1 = vld [vmem:[%s13545_s5 + $0x28] sm:$0xff]  }
 0x339   : > { %v4873_v59 = vpop.f32.mrb[125].mxu1  ;;  %v6335_v11 = vrot.slane %v6333_v60, 5  ;;  %v6331_v53 = vsel %vm5835_vm1, %v6321_v32, %v6330_v22  ;;  %10458 = vmatprep.subr.bf16.mxu0 %v11295_v1 }
 0x33a   : > { %v12902_v54 = vadd.f32 %v4873_v59, %v12870_v42  ;;  %v10275_v17 = vpop.f32.mrb[126].mxu1  ;;  %v6268_v42 = vld [vmem:[#allocation2 + $0xa8] sm:$0xff]  ;;  %10459 = vmatpush3.bf16.msra.mxu0 %v11295_v1 }
 0x33b   : > { %v4876_v52 = vpop.f32.mrb[127].mxu1  ;;  %v6306_v8 = vshrl.u32 %v6268_v42, 16  ;;  %v6309_v37 = vshll.u32 %v6268_v42, 16  ;;  %v6339_v2 = vor.u32 %v6338_v50, %v6335_v11  ;;  %v6504_v42 = vld [vmem:[#allocation2] sm:$0xc0]  ;;  %10460 = vmatprep.subr.bf16.mxu0 %v11296_v45 }
 0x33c   : > { %v12905_v26 = vadd.f32 %v4876_v52, %v12872_v3  ;;  %v6300_v3 = vshll.u32 %v6267_v10, 16  ;;  %v6348_v52 = vor.u32 %v6347_v5, %v6344_v35  ;;  %v11297_v5 = vld [vmem:[%s13545_s5 + $0x38] sm:$0xff]  }
 0x33d   : > { %10409 = vmatmul.mubr.msk.bf16.gmra.mrb[96].mxu1 %vm655_vm0, %v6101_v58  ;;  %v6308_v34 = vrot.slane %v6306_v8, 5  ;;  %v6311_v33 = vrot.slane %v6309_v37, 6  ;;  %v6340_v6 = vsel %vm5835_vm1, %v6330_v22, %v6339_v2 }
 0x33e   : > { %10412 = vmatprep.mubr.msk.bf16.mxu1 %vm655_vm0, %v6110_v14  ;;  %v6302_v51 = vrot.slane %v6300_v3, 6  ;;  %v6349_v40 = vsel %vm5835_vm1, %v6339_v2, %v6348_v52  ;;  %v6523_v3 = vrot.slane %v11342_v63, 6  ;;  %10461 = vmatpush3.bf16.msra.mxu0 %v11296_v45 }
 0x33f   : > { %v6312_v57 = vor.u32 %v6311_v33, %v6308_v34  ;;  %10462 = vmatprep.subr.bf16.mxu0 %v11297_v5 }
 0x340   : > { %v6303_v29 = vor.u32 %v6302_v51, %v6299_v4  ;;  %v6524_v37 = vsel %vm6519_vm3, %v6521_v24, %v6523_v3  ;;  %v11345_v51 = vld [vmem:[#allocation2 + $0x28] sm:$0xff] }
 0x341   : > { %v6322_v13 = vsel %vm5835_vm1, %v6312_v57, %v6321_v32 }
 0x342   : > { %v6304_v9 = vsel %vm5835_vm1, %v6294_v36, %v6303_v29  ;;  %v6313_v23 = vsel %vm5835_vm1, %v6303_v29, %v6312_v57  ;;  %v11343_v36 = vld [vmem:[#allocation2 + $0x18] sm:$0xff]  ;;  %v6531_v29 = vrot.slane %v11346_v39, 6  ;;  %v6533_v57 = vrot.slane %v11347_v56, 6  ;;  %10463 = vmatpush3.bf16.msra.mxu0 %v11297_v5 }
 0x343   : > { %v6525_v8 = vrot.slane %v11343_v36, 6 }
 0x344   : > { %v6536_v49 = vsel %vm6519_vm3, %v6533_v57, %v6535_v30 }
 0x345   : > { %10413 = vmatmul.mubr.msk.bf16.gmra.mrb[152].mxu1 %vm655_vm0, %v6119_v15  ;;  %v6526_v19 = vsel %vm6519_vm3, %v6523_v3, %v6525_v8  ;;  %v11344_v15 = vld [vmem:[#allocation2 + $0x20] sm:$0xff] }
 0x346   : > { %10420 = vmatprep.mubr.msk.bf16.mxu1 %vm655_vm0, %v6295_v31  ;;  %v6527_v4 = vrot.slane %v11344_v15, 6  ;;  %v6529_v31 = vrot.slane %v11345_v51, 6 }
 0x348   : > { %v6528_v34 = vsel %vm6519_vm3, %v6525_v8, %v6527_v4  ;;  %v6530_v33 = vsel %vm6519_vm3, %v6527_v4, %v6529_v31  ;;  %v6532_v41 = vsel %vm6519_vm3, %v6529_v31, %v6531_v29 }
 0x34d   : > { %10421 = vmatmul.mubr.msk.bf16.vlgmr.msra.gmra.mrb[88].mxu1 %vm655_vm0, %v6304_v9 }
 0x34e   : > { %10424 = vmatprep.mubr.msk.bf16.mxu1 %vm655_vm0, %v6313_v23  ;;  %10437 = vmatpush3.bf16.msra.mxu1 %v12894_v0  ;;  %v6273_v0 = vld [vmem:[#allocation2 + $0xd0] sm:$0x3f]  ;;  %v6534_v23 = vsel %vm6519_vm3, %v6531_v29, %v6533_v57 }
 0x34f   : > { %10438 = vmatprep.subr.bf16.mxu1 %v11293_v43  ;;  %v6351_v46 = vshrl.u32 %v6273_v0, 16  ;;  %v6354_v38 = vshll.u32 %v6273_v0, 16  ;;  %v11298_v0 = vld [vmem:[%s11438_s26 + $0x504] ss:$8 sps:$4 sm:$0xff]  }
 0x350   : > { %3707 = vmatprep.mubr.bf16.mxu0 %v11298_v0 }
 0x351   : > { %v6353_v14 = vrot.slane %v6351_v46, 5  ;;  %v6356_v18 = vrot.slane %v6354_v38, 6  ;;  %v12969_v46 = vld [vmem:[%s13545_s5] sm:$0xff]  }
 0x352   : > { %10439 = vmatpush3.bf16.msra.mxu1 %v11293_v43  ;;  %10476 = vmatprep.subr.bf16.mxu0 %v12969_v46 }
 0x353   : > { %v6357_v10 = vor.u32 %v6356_v18, %v6353_v14 }
 0x355   : > { %10425 = vmatmul.mubr.msk.bf16.gmra.mrb[92].mxu1 %vm655_vm0, %v6322_v13  ;;  %v6358_v7 = vsel %vm5835_vm1, %v6348_v52, %v6357_v10 }
 0x356   : > { %10428 = vmatprep.mubr.msk.bf16.mxu1 %vm655_vm0, %v6331_v53 }
 0x358   : > { %v10294_v59 = vpop.f32.mrb[128].mxu1 }
 0x359   : > { %v5100_v17 = vpop.f32.mrb[129].mxu1  ;;  %v11300_v59 = vld [vmem:[%s11438_s26 + $0x500] ss:$8 sps:$4 sm:$0xff]  }
 0x35a   : > { %v5125_v61 = vadd.f32 %v5100_v17, %v12902_v54  ;;  %v10295_v16 = vpop.f32.mrb[130].mxu1  ;;  %v6520_v54 = vrot.slane %v6504_v42, 6  ;;  %3708 = vmatmul.mubr.bf16.gmra.mrb[232].mxu0 %v11300_v59 }
 0x35b   : > { %v5103_v58 = vpop.f32.mrb[131].mxu1 }
 0x35c   : > { %v5126_v21 = vadd.f32 %v5103_v58, %v12905_v26  ;;  %v6522_v26 = vsel %vm6519_vm3, %v6520_v54, %v6521_v24 }
 0x35d   : > { %10429 = vmatmul.mubr.msk.bf16.gmra.mrb[96].mxu1 %vm655_vm0, %v6340_v6 }
 0x35e   : > { %10432 = vmatprep.mubr.msk.bf16.mxu1 %vm655_vm0, %v6349_v40 }
 0x365   : > { %10433 = vmatmul.mubr.msk.bf16.gmra.mrb[156].mxu1 %vm655_vm0, %v6358_v7 }
 0x366   : > { %10440 = vmatprep.mubr.msk.bf16.mxu1 %vm655_vm0, %v6522_v26 }
 0x36d   : > { %10441 = vmatmul.mubr.msk.bf16.vlgmr.msra.gmra.mrb[88].mxu1 %vm655_vm0, %v6524_v37 }
 0x36e   : > { %10444 = vmatprep.mubr.msk.bf16.mxu1 %vm655_vm0, %v6526_v19  ;;  %v12979_v19 = vld [vmem:[%s13544_s4] ss:$0 sm:$0xff] }
 0x375   : > { %10445 = vmatmul.mubr.msk.bf16.gmra.mrb[92].mxu1 %vm655_vm0, %v6528_v34 }
 0x376   : > { %10448 = vmatprep.mubr.msk.bf16.mxu1 %vm655_vm0, %v6530_v33 }
 0x378   : > { %v10314_v28 = vpop.f32.mrb[132].mxu1 }
 0x379   : > { %v5258_v20 = vpop.f32.mrb[133].mxu1 }
 0x37a   : > { %v5283_v25 = vadd.f32 %v5258_v20, %v5125_v61  ;;  %v10315_v62 = vpop.f32.mrb[134].mxu1 }
 0x37b   : > { %v5261_v43 = vpop.f32.mrb[135].mxu1 }
 0x37c   : > { %v5284_v9 = vadd.f32 %v5261_v43, %v5126_v21 }
 0x37d   : > { %10449 = vmatmul.mubr.msk.bf16.gmra.mrb[96].mxu1 %vm655_vm0, %v6532_v41 }
 0x37e   : > { %10452 = vmatprep.mubr.msk.bf16.mxu1 %vm655_vm0, %v6534_v23 }
 0x385   : > { %10453 = vmatmul.mubr.msk.bf16.gmra.mrb[160].mxu1 %vm655_vm0, %v6536_v49  ;;  %vm8275_vm0 = vsmask.f32 4368 }
 0x398   : > { %v10334_v27 = vpop.f32.mrb[136].mxu1 }
 0x399   : > { %v5416_v48 = vpop.f32.mrb[137].mxu1 }
 0x39a   : > { %v5441_v32 = vadd.f32 %v5416_v48, %v5283_v25  ;;  %v10335_v60 = vpop.f32.mrb[138].mxu1 }
 0x39b   : > { %v5419_v47 = vpop.f32.mrb[139].mxu1 }
 0x39c   : > { %v5442_v22 = vadd.f32 %v5419_v47, %v5284_v9 }
 0x3b8   : > { %v10354_v44 = vpop.f32.mrb[140].mxu1 }
 0x3b9   : > { %v5574_v13 = vpop.f32.mrb[141].mxu1 }
 0x3ba   : > { %v5599_v11 = vadd.f32 %v5574_v13, %v5441_v32  ;;  %v10355_v50 = vpop.f32.mrb[142].mxu1 }
 0x3bb   : > { %v5577_v53 = vpop.f32.mrb[143].mxu1 }
 0x3bc   : > { %v5600_v35 = vadd.f32 %v5577_v53, %v5442_v22 }
 0x3d8   : > { %v10374_v2 = vpop.f32.mrb[144].mxu1 }
 0x3d9   : > { %v5801_v38 = vpop.f32.mrb[145].mxu1 }
 0x3da   : > { %v5826_v17 = vadd.f32 %v5801_v38, %v5599_v11  ;;  %v10375_v52 = vpop.f32.mrb[146].mxu1 }
 0x3db   : > { %v5804_v61 = vpop.f32.mrb[147].mxu1 }
 0x3dc   : > { %v5827_v16 = vadd.f32 %v5804_v61, %v5600_v35 }
 0x3f8   : > { %v10394_v58 = vpop.f32.mrb[148].mxu1 }
 0x3f9   : > { %v5999_v21 = vpop.f32.mrb[149].mxu1 }
 0x3fa   : > { %v6024_v6 = vadd.f32 %v5999_v21, %v5826_v17  ;;  %v10395_v14 = vpop.f32.mrb[150].mxu1 }
 0x3fb   : > { %v6002_v18 = vpop.f32.mrb[151].mxu1 }
 0x3fc   : > { %v6025_v40 = vadd.f32 %v6002_v18, %v5827_v16 }
 0x418   : > { %v10414_v10 = vpop.f32.mrb[152].mxu1 }
 0x419   : > { %v6238_v42 = vpop.f32.mrb[153].mxu1 }
 0x41a   : > { %v6263_v55 = vadd.f32 %v6238_v42, %v6024_v6  ;;  %v10415_v24 = vpop.f32.mrb[154].mxu1 }
 0x41b   : > { %v6241_v54 = vpop.f32.mrb[155].mxu1 }
 0x41c   : > { %v6264_v7 = vadd.f32 %v6241_v54, %v6025_v40 }
 0x438   : > { %v10434_v26 = vpop.f32.mrb[156].mxu1 }
 0x439   : > { %v6477_v63 = vpop.f32.mrb[157].mxu1 }
 0x43a   : > { %v12972_v3 = vadd.f32 %v6477_v63, %v6263_v55  ;;  %v10435_v36 = vpop.f32.mrb[158].mxu1 }
 0x43b   : > { %v6480_v8 = vpop.f32.mrb[159].mxu1 }
 0x43c   : > { %v12974_v37 = vadd.f32 %v6480_v8, %v6264_v7 }
 0x440   : > { %v10442_v15 = vpop.f32.mrb[88].mxu1 }
 0x441   : > { %v6691_v4 = vadd.f32 %v10442_v15, %v12979_v19  ;;  %v6607_v51 = vpop.f32.mrb[89].mxu1 }
 0x442   : > { %v6689_v31 = vadd.f32 %v12979_v19, %v6607_v51  ;;  %v10443_v34 = vpop.f32.mrb[90].mxu1 }
 0x443   : > { %v6692_v33 = vadd.f32 %v10443_v34, %v12979_v19  ;;  %v6610_v28 = vpop.f32.mrb[91].mxu1  ;;  %v6705_v29 = vmax.f32 %v6691_v4, 0.0 }
 0x444   : > { %v6690_v39 = vadd.f32 %v12979_v19, %v6610_v28  ;;  %v6703_v56 = vmax.f32 %v6689_v31, 0.0 }
 0x445   : > { %v6706_v20 = vmax.f32 %v6692_v33, 0.0 }
 0x446   : > { %v6704_v57 = vmax.f32 %v6690_v39, 0.0 }
 0x447   : > { %v12985_v25 = vpack.c.bf16 %v6706_v20, %v6705_v29 }
 0x448   : > { %v12987_v62 = vpack.c.bf16 %v6704_v57, %v6703_v56  ;;  %v10446_v43 = vpop.f32.mrb[92].mxu1  ;;  %v11302_v57 = vld [vmem:[%s13545_s5 + $0x8] sm:$0xff]  }
 0x449   : > { %v6695_v9 = vadd.f32 %v10446_v43, %v12979_v19  ;;  %v6623_v41 = vpop.f32.mrb[93].mxu1  ;;  %v12991_v12 = vshll.u32 %v12985_v25, 16  ;;  %v12994_v23 = vshrl.u32 %v12985_v25, 16  ;;  %v7044_v30 = vrot.slane %v12985_v25, 1 }
 0x44a   : > { %v6693_v49 = vadd.f32 %v12979_v19, %v6623_v41  ;;  %v10447_v27 = vpop.f32.mrb[94].mxu1  ;;  %v12999_v48 = vshrl.u32 %v12987_v62, 16  ;;  %v13002_v32 = vshll.u32 %v12987_v62, 16  ;;  %v7043_v60 = vrot.slane %v12987_v62, 1 }
 0x44b   : > { %v6709_v47 = vmax.f32 %v6695_v9, 0.0  ;;  %v6696_v22 = vadd.f32 %v10447_v27, %v12979_v19  ;;  %v6626_v1 = vpop.f32.mrb[95].mxu1  ;;  %v6751_v45 = vrot.slane %v12991_v12, 1  ;;  %v7199_v44 = vrot.slane %v12994_v23, 5 }
 0x44c   : > { %v6707_v13 = vmax.f32 %v6693_v49, 0.0  ;;  %v6694_v11 = vadd.f32 %v12979_v19, %v6626_v1  ;;  %v6746_v50 = vrot.slane %v13002_v32, 1  ;;  %v13011_v53 = vsel %vm7042_vm5, %v7043_v60, %v7044_v30 }
 0x44d   : > { %v6710_v35 = vmax.f32 %v6696_v22, 0.0  ;;  %v6755_v5 = vor.u32 %v12994_v23, %v6751_v45  ;;  %v7196_v0 = vrot.slane %v12999_v48, 5  ;;  %v7197_v59 = vrot.slane %v13002_v32, 6 }
 0x44e   : > { %v6708_v2 = vmax.f32 %v6694_v11, 0.0  ;;  %v6747_v38 = vor.u32 %v6746_v50, %v12999_v48  ;;  %v7200_v17 = vrot.slane %v12991_v12, 6  ;;  %v7371_v52 = vrot.slane %v12987_v62, 6 }
 0x44f   : > { %v13019_v61 = vpack.c.bf16 %v6710_v35, %v6709_v47  ;;  %v7198_v16 = vor.u32 %v7197_v59, %v7196_v0  ;;  %v7372_v58 = vrot.slane %v12985_v25, 6  ;;  %v7527_v21 = vrot.slane %v12999_v48, 6  ;;  %v11303_v59 = vld [vmem:[%s13545_s5 + $0x10] sm:$0xff]  }
 0x450   : > { %v13023_v6 = vpack.c.bf16 %v6708_v2, %v6707_v13  ;;  %v10450_v14 = vpop.f32.mrb[96].mxu1  ;;  %v6752_v18 = vsel %vm4212_vm2, %v6747_v38, %v6751_v45  ;;  %v7201_v40 = vor.u32 %v7200_v17, %v7199_v44  ;;  %v7528_v10 = vrot.slane %v13002_v32, 7 }
 0x451   : > { %v6699_v42 = vadd.f32 %v10450_v14, %v12979_v19  ;;  %v6639_v55 = vpop.f32.mrb[97].mxu1  ;;  %10464 = vmatprep.mubr.msk.bf16.mxu0 %vm6812_vm4, %v6752_v18  ;;  %v13030_v24 = vshll.u32 %v13019_v61, 16  ;;  %v13033_v54 = vshrl.u32 %v13019_v61, 16  ;;  %v7048_v7 = vrot.slane %v13019_v61, 1 }
 0x452   : > { %v6697_v26 = vadd.f32 %v12979_v19, %v6639_v55  ;;  %v10451_v63 = vpop.f32.mrb[98].mxu1  ;;  %v13038_v36 = vshll.u32 %v13023_v6, 16  ;;  %v13041_v8 = vshrl.u32 %v13023_v6, 16  ;;  %v7046_v15 = vrot.slane %v13023_v6, 1 }
 0x453   : > { %v6713_v4 = vmax.f32 %v6699_v42, 0.0  ;;  %v6700_v51 = vadd.f32 %v10451_v63, %v12979_v19  ;;  %v6642_v31 = vpop.f32.mrb[99].mxu1  ;;  %v6767_v34 = vrot.slane %v13030_v24, 1  ;;  %v13047_v33 = vsel %vm5835_vm1, %v7198_v16, %v7201_v40 }
 0x454   : > { %v6711_v28 = vmax.f32 %v6697_v26, 0.0  ;;  %v6698_v39 = vadd.f32 %v12979_v19, %v6642_v31  ;;  %v6759_v29 = vrot.slane %v13038_v36, 1  ;;  %v13052_v20 = vsel %vm7042_vm5, %v7044_v30, %v7046_v15 }
 0x455   : > { %v6714_v56 = vmax.f32 %v6700_v51, 0.0  ;;  %v6771_v43 = vor.u32 %v13033_v54, %v6767_v34  ;;  %v13059_v9 = vsel %vm7042_vm5, %v7046_v15, %v7048_v7  ;;  %v7203_v41 = vrot.slane %v13041_v8, 5 }
 0x456   : > { %v6712_v49 = vmax.f32 %v6698_v39, 0.0  ;;  %v6760_v27 = vsel %vm4212_vm2, %v6755_v5, %v6759_v29  ;;  %v6763_v60 = vor.u32 %v13041_v8, %v6759_v29  ;;  %v7204_v30 = vrot.slane %v13038_v36, 6 }
 0x457   : > { %v13065_v47 = vpack.c.bf16 %v6714_v56, %v6713_v4  ;;  %10465 = vmatmul.mubr.msk.bf16.vlgmr.msra.gmra.mrb[236].mxu0 %vm6812_vm4, %v6760_v27  ;;  %v7207_v22 = vrot.slane %v13033_v54, 5  ;;  %v7208_v1 = vrot.slane %v13030_v24, 6  ;;  %v13073_v45 = vsel %vm6519_vm3, %v7371_v52, %v7372_v58 }
 0x458   : > { %v13075_v44 = vpack.c.bf16 %v6712_v49, %v6711_v28  ;;  %v10454_v13 = vpop.f32.mrb[160].mxu1  ;;  %10477 = vmatpush3.bf16.msra.mxu0 %v12969_v46  ;;  %v6768_v11 = vsel %vm4212_vm2, %v6763_v60, %v6767_v34  ;;  %v7205_v50 = vor.u32 %v7204_v30, %v7203_v41  ;;  %v7374_v35 = vrot.slane %v13023_v6, 6  ;;  %v11304_v34 = vld [vmem:[%s13545_s5 + $0x18] sm:$0xff]  }
 0x459   : > { %v6655_v5 = vpop.f32.mrb[161].mxu1  ;;  %10468 = vmatprep.mubr.msk.bf16.mxu0 %vm6812_vm4, %v6768_v11  ;;  %10478 = vmatprep.subr.bf16.mxu0 %v11302_v57  ;;  %v13082_v0 = vshll.u32 %v13065_v47, 16  ;;  %v13088_v2 = vshrl.u32 %v13065_v47, 16  ;;  %v7052_v46 = vrot.slane %v13065_v47, 1  ;;  %v7209_v38 = vor.u32 %v7208_v1, %v7207_v22  ;;  %v13142_v1 = vld [vmem:[%s13545_s5 + $0x40] sm:$0xff]  }
 0x45a   : > { %v6680_v17 = vadd.f32 %v6655_v5, %v12972_v3  ;;  %v10455_v52 = vpop.f32.mrb[162].mxu1  ;;  %v13093_v16 = vshll.u32 %v13075_v44, 16  ;;  %v13096_v14 = vshrl.u32 %v13075_v44, 16  ;;  %v7050_v18 = vrot.slane %v13075_v44, 1 }
 0x45b   : > { %v6658_v42 = vpop.f32.mrb[163].mxu1  ;;  %v6783_v55 = vrot.slane %v13082_v0, 1  ;;  %v13101_v26 = vsel %vm5835_vm1, %v7201_v40, %v7205_v50  ;;  %v13104_v63 = vsel %vm5835_vm1, %v7205_v50, %v7209_v38  ;;  %v7215_v3 = vrot.slane %v13088_v2, 5 }
 0x45c   : > { %v6701_v15 = vadd.f32 %v12979_v19, %v6680_v17  ;;  %v6681_v4 = vadd.f32 %v6658_v42, %v12974_v37  ;;  %10479 = vmatpush3.bf16.msra.mxu0 %v11302_v57  ;;  %v6775_v51 = vrot.slane %v13093_v16, 1  ;;  %v13111_v31 = vsel %vm7042_vm5, %v7048_v7, %v7050_v18 }
 0x45d   : > { %10480 = vmatprep.subr.bf16.mxu0 %v11303_v59  ;;  %v6787_v40 = vor.u32 %v13088_v2, %v6783_v55  ;;  %v13120_v28 = vsel %vm7042_vm5, %v7050_v18, %v7052_v46  ;;  %v7211_v37 = vrot.slane %v13096_v14, 5  ;;  %v7212_v39 = vrot.slane %v13093_v16, 6  ;;  %vm8205_vm5 = vmor %vm5835_vm1, %vm8204_vm14 }
 0x45e   : > { %v6715_v29 = vmax.f32 %v6701_v15, 0.0  ;;  %v6702_v7 = vadd.f32 %v12979_v19, %v6681_v4  ;;  %v6776_v56 = vsel %vm4212_vm2, %v6771_v43, %v6775_v51  ;;  %v6779_v57 = vor.u32 %v13096_v14, %v6775_v51 }
 0x45f   : > { %10469 = vmatmul.mubr.msk.bf16.gmra.mrb[240].mxu0 %vm6812_vm4, %v6776_v56  ;;  %v7213_v41 = vor.u32 %v7212_v39, %v7211_v37  ;;  %v7216_v49 = vrot.slane %v13082_v0, 6  ;;  %v13132_v27 = vsel %vm6519_vm3, %v7372_v58, %v7374_v35  ;;  %v7376_v60 = vrot.slane %v13019_v61, 6 }
 0x460   : > { %v6716_v30 = vmax.f32 %v6702_v7, 0.0  ;;  %v6784_v22 = vsel %vm4212_vm2, %v6779_v57, %v6783_v55  ;;  %10481 = vmatpush3.bf16.msra.mxu0 %v11303_v59  ;;  %v7378_v19 = vrot.slane %v13075_v44, 6  ;;  %v7380_v43 = vrot.slane %v13065_v47, 6 }
 0x461   : > { %10472 = vmatprep.mubr.msk.bf16.mxu0 %vm6812_vm4, %v6784_v22  ;;  %10482 = vmatprep.subr.bf16.mxu0 %v11304_v34  ;;  %v13145_v58 = vsel %vm5835_vm1, %v7209_v38, %v7213_v41  ;;  %v7217_v13 = vor.u32 %v7216_v49, %v7215_v3  ;;  %v13148_v11 = vsel %vm6519_vm3, %v7374_v35, %v7376_v60  ;;  %v7530_v50 = vrot.slane %v12994_v23, 6 }
 0x462   : > { %v13151_v5 = vpack.c.bf16 %v6716_v30, %v6715_v29  ;;  %v13154_v59 = vsel %vm6519_vm3, %v7376_v60, %v7378_v19  ;;  %v13157_v17 = vsel %vm6519_vm3, %v7378_v19, %v7380_v43  ;;  %v7529_v38 = vor.u32 %v7528_v10, %v7527_v21 }
 0x463   : > { %v13164_v52 = vsel %vm5835_vm1, %v7213_v41, %v7217_v13  ;;  %v7531_v35 = vrot.slane %v12991_v12, 7  ;;  %v7534_v18 = vrot.slane %v13041_v8, 6  ;;  %v7535_v42 = vrot.slane %v13038_v36, 7 }
 0x464   : > { %v13170_v55 = vshrl.u32 %v13151_v5, 16  ;;  %v13173_v3 = vshll.u32 %v13151_v5, 16  ;;  %10483 = vmatpush3.bf16.msra.mxu0 %v11304_v34  ;;  %v7382_v48 = vrot.slane %v13151_v5, 6  ;;  %v7538_v32 = vrot.slane %v13033_v54, 6 }
 0x465   : > { %10496 = vmatprep.subr.bf16.mxu0 %v13142_v1  ;;  %v7532_v21 = vor.u32 %v7531_v35, %v7530_v50  ;;  %v7536_v10 = vor.u32 %v7535_v42, %v7534_v18  ;;  %v7539_v15 = vrot.slane %v13030_v24, 7  ;;  %v7542_v4 = vrot.slane %v13096_v14, 6 }
 0x466   : > { %v7222_v51 = vrot.slane %v13170_v55, 5  ;;  %v7225_v37 = vrot.slane %v13173_v3, 6  ;;  %v13183_v39 = vsel %vm6519_vm3, %v7380_v43, %v7382_v48  ;;  %v7543_v34 = vrot.slane %v13093_v16, 7 }
 0x467   : > { %10473 = vmatmul.mubr.msk.bf16.gmra.mrb[244].mxu0 %vm6812_vm4, %v6787_v40  ;;  %v13188_v29 = vsel %vm7526_vm6, %v7529_v38, %v7532_v21  ;;  %v13191_v7 = vsel %vm7526_vm6, %v7532_v21, %v7536_v10  ;;  %v7540_v56 = vor.u32 %v7539_v15, %v7538_v32  ;;  %v7546_v57 = vrot.slane %v13088_v2, 6 }
 0x468   : > { %10484 = vmatprep.mubr.msk.bf16.mxu0 %vm6812_vm4, %v12987_v62  ;;  %v7226_v41 = vor.u32 %v7225_v37, %v7222_v51  ;;  %v7544_v49 = vor.u32 %v7543_v34, %v7542_v4  ;;  %v7547_v60 = vrot.slane %v13082_v0, 7  ;;  %v7550_v30 = vrot.slane %v13170_v55, 6  ;;  %v11306_v4 = vld [vmem:[%s13545_s5 + $0x48] sm:$0xff]  }
 0x469   : > { %v13199_v40 = vsel %vm7526_vm6, %v7536_v10, %v7540_v56  ;;  %v7551_v22 = vrot.slane %v13173_v3, 7  ;;  %v7697_v19 = vrot.slane %v12985_v25, 3  ;;  %v7698_v43 = vrot.slane %v13023_v6, 3 }
 0x46a   : > { %v13205_v50 = vsel %vm5835_vm1, %v7217_v13, %v7226_v41  ;;  %v13208_v62 = vsel %vm7526_vm6, %v7540_v56, %v7544_v49  ;;  %v7548_v38 = vor.u32 %v7547_v60, %v7546_v57  ;;  %v7700_v35 = vrot.slane %v13019_v61, 3 }
 0x46b   : > { %v7552_v18 = vor.u32 %v7551_v22, %v7550_v30  ;;  %v13212_v42 = vsel %vm7696_vm7, %v7697_v19, %v7698_v43  ;;  %v7702_v48 = vrot.slane %v13075_v44, 3  ;;  %v7704_v32 = vrot.slane %v13065_v47, 3 }
 0x46c   : > { %v13217_v21 = vsel %vm7526_vm6, %v7544_v49, %v7548_v38  ;;  %v13220_v13 = vsel %vm7696_vm7, %v7698_v43, %v7700_v35  ;;  %v7706_v10 = vrot.slane %v13151_v5, 3  ;;  %v7851_v15 = vrot.slane %v12994_v23, 3 }
 0x46d   : > { %v13228_v51 = vsel %vm7526_vm6, %v7548_v38, %v7552_v18  ;;  %v13231_v37 = vsel %vm7696_vm7, %v7700_v35, %v7702_v48  ;;  %v13234_v34 = vsel %vm7696_vm7, %v7702_v48, %v7704_v32  ;;  %v7852_v56 = vrot.slane %v12991_v12, 4 }
 0x46e   : > { %v13240_v57 = vsel %vm7696_vm7, %v7704_v32, %v7706_v10  ;;  %v7854_v23 = vrot.slane %v13041_v8, 3  ;;  %v7855_v41 = vrot.slane %v13038_v36, 4  ;;  %v7858_v49 = vrot.slane %v13033_v54, 3 }
 0x46f   : > { %10485 = vmatmul.mubr.msk.bf16.vlgmr.msra.gmra.mrb[236].mxu0 %vm6812_vm4, %v12985_v25  ;;  %v7853_v60 = vor.u32 %v7852_v56, %v7851_v15  ;;  %v7859_v30 = vrot.slane %v13030_v24, 4  ;;  %v7862_v22 = vrot.slane %v13096_v14, 3  ;;  %v7863_v12 = vrot.slane %v13093_v16, 4  ;;  %v11307_v24 = vld [vmem:[%s13545_s5 + $0x50] sm:$0xff]   ;;  %v11308_v56 = vld [vmem:[%s13545_s5 + $0x58] sm:$0xff]  }
 0x470   : > { %10488 = vmatprep.mubr.msk.bf16.mxu0 %vm6812_vm4, %v13023_v6  ;;  %10497 = vmatpush3.bf16.msra.mxu0 %v13142_v1  ;;  %v7856_v8 = vor.u32 %v7855_v41, %v7854_v23  ;;  %v7866_v36 = vrot.slane %v13088_v2, 3  ;;  %v7867_v54 = vrot.slane %v13082_v0, 4  ;;  %v7870_v19 = vrot.slane %v13170_v55, 3 }
 0x471   : > { %10498 = vmatprep.subr.bf16.mxu0 %v11306_v4  ;;  %v7860_v14 = vor.u32 %v7859_v30, %v7858_v49  ;;  %v7864_v43 = vor.u32 %v7863_v12, %v7862_v22  ;;  %v7871_v16 = vrot.slane %v13173_v3, 4  ;;  %v8017_v38 = vrot.slane %v12985_v25, 4  ;;  %v11309_v30 = vld [vmem:[%s13545_s5 + $0x60] sm:$0xff]  }
 0x472   : > { %v13262_v1 = vsel %vm7850_vm8, %v7853_v60, %v7856_v8  ;;  %v7868_v35 = vor.u32 %v7867_v54, %v7866_v36  ;;  %v8018_v2 = vrot.slane %v13023_v6, 4  ;;  %v8020_v0 = vrot.slane %v13019_v61, 4 }
 0x473   : > { %v13267_v55 = vsel %vm7850_vm8, %v7856_v8, %v7860_v14  ;;  %v13270_v18 = vsel %vm7850_vm8, %v7860_v14, %v7864_v43  ;;  %v13272_v48 = vor.u32 %v7871_v16, %v7870_v19  ;;  %v8022_v3 = vrot.slane %v13075_v44, 4 }
 0x474   : > { %10499 = vmatpush3.bf16.msra.mxu0 %v11306_v4  ;;  %v13276_v25 = vsel %vm7850_vm8, %v7864_v43, %v7868_v35  ;;  %v13279_v32 = vsel %vm8016_vm9, %v8017_v38, %v8018_v2  ;;  %v13282_v6 = vsel %vm8016_vm9, %v8018_v2, %v8020_v0  ;;  %v8024_v15 = vrot.slane %v13065_v47, 4 }
 0x475   : > { %10500 = vmatprep.subr.bf16.mxu0 %v11307_v24  ;;  %v13290_v23 = vsel %vm7850_vm8, %v7868_v35, %v13272_v48  ;;  %v13293_v4 = vsel %vm8016_vm9, %v8020_v0, %v8022_v3  ;;  %v8026_v41 = vrot.slane %v13151_v5, 4  ;;  %vm8242_vm2 = vsmask.f32 3328  ;;  %vm8276_vm8 = vmor %vm8274_vm15, %vm8275_vm0 }
 0x476   : > { %v13297_v49 = vsel %vm8016_vm9, %v8022_v3, %v8024_v15  ;;  %vm8264_vm7 = vcmask 1045508  }
 0x477   : > { %10489 = vmatmul.mubr.msk.bf16.gmra.mrb[240].mxu0 %vm6812_vm4, %v13019_v61  ;;  %v13304_v60 = vsel %vm8016_vm9, %v8024_v15, %v8026_v41  ;;  %v11310_v61 = vld [vmem:[%s13545_s5 + $0x68] sm:$0xff]   ;;  %vm8265_vm1 = vmor %vm6519_vm3, %vm8264_vm7  ;;  %vm8297_vm9 = vcmask 1042432  }
 0x478   : > { %10492 = vmatprep.mubr.msk.bf16.mxu0 %vm6812_vm4, %v13075_v44  ;;  %10501 = vmatpush3.bf16.msra.mxu0 %v11307_v24  ;;  %v11311_v44 = vld [vmem:[%s13545_s5 + $0x70] sm:$0xff]   ;;  %vm8299_vm11 = vmor %vm8297_vm9, %vm8298_vm10 }
 0x479   : > { %10502 = vmatprep.subr.bf16.mxu0 %v11308_v56 }
 0x47c   : > { %10503 = vmatpush3.bf16.msra.mxu0 %v11308_v56 }
 0x47d   : > { %10516 = vmatprep.subr.bf16.mxu0 %v11309_v30 }
 0x47f   : > { %10493 = vmatmul.mubr.msk.bf16.gmra.mrb[248].mxu0 %vm6812_vm4, %v13065_v47  ;;  %v11315_v47 = vld [vmem:[%s13545_s5 + $0x90] sm:$0xff]  }
 0x480   : > { %10504 = vmatprep.mubr.msk.bf16.mxu0 %vm6812_vm4, %v13011_v53  ;;  %v11312_v53 = vld [vmem:[%s13545_s5 + $0x78] sm:$0xff]  }
 0x487   : > { %10505 = vmatmul.mubr.msk.bf16.vlgmr.msra.gmra.mrb[236].mxu0 %vm6812_vm4, %v13052_v20  ;;  %v11313_v20 = vld [vmem:[%s13545_s5 + $0x80] sm:$0xff]  }
 0x488   : > { %10508 = vmatprep.mubr.msk.bf16.mxu0 %vm6812_vm4, %v13059_v9  ;;  %10517 = vmatpush3.bf16.msra.mxu0 %v11309_v30  ;;  %v11314_v9 = vld [vmem:[%s13545_s5 + $0x88] sm:$0xff]  }
 0x489   : > { %10518 = vmatprep.subr.bf16.mxu0 %v11310_v61 }
 0x48c   : > { %10519 = vmatpush3.bf16.msra.mxu0 %v11310_v61 }
 0x48d   : > { %10520 = vmatprep.subr.bf16.mxu0 %v11311_v44 }
 0x48f   : > { %10509 = vmatmul.mubr.msk.bf16.gmra.mrb[240].mxu0 %vm6812_vm4, %v13111_v31  ;;  %v11317_v31 = vld [vmem:[%s13545_s5 + $0xa0] sm:$0xff]  }
 0x490   : > { %10512 = vmatprep.mubr.msk.bf16.mxu0 %vm6812_vm4, %v13120_v28  ;;  %10521 = vmatpush3.bf16.msra.mxu0 %v11311_v44 }
 0x491   : > { %10522 = vmatprep.subr.bf16.mxu0 %v11312_v53 }
 0x494   : > { %10523 = vmatpush3.bf16.msra.mxu0 %v11312_v53 }
 0x495   : > { %10536 = vmatprep.subr.bf16.mxu0 %v11313_v20 }
 0x497   : > { %10513 = vmatmul.mubr.msk.bf16.gmra.mrb[252].mxu0 %vm6812_vm4, %v7052_v46  ;;  %v9880_v46 = vpop.f32.mrb[232].mxu0 }
 0x498   : > { %10524 = vmatprep.mubr.msk.bf16.mxu0 %vm6812_vm4, %v13047_v33  ;;  %v11316_v33 = vld [vmem:[%s13545_s5 + $0x98] sm:$0xff]  }
 0x49f   : > { %10525 = vmatmul.mubr.msk.bf16.vlgmr.msra.gmra.mrb[236].mxu0 %vm6812_vm4, %v13101_v26  ;;  %v9881_v26 = vpop.f32.mrb[233].mxu0 }
 0x4a0   : > { %10528 = vmatprep.mubr.msk.bf16.mxu0 %vm6812_vm4, %v13104_v63  ;;  %10537 = vmatpush3.bf16.msra.mxu0 %v11313_v20  ;;  %v9883_v63 = vpop.f32.mrb[234].mxu0 }
 0x4a1   : > { %10538 = vmatprep.subr.bf16.mxu0 %v11314_v9  ;;  %v9884_v28 = vpop.f32.mrb[235].mxu0 }
 0x4a4   : > { %10539 = vmatpush3.bf16.msra.mxu0 %v11314_v9 }
 0x4a5   : > { %10540 = vmatprep.subr.bf16.mxu0 %v11315_v47 }
 0x4a7   : > { %10529 = vmatmul.mubr.msk.bf16.gmra.mrb[240].mxu0 %vm6812_vm4, %v13145_v58  ;;  %v11318_v58 = vld [vmem:[%s13545_s5 + $0xa8] sm:$0xff]  }
 0x4a8   : > { %10532 = vmatprep.mubr.msk.bf16.mxu0 %vm6812_vm4, %v13164_v52  ;;  %10541 = vmatpush3.bf16.msra.mxu0 %v11315_v47  ;;  %v11319_v52 = vld [vmem:[%s13545_s5 + $0xb0] sm:$0xff]  }
 0x4a9   : > { %10542 = vmatprep.subr.bf16.mxu0 %v11316_v33 }
 0x4ac   : > { %10543 = vmatpush3.bf16.msra.mxu0 %v11316_v33 }
 0x4ad   : > { %10556 = vmatprep.subr.bf16.mxu0 %v11317_v31 }
 0x4af   : > { %10533 = vmatmul.mubr.msk.bf16.gmra.mrb[0].mxu0 %vm6812_vm4, %v13205_v50  ;;  %v11329_v50 = vld [vmem:[%s13545_s5 + $0x100] sm:$0xff]  }
 0x4b0   : > { %10544 = vmatprep.mubr.msk.bf16.mxu0 %vm6812_vm4, %v13073_v45  ;;  %v11320_v45 = vld [vmem:[%s13545_s5 + $0xb8] sm:$0xff]  }
 0x4b7   : > { %10545 = vmatmul.mubr.msk.bf16.vlgmr.msra.gmra.mrb[236].mxu0 %vm6812_vm4, %v13132_v27  ;;  %v11321_v27 = vld [vmem:[%s13545_s5 + $0xc0] sm:$0xff]  }
 0x4b8   : > { %10548 = vmatprep.mubr.msk.bf16.mxu0 %vm6812_vm4, %v13148_v11  ;;  %10557 = vmatpush3.bf16.msra.mxu0 %v11317_v31  ;;  %v11322_v11 = vld [vmem:[%s13545_s5 + $0xc8] sm:$0xff]  }
 0x4b9   : > { %10558 = vmatprep.subr.bf16.mxu0 %v11318_v58 }
 0x4bc   : > { %10559 = vmatpush3.bf16.msra.mxu0 %v11318_v58 }
 0x4bd   : > { %10560 = vmatprep.subr.bf16.mxu0 %v11319_v52 }
 0x4bf   : > { %10549 = vmatmul.mubr.msk.bf16.gmra.mrb[240].mxu0 %vm6812_vm4, %v13154_v59  ;;  %v11323_v59 = vld [vmem:[%s13545_s5 + $0xd0] sm:$0xff]  }
 0x4c0   : > { %10552 = vmatprep.mubr.msk.bf16.mxu0 %vm6812_vm4, %v13157_v17  ;;  %10561 = vmatpush3.bf16.msra.mxu0 %v11319_v52  ;;  %v11324_v17 = vld [vmem:[%s13545_s5 + $0xd8] sm:$0xff]  }
 0x4c1   : > { %10562 = vmatprep.subr.bf16.mxu0 %v11320_v45 }
 0x4c4   : > { %10563 = vmatpush3.bf16.msra.mxu0 %v11320_v45 }
 0x4c5   : > { %10576 = vmatprep.subr.bf16.mxu0 %v11321_v27 }
 0x4c7   : > { %10553 = vmatmul.mubr.msk.bf16.gmra.mrb[4].mxu0 %vm6812_vm4, %v13183_v39  ;;  %v11325_v39 = vld [vmem:[%s13545_s5 + $0xe0] sm:$0xff]  }
 0x4c8   : > { %10564 = vmatprep.mubr.msk.bf16.mxu0 %vm6812_vm4, %v13188_v29  ;;  %v11326_v29 = vld [vmem:[%s13545_s5 + $0xe8] sm:$0xff]  }
 0x4cf   : > { %10565 = vmatmul.mubr.msk.bf16.vlgmr.msra.gmra.mrb[236].mxu0 %vm6812_vm4, %v13191_v7  ;;  %v11327_v7 = vld [vmem:[%s13545_s5 + $0xf0] sm:$0xff]  }
 0x4d0   : > { %10568 = vmatprep.mubr.msk.bf16.mxu0 %vm6812_vm4, %v13199_v40  ;;  %10577 = vmatpush3.bf16.msra.mxu0 %v11321_v27  ;;  %v11328_v40 = vld [vmem:[%s13545_s5 + $0xf8] sm:$0xff]  }
 0x4d1   : > { %10578 = vmatprep.subr.bf16.mxu0 %v11322_v11 }
 0x4d4   : > { %10579 = vmatpush3.bf16.msra.mxu0 %v11322_v11  ;;  %v13478_v11 = vld [vmem:[%s13546_s6] ss:$0 sm:$0xff] }
 0x4d5   : > { %10580 = vmatprep.subr.bf16.mxu0 %v11323_v59 }
 0x4d7   : > { %10569 = vmatmul.mubr.msk.bf16.gmra.mrb[240].mxu0 %vm6812_vm4, %v13208_v62  ;;  %v11330_v62 = vld [vmem:[%s13545_s5 + $0x108] sm:$0xff]  }
 0x4d8   : > { %10572 = vmatprep.mubr.msk.bf16.mxu0 %vm6812_vm4, %v13217_v21  ;;  %10581 = vmatpush3.bf16.msra.mxu0 %v11323_v59  ;;  %v11332_v21 = vld [vmem:[%s13545_s5 + $0x118] sm:$0xff]  }
 0x4d9   : > { %10582 = vmatprep.subr.bf16.mxu0 %v11324_v17 }
 0x4dc   : > { %10583 = vmatpush3.bf16.msra.mxu0 %v11324_v17 }
 0x4dd   : > { %10596 = vmatprep.subr.bf16.mxu0 %v11325_v39 }
 0x4df   : > { %10573 = vmatmul.mubr.msk.bf16.gmra.mrb[8].mxu0 %vm6812_vm4, %v13228_v51 }
 0x4e0   : > { %10584 = vmatprep.mubr.msk.bf16.mxu0 %vm6812_vm4, %v13212_v42  ;;  %v11331_v42 = vld [vmem:[%s13545_s5 + $0x110] sm:$0xff]  }
 0x4e7   : > { %10585 = vmatmul.mubr.msk.bf16.vlgmr.msra.gmra.mrb[236].mxu0 %vm6812_vm4, %v13220_v13 }
 0x4e8   : > { %10588 = vmatprep.mubr.msk.bf16.mxu0 %vm6812_vm4, %v13231_v37  ;;  %10597 = vmatpush3.bf16.msra.mxu0 %v11325_v39 }
 0x4e9   : > { %10598 = vmatprep.subr.bf16.mxu0 %v11326_v29 }
 0x4ec   : > { %10599 = vmatpush3.bf16.msra.mxu0 %v11326_v29 }
 0x4ed   : > { %10600 = vmatprep.subr.bf16.mxu0 %v11327_v7 }
 0x4ef   : > { %10589 = vmatmul.mubr.msk.bf16.gmra.mrb[240].mxu0 %vm6812_vm4, %v13234_v34 }
 0x4f0   : > { %10592 = vmatprep.mubr.msk.bf16.mxu0 %vm6812_vm4, %v13240_v57  ;;  %10601 = vmatpush3.bf16.msra.mxu0 %v11327_v7 }
 0x4f1   : > { %10602 = vmatprep.subr.bf16.mxu0 %v11328_v40 }
 0x4f4   : > { %10603 = vmatpush3.bf16.msra.mxu0 %v11328_v40 }
 0x4f5   : > { %10616 = vmatprep.subr.bf16.mxu0 %v11329_v50 }
 0x4f7   : > { %10593 = vmatmul.mubr.msk.bf16.gmra.mrb[12].mxu0 %vm6812_vm4, %v7706_v10 }
 0x4f8   : > { %10604 = vmatprep.mubr.msk.bf16.mxu0 %vm6812_vm4, %v13262_v1 }
 0x4ff   : > { %10605 = vmatmul.mubr.msk.bf16.vlgmr.msra.gmra.mrb[236].mxu0 %vm6812_vm4, %v13267_v55 }
 0x500   : > { %10608 = vmatprep.mubr.msk.bf16.mxu0 %vm6812_vm4, %v13270_v18  ;;  %10617 = vmatpush3.bf16.msra.mxu0 %v11329_v50 }
 0x501   : > { %10618 = vmatprep.subr.bf16.mxu0 %v11330_v62 }
 0x504   : > { %10619 = vmatpush3.bf16.msra.mxu0 %v11330_v62 }
 0x505   : > { %10620 = vmatprep.subr.bf16.mxu0 %v11331_v42 }
 0x507   : > { %10609 = vmatmul.mubr.msk.bf16.gmra.mrb[240].mxu0 %vm6812_vm4, %v13276_v25 }
 0x508   : > { %10612 = vmatprep.mubr.msk.bf16.mxu0 %vm6812_vm4, %v13290_v23  ;;  %10621 = vmatpush3.bf16.msra.mxu0 %v11331_v42 }
 0x509   : > { %10622 = vmatprep.subr.bf16.mxu0 %v11332_v21 }
 0x50c   : > { %10623 = vmatpush3.bf16.msra.mxu0 %v11332_v21 }
 0x50f   : > { %10613 = vmatmul.mubr.msk.bf16.gmra.mrb[16].mxu0 %vm6812_vm4, %v13272_v48 }
 0x510   : > { %10624 = vmatprep.mubr.msk.bf16.mxu0 %vm6812_vm4, %v13279_v32 }
 0x517   : > { %10625 = vmatmul.mubr.msk.bf16.vlgmr.msra.gmra.mrb[236].mxu0 %vm6812_vm4, %v13282_v6 }
 0x518   : > { %10628 = vmatprep.mubr.msk.bf16.mxu0 %vm6812_vm4, %v13293_v4 }
 0x51f   : > { %10629 = vmatmul.mubr.msk.bf16.gmra.mrb[240].mxu0 %vm6812_vm4, %v13297_v49 }
 0x520   : > { %10632 = vmatprep.mubr.msk.bf16.mxu0 %vm6812_vm4, %v13304_v60 }
 0x527   : > { %10633 = vmatmul.mubr.msk.bf16.gmra.mrb[20].mxu0 %vm6812_vm4, %v8026_v41  ;;  %vm8243_vm4 = vsmask.f32 7440 }
 0x528   : > { %vm13518_vm3 = vmor %vm8242_vm2, %vm8243_vm4 }
 0x53a   : > { %v10474_v13 = vpop.f32.mrb[244].mxu0 }
 0x53b   : > { %v6897_v10 = vpop.f32.mrb[245].mxu0 }
 0x53c   : > { %v10475_v51 = vpop.f32.mrb[246].mxu0 }
 0x53d   : > { %v6900_v37 = vpop.f32.mrb[247].mxu0 }
 0x552   : > { %v10494_v34 = vpop.f32.mrb[248].mxu0 }
 0x553   : > { %v7022_v57 = vadd.f32 %v10494_v34, %v10474_v13  ;;  %v7013_v22 = vpop.f32.mrb[249].mxu0 }
 0x554   : > { %v7014_v12 = vadd.f32 %v7013_v22, %v6897_v10  ;;  %v10495_v8 = vpop.f32.mrb[250].mxu0 }
 0x555   : > { %v7016_v36 = vpop.f32.mrb[251].mxu0 }
 0x556   : > { %v7017_v54 = vadd.f32 %v7016_v36, %v6900_v37 }
 0x56a   : > { %v10514_v19 = vpop.f32.mrb[252].mxu0 }
 0x56b   : > { %v7186_v24 = vadd.f32 %v10514_v19, %v7022_v57  ;;  %v7162_v14 = vpop.f32.mrb[253].mxu0 }
 0x56c   : > { %v7184_v43 = vadd.f32 %v7162_v14, %v7014_v12  ;;  %v10515_v16 = vpop.f32.mrb[254].mxu0 }
 0x56d   : > { %v7165_v38 = vpop.f32.mrb[255].mxu0 }
 0x56e   : > { %v7185_v5 = vadd.f32 %v7165_v38, %v7017_v54 }
 0x582   : > { %v10534_v1 = vpop.f32.mrb[0].mxu0 }
 0x583   : > { %v7360_v35 = vadd.f32 %v10534_v1, %v7186_v24  ;;  %v7336_v2 = vpop.f32.mrb[1].mxu0 }
 0x584   : > { %v7358_v0 = vadd.f32 %v7336_v2, %v7184_v43  ;;  %v10535_v55 = vpop.f32.mrb[2].mxu0 }
 0x585   : > { %v7339_v18 = vpop.f32.mrb[3].mxu0 }
 0x586   : > { %v7359_v48 = vadd.f32 %v7339_v18, %v7185_v5 }
 0x59a   : > { %v10554_v3 = vpop.f32.mrb[4].mxu0 }
 0x59b   : > { %v7516_v25 = vadd.f32 %v10554_v3, %v7360_v35  ;;  %v7492_v32 = vpop.f32.mrb[5].mxu0 }
 0x59c   : > { %v7514_v6 = vadd.f32 %v7492_v32, %v7358_v0  ;;  %v10555_v15 = vpop.f32.mrb[6].mxu0 }
 0x59d   : > { %v7495_v56 = vpop.f32.mrb[7].mxu0 }
 0x59e   : > { %v7515_v23 = vadd.f32 %v7495_v56, %v7359_v48 }
 0x5b2   : > { %v10574_v4 = vpop.f32.mrb[8].mxu0 }
 0x5b3   : > { %v7686_v41 = vadd.f32 %v10574_v4, %v7516_v25  ;;  %v7662_v49 = vpop.f32.mrb[9].mxu0 }
 0x5b4   : > { %v7684_v60 = vadd.f32 %v7662_v49, %v7514_v6  ;;  %v10575_v30 = vpop.f32.mrb[10].mxu0 }
 0x5b5   : > { %v7665_v61 = vpop.f32.mrb[11].mxu0 }
 0x5b6   : > { %v7685_v44 = vadd.f32 %v7665_v61, %v7515_v23 }
 0x5ca   : > { %v10594_v53 = vpop.f32.mrb[12].mxu0 }
 0x5cb   : > { %v7840_v20 = vadd.f32 %v10594_v53, %v7686_v41  ;;  %v7816_v9 = vpop.f32.mrb[13].mxu0 }
 0x5cc   : > { %v7838_v47 = vadd.f32 %v7816_v9, %v7684_v60  ;;  %v10595_v33 = vpop.f32.mrb[14].mxu0 }
 0x5cd   : > { %v7819_v46 = vpop.f32.mrb[15].mxu0 }
 0x5ce   : > { %v7839_v26 = vadd.f32 %v7819_v46, %v7685_v44 }
 0x5e2   : > { %v10614_v63 = vpop.f32.mrb[16].mxu0 }
 0x5e3   : > { %v13469_v31 = vadd.f32 %v10614_v63, %v7840_v20  ;;  %v7982_v28 = vpop.f32.mrb[17].mxu0 }
 0x5e4   : > { %v13471_v58 = vadd.f32 %v7982_v28, %v7838_v47  ;;  %v10615_v52 = vpop.f32.mrb[18].mxu0 }
 0x5e5   : > { %v7985_v45 = vpop.f32.mrb[19].mxu0 }
 0x5e6   : > { %v13473_v27 = vadd.f32 %v7985_v45, %v7839_v26 }
 0x5ea   : > { %v10626_v59 = vpop.f32.mrb[236].mxu0 }
 0x5eb   : > { %v8170_v17 = vadd.f32 %v10626_v59, %v13478_v11  ;;  %v8104_v39 = vpop.f32.mrb[237].mxu0 }
 0x5ec   : > { %v8168_v29 = vadd.f32 %v13478_v11, %v8104_v39  ;;  %v10627_v7 = vpop.f32.mrb[238].mxu0 }
 0x5ed   : > { %v8181_v40 = vmax.f32 %v8170_v17, 0.0  ;;  %v8171_v50 = vadd.f32 %v10627_v7, %v13478_v11  ;;  %v8107_v62 = vpop.f32.mrb[239].mxu0 }
 0x5ee   : > { %v8169_v42 = vadd.f32 %v13478_v11, %v8107_v62  ;;  %v8179_v10 = vmax.f32 %v8168_v29, 0.0 }
 0x5ef   : > { %v9247_v21 = vpack.c.bf16 %v8181_v40, %v8181_v40  ;;  %v8182_v13 = vmax.f32 %v8171_v50, 0.0 }
 0x5f0   : > { %v8180_v51 = vmax.f32 %v8169_v42, 0.0 }
 0x5f1   : > { %v8216_v37 = vshrl.u32 %v9247_v21, 16  ;;  %v8219_v34 = vshll.u32 %v9247_v21, 16  ;;  %v9248_v57 = vpack.c.bf16 %v8182_v13, %v8182_v13  ;;  %v9232_v54 = vrot.slane %v9247_v21, 11 }
 0x5f2   : > { %v8190_v12 = vpack.c.bf16 %v8180_v51, %v8179_v10  ;;  %v9246_v8 = vpack.c.bf16 %v8180_v51, %v8180_v51  ;;  %v10630_v36 = vpop.f32.mrb[240].mxu0 }
 0x5f3   : > { %v8233_v19 = vrot.slane %v9248_v57, 7  ;;  %v8174_v24 = vadd.f32 %v10630_v36, %v13478_v11  ;;  %v8120_v14 = vpop.f32.mrb[241].mxu0  ;;  %v8218_v43 = vrot.slane %v8216_v37, 5  ;;  %v8221_v35 = vrot.slane %v8219_v34, 6 }
 0x5f4   : > { %8197 = vst.msk [vmem:[%s13488_s30] sm:$0xf] %vm8196_vm12, %v8190_v12  ;;  %v8207_v16 = vshrl.u32 %v9246_v8, 16  ;;  %v8210_v38 = vshll.u32 %v9246_v8, 16  ;;  %v8172_v5 = vadd.f32 %v13478_v11, %v8120_v14  ;;  %v10631_v1 = vpop.f32.mrb[242].mxu0 }
 0x5f5   : > { %v8234_v2 = vsel %vm13490_vm13, %v9232_v54, %v8233_v19  ;;  %v8185_v0 = vmax.f32 %v8174_v24, 0.0  ;;  %v8175_v55 = vadd.f32 %v10631_v1, %v13478_v11  ;;  %v8123_v18 = vpop.f32.mrb[243].mxu0  ;;  %v8222_v41 = vor.u32 %v8221_v35, %v8218_v43 }
 0x5f6   : > { %8236 = vst.msk [vmem:[%s13488_s30 + $0x8] sm:$0xf] %vm8196_vm12, %v8234_v2  ;;  %v8209_v48 = vrot.slane %v8207_v16, 5  ;;  %v8212_v3 = vrot.slane %v8210_v38, 6  ;;  %v8183_v25 = vmax.f32 %v8172_v5, 0.0  ;;  %v8173_v32 = vadd.f32 %v13478_v11, %v8123_v18 }
 0x5f7   : > { %v9251_v6 = vpack.c.bf16 %v8185_v0, %v8185_v0  ;;  %v8186_v15 = vmax.f32 %v8175_v55, 0.0  ;;  %vm8309_vm13 = vsmask.f32 5392 }
 0x5f8   : > { %v8213_v56 = vor.u32 %v8212_v3, %v8209_v48  ;;  %v9249_v23 = vpack.c.bf16 %v8183_v25, %v8183_v25  ;;  %v8184_v4 = vmax.f32 %v8173_v32, 0.0  ;;  %vm8310_vm14 = vmor %vm7526_vm6, %vm8309_vm13 }
 0x5f9   : > { %v8278_v49 = vshrl.u32 %v9251_v6, 16  ;;  %v9252_v60 = vpack.c.bf16 %v8186_v15, %v8186_v15  ;;  %v8268_v9 = vrot.slane %v9251_v6, 6 }
 0x5fa   : > { %v8214_v30 = vrot.slane %v8213_v56, 4  ;;  %v8246_v61 = vshrl.u32 %v9249_v23, 16  ;;  %v8249_v44 = vshll.u32 %v9249_v23, 16  ;;  %v9250_v53 = vpack.c.bf16 %v8184_v4, %v8184_v4  ;;  %v10634_v20 = vpop.f32.mrb[20].mxu0 }
 0x5fb   : > { %v8283_v47 = vshrl.u32 %v9252_v60, 16  ;;  %v8286_v33 = vshll.u32 %v9252_v60, 16  ;;  %v8160_v46 = vadd.f32 %v10634_v20, %v13469_v31  ;;  %v8136_v26 = vpop.f32.mrb[21].mxu0  ;;  %v9238_v31 = vrot.slane %v8278_v49, 11 }
 0x5fc   : > { %v8223_v63 = vsel %vm8205_vm5, %v8214_v30, %v8222_v41  ;;  %v8248_v28 = vrot.slane %v8246_v61, 4  ;;  %v8251_v52 = vrot.slane %v8249_v44, 5  ;;  %v8255_v45 = vshll.u32 %v9250_v53, 16  ;;  %v10635_v59 = vpop.f32.mrb[22].mxu0 }
 0x5fd   : > { %8225 = vst.msk [vmem:[%s13488_s30 + $0x4] sm:$0xf] %vm8196_vm12, %v8223_v63  ;;  %v8285_v17 = vrot.slane %v8283_v47, 7  ;;  %v9236_v39 = vrot.slane %v9250_v53, 10  ;;  %v8178_v29 = vadd.f32 %v13478_v11, %v8160_v46  ;;  %v8158_v7 = vadd.f32 %v8136_v26, %v13471_v58  ;;  %v8139_v40 = vpop.f32.mrb[23].mxu0 }
 0x5fe   : > { %v8252_v50 = vor.u32 %v8251_v52, %v8248_v28  ;;  %v8159_v62 = vadd.f32 %v8139_v40, %v13473_v27  ;;  %v8257_v37 = vrot.slane %v8255_v45, 5 }
 0x5ff   : > { %v8288_v42 = vor.u32 %v8286_v33, %v8285_v17  ;;  %v8269_v13 = vsel %vm8265_vm1, %v9236_v39, %v8268_v9  ;;  %v8189_v10 = vmax.f32 %v8178_v29, 0.0  ;;  %v8176_v58 = vadd.f32 %v13478_v11, %v8158_v7 }
 0x600   : > { %v8253_v51 = vrot.slane %v8252_v50, 4  ;;  %8271 = vst.msk [vmem:[%s13488_s30 + $0x10] sm:$0xf] %vm8196_vm12, %v8269_v13  ;;  %v8177_v34 = vadd.f32 %v13478_v11, %v8159_v62 }
 0x601   : > { %v8289_v57 = vsel %vm8276_vm8, %v9238_v31, %v8288_v42  ;;  %v9255_v27 = vpack.c.bf16 %v8189_v10, %v8189_v10  ;;  %v8187_v22 = vmax.f32 %v8176_v58, 0.0 }
 0x602   : > { %8291 = vst.msk [vmem:[%s13488_s30 + $0x14] sm:$0xf] %vm8196_vm12, %v8289_v57  ;;  %v8258_v12 = vsel %vm13518_vm3, %v8253_v51, %v8257_v37  ;;  %v8188_v8 = vmax.f32 %v8177_v34, 0.0 }
 0x603   : > { %8260 = vst.msk [vmem:[%s13488_s30 + $0xc] sm:$0xf] %vm8196_vm12, %v8258_v12  ;;  %v8321_v36 = vshrl.u32 %v9255_v27, 16  ;;  %v9253_v54 = vpack.c.bf16 %v8187_v22, %v8187_v22  ;;  %v8324_v19 = vshll.u32 %v9255_v27, 16 }
 0x604   : > { %v9254_v24 = vpack.c.bf16 %v8188_v8, %v8188_v8 }
 0x605   : > { %v9241_v11 = vrot.slane %v9253_v54, 9  ;;  %v8323_v38 = vrot.slane %v8321_v36, 6  ;;  %v8326_v5 = vrot.slane %v8324_v19, 7 }
 0x606   : > { %v8302_v14 = vrot.slane %v9254_v24, 5  ;;  %v8312_v43 = vshrl.u32 %v9254_v24, 16  ;;  %v8315_v16 = vshll.u32 %v9254_v24, 16 }
 0x607   : > { %v8327_v55 = vor.u32 %v8326_v5, %v8323_v38 }
 0x608   : > { %v8303_v1 = vsel %vm8299_vm11, %v9241_v11, %v8302_v14  ;;  %v8314_v35 = vrot.slane %v8312_v43, 6  ;;  %v8317_v2 = vrot.slane %v8315_v16, 7 }
 0x609   : > { %8305 = vst.msk [vmem:[%s13488_s30 + $0x18] sm:$0xf] %vm8196_vm12, %v8303_v1 }
 0x60a   : > { %v8318_v0 = vor.u32 %v8317_v2, %v8314_v35 }
 0x60c   : > { %v8319_v18 = vrot.slane %v8318_v0, 4 }
 0x60e   : > { %v8328_v48 = vsel %vm8310_vm14, %v8319_v18, %v8327_v55 }
 0x60f   : > { %8330 = vst.msk [vmem:[%s13488_s30 + $0x1c] sm:$0xf] %vm8196_vm12, %v8328_v48 }
 0x610 PF: > { %s17_s24 = sadd.s32 1, %s11355_s24  }
 0x611   : > { %p14_p4 = scmp.ge.s32.totalorder %s17_s24, 4  }
 0x613   :  { %16 = sbr.rel (!%p14_p4) target bundleno = 1 (0x1), region = 117 }

</bundles_post_ra>
